<compile_context>
chip_gen: v7x
topology: tpu7x:2x2x1
jax: 0.10.0
libtpu: 0.0.40
codegen_flags: <defaults>
</compile_context>

<pallas_src>
import jax
import jax.numpy as jnp
from jax import lax
from jax.experimental import pallas as pl
from jax.experimental.pallas import tpu as pltpu


# ----------------------------------------------------------------------------
# Fused conv stack: conv -> bias -> ReLU -> 2x2 max-pool, three layers, one
# image per grid step, every intermediate resident in VMEM.
# ----------------------------------------------------------------------------
def _conv_chunks(src_ref, w_ref, b_ref, h_out, w_out, hc, ymid_ref, write_pooled):
    """Conv (+bias+ReLU) in chunks of `hc` output rows, fused with 2x2 max-pool.

    src_ref : (h_out [+2 if 3 taps], w_out, K) bf16 folded input (height halo
              included when w_ref has 3 height taps).
    w_ref   : (n_taps, K, Cout) bf16 folded weights.
    b_ref   : (1, Cout) f32 bias.
    ymid_ref: (h_out//2, w_out, Cout) f32 scratch holding h-pooled rows so the
              width pool can be done with stride-2 ref reads.
    write_pooled(h0, pooled): stores one pooled chunk (hc//2, w_out//2, Cout).
    """
    n_taps, k_dim, c_out = w_ref.shape
    assert h_out % hc == 0 and hc % 2 == 0
    m = hc * w_out
    w_half = w_out // 2
    n_chunks = h_out // hc

    def body(i, carry):
        r0 = pl.multiple_of(i * hc, hc)
        acc = None
        for t in range(n_taps):                       # 1 tap (conv1) or 3 (conv2/3)
            lhs = src_ref[pl.ds(r0 + t, hc), :, :].reshape(m, k_dim)
            part = jnp.dot(lhs, w_ref[t], preferred_element_type=jnp.float32)
            acc = part if acc is None else acc + part
        y = jnp.maximum(acc + b_ref[...], 0.0)        # bias + ReLU (f32), (m, Cout)
        # Height pool: rows 2i / 2i+1 are adjacent w_out-blocks of sublanes.
        y = y.reshape(hc // 2, 2 * w_out, c_out)
        yh = jnp.maximum(y[:, 0:w_out, :], y[:, w_out:2 * w_out, :])
        h0 = pl.multiple_of(i * (hc // 2), hc // 2)
        ymid_ref[pl.ds(h0, hc // 2), :, :] = yh
        # Width pool: stride-2 reads of the rows just written (even/odd w).
        pooled = jnp.maximum(
            ymid_ref[pl.ds(h0, hc // 2), pl.ds(0, w_half, stride=2), :],
            ymid_ref[pl.ds(h0, hc // 2), pl.ds(1, w_half, stride=2), :])
        write_pooled(h0, pooled)
        return carry

    lax.fori_loop(0, n_chunks, body, 0)


def _fold_with_halo(pool_ref, xw_ref, cin):
    """Width-fold pool_ref (H, W, cin) into xw_ref (H+2, W, 3*cin) with a
    zero 1-pixel halo (only the halo ring is zeroed, not the whole buffer)."""
    h, w = pool_ref.shape[0], pool_ref.shape[1]
    dt = xw_ref.dtype
    # Height halo rows and width halo columns (tiny, re-done every image so
    # the kernel stays correct when the batch axis is megacore-sharded).
    xw_ref[0:1, :, :] = jnp.zeros((1, w, 3 * cin), dt)
    xw_ref[h + 1:h + 2, :, :] = jnp.zeros((1, w, 3 * cin), dt)
    xw_ref[:, 0:1, 0:cin] = jnp.zeros((h + 2, 1, cin), dt)
    xw_ref[:, w - 1:w, 2 * cin:3 * cin] = jnp.zeros((h + 2, 1, cin), dt)
    # Width taps: xw[1+r, w, dw*cin + c] = pool[r, w + dw - 1, c].
    xw_ref[1:h + 1, :, cin:2 * cin] = pool_ref[...]
    xw_ref[1:h + 1, 1:w, 0:cin] = pool_ref[:, 0:w - 1, :]
    xw_ref[1:h + 1, 0:w - 1, 2 * cin:3 * cin] = pool_ref[:, 1:w, :]


def conv_stack_kernel(xcol_ref, w1_ref, b1_ref, w2_ref, b2_ref, w3_ref, b3_ref,
                      o_ref, ymid1, pool1, xw2, ymid2, pool2, xw3, ymid3):
    # ---- conv1: host-side im2col, K=27 padded to 128 lanes, one dot/chunk ----
    def wp1(h0, p):
        pool1[pl.ds(h0, p.shape[0]), :, :] = p.astype(pool1.dtype)
    _conv_chunks(xcol_ref, w1_ref, b1_ref, 64, 64, 2, ymid1, wp1)

    # ---- conv2: (32,32,32) -> pooled (16,16,64) ----
    _fold_with_halo(pool1, xw2, 32)
    def wp2(h0, p):
        pool2[pl.ds(h0, p.shape[0]), :, :] = p.astype(pool2.dtype)
    _conv_chunks(xw2, w2_ref, b2_ref, 32, 32, 4, ymid2, wp2)

    # ---- conv3: (16,16,64) -> pooled (8,8,128), written straight to output ----
    _fold_with_halo(pool2, xw3, 64)
    def wp3(h0, p):
        o_ref[pl.ds(h0, p.shape[0]), :, :] = p.astype(o_ref.dtype)
    _conv_chunks(xw3, w3_ref, b3_ref, 16, 16, 8, ymid3, wp3)


def _full_spec(a):
    zeros = (0,) * a.ndim
    return pl.BlockSpec(a.shape, lambda b: zeros)


def conv_stack(xcol, w1, b1, w2, b2, w3, b3):
    """xcol: (B, 64, 64, 128) bf16 im2col'd conv1 input. -> (B, 8, 8, 128) f32."""
    B = xcol.shape[0]
    return pl.pallas_call(
        conv_stack_kernel,
        out_shape=jax.ShapeDtypeStruct((B, 8, 8, 128), jnp.float32),
        grid_spec=pltpu.PrefetchScalarGridSpec(
            num_scalar_prefetch=0,
            grid=(B,),
            in_specs=[
                pl.BlockSpec((None, 64, 64, 128), lambda b: (b, 0, 0, 0)),
                _full_spec(w1), _full_spec(b1),
                _full_spec(w2), _full_spec(b2),
                _full_spec(w3), _full_spec(b3),
            ],
            out_specs=pl.BlockSpec((None, 8, 8, 128), lambda b: (b, 0, 0, 0)),
            scratch_shapes=[
                pltpu.VMEM((32, 64, 32), jnp.float32),    # ymid1 (h-pooled rows)
                pltpu.VMEM((32, 32, 32), jnp.bfloat16),   # pool1
                pltpu.VMEM((34, 32, 96), jnp.bfloat16),   # xw2 (width-folded)
                pltpu.VMEM((16, 32, 64), jnp.float32),    # ymid2
                pltpu.VMEM((16, 16, 64), jnp.bfloat16),   # pool2
                pltpu.VMEM((18, 16, 192), jnp.bfloat16),  # xw3
                pltpu.VMEM((8, 16, 128), jnp.float32),    # ymid3
            ],
        ),
        compiler_params=pltpu.CompilerParams(dimension_semantics=("parallel",)),
    )(xcol, w1, b1, w2, b2, w3, b3)


# ----------------------------------------------------------------------------
# fc1 (+bias, ReLU, eval-mode dropout) fused with fc2.  bf16 weight stream,
# f32 accumulation, large K tiles, hidden split only useful on v7x megacore.
# ----------------------------------------------------------------------------
def fc_kernel(x_ref, w1_ref, b1_ref, w2_ref, o_ref, acc_ref):
    k = pl.program_id(1)

    @pl.when(k == 0)
    def _():
        acc_ref[...] = jnp.zeros_like(acc_ref)

    acc_ref[...] += jnp.dot(x_ref[...].astype(w1_ref.dtype), w1_ref[...],
                            preferred_element_type=jnp.float32)

    @pl.when(k == pl.num_programs(1) - 1)
    def _():
        h = jnp.maximum(acc_ref[...] + b1_ref[...], 0.0)   # bias + ReLU
        # TODO(synk): dropout(p=0.5) eval-mode identity only.
        o_ref[...] = jnp.dot(h.astype(w2_ref.dtype), w2_ref[...],
                             preferred_element_type=jnp.float32
                             ).astype(o_ref.dtype)


def fc_forward(x, w1, b1, w2pad, b2, *, tk=4096, dh_split=1):
    """x: (B, 8192) f32; w1: (8192, 512) bf16; w2pad: (512, 128) bf16 (classes
    zero-padded to 128 lanes).  Returns logits (B, num_classes)."""
    B, K = x.shape
    Dh = w1.shape[1]
    ncp = w2pad.shape[1]
    assert K % tk == 0 and Dh % dh_split == 0
    dh = Dh // dh_split

    parts = pl.pallas_call(
        fc_kernel,
        out_shape=jax.ShapeDtypeStruct((dh_split, B, ncp), jnp.float32),
        grid_spec=pltpu.PrefetchScalarGridSpec(
            num_scalar_prefetch=0,
            grid=(dh_split, K // tk),
            in_specs=[
                pl.BlockSpec((B, tk), lambda j, k: (0, k)),
                pl.BlockSpec((tk, dh), lambda j, k: (k, j)),
                pl.BlockSpec((1, dh), lambda j, k: (0, j)),
                pl.BlockSpec((dh, ncp), lambda j, k: (j, 0)),
            ],
            out_specs=pl.BlockSpec((None, B, ncp), lambda j, k: (j, 0, 0)),
            scratch_shapes=[pltpu.VMEM((B, dh), jnp.float32)],
        ),
        compiler_params=pltpu.CompilerParams(
            dimension_semantics=("parallel", "arbitrary")),
    )(x, w1, b1.reshape(1, Dh), w2pad)

    return parts.sum(axis=0)[:, :b2.shape[0]] + b2[None, :]


# ----------------------------------------------------------------------------
# Full forward pass (matches RiceLeafCNN.forward, eval mode).
# ----------------------------------------------------------------------------
def _conv1_im2col(x_nchw):
    """NCHW f32 -> lane-dense im2col (B, 64, 64, 128) bf16 (K=27, zero-padded)."""
    x = jnp.transpose(x_nchw, (0, 2, 3, 1))                 # NHWC
    h, w = x.shape[1], x.shape[2]
    xp = jnp.pad(x, ((0, 0), (1, 1), (1, 1), (0, 0)))
    taps = [xp[:, dh:dh + h, dw:dw + w, :] for dh in range(3) for dw in range(3)]
    cols = jnp.concatenate(taps, axis=-1)                   # (B, H, W, 27)
    cols = jnp.pad(cols, ((0, 0), (0, 0), (0, 0), (0, 128 - cols.shape[-1])))
    return cols.astype(jnp.bfloat16)


def rice_leaf_cnn_forward(x_nchw, params):
    """x_nchw: (B, 3, 64, 64) float32 (PyTorch layout). Returns (B, num_classes)."""
    xcol = _conv1_im2col(x_nchw)
    feat = conv_stack(xcol,
                      params["conv1_w"], params["conv1_b"],
                      params["conv2_w"], params["conv2_b"],
                      params["conv3_w"], params["conv3_b"])   # (B, 8, 8, 128) f32
    flat = feat.reshape(feat.shape[0], 8 * 8 * 128)           # NHWC flatten (free)
    return fc_forward(flat, params["fc1_w"], params["fc1_b"],
                      params["fc2_w"], params["fc2_b"])


# ----------------------------------------------------------------------------
# Parameters: init in PyTorch-native layouts, then one-time preparation into
# kernel layouts.  prepare_params is called once, OUTSIDE jit.
# ----------------------------------------------------------------------------
def init_params(key, num_classes):
    ks = jax.random.split(key, 10)

    def u(k, shape, fan_in):
        bound = 1.0 / (fan_in ** 0.5)
        return jax.random.uniform(k, shape, jnp.float32, -bound, bound)

    return {
        "conv1_w": u(ks[0], (32, 3, 3, 3), 3 * 9),
        "conv1_b": u(ks[1], (32,), 3 * 9),
        "conv2_w": u(ks[2], (64, 32, 3, 3), 32 * 9),
        "conv2_b": u(ks[3], (64,), 32 * 9),
        "conv3_w": u(ks[4], (128, 64, 3, 3), 64 * 9),
        "conv3_b": u(ks[5], (128,), 64 * 9),
        "fc1_w": u(ks[6], (512, 128 * 8 * 8), 128 * 8 * 8),
        "fc1_b": u(ks[7], (512,), 128 * 8 * 8),
        "fc2_w": u(ks[8], (num_classes, 512), 512),
        "fc2_b": u(ks[9], (num_classes,), 512),
    }


def prepare_params(p, weight_dtype=jnp.bfloat16):
    """One-time conversion of PyTorch-layout params into kernel layouts."""
    def fold_conv(w_oihw):
        cout, cin = w_oihw.shape[0], w_oihw.shape[1]
        w_hwio = jnp.transpose(w_oihw, (2, 3, 1, 0))         # (3, 3, Cin, Cout)
        return w_hwio.reshape(3, 3 * cin, cout).astype(weight_dtype)

    # conv1: all 9 taps folded, k = dh*9 + dw*3 + c, padded to 128 lanes.
    w1 = jnp.transpose(p["conv1_w"], (2, 3, 1, 0)).reshape(27, 32)
    w1 = jnp.pad(w1, ((0, 128 - 27), (0, 0))).reshape(1, 128, 32)

    # fc1: permute rows from PyTorch NCHW flatten to the kernel's NHWC flatten.
    wf1 = jnp.transpose(p["fc1_w"], (1, 0))                  # (8192, 512)
    wf1 = wf1.reshape(128, 8, 8, 512).transpose(1, 2, 0, 3).reshape(8192, 512)

    # fc2: pad class dim to 128 lanes (lane-dense weight DMA and output store).
    nc = p["fc2_w"].shape[0]
    wf2 = jnp.transpose(p["fc2_w"], (1, 0))                  # (512, nc)
    wf2 = jnp.pad(wf2, ((0, 0), (0, 128 - nc)))

    return {
        "conv1_w": w1.astype(weight_dtype), "conv1_b": p["conv1_b"].reshape(1, -1),
        "conv2_w": fold_conv(p["conv2_w"]), "conv2_b": p["conv2_b"].reshape(1, -1),
        "conv3_w": fold_conv(p["conv3_w"]), "conv3_b": p["conv3_b"].reshape(1, -1),
        "fc1_w": wf1.astype(weight_dtype), "fc1_b": p["fc1_b"],
        "fc2_w": wf2.astype(weight_dtype), "fc2_b": p["fc2_b"],
    }


# ----------------------------------------------------------------------------
# Plain-XLA reference with the same bf16-weight / f32-accumulate numerics
# (only accumulation order differs); used as an in-script self-check.
# ----------------------------------------------------------------------------
def reference_forward(x_nchw, params):
    a = jnp.transpose(x_nchw, (0, 2, 3, 1))

    def conv_block(a, w_hwio, b):
        cout = w_hwio.shape[-1]
        y = lax.conv_general_dilated(
            a.astype(w_hwio.dtype), w_hwio, window_strides=(1, 1), padding="SAME",
            dimension_numbers=("NHWC", "HWIO", "NHWC"),
            preferred_element_type=jnp.float32)
        y = jnp.maximum(y + b.reshape(1, 1, 1, cout), 0.0)
        B, H, W, C = y.shape
        y = y.reshape(B, H // 2, 2, W // 2, 2, C)
        return jnp.max(jnp.max(y, axis=4), axis=2)

    w1 = params["conv1_w"][0, :27, :].reshape(3, 3, 3, 32)
    w2 = params["conv2_w"].reshape(3, 3, 32, 64)
    w3 = params["conv3_w"].reshape(3, 3, 64, 128)
    a = conv_block(a, w1, params["conv1_b"])
    a = conv_block(a, w2, params["conv2_b"])
    a = conv_block(a, w3, params["conv3_b"])
    flat = a.reshape(a.shape[0], -1)
    h = jnp.maximum(
        jnp.dot(flat.astype(params["fc1_w"].dtype), params["fc1_w"],
                preferred_element_type=jnp.float32) + params["fc1_b"], 0.0)
    nc = params["fc2_b"].shape[0]
    return jnp.dot(h.astype(params["fc2_w"].dtype), params["fc2_w"][:, :nc],
                   preferred_element_type=jnp.float32) + params["fc2_b"]


if __name__ == "__main__":
    num_classes = 4
    key = jax.random.PRNGKey(0)
    k_x, k_p = jax.random.split(key)

    # 64x64 input is required by the module (three 2x2 pools -> 8x8 feeding
    # fc1 = Linear(128*8*8, 512)); batch kept small (and even for v7x).
    x = jax.random.normal(k_x, (2, 3, 64, 64), jnp.float32)
    params = prepare_params(init_params(k_p, num_classes))   # once, outside jit

    fwd = jax.jit(rice_leaf_cnn_forward)
    logits = jax.block_until_ready(fwd(x, params))

    assert logits.shape == (2, num_classes), logits.shape
    assert bool(jnp.all(jnp.isfinite(logits)))

    # Self-check against a plain-XLA reference using identical (bf16-weight,
    # f32-accumulate) numerics; ~1e-2-level deviation vs a pure-f32 PyTorch
    # forward is expected and documented.
    ref = jax.block_until_ready(jax.jit(reference_forward)(x, params))
    err = float(jnp.max(jnp.abs(logits - ref)))
    assert err < 2e-2, f"mismatch vs reference: max abs err = {err}"

    print("KERNEL_OK")
</pallas_src>

<mosaic_0001>
module attributes {stable_mosaic.version = 11 : i64} {
  func.func @fc_kernel(%arg0: i32, %arg1: i32, %arg2: memref<2x4096xf32, #tpu.memory_space<vmem>>, %arg3: memref<4096x512xbf16, #tpu.memory_space<vmem>>, %arg4: memref<1x512xf32, #tpu.memory_space<vmem>>, %arg5: memref<512x128xbf16, #tpu.memory_space<vmem>>, %arg6: memref<1x2x128xf32, #tpu.memory_space<vmem>>, %arg7: memref<2x512xf32, #tpu.memory_space<vmem>>) attributes {dimension_semantics = [#tpu.dimension_semantics<parallel>, #tpu.dimension_semantics<arbitrary>], iteration_bounds = array<i64: 1, 2>, scalar_prefetch = 0 : i64, scratch_operands = 1 : i64, tpu.core_type = #tpu.core_type<tc>, window_params = [{transform_indices = @transform_0, window_bounds = array<i64: 2, 4096>}, {transform_indices = @transform_1, window_bounds = array<i64: 4096, 512>}, {transform_indices = @transform_2, window_bounds = array<i64: 1, 512>}, {transform_indices = @transform_3, window_bounds = array<i64: 512, 128>}, {transform_indices = @transform_4, window_bounds = array<i64: 1, 2, 128>}]} {
    %c0_i32 = arith.constant 0 : i32
    %0 = arith.cmpi eq, %arg1, %c0_i32 : i32
    %1 = arith.extui %0 : i1 to i32
    %c0_i32_0 = arith.constant 0 : i32
    %2 = arith.cmpi ne, %1, %c0_i32_0 : i32
    scf.if %2 {
      %cst_9 = arith.constant 0.000000e+00 : f32
      %13 = vector.broadcast %cst_9 : f32 to vector<2x512xf32>
      %c0_10 = arith.constant 0 : index
      %c0_11 = arith.constant 0 : index
      %14 = vector.load %arg7[%c0_10, %c0_11] : memref<2x512xf32, #tpu.memory_space<vmem>>, vector<2x512xf32>
      tpu.vector_store %arg7[%c0_10, %c0_11], %13 {strides = array<i32>} : memref<2x512xf32, #tpu.memory_space<vmem>>, vector<2x512xf32>,
    } else {
    }
    %c0 = arith.constant 0 : index
    %c0_1 = arith.constant 0 : index
    %3 = vector.load %arg7[%c0, %c0_1] : memref<2x512xf32, #tpu.memory_space<vmem>>, vector<2x512xf32>
    %c0_2 = arith.constant 0 : index
    %c0_3 = arith.constant 0 : index
    %4 = vector.load %arg2[%c0_2, %c0_3] : memref<2x4096xf32, #tpu.memory_space<vmem>>, vector<2x4096xf32>
    %5 = arith.truncf %4 : vector<2x4096xf32> to vector<2x4096xbf16>
    %c0_4 = arith.constant 0 : index
    %c0_5 = arith.constant 0 : index
    %6 = vector.load %arg3[%c0_4, %c0_5] : memref<4096x512xbf16, #tpu.memory_space<vmem>>, vector<4096x512xbf16>
    %cst = arith.constant dense<0.000000e+00> : vector<2x512xf32>
    %7 = tpu.matmul %5, %6, %cst {dimension_numbers = #tpu.dot_dimension_numbers<[1], [0], [0], [1], [0, 0, 1, 1], [], []>} : vector<2x4096xbf16>, vector<4096x512xbf16>, vector<2x512xf32> -> vector<2x512xf32>
    %8 = arith.addf %3, %7 : vector<2x512xf32>
    %c0_6 = arith.constant 0 : index
    %c0_7 = arith.constant 0 : index
    %9 = vector.load %arg7[%c0_6, %c0_7] : memref<2x512xf32, #tpu.memory_space<vmem>>, vector<2x512xf32>
    tpu.vector_store %arg7[%c0_6, %c0_7], %8 {strides = array<i32>} : memref<2x512xf32, #tpu.memory_space<vmem>>, vector<2x512xf32>,
    %c1_i32 = arith.constant 1 : i32
    %10 = arith.cmpi eq, %arg1, %c1_i32 : i32
    %11 = arith.extui %10 : i1 to i32
    %c0_i32_8 = arith.constant 0 : i32
    %12 = arith.cmpi ne, %11, %c0_i32_8 : i32
    scf.if %12 {
      %c0_9 = arith.constant 0 : index
      %c0_10 = arith.constant 0 : index
      %13 = vector.load %arg7[%c0_9, %c0_10] : memref<2x512xf32, #tpu.memory_space<vmem>>, vector<2x512xf32>
      %c0_11 = arith.constant 0 : index
      %c0_12 = arith.constant 0 : index
      %14 = vector.load %arg4[%c0_11, %c0_12] : memref<1x512xf32, #tpu.memory_space<vmem>>, vector<1x512xf32>
      %15 = vector.broadcast %14 : vector<1x512xf32> to vector<2x512xf32>
      %16 = arith.addf %13, %15 : vector<2x512xf32>
      %cst_13 = arith.constant 0.000000e+00 : f32
      %17 = vector.broadcast %cst_13 : f32 to vector<2x512xf32>
      %18 = arith.maximumf %16, %17 : vector<2x512xf32>
      %19 = arith.truncf %18 : vector<2x512xf32> to vector<2x512xbf16>
      %c0_14 = arith.constant 0 : index
      %c0_15 = arith.constant 0 : index
      %20 = vector.load %arg5[%c0_14, %c0_15] : memref<512x128xbf16, #tpu.memory_space<vmem>>, vector<512x128xbf16>
      %cst_16 = arith.constant dense<0.000000e+00> : vector<2x128xf32>
      %21 = tpu.matmul %19, %20, %cst_16 {dimension_numbers = #tpu.dot_dimension_numbers<[1], [0], [0], [1], [0, 0, 1, 1], [], []>} : vector<2x512xbf16>, vector<512x128xbf16>, vector<2x128xf32> -> vector<2x128xf32>
      %c0_17 = arith.constant 0 : index
      %c0_18 = arith.constant 0 : index
      %c0_19 = arith.constant 0 : index
      %22 = vector.load %arg6[%c0_17, %c0_18, %c0_19] : memref<1x2x128xf32, #tpu.memory_space<vmem>>, vector<1x2x128xf32>
      %23 = vector.shape_cast %22 : vector<1x2x128xf32> to vector<2x128xf32>
      %24 = vector.shape_cast %21 : vector<2x128xf32> to vector<1x2x128xf32>
      tpu.vector_store %arg6[%c0_17, %c0_18, %c0_19], %24 {strides = array<i32>} : memref<1x2x128xf32, #tpu.memory_space<vmem>>, vector<1x2x128xf32>,
    } else {
    }
    return
  }
  func.func @transform_0(%arg0: i32, %arg1: i32) -> (i32, i32) {
    %c0_i32 = arith.constant 0 : i32
    %c0_i32_0 = arith.constant 0 : i32
    return %c0_i32, %arg1 : i32, i32
  }
  func.func @transform_1(%arg0: i32, %arg1: i32) -> (i32, i32) {
    %c0_i32 = arith.constant 0 : i32
    return %arg1, %arg0 : i32, i32
  }
  func.func @transform_2(%arg0: i32, %arg1: i32) -> (i32, i32) {
    %c0_i32 = arith.constant 0 : i32
    %c0_i32_0 = arith.constant 0 : i32
    return %c0_i32, %arg0 : i32, i32
  }
  func.func @transform_3(%arg0: i32, %arg1: i32) -> (i32, i32) {
    %c0_i32 = arith.constant 0 : i32
    %c0_i32_0 = arith.constant 0 : i32
    return %arg0, %c0_i32 : i32, i32
  }
  func.func @transform_4(%arg0: i32, %arg1: i32) -> (i32, i32, i32) {
    %c0_i32 = arith.constant 0 : i32
    %c0_i32_0 = arith.constant 0 : i32
    %c0_i32_1 = arith.constant 0 : i32
    return %arg0, %c0_i32, %c0_i32_0 : i32, i32, i32
  }
}

module attributes {stable_mosaic.version = 11 : i64} {
  func.func @conv_stack_kernel(%arg0: i32, %arg1: memref<1x64x64x128xbf16, #tpu.memory_space<vmem>>, %arg2: memref<1x128x32xbf16, #tpu.memory_space<vmem>>, %arg3: memref<1x32xf32, #tpu.memory_space<vmem>>, %arg4: memref<3x96x64xbf16, #tpu.memory_space<vmem>>, %arg5: memref<1x64xf32, #tpu.memory_space<vmem>>, %arg6: memref<3x192x128xbf16, #tpu.memory_space<vmem>>, %arg7: memref<1x128xf32, #tpu.memory_space<vmem>>, %arg8: memref<1x8x8x128xf32, #tpu.memory_space<vmem>>, %arg9: memref<32x64x32xf32, #tpu.memory_space<vmem>>, %arg10: memref<32x32x32xbf16, #tpu.memory_space<vmem>>, %arg11: memref<34x32x96xbf16, #tpu.memory_space<vmem>>, %arg12: memref<16x32x64xf32, #tpu.memory_space<vmem>>, %arg13: memref<16x16x64xbf16, #tpu.memory_space<vmem>>, %arg14: memref<18x16x192xbf16, #tpu.memory_space<vmem>>, %arg15: memref<8x16x128xf32, #tpu.memory_space<vmem>>) attributes {dimension_semantics = [#tpu.dimension_semantics<parallel>], iteration_bounds = array<i64: 2>, scalar_prefetch = 0 : i64, scratch_operands = 7 : i64, tpu.core_type = #tpu.core_type<tc>, window_params = [{transform_indices = @transform_0, window_bounds = array<i64: 1, 64, 64, 128>}, {pipeline_mode = #tpu.pipeline_mode<synchronous>, transform_indices = @transform_1, window_bounds = array<i64: 1, 128, 32>}, {pipeline_mode = #tpu.pipeline_mode<synchronous>, transform_indices = @transform_2, window_bounds = array<i64: 1, 32>}, {pipeline_mode = #tpu.pipeline_mode<synchronous>, transform_indices = @transform_3, window_bounds = array<i64: 3, 96, 64>}, {pipeline_mode = #tpu.pipeline_mode<synchronous>, transform_indices = @transform_4, window_bounds = array<i64: 1, 64>}, {pipeline_mode = #tpu.pipeline_mode<synchronous>, transform_indices = @transform_5, window_bounds = array<i64: 3, 192, 128>}, {pipeline_mode = #tpu.pipeline_mode<synchronous>, transform_indices = @transform_6, window_bounds = array<i64: 1, 128>}, {transform_indices = @transform_7, window_bounds = array<i64: 1, 8, 8, 128>}]} {
    %c0_i32 = arith.constant 0 : i32
    %c32_i32 = arith.constant 32 : i32
    %0 = arith.addi %c0_i32, %c32_i32 : i32
    %c1_i32 = arith.constant 1 : i32
    scf.for %arg16 = %c0_i32 to %0 step %c1_i32  : i32 {
      %c2_i32_65 = arith.constant 2 : i32
      %31 = arith.muli %arg16, %c2_i32_65 : i32
      %32 = tpu.assume_multiple %31, 2 : i32
      %c0_i32_66 = arith.constant 0 : i32
      %33 = arith.addi %32, %c0_i32_66 : i32
      %c0_67 = arith.constant 0 : index
      %34 = arith.index_cast %33 : i32 to index
      %c0_68 = arith.constant 0 : index
      %c0_69 = arith.constant 0 : index
      %35 = vector.load %arg1[%c0_67, %34, %c0_68, %c0_69] : memref<1x64x64x128xbf16, #tpu.memory_space<vmem>>, vector<1x2x64x128xbf16>
      %36 = vector.shape_cast %35 : vector<1x2x64x128xbf16> to vector<2x64x128xbf16>
      %37 = vector.shape_cast %36 : vector<2x64x128xbf16> to vector<128x128xbf16>
      %c0_70 = arith.constant 0 : index
      %c0_71 = arith.constant 0 : index
      %c0_72 = arith.constant 0 : index
      %38 = vector.load %arg2[%c0_70, %c0_71, %c0_72] : memref<1x128x32xbf16, #tpu.memory_space<vmem>>, vector<1x128x32xbf16>
      %39 = vector.shape_cast %38 : vector<1x128x32xbf16> to vector<128x32xbf16>
      %cst_73 = arith.constant dense<0.000000e+00> : vector<128x32xf32>
      %40 = tpu.matmul %37, %39, %cst_73 {dimension_numbers = #tpu.dot_dimension_numbers<[1], [0], [0], [1], [0, 0, 1, 1], [], []>} : vector<128x128xbf16>, vector<128x32xbf16>, vector<128x32xf32> -> vector<128x32xf32>
      %c0_74 = arith.constant 0 : index
      %c0_75 = arith.constant 0 : index
      %41 = vector.load %arg3[%c0_74, %c0_75] : memref<1x32xf32, #tpu.memory_space<vmem>>, vector<1x32xf32>
      %42 = vector.broadcast %41 : vector<1x32xf32> to vector<128x32xf32>
      %43 = arith.addf %40, %42 : vector<128x32xf32>
      %cst_76 = arith.constant 0.000000e+00 : f32
      %44 = vector.broadcast %cst_76 : f32 to vector<128x32xf32>
      %45 = arith.maximumf %43, %44 : vector<128x32xf32>
      %46 = vector.shape_cast %45 : vector<128x32xf32> to vector<1x128x32xf32>
      %47 = vector.extract_strided_slice %46 {offsets = [0, 0, 0], sizes = [1, 64, 32], strides = [1, 1, 1]} : vector<1x128x32xf32> to vector<1x64x32xf32>
      %48 = vector.extract_strided_slice %46 {offsets = [0, 64, 0], sizes = [1, 64, 32], strides = [1, 1, 1]} : vector<1x128x32xf32> to vector<1x64x32xf32>
      %49 = arith.maximumf %47, %48 : vector<1x64x32xf32>
      %c1_i32_77 = arith.constant 1 : i32
      %50 = arith.muli %arg16, %c1_i32_77 : i32
      %51 = tpu.assume_multiple %50, 1 : i32
      %52 = arith.index_cast %51 : i32 to index
      %c0_78 = arith.constant 0 : index
      %c0_79 = arith.constant 0 : index
      %53 = vector.load %arg9[%52, %c0_78, %c0_79] : memref<32x64x32xf32, #tpu.memory_space<vmem>>, vector<1x64x32xf32>
      tpu.vector_store %arg9[%52, %c0_78, %c0_79], %49 {strides = array<i32>} : memref<32x64x32xf32, #tpu.memory_space<vmem>>, vector<1x64x32xf32>,
      %54 = arith.index_cast %51 : i32 to index
      %c0_80 = arith.constant 0 : index
      %c0_81 = arith.constant 0 : index
      %55 = tpu.strided_load %arg9[%54, %c0_80, %c0_81] {strides = array<i32: 1, 2, 1>} : memref<32x64x32xf32, #tpu.memory_space<vmem>>, vector<1x32x32xf32>
      %56 = arith.index_cast %51 : i32 to index
      %c1_82 = arith.constant 1 : index
      %c0_83 = arith.constant 0 : index
      %57 = tpu.strided_load %arg9[%56, %c1_82, %c0_83] {strides = array<i32: 1, 2, 1>} : memref<32x64x32xf32, #tpu.memory_space<vmem>>, vector<1x32x32xf32>
      %58 = arith.maximumf %55, %57 : vector<1x32x32xf32>
      %59 = arith.truncf %58 : vector<1x32x32xf32> to vector<1x32x32xbf16>
      %60 = arith.index_cast %51 : i32 to index
      %c0_84 = arith.constant 0 : index
      %c0_85 = arith.constant 0 : index
      %61 = vector.load %arg10[%60, %c0_84, %c0_85] : memref<32x32x32xbf16, #tpu.memory_space<vmem>>, vector<1x32x32xbf16>
      tpu.vector_store %arg10[%60, %c0_84, %c0_85], %59 {strides = array<i32>} : memref<32x32x32xbf16, #tpu.memory_space<vmem>>, vector<1x32x32xbf16>,
    }
    %c32_i32_0 = arith.constant 32 : i32
    %cst = arith.constant 0.000000e+00 : bf16
    %1 = vector.broadcast %cst : bf16 to vector<1x32x96xbf16>
    %c0 = arith.constant 0 : index
    %c0_1 = arith.constant 0 : index
    %c0_2 = arith.constant 0 : index
    %2 = vector.load %arg11[%c0, %c0_1, %c0_2] : memref<34x32x96xbf16, #tpu.memory_space<vmem>>, vector<1x32x96xbf16>
    tpu.vector_store %arg11[%c0, %c0_1, %c0_2], %1 {strides = array<i32>} : memref<34x32x96xbf16, #tpu.memory_space<vmem>>, vector<1x32x96xbf16>,
    %cst_3 = arith.constant 0.000000e+00 : bf16
    %3 = vector.broadcast %cst_3 : bf16 to vector<1x32x96xbf16>
    %c33 = arith.constant 33 : index
    %c0_4 = arith.constant 0 : index
    %c0_5 = arith.constant 0 : index
    %4 = vector.load %arg11[%c33, %c0_4, %c0_5] : memref<34x32x96xbf16, #tpu.memory_space<vmem>>, vector<1x32x96xbf16>
    tpu.vector_store %arg11[%c33, %c0_4, %c0_5], %3 {strides = array<i32>} : memref<34x32x96xbf16, #tpu.memory_space<vmem>>, vector<1x32x96xbf16>,
    %cst_6 = arith.constant 0.000000e+00 : bf16
    %5 = vector.broadcast %cst_6 : bf16 to vector<34x1x32xbf16>
    %c0_7 = arith.constant 0 : index
    %c0_8 = arith.constant 0 : index
    %c0_9 = arith.constant 0 : index
    %6 = vector.load %arg11[%c0_7, %c0_8, %c0_9] : memref<34x32x96xbf16, #tpu.memory_space<vmem>>, vector<34x1x32xbf16>
    tpu.vector_store %arg11[%c0_7, %c0_8, %c0_9], %5 {strides = array<i32>} : memref<34x32x96xbf16, #tpu.memory_space<vmem>>, vector<34x1x32xbf16>,
    %cst_10 = arith.constant 0.000000e+00 : bf16
    %7 = vector.broadcast %cst_10 : bf16 to vector<34x1x32xbf16>
    %c0_11 = arith.constant 0 : index
    %c31 = arith.constant 31 : index
    %c64 = arith.constant 64 : index
    %8 = vector.load %arg11[%c0_11, %c31, %c64] : memref<34x32x96xbf16, #tpu.memory_space<vmem>>, vector<34x1x32xbf16>
    tpu.vector_store %arg11[%c0_11, %c31, %c64], %7 {strides = array<i32>} : memref<34x32x96xbf16, #tpu.memory_space<vmem>>, vector<34x1x32xbf16>,
    %c0_12 = arith.constant 0 : index
    %c0_13 = arith.constant 0 : index
    %c0_14 = arith.constant 0 : index
    %9 = vector.load %arg10[%c0_12, %c0_13, %c0_14] : memref<32x32x32xbf16, #tpu.memory_space<vmem>>, vector<32x32x32xbf16>
    %c1 = arith.constant 1 : index
    %c0_15 = arith.constant 0 : index
    %c32 = arith.constant 32 : index
    %10 = vector.load %arg11[%c1, %c0_15, %c32] : memref<34x32x96xbf16, #tpu.memory_space<vmem>>, vector<32x32x32xbf16>
    tpu.vector_store %arg11[%c1, %c0_15, %c32], %9 {strides = array<i32>} : memref<34x32x96xbf16, #tpu.memory_space<vmem>>, vector<32x32x32xbf16>,
    %c0_16 = arith.constant 0 : index
    %c0_17 = arith.constant 0 : index
    %c0_18 = arith.constant 0 : index
    %11 = vector.load %arg10[%c0_16, %c0_17, %c0_18] : memref<32x32x32xbf16, #tpu.memory_space<vmem>>, vector<32x31x32xbf16>
    %c1_19 = arith.constant 1 : index
    %c1_20 = arith.constant 1 : index
    %c0_21 = arith.constant 0 : index
    %12 = vector.load %arg11[%c1_19, %c1_20, %c0_21] : memref<34x32x96xbf16, #tpu.memory_space<vmem>>, vector<32x31x32xbf16>
    tpu.vector_store %arg11[%c1_19, %c1_20, %c0_21], %11 {strides = array<i32>} : memref<34x32x96xbf16, #tpu.memory_space<vmem>>, vector<32x31x32xbf16>,
    %c0_22 = arith.constant 0 : index
    %c1_23 = arith.constant 1 : index
    %c0_24 = arith.constant 0 : index
    %13 = vector.load %arg10[%c0_22, %c1_23, %c0_24] : memref<32x32x32xbf16, #tpu.memory_space<vmem>>, vector<32x31x32xbf16>
    %c1_25 = arith.constant 1 : index
    %c0_26 = arith.constant 0 : index
    %c64_27 = arith.constant 64 : index
    %14 = vector.load %arg11[%c1_25, %c0_26, %c64_27] : memref<34x32x96xbf16, #tpu.memory_space<vmem>>, vector<32x31x32xbf16>
    tpu.vector_store %arg11[%c1_25, %c0_26, %c64_27], %13 {strides = array<i32>} : memref<34x32x96xbf16, #tpu.memory_space<vmem>>, vector<32x31x32xbf16>,
    %c0_i32_28 = arith.constant 0 : i32
    %c8_i32 = arith.constant 8 : i32
    %15 = arith.addi %c0_i32_28, %c8_i32 : i32
    %c1_i32_29 = arith.constant 1 : i32
    scf.for %arg16 = %c0_i32_28 to %15 step %c1_i32_29  : i32 {
      %c4_i32 = arith.constant 4 : i32
      %31 = arith.muli %arg16, %c4_i32 : i32
      %32 = tpu.assume_multiple %31, 4 : i32
      %c0_i32_65 = arith.constant 0 : i32
      %33 = arith.addi %32, %c0_i32_65 : i32
      %34 = arith.index_cast %33 : i32 to index
      %c0_66 = arith.constant 0 : index
      %c0_67 = arith.constant 0 : index
      %35 = vector.load %arg11[%34, %c0_66, %c0_67] : memref<34x32x96xbf16, #tpu.memory_space<vmem>>, vector<4x32x96xbf16>
      %36 = vector.shape_cast %35 : vector<4x32x96xbf16> to vector<128x96xbf16>
      %c0_68 = arith.constant 0 : index
      %c0_69 = arith.constant 0 : index
      %c0_70 = arith.constant 0 : index
      %37 = vector.load %arg4[%c0_68, %c0_69, %c0_70] : memref<3x96x64xbf16, #tpu.memory_space<vmem>>, vector<1x96x64xbf16>
      %38 = vector.shape_cast %37 : vector<1x96x64xbf16> to vector<96x64xbf16>
      %cst_71 = arith.constant dense<0.000000e+00> : vector<128x64xf32>
      %39 = tpu.matmul %36, %38, %cst_71 {dimension_numbers = #tpu.dot_dimension_numbers<[1], [0], [0], [1], [0, 0, 1, 1], [], []>} : vector<128x96xbf16>, vector<96x64xbf16>, vector<128x64xf32> -> vector<128x64xf32>
      %c1_i32_72 = arith.constant 1 : i32
      %40 = arith.addi %32, %c1_i32_72 : i32
      %41 = arith.index_cast %40 : i32 to index
      %c0_73 = arith.constant 0 : index
      %c0_74 = arith.constant 0 : index
      %42 = vector.load %arg11[%41, %c0_73, %c0_74] : memref<34x32x96xbf16, #tpu.memory_space<vmem>>, vector<4x32x96xbf16>
      %43 = vector.shape_cast %42 : vector<4x32x96xbf16> to vector<128x96xbf16>
      %c1_75 = arith.constant 1 : index
      %c0_76 = arith.constant 0 : index
      %c0_77 = arith.constant 0 : index
      %44 = vector.load %arg4[%c1_75, %c0_76, %c0_77] : memref<3x96x64xbf16, #tpu.memory_space<vmem>>, vector<1x96x64xbf16>
      %45 = vector.shape_cast %44 : vector<1x96x64xbf16> to vector<96x64xbf16>
      %cst_78 = arith.constant dense<0.000000e+00> : vector<128x64xf32>
      %46 = tpu.matmul %43, %45, %cst_78 {dimension_numbers = #tpu.dot_dimension_numbers<[1], [0], [0], [1], [0, 0, 1, 1], [], []>} : vector<128x96xbf16>, vector<96x64xbf16>, vector<128x64xf32> -> vector<128x64xf32>
      %47 = arith.addf %39, %46 : vector<128x64xf32>
      %c2_i32_79 = arith.constant 2 : i32
      %48 = arith.addi %32, %c2_i32_79 : i32
      %49 = arith.index_cast %48 : i32 to index
      %c0_80 = arith.constant 0 : index
      %c0_81 = arith.constant 0 : index
      %50 = vector.load %arg11[%49, %c0_80, %c0_81] : memref<34x32x96xbf16, #tpu.memory_space<vmem>>, vector<4x32x96xbf16>
      %51 = vector.shape_cast %50 : vector<4x32x96xbf16> to vector<128x96xbf16>
      %c2 = arith.constant 2 : index
      %c0_82 = arith.constant 0 : index
      %c0_83 = arith.constant 0 : index
      %52 = vector.load %arg4[%c2, %c0_82, %c0_83] : memref<3x96x64xbf16, #tpu.memory_space<vmem>>, vector<1x96x64xbf16>
      %53 = vector.shape_cast %52 : vector<1x96x64xbf16> to vector<96x64xbf16>
      %cst_84 = arith.constant dense<0.000000e+00> : vector<128x64xf32>
      %54 = tpu.matmul %51, %53, %cst_84 {dimension_numbers = #tpu.dot_dimension_numbers<[1], [0], [0], [1], [0, 0, 1, 1], [], []>} : vector<128x96xbf16>, vector<96x64xbf16>, vector<128x64xf32> -> vector<128x64xf32>
      %55 = arith.addf %47, %54 : vector<128x64xf32>
      %c0_85 = arith.constant 0 : index
      %c0_86 = arith.constant 0 : index
      %56 = vector.load %arg5[%c0_85, %c0_86] : memref<1x64xf32, #tpu.memory_space<vmem>>, vector<1x64xf32>
      %57 = vector.broadcast %56 : vector<1x64xf32> to vector<128x64xf32>
      %58 = arith.addf %55, %57 : vector<128x64xf32>
      %cst_87 = arith.constant 0.000000e+00 : f32
      %59 = vector.broadcast %cst_87 : f32 to vector<128x64xf32>
      %60 = arith.maximumf %58, %59 : vector<128x64xf32>
      %61 = vector.shape_cast %60 : vector<128x64xf32> to vector<2x64x64xf32>
      %62 = vector.extract_strided_slice %61 {offsets = [0, 0, 0], sizes = [2, 32, 64], strides = [1, 1, 1]} : vector<2x64x64xf32> to vector<2x32x64xf32>
      %63 = vector.extract_strided_slice %61 {offsets = [0, 32, 0], sizes = [2, 32, 64], strides = [1, 1, 1]} : vector<2x64x64xf32> to vector<2x32x64xf32>
      %64 = arith.maximumf %62, %63 : vector<2x32x64xf32>
      %c2_i32_88 = arith.constant 2 : i32
      %65 = arith.muli %arg16, %c2_i32_88 : i32
      %66 = tpu.assume_multiple %65, 2 : i32
      %67 = arith.index_cast %66 : i32 to index
      %c0_89 = arith.constant 0 : index
      %c0_90 = arith.constant 0 : index
      %68 = vector.load %arg12[%67, %c0_89, %c0_90] : memref<16x32x64xf32, #tpu.memory_space<vmem>>, vector<2x32x64xf32>
      tpu.vector_store %arg12[%67, %c0_89, %c0_90], %64 {strides = array<i32>} : memref<16x32x64xf32, #tpu.memory_space<vmem>>, vector<2x32x64xf32>,
      %69 = arith.index_cast %66 : i32 to index
      %c0_91 = arith.constant 0 : index
      %c0_92 = arith.constant 0 : index
      %70 = tpu.strided_load %arg12[%69, %c0_91, %c0_92] {strides = array<i32: 1, 2, 1>} : memref<16x32x64xf32, #tpu.memory_space<vmem>>, vector<2x16x64xf32>
      %71 = arith.index_cast %66 : i32 to index
      %c1_93 = arith.constant 1 : index
      %c0_94 = arith.constant 0 : index
      %72 = tpu.strided_load %arg12[%71, %c1_93, %c0_94] {strides = array<i32: 1, 2, 1>} : memref<16x32x64xf32, #tpu.memory_space<vmem>>, vector<2x16x64xf32>
      %73 = arith.maximumf %70, %72 : vector<2x16x64xf32>
      %74 = arith.truncf %73 : vector<2x16x64xf32> to vector<2x16x64xbf16>
      %75 = arith.index_cast %66 : i32 to index
      %c0_95 = arith.constant 0 : index
      %c0_96 = arith.constant 0 : index
      %76 = vector.load %arg13[%75, %c0_95, %c0_96] : memref<16x16x64xbf16, #tpu.memory_space<vmem>>, vector<2x16x64xbf16>
      tpu.vector_store %arg13[%75, %c0_95, %c0_96], %74 {strides = array<i32>} : memref<16x16x64xbf16, #tpu.memory_space<vmem>>, vector<2x16x64xbf16>,
    }
    %c8_i32_30 = arith.constant 8 : i32
    %cst_31 = arith.constant 0.000000e+00 : bf16
    %16 = vector.broadcast %cst_31 : bf16 to vector<1x16x192xbf16>
    %c0_32 = arith.constant 0 : index
    %c0_33 = arith.constant 0 : index
    %c0_34 = arith.constant 0 : index
    %17 = vector.load %arg14[%c0_32, %c0_33, %c0_34] : memref<18x16x192xbf16, #tpu.memory_space<vmem>>, vector<1x16x192xbf16>
    tpu.vector_store %arg14[%c0_32, %c0_33, %c0_34], %16 {strides = array<i32>} : memref<18x16x192xbf16, #tpu.memory_space<vmem>>, vector<1x16x192xbf16>,
    %cst_35 = arith.constant 0.000000e+00 : bf16
    %18 = vector.broadcast %cst_35 : bf16 to vector<1x16x192xbf16>
    %c17 = arith.constant 17 : index
    %c0_36 = arith.constant 0 : index
    %c0_37 = arith.constant 0 : index
    %19 = vector.load %arg14[%c17, %c0_36, %c0_37] : memref<18x16x192xbf16, #tpu.memory_space<vmem>>, vector<1x16x192xbf16>
    tpu.vector_store %arg14[%c17, %c0_36, %c0_37], %18 {strides = array<i32>} : memref<18x16x192xbf16, #tpu.memory_space<vmem>>, vector<1x16x192xbf16>,
    %cst_38 = arith.constant 0.000000e+00 : bf16
    %20 = vector.broadcast %cst_38 : bf16 to vector<18x1x64xbf16>
    %c0_39 = arith.constant 0 : index
    %c0_40 = arith.constant 0 : index
    %c0_41 = arith.constant 0 : index
    %21 = vector.load %arg14[%c0_39, %c0_40, %c0_41] : memref<18x16x192xbf16, #tpu.memory_space<vmem>>, vector<18x1x64xbf16>
    tpu.vector_store %arg14[%c0_39, %c0_40, %c0_41], %20 {strides = array<i32>} : memref<18x16x192xbf16, #tpu.memory_space<vmem>>, vector<18x1x64xbf16>,
    %cst_42 = arith.constant 0.000000e+00 : bf16
    %22 = vector.broadcast %cst_42 : bf16 to vector<18x1x64xbf16>
    %c0_43 = arith.constant 0 : index
    %c15 = arith.constant 15 : index
    %c128 = arith.constant 128 : index
    %23 = vector.load %arg14[%c0_43, %c15, %c128] : memref<18x16x192xbf16, #tpu.memory_space<vmem>>, vector<18x1x64xbf16>
    tpu.vector_store %arg14[%c0_43, %c15, %c128], %22 {strides = array<i32>} : memref<18x16x192xbf16, #tpu.memory_space<vmem>>, vector<18x1x64xbf16>,
    %c0_44 = arith.constant 0 : index
    %c0_45 = arith.constant 0 : index
    %c0_46 = arith.constant 0 : index
    %24 = vector.load %arg13[%c0_44, %c0_45, %c0_46] : memref<16x16x64xbf16, #tpu.memory_space<vmem>>, vector<16x16x64xbf16>
    %c1_47 = arith.constant 1 : index
    %c0_48 = arith.constant 0 : index
    %c64_49 = arith.constant 64 : index
    %25 = vector.load %arg14[%c1_47, %c0_48, %c64_49] : memref<18x16x192xbf16, #tpu.memory_space<vmem>>, vector<16x16x64xbf16>
    tpu.vector_store %arg14[%c1_47, %c0_48, %c64_49], %24 {strides = array<i32>} : memref<18x16x192xbf16, #tpu.memory_space<vmem>>, vector<16x16x64xbf16>,
    %c0_50 = arith.constant 0 : index
    %c0_51 = arith.constant 0 : index
    %c0_52 = arith.constant 0 : index
    %26 = vector.load %arg13[%c0_50, %c0_51, %c0_52] : memref<16x16x64xbf16, #tpu.memory_space<vmem>>, vector<16x15x64xbf16>
    %c1_53 = arith.constant 1 : index
    %c1_54 = arith.constant 1 : index
    %c0_55 = arith.constant 0 : index
    %27 = vector.load %arg14[%c1_53, %c1_54, %c0_55] : memref<18x16x192xbf16, #tpu.memory_space<vmem>>, vector<16x15x64xbf16>
    tpu.vector_store %arg14[%c1_53, %c1_54, %c0_55], %26 {strides = array<i32>} : memref<18x16x192xbf16, #tpu.memory_space<vmem>>, vector<16x15x64xbf16>,
    %c0_56 = arith.constant 0 : index
    %c1_57 = arith.constant 1 : index
    %c0_58 = arith.constant 0 : index
    %28 = vector.load %arg13[%c0_56, %c1_57, %c0_58] : memref<16x16x64xbf16, #tpu.memory_space<vmem>>, vector<16x15x64xbf16>
    %c1_59 = arith.constant 1 : index
    %c0_60 = arith.constant 0 : index
    %c128_61 = arith.constant 128 : index
    %29 = vector.load %arg14[%c1_59, %c0_60, %c128_61] : memref<18x16x192xbf16, #tpu.memory_space<vmem>>, vector<16x15x64xbf16>
    tpu.vector_store %arg14[%c1_59, %c0_60, %c128_61], %28 {strides = array<i32>} : memref<18x16x192xbf16, #tpu.memory_space<vmem>>, vector<16x15x64xbf16>,
    %c0_i32_62 = arith.constant 0 : i32
    %c2_i32 = arith.constant 2 : i32
    %30 = arith.addi %c0_i32_62, %c2_i32 : i32
    %c1_i32_63 = arith.constant 1 : i32
    scf.for %arg16 = %c0_i32_62 to %30 step %c1_i32_63  : i32 {
      %c8_i32_65 = arith.constant 8 : i32
      %31 = arith.muli %arg16, %c8_i32_65 : i32
      %32 = tpu.assume_multiple %31, 8 : i32
      %c0_i32_66 = arith.constant 0 : i32
      %33 = arith.addi %32, %c0_i32_66 : i32
      %34 = arith.index_cast %33 : i32 to index
      %c0_67 = arith.constant 0 : index
      %c0_68 = arith.constant 0 : index
      %35 = vector.load %arg14[%34, %c0_67, %c0_68] : memref<18x16x192xbf16, #tpu.memory_space<vmem>>, vector<8x16x192xbf16>
      %36 = vector.shape_cast %35 : vector<8x16x192xbf16> to vector<128x192xbf16>
      %c0_69 = arith.constant 0 : index
      %c0_70 = arith.constant 0 : index
      %c0_71 = arith.constant 0 : index
      %37 = vector.load %arg6[%c0_69, %c0_70, %c0_71] : memref<3x192x128xbf16, #tpu.memory_space<vmem>>, vector<1x192x128xbf16>
      %38 = vector.shape_cast %37 : vector<1x192x128xbf16> to vector<192x128xbf16>
      %cst_72 = arith.constant dense<0.000000e+00> : vector<128x128xf32>
      %39 = tpu.matmul %36, %38, %cst_72 {dimension_numbers = #tpu.dot_dimension_numbers<[1], [0], [0], [1], [0, 0, 1, 1], [], []>} : vector<128x192xbf16>, vector<192x128xbf16>, vector<128x128xf32> -> vector<128x128xf32>
      %c1_i32_73 = arith.constant 1 : i32
      %40 = arith.addi %32, %c1_i32_73 : i32
      %41 = arith.index_cast %40 : i32 to index
      %c0_74 = arith.constant 0 : index
      %c0_75 = arith.constant 0 : index
      %42 = vector.load %arg14[%41, %c0_74, %c0_75] : memref<18x16x192xbf16, #tpu.memory_space<vmem>>, vector<8x16x192xbf16>
      %43 = vector.shape_cast %42 : vector<8x16x192xbf16> to vector<128x192xbf16>
      %c1_76 = arith.constant 1 : index
      %c0_77 = arith.constant 0 : index
      %c0_78 = arith.constant 0 : index
      %44 = vector.load %arg6[%c1_76, %c0_77, %c0_78] : memref<3x192x128xbf16, #tpu.memory_space<vmem>>, vector<1x192x128xbf16>
      %45 = vector.shape_cast %44 : vector<1x192x128xbf16> to vector<192x128xbf16>
      %cst_79 = arith.constant dense<0.000000e+00> : vector<128x128xf32>
      %46 = tpu.matmul %43, %45, %cst_79 {dimension_numbers = #tpu.dot_dimension_numbers<[1], [0], [0], [1], [0, 0, 1, 1], [], []>} : vector<128x192xbf16>, vector<192x128xbf16>, vector<128x128xf32> -> vector<128x128xf32>
      %47 = arith.addf %39, %46 : vector<128x128xf32>
      %c2_i32_80 = arith.constant 2 : i32
      %48 = arith.addi %32, %c2_i32_80 : i32
      %49 = arith.index_cast %48 : i32 to index
      %c0_81 = arith.constant 0 : index
      %c0_82 = arith.constant 0 : index
      %50 = vector.load %arg14[%49, %c0_81, %c0_82] : memref<18x16x192xbf16, #tpu.memory_space<vmem>>, vector<8x16x192xbf16>
      %51 = vector.shape_cast %50 : vector<8x16x192xbf16> to vector<128x192xbf16>
      %c2 = arith.constant 2 : index
      %c0_83 = arith.constant 0 : index
      %c0_84 = arith.constant 0 : index
      %52 = vector.load %arg6[%c2, %c0_83, %c0_84] : memref<3x192x128xbf16, #tpu.memory_space<vmem>>, vector<1x192x128xbf16>
      %53 = vector.shape_cast %52 : vector<1x192x128xbf16> to vector<192x128xbf16>
      %cst_85 = arith.constant dense<0.000000e+00> : vector<128x128xf32>
      %54 = tpu.matmul %51, %53, %cst_85 {dimension_numbers = #tpu.dot_dimension_numbers<[1], [0], [0], [1], [0, 0, 1, 1], [], []>} : vector<128x192xbf16>, vector<192x128xbf16>, vector<128x128xf32> -> vector<128x128xf32>
      %55 = arith.addf %47, %54 : vector<128x128xf32>
      %c0_86 = arith.constant 0 : index
      %c0_87 = arith.constant 0 : index
      %56 = vector.load %arg7[%c0_86, %c0_87] : memref<1x128xf32, #tpu.memory_space<vmem>>, vector<1x128xf32>
      %57 = vector.broadcast %56 : vector<1x128xf32> to vector<128x128xf32>
      %58 = arith.addf %55, %57 : vector<128x128xf32>
      %cst_88 = arith.constant 0.000000e+00 : f32
      %59 = vector.broadcast %cst_88 : f32 to vector<128x128xf32>
      %60 = arith.maximumf %58, %59 : vector<128x128xf32>
      %61 = vector.shape_cast %60 : vector<128x128xf32> to vector<4x32x128xf32>
      %62 = vector.extract_strided_slice %61 {offsets = [0, 0, 0], sizes = [4, 16, 128], strides = [1, 1, 1]} : vector<4x32x128xf32> to vector<4x16x128xf32>
      %63 = vector.extract_strided_slice %61 {offsets = [0, 16, 0], sizes = [4, 16, 128], strides = [1, 1, 1]} : vector<4x32x128xf32> to vector<4x16x128xf32>
      %64 = arith.maximumf %62, %63 : vector<4x16x128xf32>
      %c4_i32 = arith.constant 4 : i32
      %65 = arith.muli %arg16, %c4_i32 : i32
      %66 = tpu.assume_multiple %65, 4 : i32
      %67 = arith.index_cast %66 : i32 to index
      %c0_89 = arith.constant 0 : index
      %c0_90 = arith.constant 0 : index
      %68 = vector.load %arg15[%67, %c0_89, %c0_90] : memref<8x16x128xf32, #tpu.memory_space<vmem>>, vector<4x16x128xf32>
      tpu.vector_store %arg15[%67, %c0_89, %c0_90], %64 {strides = array<i32>} : memref<8x16x128xf32, #tpu.memory_space<vmem>>, vector<4x16x128xf32>,
      %69 = arith.index_cast %66 : i32 to index
      %c0_91 = arith.constant 0 : index
      %c0_92 = arith.constant 0 : index
      %70 = tpu.strided_load %arg15[%69, %c0_91, %c0_92] {strides = array<i32: 1, 2, 1>} : memref<8x16x128xf32, #tpu.memory_space<vmem>>, vector<4x8x128xf32>
      %71 = arith.index_cast %66 : i32 to index
      %c1_93 = arith.constant 1 : index
      %c0_94 = arith.constant 0 : index
      %72 = tpu.strided_load %arg15[%71, %c1_93, %c0_94] {strides = array<i32: 1, 2, 1>} : memref<8x16x128xf32, #tpu.memory_space<vmem>>, vector<4x8x128xf32>
      %73 = arith.maximumf %70, %72 : vector<4x8x128xf32>
      %c0_95 = arith.constant 0 : index
      %74 = arith.index_cast %66 : i32 to index
      %c0_96 = arith.constant 0 : index
      %c0_97 = arith.constant 0 : index
      %75 = vector.load %arg8[%c0_95, %74, %c0_96, %c0_97] : memref<1x8x8x128xf32, #tpu.memory_space<vmem>>, vector<1x4x8x128xf32>
      %76 = vector.shape_cast %75 : vector<1x4x8x128xf32> to vector<4x8x128xf32>
      %77 = vector.shape_cast %73 : vector<4x8x128xf32> to vector<1x4x8x128xf32>
      tpu.vector_store %arg8[%c0_95, %74, %c0_96, %c0_97], %77 {strides = array<i32>} : memref<1x8x8x128xf32, #tpu.memory_space<vmem>>, vector<1x4x8x128xf32>,
    }
    %c2_i32_64 = arith.constant 2 : i32
    return
  }
  func.func @transform_0(%arg0: i32) -> (i32, i32, i32, i32) {
    %c0_i32 = arith.constant 0 : i32
    %c0_i32_0 = arith.constant 0 : i32
    %c0_i32_1 = arith.constant 0 : i32
    %c0_i32_2 = arith.constant 0 : i32
    return %arg0, %c0_i32, %c0_i32_0, %c0_i32_1 : i32, i32, i32, i32
  }
  func.func @transform_1(%arg0: i32) -> (i32, i32, i32) {
    %c0_i32 = arith.constant 0 : i32
    %c0_i32_0 = arith.constant 0 : i32
    %c0_i32_1 = arith.constant 0 : i32
    %c0_i32_2 = arith.constant 0 : i32
    return %c0_i32, %c0_i32_0, %c0_i32_1 : i32, i32, i32
  }
  func.func @transform_2(%arg0: i32) -> (i32, i32) {
    %c0_i32 = arith.constant 0 : i32
    %c0_i32_0 = arith.constant 0 : i32
    %c0_i32_1 = arith.constant 0 : i32
    return %c0_i32, %c0_i32_0 : i32, i32
  }
  func.func @transform_3(%arg0: i32) -> (i32, i32, i32) {
    %c0_i32 = arith.constant 0 : i32
    %c0_i32_0 = arith.constant 0 : i32
    %c0_i32_1 = arith.constant 0 : i32
    %c0_i32_2 = arith.constant 0 : i32
    return %c0_i32, %c0_i32_0, %c0_i32_1 : i32, i32, i32
  }
  func.func @transform_4(%arg0: i32) -> (i32, i32) {
    %c0_i32 = arith.constant 0 : i32
    %c0_i32_0 = arith.constant 0 : i32
    %c0_i32_1 = arith.constant 0 : i32
    return %c0_i32, %c0_i32_0 : i32, i32
  }
  func.func @transform_5(%arg0: i32) -> (i32, i32, i32) {
    %c0_i32 = arith.constant 0 : i32
    %c0_i32_0 = arith.constant 0 : i32
    %c0_i32_1 = arith.constant 0 : i32
    %c0_i32_2 = arith.constant 0 : i32
    return %c0_i32, %c0_i32_0, %c0_i32_1 : i32, i32, i32
  }
  func.func @transform_6(%arg0: i32) -> (i32, i32) {
    %c0_i32 = arith.constant 0 : i32
    %c0_i32_0 = arith.constant 0 : i32
    %c0_i32_1 = arith.constant 0 : i32
    return %c0_i32, %c0_i32_0 : i32, i32
  }
  func.func @transform_7(%arg0: i32) -> (i32, i32, i32, i32) {
    %c0_i32 = arith.constant 0 : i32
    %c0_i32_0 = arith.constant 0 : i32
    %c0_i32_1 = arith.constant 0 : i32
    %c0_i32_2 = arith.constant 0 : i32
    return %arg0, %c0_i32, %c0_i32_0, %c0_i32_1 : i32, i32, i32, i32
  }
}

</mosaic_0001>

<bundles_post_ra>
// kernel: rice_leaf_cnn_forward.2
= control target key start
LH: loop header
LB: loop body
LE: loop exit
PB: predicated region body
PF: predicated region fallthrough
CT: control target
= control target key end

     0   :  { %s5729_s24 = smov 0   ;;  %s8183_s0 = inlined_call_operand.vmem [shape: bf16[2,64,64,128], index: 0, kind: input, shape index: {}]   ;;  %s8184_s1 = inlined_call_operand.vmem [shape: bf16[1,128,32], index: 1, kind: input, shape index: {}]   ;;  %s8185_s2 = inlined_call_operand.vmem [shape: f32[1,32], index: 2, kind: input, shape index: {}]   ;;  %s8186_s3 = inlined_call_operand.vmem [shape: bf16[3,96,64], index: 3, kind: input, shape index: {}]   ;;  %s8187_s4 = inlined_call_operand.vmem [shape: f32[1,64], index: 4, kind: input, shape index: {}]   ;;  %s8188_s5 = inlined_call_operand.vmem [shape: bf16[3,192,128], index: 5, kind: input, shape index: {}]   ;;  %s8189_s6 = inlined_call_operand.vmem [shape: f32[1,128], index: 6, kind: input, shape index: {}]   ;;  %s8190_s7 = inlined_call_operand.vmem [shape: f32[2,8,8,128], index: 7, kind: output, shape index: {}]  }
   0x1 LB: > { %s4969_s25 = sadd.s32 4294967295, %s5671_s24   ;;  %p4973_p0 = scmp.ge.s32.totalorder %s5671_s24, 1  ;;  %s5671_s24 = sphi %s5729_s24, %s17_s24  }
   0x2   : > { %p237_p1 = scmp.lt.s32.totalorder %s5671_s24, 3 }
   0x4   : > { %p238_p2 = pnand %p4973_p0, %p237_p1 }
   0x5   : > { %p269_p3 = scmp.lt.s32.totalorder (!%p238_p2), %s4969_s25, 1  ;;  %s5747_s11 = smov (!%p238_p2), 0  }
   0x6   : > { %241 = sbr.rel (%p238_p2) target bundleno = 1500 (0x5dc), region = 48 }
   0xd   : > { %s8280_s25 = smov (!%p269_p3, %s4969_s25), 1 }
   0xe   : > { %s5268_s26 = sshll.u32 %s8280_s25, 11  ;;  %s5269_s27 = sshll.u32 %s8280_s25, 6 }
   0xf   : > { %s5740_s30 = scalar_lea.vmem %s8183_s0, %s5268_s26  ;;  %s5745_s10 = scalar_lea.vmem %s8190_s7, %s5269_s27 }
  0x10 LB: >> { %v5579_v0 = vld [vmem:[%s8184_s1] sm:$0xff]   ;;  %v5580_v1 = vld [vmem:[%s8184_s1 + $0x8] sm:$0xff]   ;;  %s5271_s16 = sshll.u32 %s5675_s11, 6  ;;  %v5581_v2 = vld [vmem:[%s8184_s1 + $0x10] sm:$0xff]   ;;  %vm548_vm0 = vcmask 261120   ;;  %s5272_s14 = sshll.u32 %s5675_s11, 4  ;;  %s5675_s11 = sphi %s5747_s11, %s285_s11  }
  0x11   : >> { %5343 = vmatprep.subr.bf16.mxu0 %v5579_v0  ;;  %5459 = vmatprep.subr.bf16.mxu1 %v5579_v0  ;;  %s5765_s19 = scalar_lea.vmem %s5740_s30, %s5271_s16  ;;  %v5582_v3 = vld [vmem:[%s8184_s1 + $0x18] sm:$0xff]   ;;  %v5583_v6 = vld [vmem:[%s8184_s1 + $0x20] sm:$0xff]   ;;  %v5584_v7 = vld [vmem:[%s8184_s1 + $0x28] sm:$0xff]   ;;  %s5795_s13 = scalar_lea.vmem [#allocation2], %s5271_s16 }
  0x12   : >> { %5344 = vmatpush3.bf16.msra.mxu0 %v5579_v0  ;;  %5467 = vmatpush3.bf16.msra.mxu1 %v5579_v0  ;;  %v5587_v4 = vld [vmem:[%s5765_s19] sm:$0xff]   ;;  %v5585_v8 = vld [vmem:[%s8184_s1 + $0x30] sm:$0xff]   ;;  %v5586_v9 = vld [vmem:[%s8184_s1 + $0x38] sm:$0xff]   ;;  %s580_s15 = scalar_lea.vmem [#allocation3], %s5272_s14  ;;  %s285_s11 = sadd.s32 1, %s5675_s11  }
  0x13   : >> { %5345 = vmatprep.subr.bf16.mxu0 %v5580_v1  ;;  %5460 = vmatprep.subr.bf16.mxu1 %v5580_v1  ;;  %v5588_v5 = vld [vmem:[%s5765_s19 + $0x20] sm:$0xff]   ;;  %v5589_v10 = vld [vmem:[%s5765_s19 + $0x8] sm:$0xff]   ;;  %v5591_v12 = vld [vmem:[%s5765_s19 + $0x10] sm:$0xff]   ;;  %p282_p4 = scmp.ge.s32.totalorder %s285_s11, 32  }
  0x14   : >> { %5359 = vmatprep.mubr.bf16.mxu0 %v5587_v4  ;;  %5367 = vmatprep.mubr.bf16.mxu1 %v5588_v5  ;;  %v5590_v11 = vld [vmem:[%s5765_s19 + $0x28] sm:$0xff]   ;;  %v5592_v13 = vld [vmem:[%s5765_s19 + $0x30] sm:$0xff]   ;;  %v5593_v14 = vld [vmem:[%s5765_s19 + $0x18] sm:$0xff]   ;;  %s5685_s16 = smov (%p282_p4), 32   ;;  %vm589_vm1 = vcmask (%p282_p4), 253952   ;;  %vm694_vm3 = vcmask (%p282_p4), 785927  }
  0x15   : >> { %v5594_v15 = vld [vmem:[%s5765_s19 + $0x38] sm:$0xff]   ;;  %v4981_v16 = vld [vmem:[%s8185_s2] ss:$0 sm:$0xff]  ;;  %vm590_vm2 = vsmask.f32 (%p282_p4), 256  ;;  %vm1120_vm7 = vcmask (%p282_p4), 523520  }
  0x16   : >> { %5346 = vmatpush3.bf16.msra.mxu0 %v5580_v1  ;;  %5468 = vmatpush3.bf16.msra.mxu1 %v5580_v1  ;;  %vm695_vm4 = vsmask.f32 (%p282_p4), 7966  ;;  %vm5872_vm5 = vmand (%p282_p4), %vm589_vm1, %vm590_vm2  ;;  %vm1989_vm8 = vsmask.f32 (%p282_p4), 7424  ;;  %vm1794_vm9 = vsmask.f32 (%p282_p4), 7938 }
  0x17   : >> { %5347 = vmatprep.subr.bf16.mxu0 %v5581_v2  ;;  %5461 = vmatprep.subr.bf16.mxu1 %v5581_v2  ;;  %vm5885_vm6 = vmand (%p282_p4), %vm694_vm3, %vm695_vm4  ;;  %s5686_s30 = smov (%p282_p4), 64   ;;  %vm583_vm11 = vcmask (%p282_p4), 785408   ;;  %vm2662_vm12 = vcmask (%p282_p4), 785920   ;;  %s7266_s11 = smov (%p282_p4), 0  }
  0x18   : > { %vm6217_vm10 = vmand (%p282_p4), %vm548_vm0, %vm1794_vm9 }
  0x19   : > { %vm7122_vm13 = vmand (%p282_p4), %vm2662_vm12, %vm1989_vm8 }
  0x1a   : >> { %5348 = vmatpush3.bf16.msra.mxu0 %v5581_v2  ;;  %5469 = vmatpush3.bf16.msra.mxu1 %v5581_v2 }
  0x1b   : >> { %5349 = vmatprep.subr.bf16.mxu0 %v5582_v3  ;;  %5462 = vmatprep.subr.bf16.mxu1 %v5582_v3 }
  0x1e   : >> { %5350 = vmatpush3.bf16.msra.mxu0 %v5582_v3  ;;  %5470 = vmatpush3.bf16.msra.mxu1 %v5582_v3 }
  0x1f   : >> { %5351 = vmatprep.subr.bf16.mxu0 %v5583_v6  ;;  %5463 = vmatprep.subr.bf16.mxu1 %v5583_v6 }
  0x22   : >> { %5352 = vmatpush3.bf16.msra.mxu0 %v5583_v6  ;;  %5471 = vmatpush3.bf16.msra.mxu1 %v5583_v6 }
  0x23   : >> { %5353 = vmatprep.subr.bf16.mxu0 %v5584_v7  ;;  %5464 = vmatprep.subr.bf16.mxu1 %v5584_v7 }
  0x26   : >> { %5354 = vmatpush3.bf16.msra.mxu0 %v5584_v7  ;;  %5472 = vmatpush3.bf16.msra.mxu1 %v5584_v7 }
  0x27   : >> { %5355 = vmatprep.subr.bf16.mxu0 %v5585_v8  ;;  %5465 = vmatprep.subr.bf16.mxu1 %v5585_v8 }
  0x2a   : >> { %5356 = vmatpush3.bf16.msra.mxu0 %v5585_v8  ;;  %5473 = vmatpush3.bf16.msra.mxu1 %v5585_v8 }
  0x2b   : >> { %5357 = vmatprep.subr.bf16.mxu0 %v5586_v9  ;;  %5466 = vmatprep.subr.bf16.mxu1 %v5586_v9 }
  0x2e   : >> { %5358 = vmatpush3.bf16.msra.mxu0 %v5586_v9  ;;  %5474 = vmatpush3.bf16.msra.mxu1 %v5586_v9 }
  0x31   : >> { %5360 = vmatmul.mubr.bf16.vlgmr.msra.gmra.mrb[0].mxu0 %v5589_v10  ;;  %5368 = vmatmul.mubr.bf16.vlgmr.msra.gmra.mrb[0].mxu1 %v5590_v11 }
  0x32   : >> { %5363 = vmatprep.mubr.bf16.mxu0 %v5591_v12  ;;  %5371 = vmatprep.mubr.bf16.mxu1 %v5592_v13 }
  0x39   : >> { %5364 = vmatmul.mubr.bf16.gmra.mrb[4].mxu0 %v5593_v14  ;;  %5372 = vmatmul.mubr.bf16.gmra.mrb[4].mxu1 %v5594_v15 }
 0x104   : >> { %v5361_v17 = vpop.f32.mrb[0].mxu0  ;;  %v5369_v18 = vpop.f32.mrb[0].mxu1 }
 0x105   : >> { %v468_v19 = vadd.f32 %v5361_v17, %v4981_v16  ;;  %v500_v20 = vadd.f32 %v5369_v18, %v4981_v16  ;;  %v459_v21 = vpop.f32.mrb[1].mxu0  ;;  %v491_v22 = vpop.f32.mrb[1].mxu1 }
 0x106   : >> { %v460_v23 = vadd.f32 %v4981_v16, %v459_v21  ;;  %v492_v24 = vadd.f32 %v4981_v16, %v491_v22  ;;  %v5362_v25 = vpop.f32.mrb[2].mxu0  ;;  %v5370_v26 = vpop.f32.mrb[2].mxu1 }
 0x107   : >> { %v524_v27 = vmax.f32 %v468_v19, 0.0  ;;  %v532_v28 = vmax.f32 %v500_v20, 0.0  ;;  %v471_v29 = vadd.f32 %v5362_v25, %v4981_v16  ;;  %v503_v30 = vadd.f32 %v5370_v26, %v4981_v16  ;;  %v462_v31 = vpop.f32.mrb[3].mxu0  ;;  %v494_v32 = vpop.f32.mrb[3].mxu1 }
 0x108   : >> { %v522_v33 = vmax.f32 %v460_v23, 0.0  ;;  %v530_v34 = vmax.f32 %v492_v24, 0.0  ;;  %v463_v35 = vadd.f32 %v4981_v16, %v462_v31  ;;  %v495_v36 = vadd.f32 %v4981_v16, %v494_v32 }
 0x109   : >> { %v540_v37 = vmax.f32 %v524_v27, %v532_v28  ;;  %v525_v38 = vmax.f32 %v471_v29, 0.0  ;;  %v533_v39 = vmax.f32 %v503_v30, 0.0 }
 0x10a   : >> { %v538_v40 = vmax.f32 %v522_v33, %v530_v34  ;;  %v523_v41 = vmax.f32 %v463_v35, 0.0  ;;  %v531_v42 = vmax.f32 %v495_v36, 0.0  ;;  %v598_v36 = vld [vmem:[#allocation4 + $0x20] sm:$0x1] (%p282_p4) }
 0x10b   : >> { %551 = vst.msk [vmem:[%s5795_s13 + $0x10] sm:$0xff] %vm548_vm0, %v540_v37  ;;  %v541_v43 = vmax.f32 %v525_v38, %v533_v39  ;;  %v599_v37 = vsel (%p282_p4), %vm5872_vm5, 0, %v598_v36  ;;  %v595_v38 = vld [vmem:[#allocation4 + $0x10] sm:$0x1] (%p282_p4) }
 0x10c   : >> { %549 = vst.msk [vmem:[%s5795_s13] sm:$0xff] %vm548_vm0, %v538_v40  ;;  %v539_v44 = vmax.f32 %v523_v41, %v531_v42  ;;  %v5365_v45 = vpop.f32.mrb[4].mxu0  ;;  %v5373_v46 = vpop.f32.mrb[4].mxu1  ;;  %600 = vst [vmem:[#allocation4 + $0x20] sm:$0x1] (%p282_p4), %v599_v37  ;;  %v596_v39 = vsel (%p282_p4), %vm5872_vm5, 0, %v595_v38 }
 0x10d   : >> { %552 = vst.msk [vmem:[%s5795_s13 + $0x18] sm:$0xff] %vm548_vm0, %v541_v43  ;;  %v484_v47 = vadd.f32 %v5365_v45, %v4981_v16  ;;  %v516_v48 = vadd.f32 %v5373_v46, %v4981_v16  ;;  %v475_v49 = vpop.f32.mrb[5].mxu0  ;;  %v507_v50 = vpop.f32.mrb[5].mxu1  ;;  %v703_v41 = vld [vmem:[#allocation4 + $0x28] sm:$0x80] (%p282_p4) }
 0x10e   : >> { %550 = vst.msk [vmem:[%s5795_s13 + $0x8] sm:$0xff] %vm548_vm0, %v539_v44  ;;  %v476_v51 = vadd.f32 %v4981_v16, %v475_v49  ;;  %v508_v52 = vadd.f32 %v4981_v16, %v507_v50  ;;  %v5366_v53 = vpop.f32.mrb[6].mxu0  ;;  %v5374_v54 = vpop.f32.mrb[6].mxu1  ;;  %v700_v42 = vld [vmem:[#allocation4 + $0x18] sm:$0x80] (%p282_p4)  ;;  %v704_v45 = vsel (%p282_p4), %vm5885_vm6, 0, %v703_v41 }
 0x10f   : >> { %v528_v55 = vmax.f32 %v484_v47, 0.0  ;;  %v536_v56 = vmax.f32 %v516_v48, 0.0  ;;  %v487_v57 = vadd.f32 %v5366_v53, %v4981_v16  ;;  %v519_v58 = vadd.f32 %v5374_v54, %v4981_v16  ;;  %v478_v59 = vpop.f32.mrb[7].mxu0  ;;  %v510_v60 = vpop.f32.mrb[7].mxu1  ;;  %597 = vst [vmem:[#allocation4 + $0x10] sm:$0x1] (%p282_p4), %v596_v39 }
 0x110   : >> { %v526_v61 = vmax.f32 %v476_v51, 0.0  ;;  %v534_v62 = vmax.f32 %v508_v52, 0.0  ;;  %v479_v63 = vadd.f32 %v4981_v16, %v478_v59  ;;  %v511_v0 = vadd.f32 %v4981_v16, %v510_v60  ;;  %v706_v47 = vld [vmem:[#allocation4 + $0x38] sm:$0x80] (%p282_p4)  ;;  %705 = vst [vmem:[#allocation4 + $0x28] sm:$0x80] (%p282_p4), %v704_v45 }
 0x111   : >> { %v544_v1 = vmax.f32 %v528_v55, %v536_v56  ;;  %v529_v2 = vmax.f32 %v487_v57, 0.0  ;;  %v537_v3 = vmax.f32 %v519_v58, 0.0  ;;  %v701_v46 = vsel (%p282_p4), %vm5885_vm6, 0, %v700_v42  ;;  %v601_v49 = vld [vmem:[#allocation4 + $0x30] sm:$0x1] (%p282_p4) }
 0x112   : >> { %v542_v4 = vmax.f32 %v526_v61, %v534_v62  ;;  %v527_v5 = vmax.f32 %v479_v63, 0.0  ;;  %v535_v6 = vmax.f32 %v511_v0, 0.0  ;;  %702 = vst [vmem:[#allocation4 + $0x18] sm:$0x80] (%p282_p4), %v701_v46  ;;  %v707_v48 = vsel (%p282_p4), %vm5885_vm6, 0, %v706_v47 }
 0x113   : >> { %555 = vst.msk [vmem:[%s5795_s13 + $0x30] sm:$0xff] %vm548_vm0, %v544_v1  ;;  %v545_v7 = vmax.f32 %v529_v2, %v537_v3  ;;  %708 = vst [vmem:[#allocation4 + $0x38] sm:$0x80] (%p282_p4), %v707_v48  ;;  %v602_v52 = vsel (%p282_p4), %vm5872_vm5, 0, %v601_v49  ;;  %v709_v53 = vld [vmem:[#allocation4 + $0x48] sm:$0x80] (%p282_p4) }
 0x114   : >> { %v4999_v8 = vld [vmem:[%s5795_s13 + $0x10] ss:$2 sm:$0xff]  ;;  %v5003_v9 = vld [vmem:[%s5795_s13 + $0x11] ss:$2 sm:$0xff]  ;;  %553 = vst.msk [vmem:[%s5795_s13 + $0x20] sm:$0xff] %vm548_vm0, %v542_v4  ;;  %v543_v10 = vmax.f32 %v527_v5, %v535_v6  ;;  %v710_v55 = vsel (%p282_p4), %vm5885_vm6, 0, %v709_v53 }
 0x115   : >> { %v573_v11 = vmax.f32 %v4999_v8, %v5003_v9  ;;  %v557_v12 = vld [vmem:[%s5795_s13] ss:$2 sm:$0xff]  ;;  %v5002_v13 = vld [vmem:[%s5795_s13 + $0x1] ss:$2 sm:$0xff]  ;;  %556 = vst.msk [vmem:[%s5795_s13 + $0x38] sm:$0xff] %vm548_vm0, %v545_v7 }
 0x116   : >> { %v572_v14 = vmax.f32 %v557_v12, %v5002_v13  ;;  %554 = vst.msk [vmem:[%s5795_s13 + $0x28] sm:$0xff] %vm548_vm0, %v543_v10  ;;  %v604_v54 = vld [vmem:[#allocation4 + $0x40] sm:$0x1] (%p282_p4)  ;;  %603 = vst [vmem:[#allocation4 + $0x30] sm:$0x1] (%p282_p4), %v602_v52 }
 0x117   : > { %v605_v56 = vsel (%p282_p4), %vm5872_vm5, 0, %v604_v54  ;;  %v712_v57 = vld [vmem:[#allocation4 + $0x58] sm:$0x80] (%p282_p4)  ;;  %v607_v58 = vld [vmem:[#allocation4 + $0x50] sm:$0x1] (%p282_p4) }
 0x118   : >> { %v576_v15 = vpack.c.bf16 %v573_v11, %v572_v14  ;;  %711 = vst [vmem:[#allocation4 + $0x48] sm:$0x80] (%p282_p4), %v710_v55  ;;  %606 = vst [vmem:[#allocation4 + $0x40] sm:$0x1] (%p282_p4), %v605_v56  ;;  %v713_v59 = vsel (%p282_p4), %vm5885_vm6, 0, %v712_v57  ;;  %v608_v60 = vsel (%p282_p4), %vm5872_vm5, 0, %v607_v58 }
 0x119   : > { %v715_v61 = vld [vmem:[#allocation4 + $0x68] sm:$0x80] (%p282_p4)  ;;  %v610_v62 = vld [vmem:[#allocation4 + $0x60] sm:$0x1] (%p282_p4)  ;;  %714 = vst [vmem:[#allocation4 + $0x58] sm:$0x80] (%p282_p4), %v713_v59 }
 0x11a   : >> { %581 = vst.msk [vmem:[%s580_s15] sm:$0xff] %vm548_vm0, %v576_v15  ;;  %609 = vst [vmem:[#allocation4 + $0x50] sm:$0x1] (%p282_p4), %v608_v60  ;;  %v716_v63 = vsel (%p282_p4), %vm5885_vm6, 0, %v715_v61  ;;  %v611_v0 = vsel (%p282_p4), %vm5872_vm5, 0, %v610_v62 }
 0x11b   : > { %v718_v1 = vld [vmem:[#allocation4 + $0x78] sm:$0x80] (%p282_p4)  ;;  %v613_v2 = vld [vmem:[#allocation4 + $0x70] sm:$0x1] (%p282_p4)  ;;  %717 = vst [vmem:[#allocation4 + $0x68] sm:$0x80] (%p282_p4), %v716_v63 }
 0x11c   : >> { %v5001_v16 = vld [vmem:[%s5795_s13 + $0x30] ss:$2 sm:$0xff]  ;;  %v5005_v17 = vld [vmem:[%s5795_s13 + $0x31] ss:$2 sm:$0xff]  ;;  %284 = sbr.rel (!%p282_p4) target bundleno = 16 (0x10), region = 141  ;;  %v719_v3 = vsel (%p282_p4), %vm5885_vm6, 0, %v718_v1 }
 0x11d   : >> { %v575_v18 = vmax.f32 %v5001_v16, %v5005_v17  ;;  %v5000_v19 = vld [vmem:[%s5795_s13 + $0x20] ss:$2 sm:$0xff]  ;;  %v5004_v20 = vld [vmem:[%s5795_s13 + $0x21] ss:$2 sm:$0xff]  ;;  %612 = vst [vmem:[#allocation4 + $0x60] sm:$0x1] (%p282_p4), %v611_v0 }
 0x11e   : >> { %v574_v21 = vmax.f32 %v5000_v19, %v5004_v20  ;;  %v614_v4 = vsel (%p282_p4), %vm5872_vm5, 0, %v613_v2  ;;  %v721_v5 = vld [vmem:[#allocation4 + $0x88] sm:$0x80] (%p282_p4)  ;;  %720 = vst [vmem:[#allocation4 + $0x78] sm:$0x80] (%p282_p4), %v719_v3 }
 0x11f   : > { %615 = vst [vmem:[#allocation4 + $0x70] sm:$0x1] (%p282_p4), %v614_v4  ;;  %v722_v6 = vsel (%p282_p4), %vm5885_vm6, 0, %v721_v5  ;;  %v616_v7 = vld [vmem:[#allocation4 + $0x80] sm:$0x1] (%p282_p4) }
 0x120   : >> { %v577_v22 = vpack.c.bf16 %v575_v18, %v574_v21  ;;  %723 = vst [vmem:[#allocation4 + $0x88] sm:$0x80] (%p282_p4), %v722_v6  ;;  %v617_v10 = vsel (%p282_p4), %vm5872_vm5, 0, %v616_v7  ;;  %v724_v11 = vld [vmem:[#allocation4 + $0x98] sm:$0x80] (%p282_p4) }
 0x121   : > { %618 = vst [vmem:[#allocation4 + $0x80] sm:$0x1] (%p282_p4), %v617_v10  ;;  %v725_v12 = vsel (%p282_p4), %vm5885_vm6, 0, %v724_v11  ;;  %v619_v13 = vld [vmem:[#allocation4 + $0x90] sm:$0x1] (%p282_p4) }
 0x122   : >> { %582 = vst.msk [vmem:[%s580_s15 + $0x8] sm:$0xff] %vm548_vm0, %v577_v22  ;;  %726 = vst [vmem:[#allocation4 + $0x98] sm:$0x80] (%p282_p4), %v725_v12  ;;  %v620_v14 = vsel (%p282_p4), %vm5872_vm5, 0, %v619_v13  ;;  %v727_v15 = vld [vmem:[#allocation4 + $0xa8] sm:$0x80] (%p282_p4) }
 0x123   : > { %621 = vst [vmem:[#allocation4 + $0x90] sm:$0x1] %v620_v14  ;;  %v622_v16 = vld [vmem:[#allocation4 + $0xa0] sm:$0x1]  ;;  %v730_v19 = vld [vmem:[#allocation4 + $0xb8] sm:$0x80] }
 0x124   : > { %v728_v20 = vsel %vm5885_vm6, 0, %v727_v15  ;;  %v623_v21 = vsel %vm5872_vm5, 0, %v622_v16  ;;  %v625_v22 = vld [vmem:[#allocation4 + $0xb0] sm:$0x1]  ;;  %v731_v38 = vsel %vm5885_vm6, 0, %v730_v19 }
 0x125   : > { %729 = vst [vmem:[#allocation4 + $0xa8] sm:$0x80] %v728_v20  ;;  %624 = vst [vmem:[#allocation4 + $0xa0] sm:$0x1] %v623_v21  ;;  %v733_v39 = vld [vmem:[#allocation4 + $0xc8] sm:$0x80] }
 0x126   : > { %732 = vst [vmem:[#allocation4 + $0xb8] sm:$0x80] %v731_v38  ;;  %v626_v41 = vsel %vm5872_vm5, 0, %v625_v22  ;;  %v628_v42 = vld [vmem:[#allocation4 + $0xc0] sm:$0x1]  ;;  %v734_v47 = vsel %vm5885_vm6, 0, %v733_v39 }
 0x127   : > { %627 = vst [vmem:[#allocation4 + $0xb0] sm:$0x1] %v626_v41  ;;  %735 = vst [vmem:[#allocation4 + $0xc8] sm:$0x80] %v734_v47  ;;  %v629_v48 = vsel %vm5872_vm5, 0, %v628_v42 }
 0x128   : > { %v736_v49 = vld [vmem:[#allocation4 + $0xd8] sm:$0x80]  ;;  %630 = vst [vmem:[#allocation4 + $0xc0] sm:$0x1] %v629_v48  ;;  %v631_v52 = vld [vmem:[#allocation4 + $0xd0] sm:$0x1] }
 0x129   : > { %v5827_v23 = vld [vmem:[#allocation3 + $0x10] sm:$0xff]  ;;  %v5829_v24 = vld [vmem:[#allocation3] sm:$0xff]  ;;  %v5835_v25 = vld [vmem:[#allocation3 + $0x18] sm:$0xff]  ;;  %v737_v55 = vsel %vm5885_vm6, 0, %v736_v49  ;;  %v632_v57 = vsel %vm5872_vm5, 0, %v631_v52 }
 0x12a   : > { %931 = vrot.lane.b32.xlu1 %v5827_v23, %s5685_s16  ;;  %927 = vrot.lane.b32.xlu0 %v5829_v24, %s5685_s16  ;;  %v5837_v26 = vld [vmem:[#allocation3 + $0x8] sm:$0xff]  ;;  %v5845_v28 = vld [vmem:[#allocation3 + $0x20] sm:$0xff]  ;;  %v5851_v29 = vld [vmem:[#allocation3 + $0x38] sm:$0xff]  ;;  %738 = vst [vmem:[#allocation4 + $0xd8] sm:$0x80] %v737_v55 }
 0x12b   : > { %v5843_v27 = vld [vmem:[#allocation3 + $0x28] sm:$0xff]  ;;  %v5853_v30 = vld [vmem:[#allocation3 + $0x30] sm:$0xff]  ;;  %v5861_v32 = vld [vmem:[#allocation3 + $0x40] sm:$0xff]  ;;  %633 = vst [vmem:[#allocation4 + $0xd0] sm:$0x1] %v632_v57 }
 0x12c   : > { %v5859_v31 = vld [vmem:[#allocation3 + $0x48] sm:$0xff]  ;;  %v5867_v33 = vld [vmem:[#allocation3 + $0x58] sm:$0xff]  ;;  %v5869_v34 = vld [vmem:[#allocation3 + $0x50] sm:$0xff] }
 0x12d   : > { %v5889_v43 = vld [vmem:[#allocation3 + $0x68] sm:$0xff]  ;;  %v5891_v44 = vld [vmem:[#allocation3 + $0x60] sm:$0xff]  ;;  %v5899_v50 = vld [vmem:[#allocation3 + $0x78] sm:$0xff] }
 0x12e   : > { %933 = vrot.lane.b32.xlu1 %v5835_v25, %s5685_s16  ;;  %929 = vrot.lane.b32.xlu0 %v5837_v26, %s5685_s16  ;;  %v5901_v51 = vld [vmem:[#allocation3 + $0x70] sm:$0xff]  ;;  %v5931_v8 = vld [vmem:[#allocation3 + $0x88] sm:$0xff]  ;;  %v5933_v9 = vld [vmem:[#allocation3 + $0x80] sm:$0xff] }
 0x12f   : > { %v5945_v17 = vld [vmem:[#allocation3 + $0x98] sm:$0xff]  ;;  %v5947_v18 = vld [vmem:[#allocation3 + $0x90] sm:$0xff]  ;;  %v5957_v36 = vld [vmem:[#allocation3 + $0xa8] sm:$0xff] }
 0x130   : > { %v5959_v37 = vld [vmem:[#allocation3 + $0xa0] sm:$0xff]  ;;  %v5969_v45 = vld [vmem:[#allocation3 + $0xb8] sm:$0xff]  ;;  %v5971_v46 = vld [vmem:[#allocation3 + $0xb0] sm:$0xff] }
 0x131   : > { %v5981_v53 = vld [vmem:[#allocation3 + $0xc8] sm:$0xff]  ;;  %v5983_v54 = vld [vmem:[#allocation3 + $0xc0] sm:$0xff]  ;;  %v5995_v60 = vld [vmem:[#allocation3 + $0xd8] sm:$0xff] }
 0x132   : > { %937 = vrot.lane.b32.xlu1 %v5843_v27, %s5685_s16  ;;  %935 = vrot.lane.b32.xlu0 %v5845_v28, %s5685_s16  ;;  %v739_v56 = vld [vmem:[#allocation4 + $0xe8] sm:$0x80]  ;;  %v634_v58 = vld [vmem:[#allocation4 + $0xe0] sm:$0x1]  ;;  %v5997_v61 = vld [vmem:[#allocation3 + $0xd0] sm:$0xff] }
 0x133   : > { %v740_v59 = vsel %vm5885_vm6, 0, %v739_v56  ;;  %v742_v62 = vld [vmem:[#allocation4 + $0xf8] sm:$0x80]  ;;  %v635_v63 = vsel %vm5872_vm5, 0, %v634_v58  ;;  %v637_v0 = vld [vmem:[#allocation4 + $0xf0] sm:$0x1] }
 0x134   : > { %741 = vst [vmem:[#allocation4 + $0xe8] sm:$0x80] %v740_v59  ;;  %636 = vst [vmem:[#allocation4 + $0xe0] sm:$0x1] %v635_v63  ;;  %v743_v1 = vsel %vm5885_vm6, 0, %v742_v62  ;;  %v6007_v2 = vld [vmem:[#allocation3 + $0xe8] sm:$0xff] }
 0x135   : > { %v6009_v3 = vld [vmem:[#allocation3 + $0xe0] sm:$0xff]  ;;  %744 = vst [vmem:[#allocation4 + $0xf8] sm:$0x80] %v743_v1  ;;  %v638_v4 = vsel %vm5872_vm5, 0, %v637_v0  ;;  %v745_v5 = vld [vmem:[#allocation4 + $0x108] sm:$0x80] }
 0x136   : > { %941 = vrot.lane.b32.xlu1 %v5851_v29, %s5685_s16  ;;  %939 = vrot.lane.b32.xlu0 %v5853_v30, %s5685_s16  ;;  %639 = vst [vmem:[#allocation4 + $0xf0] sm:$0x1] %v638_v4  ;;  %v640_v6 = vld [vmem:[#allocation4 + $0x100] sm:$0x1]  ;;  %v830_v7 = vld [vmem:[#allocation3 + $0xf8] sm:$0xff]  ;;  %v829_v10 = vld [vmem:[#allocation3 + $0xf0] sm:$0xff] }
 0x137   : > { %v746_v11 = vsel %vm5885_vm6, 0, %v745_v5  ;;  %v641_v12 = vsel %vm5872_vm5, 0, %v640_v6  ;;  %v748_v13 = vld [vmem:[#allocation4 + $0x118] sm:$0x80]  ;;  %v643_v14 = vld [vmem:[#allocation4 + $0x110] sm:$0x1] }
 0x138   : > { %747 = vst [vmem:[#allocation4 + $0x108] sm:$0x80] %v746_v11  ;;  %642 = vst [vmem:[#allocation4 + $0x100] sm:$0x1] %v641_v12  ;;  %v832_v15 = vld [vmem:[#allocation3 + $0x108] sm:$0xff]  ;;  %v831_v16 = vld [vmem:[#allocation3 + $0x100] sm:$0xff] }
 0x139   : > { %v749_v19 = vsel %vm5885_vm6, 0, %v748_v13  ;;  %v644_v20 = vsel %vm5872_vm5, 0, %v643_v14  ;;  %v751_v21 = vld [vmem:[#allocation4 + $0x128] sm:$0x80]  ;;  %v646_v22 = vld [vmem:[#allocation4 + $0x120] sm:$0x1] }
 0x13a   : > { %945 = vrot.lane.b32.xlu1 %v5859_v31, %s5685_s16  ;;  %943 = vrot.lane.b32.xlu0 %v5861_v32, %s5685_s16  ;;  %750 = vst [vmem:[#allocation4 + $0x118] sm:$0x80] %v749_v19  ;;  %645 = vst [vmem:[#allocation4 + $0x110] sm:$0x1] %v644_v20  ;;  %v834_v38 = vld [vmem:[#allocation3 + $0x118] sm:$0xff]  ;;  %v833_v39 = vld [vmem:[#allocation3 + $0x110] sm:$0xff] }
 0x13b   : > { %v752_v41 = vsel %vm5885_vm6, 0, %v751_v21  ;;  %v647_v42 = vsel %vm5872_vm5, 0, %v646_v22  ;;  %v754_v47 = vld [vmem:[#allocation4 + $0x138] sm:$0x80]  ;;  %v836_v48 = vld [vmem:[#allocation3 + $0x128] sm:$0xff]  ;;  %v835_v49 = vld [vmem:[#allocation3 + $0x120] sm:$0xff] }
 0x13c   : > { %753 = vst [vmem:[#allocation4 + $0x128] sm:$0x80] %v752_v41  ;;  %648 = vst [vmem:[#allocation4 + $0x120] sm:$0x1] %v647_v42  ;;  %v649_v52 = vld [vmem:[#allocation4 + $0x130] sm:$0x1] }
 0x13d   : > { %v755_v55 = vsel %vm5885_vm6, 0, %v754_v47  ;;  %v757_v56 = vld [vmem:[#allocation4 + $0x148] sm:$0x80]  ;;  %v650_v57 = vsel %vm5872_vm5, 0, %v649_v52  ;;  %v838_v58 = vld [vmem:[#allocation3 + $0x138] sm:$0xff]  ;;  %v837_v59 = vld [vmem:[#allocation3 + $0x130] sm:$0xff] }
 0x13e   : > { %949 = vrot.lane.b32.xlu1 %v5867_v33, %s5685_s16  ;;  %947 = vrot.lane.b32.xlu0 %v5869_v34, %s5685_s16  ;;  %756 = vst [vmem:[#allocation4 + $0x138] sm:$0x80] %v755_v55  ;;  %651 = vst [vmem:[#allocation4 + $0x130] sm:$0x1] %v650_v57  ;;  %v652_v62 = vld [vmem:[#allocation4 + $0x140] sm:$0x1] }
 0x13f   : > { %v758_v63 = vsel %vm5885_vm6, 0, %v757_v56  ;;  %v760_v0 = vld [vmem:[#allocation4 + $0x158] sm:$0x80]  ;;  %v653_v1 = vsel %vm5872_vm5, 0, %v652_v62  ;;  %v655_v4 = vld [vmem:[#allocation4 + $0x150] sm:$0x1] }
 0x140   : > { %759 = vst [vmem:[#allocation4 + $0x148] sm:$0x80] %v758_v63  ;;  %v840_v5 = vld [vmem:[#allocation3 + $0x148] sm:$0xff]  ;;  %v839_v6 = vld [vmem:[#allocation3 + $0x140] sm:$0xff]  ;;  %654 = vst [vmem:[#allocation4 + $0x140] sm:$0x1] %v653_v1 }
 0x141   : > { %v656_v11 = vsel %vm5872_vm5, 0, %v655_v4  ;;  %v658_v12 = vld [vmem:[#allocation4 + $0x160] sm:$0x1]  ;;  %v842_v13 = vld [vmem:[#allocation3 + $0x158] sm:$0xff]  ;;  %v841_v14 = vld [vmem:[#allocation3 + $0x150] sm:$0xff] }
 0x142   : > { %953 = vrot.lane.b32.xlu1 %v5889_v43, %s5685_s16  ;;  %951 = vrot.lane.b32.xlu0 %v5891_v44, %s5685_s16  ;;  %657 = vst [vmem:[#allocation4 + $0x150] sm:$0x1] %v656_v11  ;;  %v659_v19 = vsel %vm5872_vm5, 0, %v658_v12  ;;  %v661_v20 = vld [vmem:[#allocation4 + $0x170] sm:$0x1]  ;;  %v844_v21 = vld [vmem:[#allocation3 + $0x168] sm:$0xff] }
 0x143   : > { %660 = vst [vmem:[#allocation4 + $0x160] sm:$0x1] %v659_v19  ;;  %v843_v22 = vld [vmem:[#allocation3 + $0x160] sm:$0xff]  ;;  %v662_v42 = vsel %vm5872_vm5, 0, %v661_v20  ;;  %v846_v47 = vld [vmem:[#allocation3 + $0x178] sm:$0xff]  ;;  %v848_v63 = vld [vmem:[#allocation3 + $0x188] sm:$0xff] }
 0x144   : > { %v664_v41 = vld [vmem:[#allocation4 + $0x180] sm:$0x1]  ;;  %663 = vst [vmem:[#allocation4 + $0x170] sm:$0x1] %v662_v42  ;;  %v772_v55 = vld [vmem:[#allocation4 + $0x198] sm:$0x80] }
 0x145   : > { %v665_v52 = vsel %vm5872_vm5, 0, %v664_v41  ;;  %v667_v56 = vld [vmem:[#allocation4 + $0x190] sm:$0x1]  ;;  %v773_v57 = vsel %vm5885_vm6, 0, %v772_v55  ;;  %v670_v62 = vld [vmem:[#allocation4 + $0x1a0] sm:$0x1] }
 0x146   : > { %957 = vrot.lane.b32.xlu1 %v5899_v50, %s5685_s16  ;;  %955 = vrot.lane.b32.xlu0 %v5901_v51, %s5685_s16  ;;  %666 = vst [vmem:[#allocation4 + $0x180] sm:$0x1] %v665_v52  ;;  %774 = vst [vmem:[#allocation4 + $0x198] sm:$0x80] %v773_v57  ;;  %v671_v4 = vsel %vm5872_vm5, 0, %v670_v62  ;;  %v1272_v19 = vshrl.u32 %v5835_v25, 16 }
 0x147   : > { %672 = vst [vmem:[#allocation4 + $0x1a0] sm:$0x1] %v671_v4  ;;  %v854_v41 = vld [vmem:[#allocation3 + $0x1b8] sm:$0xff]  ;;  %v853_v42 = vld [vmem:[#allocation3 + $0x1b0] sm:$0xff]  ;;  %v8193_v52 = vshrl.u32 %v5843_v27, 16  ;;  %v1250_v62 = vshrl.u32 %v5829_v24, 16 }
 0x148   : > { %v787_v57 = vld [vmem:[#allocation4 + $0x1e8] sm:$0x80]  ;;  %v855_v4 = vld [vmem:[#allocation3 + $0x1c0] sm:$0xff] }
 0x14a   : > { %961 = vrot.lane.b32.xlu1 %v5931_v8, %s5685_s16  ;;  %959 = vrot.lane.b32.xlu0 %v5933_v9, %s5685_s16 }
 0x14e   : > { %965 = vrot.lane.b32.xlu1 %v5945_v17, %s5685_s16  ;;  %963 = vrot.lane.b32.xlu0 %v5947_v18, %s5685_s16 }
 0x152   : > { %969 = vrot.lane.b32.xlu1 %v5957_v36, %s5685_s16  ;;  %967 = vrot.lane.b32.xlu0 %v5959_v37, %s5685_s16 }
 0x156   : > { %973 = vrot.lane.b32.xlu1 %v5969_v45, %s5685_s16  ;;  %971 = vrot.lane.b32.xlu0 %v5971_v46, %s5685_s16 }
 0x15a   : > { %977 = vrot.lane.b32.xlu1 %v5981_v53, %s5685_s16  ;;  %975 = vrot.lane.b32.xlu0 %v5983_v54, %s5685_s16 }
 0x15e   : > { %981 = vrot.lane.b32.xlu1 %v5995_v60, %s5685_s16  ;;  %979 = vrot.lane.b32.xlu0 %v5997_v61, %s5685_s16 }
 0x162   : > { %985 = vrot.lane.b32.xlu1 %v6007_v2, %s5685_s16  ;;  %983 = vrot.lane.b32.xlu0 %v6009_v3, %s5685_s16 }
 0x166   : > { %989 = vrot.lane.b32.xlu1 %v830_v7, %s5685_s16  ;;  %987 = vrot.lane.b32.xlu0 %v829_v10, %s5685_s16  ;;  %v761_v7 = vsel %vm5885_vm6, 0, %v760_v0  ;;  %v763_v10 = vld [vmem:[#allocation4 + $0x168] sm:$0x80]  ;;  %v847_v0 = vld [vmem:[#allocation3 + $0x180] sm:$0xff] }
 0x167   : > { %762 = vst [vmem:[#allocation4 + $0x158] sm:$0x80] %v761_v7  ;;  %v850_v7 = vld [vmem:[#allocation3 + $0x198] sm:$0xff] }
 0x16a   : > { %993 = vrot.lane.b32.xlu1 %v832_v15, %s5685_s16  ;;  %991 = vrot.lane.b32.xlu0 %v831_v16, %s5685_s16  ;;  %v764_v15 = vsel %vm5885_vm6, 0, %v763_v10  ;;  %v766_v16 = vld [vmem:[#allocation4 + $0x178] sm:$0x80]  ;;  %v849_v10 = vld [vmem:[#allocation3 + $0x190] sm:$0xff] }
 0x16b   : > { %765 = vst [vmem:[#allocation4 + $0x168] sm:$0x80] %v764_v15  ;;  %v852_v15 = vld [vmem:[#allocation3 + $0x1a8] sm:$0xff] }
 0x16e   : > { %997 = vrot.lane.b32.xlu1 %v834_v38, %s5685_s16  ;;  %995 = vrot.lane.b32.xlu0 %v833_v39, %s5685_s16  ;;  %v767_v38 = vsel %vm5885_vm6, 0, %v766_v16  ;;  %v769_v39 = vld [vmem:[#allocation4 + $0x188] sm:$0x80]  ;;  %v851_v16 = vld [vmem:[#allocation3 + $0x1a0] sm:$0xff] }
 0x16f   : > { %768 = vst [vmem:[#allocation4 + $0x178] sm:$0x80] %v767_v38  ;;  %v784_v38 = vld [vmem:[#allocation4 + $0x1d8] sm:$0x80] }
 0x170   : > { %v785_v55 = vsel %vm5885_vm6, 0, %v784_v38 }
 0x171   : > { %786 = vst [vmem:[#allocation4 + $0x1d8] sm:$0x80] %v785_v55  ;;  %v8194_v55 = vshll.u32 %v5851_v29, 16 }
 0x172   : > { %1001 = vrot.lane.b32.xlu1 %v836_v48, %s5685_s16  ;;  %999 = vrot.lane.b32.xlu0 %v835_v49, %s5685_s16  ;;  %v845_v48 = vld [vmem:[#allocation3 + $0x170] sm:$0xff]  ;;  %v770_v49 = vsel %vm5885_vm6, 0, %v769_v39 }
 0x173   : > { %771 = vst [vmem:[#allocation4 + $0x188] sm:$0x80] %v770_v49  ;;  %v679_v39 = vld [vmem:[#allocation4 + $0x1d0] sm:$0x1] }
 0x176   : > { %1005 = vrot.lane.b32.xlu1 %v838_v58, %s5685_s16  ;;  %1003 = vrot.lane.b32.xlu0 %v837_v59, %s5685_s16  ;;  %v668_v58 = vsel %vm5872_vm5, 0, %v667_v56  ;;  %v775_v59 = vld [vmem:[#allocation4 + $0x1a8] sm:$0x80]  ;;  %v680_v56 = vsel %vm5872_vm5, 0, %v679_v39 }
 0x177   : > { %669 = vst [vmem:[#allocation4 + $0x190] sm:$0x1] %v668_v58  ;;  %v776_v1 = vsel %vm5885_vm6, 0, %v775_v59  ;;  %v682_v58 = vld [vmem:[#allocation4 + $0x1e0] sm:$0x1]  ;;  %v1265_v59 = vshrl.u32 %v5827_v23, 16 }
 0x178   : > { %777 = vst [vmem:[#allocation4 + $0x1a8] sm:$0x80] %v776_v1  ;;  %681 = vst [vmem:[#allocation4 + $0x1d0] sm:$0x1] %v680_v56  ;;  %v856_v1 = vld [vmem:[#allocation3 + $0x1c8] sm:$0xff] }
 0x17a   : > { %1009 = vrot.lane.b32.xlu1 %v840_v5, %s5685_s16  ;;  %1007 = vrot.lane.b32.xlu0 %v839_v6, %s5685_s16  ;;  %v778_v5 = vld [vmem:[#allocation4 + $0x1b8] sm:$0x80]  ;;  %v673_v6 = vld [vmem:[#allocation4 + $0x1b0] sm:$0x1] }
 0x17b   : > { %v779_v11 = vsel %vm5885_vm6, 0, %v778_v5  ;;  %v674_v12 = vsel %vm5872_vm5, 0, %v673_v6  ;;  %v8195_v6 = vshrl.u32 %v5845_v28, 16 }
 0x17c   : > { %780 = vst [vmem:[#allocation4 + $0x1b8] sm:$0x80] %v779_v11  ;;  %675 = vst [vmem:[#allocation4 + $0x1b0] sm:$0x1] %v674_v12  ;;  %v1290_v11 = vshll.u32 %v5843_v27, 16  ;;  %v8192_v12 = vshrl.u32 %v5853_v30, 16 }
 0x17e   : > { %1013 = vrot.lane.b32.xlu1 %v842_v13, %s5685_s16  ;;  %1011 = vrot.lane.b32.xlu0 %v841_v14, %s5685_s16  ;;  %v781_v13 = vld [vmem:[#allocation4 + $0x1c8] sm:$0x80]  ;;  %v676_v14 = vld [vmem:[#allocation4 + $0x1c0] sm:$0x1] }
 0x17f   : > { %v782_v20 = vsel %vm5885_vm6, 0, %v781_v13  ;;  %v788_v13 = vsel %vm5885_vm6, 0, %v787_v57 }
 0x180   : > { %783 = vst [vmem:[#allocation4 + $0x1c8] sm:$0x80] %v782_v20  ;;  %789 = vst [vmem:[#allocation4 + $0x1e8] sm:$0x80] %v788_v13  ;;  %v8196_v13 = vshrl.u32 %v5861_v32, 16 }
 0x182   : > { %1017 = vrot.lane.b32.xlu1 %v844_v21, %s5685_s16  ;;  %1015 = vrot.lane.b32.xlu0 %v843_v22, %s5685_s16  ;;  %v677_v21 = vsel %vm5872_vm5, 0, %v676_v14  ;;  %v1257_v22 = vshrl.u32 %v5837_v26, 16  ;;  %v683_v14 = vsel %vm5872_vm5, 0, %v682_v58 }
 0x183   : > { %678 = vst [vmem:[#allocation4 + $0x1c0] sm:$0x1] %v677_v21  ;;  %684 = vst [vmem:[#allocation4 + $0x1e0] sm:$0x1] %v683_v14  ;;  %v6129_v21 = vrot.slane %v1265_v59, 7 }
 0x184   : > { %v1259_v49 = vrot.slane %v1257_v22, 7  ;;  %v793_v14 = vld [vmem:[#allocation4 + $0x208] sm:$0x80] }
 0x186   : > { %1021 = vrot.lane.b32.xlu1 %v846_v47, %s5685_s16  ;;  %1019 = vrot.lane.b32.xlu0 %v845_v48, %s5685_s16  ;;  %v1274_v47 = vrot.slane %v1272_v19, 7  ;;  %v1275_v48 = vshll.u32 %v5835_v25, 16 }
 0x188   : > { %v1277_v5 = vor.u32 %v1275_v48, %v1274_v47  ;;  %v857_v47 = vld [vmem:[#allocation3 + $0x1d0] sm:$0xff] }
 0x18a   : > { %1025 = vrot.lane.b32.xlu1 %v848_v63, %s5685_s16  ;;  %1023 = vrot.lane.b32.xlu0 %v847_v0, %s5685_s16  ;;  %v1260_v63 = vshll.u32 %v5837_v26, 16  ;;  %v1289_v0 = vrot.slane %v8193_v52, 7  ;;  %v688_v52 = vld [vmem:[#allocation4 + $0x200] sm:$0x1] }
 0x18c   : > { %v1292_v38 = vor.u32 %v1290_v11, %v1289_v0  ;;  %v2000_v39 = vrot.slane %v1260_v63, 1  ;;  %v6148_v0 = vrot.slane %v8192_v12, 7 }
 0x18e   : > { %1029 = vrot.lane.b32.xlu1 %v850_v7, %s5685_s16  ;;  %1027 = vrot.lane.b32.xlu0 %v849_v10, %s5685_s16  ;;  %v8191_v7 = vshrl.u32 %v5851_v29, 16  ;;  %v1993_v10 = vshll.u32 %v5829_v24, 16  ;;  %v2030_v24 = vrot.slane %v1290_v11, 1 }
 0x190   : > { %v1304_v20 = vrot.slane %v8191_v7, 7  ;;  %v1995_v56 = vrot.slane %v1993_v10, 1  ;;  %v2008_v7 = vshll.u32 %v5827_v23, 16  ;;  %v2053_v23 = vshll.u32 %v5861_v32, 16 }
 0x192   : > { %1033 = vrot.lane.b32.xlu1 %v852_v15, %s5685_s16  ;;  %1031 = vrot.lane.b32.xlu0 %v851_v16, %s5685_s16  ;;  %v790_v15 = vld [vmem:[#allocation4 + $0x1f8] sm:$0x80]  ;;  %v1262_v16 = vor.u32 %v1260_v63, %v1259_v49  ;;  %v6133_v49 = vrot.slane %v1250_v62, 7  ;;  %v6144_v63 = vrot.slane %v8195_v6, 7  ;;  %v8197_v6 = vshrl.u32 %v5867_v33, 16 }
 0x193   : > { %v791_v57 = vsel %vm5885_vm6, 0, %v790_v15  ;;  %v1270_v11 = vor.u32 %v2008_v7, %v6129_v21 }
 0x194   : > { %792 = vst [vmem:[#allocation4 + $0x1f8] sm:$0x80] %v791_v57  ;;  %v1263_v15 = vsel %vm590_vm2, %v6133_v49, %v1262_v16  ;;  %v1293_v57 = vsel %vm590_vm2, %v6144_v63, %v1292_v38  ;;  %v8198_v16 = vshrl.u32 %v5859_v31, 16  ;;  %v794_v38 = vsel %vm5885_vm6, 0, %v793_v14 }
 0x195   : > { %795 = vst [vmem:[#allocation4 + $0x208] sm:$0x80] %v794_v38  ;;  %v2010_v14 = vrot.slane %v2008_v7, 1  ;;  %v862_v38 = vld [vmem:[#allocation3 + $0x1f8] sm:$0xff] }
 0x196   : > { %1037 = vrot.lane.b32.xlu1 %v854_v41, %s5685_s16  ;;  %1035 = vrot.lane.b32.xlu0 %v853_v42, %s5685_s16  ;;  %v685_v41 = vld [vmem:[#allocation4 + $0x1f0] sm:$0x1]  ;;  %v858_v42 = vld [vmem:[#allocation3 + $0x1d8] sm:$0xff] }
 0x197   : > { %v686_v12 = vsel %vm5872_vm5, 0, %v685_v41  ;;  %v6171_v41 = vrot.slane %v1275_v48, 1  ;;  %v689_v48 = vsel %vm5872_vm5, 0, %v688_v52  ;;  %v1334_v52 = vrot.slane %v8197_v6, 7 }
 0x198   : > { %687 = vst [vmem:[#allocation4 + $0x1f0] sm:$0x1] %v686_v12  ;;  %v8201_v12 = vshll.u32 %v5859_v31, 16  ;;  %690 = vst [vmem:[#allocation4 + $0x200] sm:$0x1] %v689_v48  ;;  %v8200_v6 = vshll.u32 %v5867_v33, 16 }
 0x19a   : > { %1041 = vrot.lane.b32.xlu1 %v856_v1, %s5685_s16  ;;  %1039 = vrot.lane.b32.xlu0 %v855_v4, %s5685_s16  ;;  %v1278_v4 = vsel %vm590_vm2, %v6129_v21, %v1277_v5  ;;  %v1307_v5 = vor.u32 %v8194_v55, %v1304_v20  ;;  %v860_v20 = vld [vmem:[#allocation3 + $0x1e8] sm:$0xff]  ;;  %v1996_v55 = vor.u32 %v1995_v56, %v1250_v62  ;;  %v1319_v56 = vrot.slane %v8198_v16, 7 }
 0x19c   : > { %v932_v58 = vpop.permute.xlu1 %931  ;;  %v928_v1 = vpop.permute.xlu0 %927  ;;  %v1308_v62 = vsel %vm590_vm2, %v6148_v0, %v1307_v5  ;;  %v8199_v5 = vshrl.u32 %v5889_v43, 16 }
 0x19d   : > { %1123 = vst.msk [vmem:[#allocation4 + $0x20] sm:$0xff] %vm1120_vm7, %v932_v58  ;;  %1121 = vst.msk [vmem:[#allocation4 + $0x10] sm:$0xff] %vm1120_vm7, %v928_v1  ;;  %v6166_v58 = vor.u32 %v2000_v39, %v1257_v22  ;;  %v859_v1 = vld [vmem:[#allocation3 + $0x1e0] sm:$0xff]  ;;  %v6178_v22 = vrot.slane %v8196_v13, 7  ;;  %v1325_v13 = vshrl.u32 %v5869_v34, 16 }
 0x19e   : > { %1045 = vrot.lane.b32.xlu1 %v858_v42, %s5685_s16  ;;  %1043 = vrot.lane.b32.xlu0 %v857_v47, %s5685_s16  ;;  %v2023_v42 = vshll.u32 %v5845_v28, 16  ;;  %v1349_v16 = vrot.slane %v8199_v5, 7  ;;  %v2011_v5 = vor.u32 %v2010_v14, %v1265_v59 }
 0x19f   : > { %v6243_v14 = vrot.slane %v1325_v13, 7 }
 0x1a0   : > { %v934_v47 = vpop.permute.xlu1 %933  ;;  %v930_v26 = vpop.permute.xlu0 %929 }
 0x1a1   : > { %1124 = vst.msk [vmem:[#allocation4 + $0x28] sm:$0xff] %vm1120_vm7, %v934_v47  ;;  %1122 = vst.msk [vmem:[#allocation4 + $0x18] sm:$0xff] %vm1120_vm7, %v930_v26  ;;  %v861_v47 = vld [vmem:[#allocation3 + $0x1f0] sm:$0xff]  ;;  %v2001_v26 = vsel %vm1989_vm8, %v1996_v55, %v2000_v39  ;;  %v1255_v39 = vor.u32 %v1993_v10, %v6133_v49  ;;  %v1322_v55 = vor.u32 %v8201_v12, %v1319_v56  ;;  %v1340_v10 = vshrl.u32 %v5891_v44, 16 }
 0x1a2   : > { %1804 = vst.msk [vmem:[#allocation4 + $0x28] sm:$0xff] %vm548_vm0, %v1278_v4  ;;  %1800 = vst.msk [vmem:[#allocation4 + $0x18] sm:$0xff] %vm548_vm0, %v1263_v15  ;;  %1049 = vrot.lane.b32.xlu1 %v860_v20, %s5685_s16  ;;  %1047 = vrot.lane.b32.xlu0 %v859_v1, %s5685_s16  ;;  %v6204_v4 = vor.u32 %v6171_v41, %v1272_v19  ;;  %v2025_v15 = vrot.slane %v2023_v42, 1  ;;  %v2038_v20 = vshll.u32 %v5853_v30, 16  ;;  %v1350_v56 = vshll.u32 %v5889_v43, 16 }
 0x1a3   : > { %v1323_v21 = vsel %vm590_vm2, %v6178_v22, %v1322_v55 }
 0x1a4   : > { %v938_v1 = vpop.permute.xlu1 %937  ;;  %v936_v48 = vpop.permute.xlu0 %935  ;;  %v1796_v19 = vld [vmem:[#allocation4 + $0x10] sm:$0xff]  ;;  %v1801_v49 = vld [vmem:[#allocation4 + $0x20] sm:$0xff] }
 0x1a5   : > { %1126 = vst.msk [vmem:[#allocation4 + $0x38] sm:$0xff] %vm1120_vm7, %v938_v1  ;;  %1125 = vst.msk [vmem:[#allocation4 + $0x30] sm:$0xff] %vm1120_vm7, %v936_v48  ;;  %v1337_v1 = vor.u32 %v8200_v6, %v1334_v52  ;;  %v1797_v59 = vsel %vm6217_vm10, %v1255_v39, %v1796_v19  ;;  %v2040_v52 = vrot.slane %v2038_v20, 1  ;;  %v1352_v39 = vor.u32 %v1350_v56, %v1349_v16 }
 0x1a6   : > { %1808 = vst.msk [vmem:[#allocation4 + $0x38] sm:$0xff] %vm548_vm0, %v1293_v57  ;;  %1053 = vrot.lane.b32.xlu1 %v862_v38, %s5685_s16  ;;  %1051 = vrot.lane.b32.xlu0 %v861_v47, %s5685_s16  ;;  %v8233_v57 = vshrl.u32 %v5845_v28, 16  ;;  %v8234_v47 = vshll.u32 %v5851_v29, 16  ;;  %1798 = vst [vmem:[#allocation4 + $0x10] sm:$0xff] %v1797_v59  ;;  %v1802_v7 = vsel %vm6217_vm10, %v1270_v11, %v1801_v49  ;;  %v8235_v19 = vshrl.u32 %v5843_v27, 16 }
 0x1a7   : > { %v1362_v16 = vshrl.u32 %v5899_v50, 16  ;;  %1803 = vst [vmem:[#allocation4 + $0x20] sm:$0xff] %v1802_v7  ;;  %v1285_v27 = vor.u32 %v2023_v42, %v6144_v63  ;;  %v2055_v63 = vrot.slane %v2053_v23, 1  ;;  %v2068_v7 = vshll.u32 %v5869_v34, 16 }
 0x1a8   : > { %v2026_v38 = vor.u32 %v2025_v15, %v8233_v57  ;;  %v2045_v48 = vrot.slane %v8234_v47, 1  ;;  %v942_v6 = vpop.permute.xlu1 %941  ;;  %v940_v12 = vpop.permute.xlu0 %939  ;;  %v2016_v15 = vsel %vm1989_vm8, %v2011_v5, %v6171_v41  ;;  %v2034_v59 = vor.u32 %v2030_v24, %v8235_v19 }
 0x1a9   : > { %1128 = vst.msk [vmem:[#allocation4 + $0x48] sm:$0xff] %vm1120_vm7, %v942_v6  ;;  %1127 = vst.msk [vmem:[#allocation4 + $0x40] sm:$0xff] %vm1120_vm7, %v940_v12  ;;  %v1338_v6 = vsel %vm590_vm2, %v6243_v14, %v1337_v1  ;;  %v6271_v41 = vrot.slane %v1340_v10, 7  ;;  %v8236_v12 = vshrl.u32 %v5851_v29, 16  ;;  %v8237_v5 = vshrl.u32 %v5853_v30, 16 }
 0x1aa   : > { %1812 = vst.msk [vmem:[#allocation4 + $0x48] sm:$0xff] %vm548_vm0, %v1308_v62  ;;  %2472 = vrot.lane.b32.xlu1 %v6166_v58, %s5686_s30  ;;  %2470 = vrot.lane.b32.xlu0 %v2001_v26, %s5686_s30  ;;  %v1355_v26 = vshrl.u32 %v5901_v51, 16  ;;  %v1364_v55 = vrot.slane %v1362_v16, 7  ;;  %v2031_v11 = vsel %vm1989_vm8, %v2026_v38, %v2030_v24  ;;  %v1377_v29 = vshrl.u32 %v5931_v8, 16 }
 0x1ab   : > { %v6278_v62 = vor.u32 %v2045_v48, %v8236_v12  ;;  %v2041_v58 = vor.u32 %v2040_v52, %v8237_v5  ;;  %v1353_v28 = vsel %vm590_vm2, %v6271_v41, %v1352_v39  ;;  %v1365_v30 = vshll.u32 %v5899_v50, 16 }
 0x1ac   : > { %v946_v49 = vpop.permute.xlu1 %945  ;;  %v944_v1 = vpop.permute.xlu0 %943  ;;  %v1805_v42 = vld [vmem:[#allocation4 + $0x30] sm:$0xff]  ;;  %v1300_v47 = vor.u32 %v2038_v20, %v6148_v0  ;;  %v8238_v24 = vshll.u32 %v5859_v31, 16  ;;  %v1370_v52 = vshrl.u32 %v5933_v9, 16  ;;  %v1379_v39 = vrot.slane %v1377_v29, 7 }
 0x1ad   : > { %1130 = vst.msk [vmem:[#allocation4 + $0x58] sm:$0xff] %vm1120_vm7, %v946_v49  ;;  %1129 = vst.msk [vmem:[#allocation4 + $0x50] sm:$0xff] %vm1120_vm7, %v944_v1  ;;  %v1806_v57 = vsel %vm6217_vm10, %v1285_v27, %v1805_v42  ;;  %v2046_v0 = vsel %vm1989_vm8, %v2041_v58, %v2045_v48  ;;  %v6308_v20 = vrot.slane %v1355_v26, 7  ;;  %v8240_v12 = vshrl.u32 %v5861_v32, 16 }
 0x1ae   : > { %1816 = vst.msk [vmem:[#allocation4 + $0x58] sm:$0xff] %vm548_vm0, %v1323_v21  ;;  %2476 = vrot.lane.b32.xlu1 %v6204_v4, %s5686_s30  ;;  %2474 = vrot.lane.b32.xlu0 %v2016_v15, %s5686_s30  ;;  %v2060_v38 = vrot.slane %v8238_v24, 1  ;;  %1807 = vst [vmem:[#allocation4 + $0x30] sm:$0xff] %v1806_v57  ;;  %v1367_v4 = vor.u32 %v1365_v30, %v1364_v55  ;;  %v8239_v21 = vshll.u32 %v5867_v33, 16  ;;  %v1380_v49 = vshll.u32 %v5931_v8, 16 }
 0x1af   : > { %v2056_v5 = vor.u32 %v2055_v63, %v8240_v12  ;;  %v1385_v48 = vshrl.u32 %v5947_v18, 16  ;;  %v2083_v58 = vshll.u32 %v5891_v44, 16  ;;  %v1392_v55 = vshrl.u32 %v5945_v17, 16 }
 0x1b0   : > { %v6314_v15 = vrot.slane %v8239_v21, 1  ;;  %v950_v19 = vpop.permute.xlu1 %949  ;;  %v948_v27 = vpop.permute.xlu0 %947  ;;  %v1809_v1 = vld [vmem:[#allocation4 + $0x40] sm:$0xff]  ;;  %v1315_v57 = vor.u32 %v2053_v23, %v6178_v22  ;;  %v8241_v32 = vshrl.u32 %v5859_v31, 16  ;;  %v6334_v24 = vrot.slane %v1370_v52, 7 }
 0x1b1   : > { %1132 = vst.msk [vmem:[#allocation4 + $0x68] sm:$0xff] %vm1120_vm7, %v950_v19  ;;  %1131 = vst.msk [vmem:[#allocation4 + $0x60] sm:$0xff] %vm1120_vm7, %v948_v27  ;;  %v1810_v42 = vsel %vm6217_vm10, %v1300_v47, %v1809_v1  ;;  %v1382_v21 = vor.u32 %v1380_v49, %v1379_v39  ;;  %v2070_v19 = vrot.slane %v2068_v7, 1  ;;  %v1368_v22 = vsel %vm590_vm2, %v6308_v20, %v1367_v4  ;;  %v2678_v25 = vld [vmem:[#allocation4 + $0x48] sm:$0xff] }
 0x1b2   : > { %1820 = vst.msk [vmem:[#allocation4 + $0x68] sm:$0xff] %vm548_vm0, %v1338_v6  ;;  %2480 = vrot.lane.b32.xlu1 %v2034_v59, %s5686_s30  ;;  %2478 = vrot.lane.b32.xlu0 %v2031_v11, %s5686_s30  ;;  %v2064_v63 = vor.u32 %v2060_v38, %v8241_v32  ;;  %1811 = vst [vmem:[#allocation4 + $0x40] sm:$0xff] %v1810_v42  ;;  %v8242_v23 = vshrl.u32 %v5867_v33, 16  ;;  %v1394_v31 = vrot.slane %v1392_v55, 7  ;;  %v1395_v6 = vshll.u32 %v5945_v17, 16 }
 0x1b3   : > { %v2061_v27 = vsel %vm1989_vm8, %v2056_v5, %v2060_v38  ;;  %v6351_v39 = vrot.slane %v1385_v48, 7  ;;  %v2085_v12 = vrot.slane %v2083_v58, 1  ;;  %v1407_v4 = vshrl.u32 %v5957_v36, 16 }
 0x1b4   : > { %v6343_v59 = vor.u32 %v6314_v15, %v8242_v23  ;;  %v954_v11 = vpop.permute.xlu1 %953  ;;  %v952_v47 = vpop.permute.xlu0 %951  ;;  %v1813_v33 = vld [vmem:[#allocation4 + $0x50] sm:$0xff]  ;;  %v2098_v1 = vshll.u32 %v5901_v51, 16  ;;  %v1330_v32 = vor.u32 %v2068_v7, %v6243_v14  ;;  %v1383_v38 = vsel %vm590_vm2, %v6334_v24, %v1382_v21 }
 0x1b5   : > { %1134 = vst.msk [vmem:[#allocation4 + $0x78] sm:$0xff] %vm1120_vm7, %v954_v11  ;;  %1133 = vst.msk [vmem:[#allocation4 + $0x70] sm:$0xff] %vm1120_vm7, %v952_v47  ;;  %v1814_v42 = vsel %vm6217_vm10, %v1315_v57, %v1813_v33  ;;  %v2071_v5 = vor.u32 %v2070_v19, %v1325_v13  ;;  %v2090_v23 = vrot.slane %v1350_v56, 1  ;;  %v1422_v57 = vshrl.u32 %v5969_v45, 16 }
 0x1b6   : > { %1824 = vst.msk [vmem:[#allocation4 + $0x78] sm:$0xff] %vm548_vm0, %v1353_v28  ;;  %2484 = vrot.lane.b32.xlu1 %v6278_v62, %s5686_s30  ;;  %2482 = vrot.lane.b32.xlu0 %v2046_v0, %s5686_s30  ;;  %1815 = vst [vmem:[#allocation4 + $0x50] sm:$0xff] %v1814_v42  ;;  %v1397_v14 = vor.u32 %v1395_v6, %v1394_v31  ;;  %v1400_v28 = vshrl.u32 %v5959_v37, 16  ;;  %v1409_v62 = vrot.slane %v1407_v4, 7  ;;  %v1410_v7 = vshll.u32 %v5957_v36, 16 }
 0x1b7   : > { %v2086_v34 = vor.u32 %v2085_v12, %v1340_v10  ;;  %v2105_v13 = vrot.slane %v1365_v30, 1  ;;  %v1415_v56 = vshrl.u32 %v5971_v46, 16  ;;  %v2113_v19 = vshll.u32 %v5933_v9, 16 }
 0x1b8   : > { %v958_v0 = vpop.permute.xlu1 %957  ;;  %v956_v21 = vpop.permute.xlu0 %955  ;;  %v1817_v31 = vld [vmem:[#allocation4 + $0x60] sm:$0xff]  ;;  %v2100_v11 = vrot.slane %v2098_v1, 1  ;;  %v1345_v33 = vor.u32 %v2083_v58, %v6271_v41  ;;  %v8243_v44 = vshrl.u32 %v5889_v43, 16  ;;  %v1424_v10 = vrot.slane %v1422_v57, 7 }
 0x1b9   : > { %1136 = vst.msk [vmem:[#allocation4 + $0x88] sm:$0xff] %vm1120_vm7, %v958_v0  ;;  %1135 = vst.msk [vmem:[#allocation4 + $0x80] sm:$0xff] %vm1120_vm7, %v956_v21  ;;  %v1818_v47 = vsel %vm6217_vm10, %v1330_v32, %v1817_v31  ;;  %v1425_v30 = vshll.u32 %v5969_v45, 16  ;;  %v1437_v12 = vshrl.u32 %v5981_v53, 16  ;;  %v2076_v42 = vsel %vm1989_vm8, %v2071_v5, %v6314_v15 }
 0x1ba   : > { %1828 = vst.msk [vmem:[#allocation4 + $0x88] sm:$0xff] %vm548_vm0, %v1368_v22  ;;  %2488 = vrot.lane.b32.xlu1 %v2064_v63, %s5686_s30  ;;  %2486 = vrot.lane.b32.xlu0 %v2061_v27, %s5686_s30  ;;  %v2094_v46 = vor.u32 %v2090_v23, %v8243_v44  ;;  %1819 = vst [vmem:[#allocation4 + $0x60] sm:$0xff] %v1818_v47  ;;  %v1398_v41 = vsel %vm590_vm2, %v6351_v39, %v1397_v14  ;;  %v6401_v58 = vrot.slane %v1400_v28, 7  ;;  %v6456_v44 = vld [vmem:[#allocation3 + $0xb8] sm:$0xff] }
 0x1bb   : > { %v1412_v43 = vor.u32 %v1410_v7, %v1409_v62  ;;  %v2091_v45 = vsel %vm1989_vm8, %v2086_v34, %v2090_v23  ;;  %v2109_v27 = vor.u32 %v2105_v13, %v1362_v16  ;;  %v6408_v32 = vrot.slane %v1415_v56, 7 }
 0x1bc   : > { %v962_v63 = vpop.permute.xlu1 %961  ;;  %v960_v22 = vpop.permute.xlu0 %959  ;;  %v2115_v15 = vrot.slane %v2113_v19, 1  ;;  %v1821_v5 = vld [vmem:[#allocation4 + $0x70] sm:$0xff]  ;;  %v2101_v57 = vor.u32 %v2100_v11, %v1355_v26  ;;  %v1360_v62 = vor.u32 %v2098_v1, %v6308_v20  ;;  %v1427_v50 = vor.u32 %v1425_v30, %v1424_v10 }
 0x1bd   : > { %1138 = vst.msk [vmem:[#allocation4 + $0x98] sm:$0xff] %vm1120_vm7, %v962_v63  ;;  %1137 = vst.msk [vmem:[#allocation4 + $0x90] sm:$0xff] %vm1120_vm7, %v960_v22  ;;  %v1822_v14 = vsel %vm6217_vm10, %v1345_v33, %v1821_v5  ;;  %v2120_v16 = vrot.slane %v1380_v49, 1  ;;  %v1439_v23 = vrot.slane %v1437_v12, 7  ;;  %v1440_v51 = vshll.u32 %v5981_v53, 16  ;;  %v6451_v11 = vld [vmem:[#allocation3 + $0xb0] sm:$0xff] }
 0x1be   : > { %1832 = vst.msk [vmem:[#allocation4 + $0x98] sm:$0xff] %vm548_vm0, %v1383_v38  ;;  %2492 = vrot.lane.b32.xlu1 %v6343_v59, %s5686_s30  ;;  %2490 = vrot.lane.b32.xlu0 %v2076_v42, %s5686_s30  ;;  %1823 = vst [vmem:[#allocation4 + $0x70] sm:$0xff] %v1822_v14  ;;  %v1413_v26 = vsel %vm590_vm2, %v6401_v58, %v1412_v43  ;;  %v1430_v20 = vshrl.u32 %v5983_v54, 16  ;;  %v2128_v1 = vshll.u32 %v5947_v18, 16  ;;  %v1452_v38 = vshrl.u32 %v5995_v60, 16  ;;  %v6484_v5 = vld [vmem:[#allocation3 + $0xf0] sm:$0xff] }
 0x1bf   : > { %v2116_v21 = vor.u32 %v2115_v15, %v1370_v52  ;;  %v6433_v49 = vrot.slane %v1395_v6, 1  ;;  %v1445_v53 = vshrl.u32 %v5997_v61, 16  ;;  %v2143_v34 = vshll.u32 %v5959_v37, 16 }
 0x1c0   : > { %v966_v59 = vpop.permute.xlu1 %965  ;;  %v964_v0 = vpop.permute.xlu0 %963  ;;  %v1825_v56 = vld [vmem:[#allocation4 + $0x80] sm:$0xff]  ;;  %v2106_v54 = vsel %vm1989_vm8, %v2101_v57, %v2105_v13  ;;  %v1375_v9 = vor.u32 %v2113_v19, %v6334_v24  ;;  %v1428_v61 = vsel %vm590_vm2, %v6408_v32, %v1427_v50  ;;  %v2124_v52 = vor.u32 %v2120_v16, %v1377_v29  ;;  %v6486_v57 = vld [vmem:[#allocation3 + $0xf8] sm:$0xff] }
 0x1c1   : > { %1140 = vst.msk [vmem:[#allocation4 + $0xa8] sm:$0xff] %vm1120_vm7, %v966_v59  ;;  %1139 = vst.msk [vmem:[#allocation4 + $0xa0] sm:$0xff] %vm1120_vm7, %v964_v0  ;;  %v1826_v31 = vsel %vm6217_vm10, %v1360_v62, %v1825_v56  ;;  %v1442_v6 = vor.u32 %v1440_v51, %v1439_v23  ;;  %v1467_v13 = vshrl.u32 %v6007_v2, 16  ;;  %v6453_v47 = vrot.slane %v1430_v20, 7  ;;  %v6497_v23 = vld [vmem:[#allocation3 + $0xc8] sm:$0xff]  ;;  %v5595_v51 = vld [vmem:[#allocation3 + $0xb0] sm:$0xff] }
 0x1c2   : > { %1836 = vst.msk [vmem:[#allocation4 + $0xa8] sm:$0xff] %vm548_vm0, %v1398_v41  ;;  %2496 = vrot.lane.b32.xlu1 %v2094_v46, %s5686_s30  ;;  %2494 = vrot.lane.b32.xlu0 %v2091_v45, %s5686_s30  ;;  %1827 = vst [vmem:[#allocation4 + $0x80] sm:$0xff] %v1826_v31  ;;  %v2130_v24 = vrot.slane %v2128_v1, 1  ;;  %v1454_v19 = vrot.slane %v1452_v38, 7  ;;  %v1455_v33 = vshll.u32 %v5995_v60, 16  ;;  %v2121_v30 = vsel %vm1989_vm8, %v2116_v21, %v2120_v16  ;;  %v6493_v16 = vld [vmem:[#allocation3 + $0xc0] sm:$0xff] }
 0x1c3   : > { %v6462_v8 = vor.u32 %v6433_v49, %v1392_v55  ;;  %v6464_v29 = vrot.slane %v1445_v53, 7  ;;  %v2145_v12 = vrot.slane %v2143_v34, 1  ;;  %v2158_v60 = vshll.u32 %v6451_v11, 16 }
 0x1c4   : > { %v970_v46 = vpop.permute.xlu1 %969  ;;  %v968_v10 = vpop.permute.xlu0 %967  ;;  %v1829_v42 = vld [vmem:[#allocation4 + $0x90] sm:$0xff]  ;;  %v1390_v43 = vor.u32 %v2128_v1, %v6351_v39  ;;  %v1443_v17 = vsel %vm590_vm2, %v6453_v47, %v1442_v6  ;;  %v1469_v55 = vrot.slane %v1467_v13, 7  ;;  %v1470_v63 = vshll.u32 %v6007_v2, 16  ;;  %v6526_v6 = vld [vmem:[#allocation3 + $0xd8] sm:$0xff] }
 0x1c5   : > { %1142 = vst.msk [vmem:[#allocation4 + $0xb8] sm:$0xff] %vm1120_vm7, %v970_v46  ;;  %1141 = vst.msk [vmem:[#allocation4 + $0xb0] sm:$0xff] %vm1120_vm7, %v968_v10  ;;  %v1830_v41 = vsel %vm6217_vm10, %v1375_v9, %v1829_v42  ;;  %v2163_v22 = vshll.u32 %v6456_v44, 16  ;;  %v2131_v45 = vor.u32 %v2130_v24, %v1385_v48  ;;  %v1457_v15 = vor.u32 %v1455_v33, %v1454_v19  ;;  %v5596_v24 = vld [vmem:[#allocation3 + $0xc0] sm:$0xff] }
 0x1c6   : > { %1840 = vst.msk [vmem:[#allocation4 + $0xb8] sm:$0xff] %vm548_vm0, %v1413_v26  ;;  %2500 = vrot.lane.b32.xlu1 %v2109_v27, %s5686_s30  ;;  %2498 = vrot.lane.b32.xlu0 %v2106_v54, %s5686_s30  ;;  %1831 = vst [vmem:[#allocation4 + $0x90] sm:$0xff] %v1830_v41  ;;  %v2150_v39 = vrot.slane %v1410_v7, 1  ;;  %v1460_v27 = vshrl.u32 %v6009_v3, 16  ;;  %v2146_v2 = vor.u32 %v2145_v12, %v1400_v28  ;;  %v2167_v50 = vshrl.u32 %v6456_v44, 16 }
 0x1c7   : > { %v2156_v18 = vshrl.u32 %v6451_v11, 16  ;;  %v1482_v48 = vshrl.u32 %v6486_v57, 16  ;;  %v2160_v3 = vrot.slane %v2158_v60, 1  ;;  %v1405_v28 = vor.u32 %v2143_v34, %v6401_v58  ;;  %v6548_v60 = vld [vmem:[#allocation3 + $0xe0] sm:$0xff] }
 0x1c8   : > { %v974_v14 = vpop.permute.xlu1 %973  ;;  %v972_v62 = vpop.permute.xlu0 %971  ;;  %v1833_v7 = vld [vmem:[#allocation4 + $0xa0] sm:$0xff]  ;;  %v1418_v26 = vshll.u32 %v5595_v51, 16  ;;  %v1472_v20 = vor.u32 %v1470_v63, %v1469_v55  ;;  %v2165_v1 = vrot.slane %v2163_v22, 1  ;;  %v1475_v38 = vshrl.u32 %v6484_v5, 16  ;;  %v6574_v51 = vld [vmem:[#allocation3 + $0xe8] sm:$0xff] }
 0x1c9   : > { %1144 = vst.msk [vmem:[#allocation4 + $0xc8] sm:$0xff] %vm1120_vm7, %v974_v14  ;;  %1143 = vst.msk [vmem:[#allocation4 + $0xc0] sm:$0xff] %vm1120_vm7, %v972_v62  ;;  %v1834_v37 = vsel %vm6217_vm10, %v1390_v43, %v1833_v7  ;;  %v1484_v59 = vrot.slane %v1482_v48, 7  ;;  %v2136_v0 = vsel %vm1989_vm8, %v2131_v45, %v6433_v49  ;;  %v2154_v58 = vor.u32 %v2150_v39, %v1407_v4  ;;  %v6524_v4 = vld [vmem:[#allocation3 + $0x100] sm:$0xff]  ;;  %v5597_v62 = vld [vmem:[#allocation3 + $0xd0] sm:$0xff] }
 0x1ca   : > { %1844 = vst.msk [vmem:[#allocation4 + $0xc8] sm:$0xff] %vm548_vm0, %v1428_v61  ;;  %2504 = vrot.lane.b32.xlu1 %v2124_v52, %s5686_s30  ;;  %2502 = vrot.lane.b32.xlu0 %v2121_v30, %s5686_s30  ;;  %1835 = vst [vmem:[#allocation4 + $0xa0] sm:$0xff] %v1834_v37  ;;  %v6512_v21 = vrot.slane %v1460_v27, 7  ;;  %v2173_v53 = vshll.u32 %v6493_v16, 16  ;;  %v1458_v54 = vsel %vm590_vm2, %v6464_v29, %v1457_v15  ;;  %v1485_v9 = vshll.u32 %v6486_v57, 16  ;;  %v6520_v52 = vld [vmem:[#allocation3 + $0xd0] sm:$0xff] }
 0x1cb   : > { %v2151_v31 = vsel %vm1989_vm8, %v2146_v2, %v2150_v39  ;;  %v2178_v61 = vshll.u32 %v6497_v23, 16  ;;  %v2161_v36 = vor.u32 %v2160_v3, %v2156_v18  ;;  %v1420_v11 = vor.u32 %v1418_v26, %v6408_v32  ;;  %v6556_v39 = vld [vmem:[#allocation3 + $0x118] sm:$0xff] }
 0x1cc   : > { %v978_v34 = vpop.permute.xlu1 %977  ;;  %v976_v56 = vpop.permute.xlu0 %975  ;;  %v1837_v49 = vld [vmem:[#allocation4 + $0xb0] sm:$0xff]  ;;  %v1433_v19 = vshll.u32 %v5596_v24, 16  ;;  %v1473_v33 = vsel %vm590_vm2, %v6512_v21, %v1472_v20  ;;  %v2169_v44 = vor.u32 %v2167_v50, %v2165_v1  ;;  %v6539_v46 = vrot.slane %v1475_v38, 7  ;;  %v6594_v24 = vld [vmem:[#allocation3 + $0x128] sm:$0xff] }
 0x1cd   : > { %1146 = vst.msk [vmem:[#allocation4 + $0xd8] sm:$0xff] %vm1120_vm7, %v978_v34  ;;  %1145 = vst.msk [vmem:[#allocation4 + $0xd0] sm:$0xff] %vm1120_vm7, %v976_v56  ;;  %v1838_v13 = vsel %vm6217_vm10, %v1405_v28, %v1837_v49  ;;  %v1487_v32 = vor.u32 %v1485_v9, %v1484_v59  ;;  %v2182_v10 = vshrl.u32 %v6497_v23, 16  ;;  %v2171_v30 = vshrl.u32 %v6493_v16, 16  ;;  %v6567_v16 = vld [vmem:[#allocation3 + $0x110] sm:$0xff] }
 0x1ce   : > { %1848 = vst.msk [vmem:[#allocation4 + $0xd8] sm:$0xff] %vm548_vm0, %v1443_v17  ;;  %2508 = vrot.lane.b32.xlu1 %v6462_v8, %s5686_s30  ;;  %2506 = vrot.lane.b32.xlu0 %v2136_v0, %s5686_s30  ;;  %1839 = vst [vmem:[#allocation4 + $0xb0] sm:$0xff] %v1838_v13  ;;  %v2175_v12 = vrot.slane %v2173_v53, 1  ;;  %v6545_v8 = vld [vmem:[#allocation3 + $0x108] sm:$0xff]  ;;  %v2188_v42 = vshll.u32 %v6520_v52, 16  ;;  %v2180_v17 = vrot.slane %v2178_v61, 1  ;;  %v2166_v15 = vsel %vm1989_vm8, %v2161_v36, %v2165_v1 }
 0x1cf   : > { %v1490_v55 = vshrl.u32 %v6524_v4, 16  ;;  %v1497_v63 = vshrl.u32 %v6545_v8, 16  ;;  %v2193_v22 = vshll.u32 %v6526_v6, 16  ;;  %v1435_v14 = vor.u32 %v1433_v19, %v6453_v47 }
 0x1d0   : > { %v982_v41 = vpop.permute.xlu1 %981  ;;  %v980_v43 = vpop.permute.xlu0 %979  ;;  %v1841_v45 = vld [vmem:[#allocation4 + $0xc0] sm:$0xff]  ;;  %v1448_v2 = vshll.u32 %v5597_v62, 16  ;;  %v1488_v50 = vsel %vm590_vm2, %v6539_v46, %v1487_v32  ;;  %v1500_v18 = vshll.u32 %v6545_v8, 16  ;;  %v1512_v7 = vshrl.u32 %v6556_v39, 16 }
 0x1d1   : > { %1148 = vst.msk [vmem:[#allocation4 + $0xe8] sm:$0xff] %vm1120_vm7, %v982_v41  ;;  %1147 = vst.msk [vmem:[#allocation4 + $0xe0] sm:$0xff] %vm1120_vm7, %v980_v43  ;;  %v1842_v27 = vsel %vm6217_vm10, %v1420_v11, %v1841_v45  ;;  %v2203_v3 = vshll.u32 %v6548_v60, 16  ;;  %v2176_v47 = vor.u32 %v2175_v12, %v2171_v30  ;;  %v1499_v23 = vrot.slane %v1497_v63, 7  ;;  %v6608_v41 = vld [vmem:[#allocation3 + $0x120] sm:$0xff] }
 0x1d2   : > { %1852 = vst.msk [vmem:[#allocation4 + $0xe8] sm:$0xff] %vm548_vm0, %v1458_v54  ;;  %2512 = vrot.lane.b32.xlu1 %v2154_v58, %s5686_s30  ;;  %2510 = vrot.lane.b32.xlu0 %v2151_v31, %s5686_s30  ;;  %1843 = vst [vmem:[#allocation4 + $0xc0] sm:$0xff] %v1842_v27  ;;  %v2186_v37 = vshrl.u32 %v6520_v52, 16  ;;  %v2190_v28 = vrot.slane %v2188_v42, 1  ;;  %v2184_v1 = vor.u32 %v2182_v10, %v2180_v17  ;;  %v2195_v59 = vrot.slane %v2193_v22, 1  ;;  %v5598_v31 = vld [vmem:[#allocation3 + $0xe0] sm:$0xff] }
 0x1d3   : > { %v2197_v0 = vshrl.u32 %v6526_v6, 16  ;;  %v1514_v58 = vrot.slane %v1512_v7, 7  ;;  %v1505_v34 = vshrl.u32 %v6567_v16, 16  ;;  %v1450_v54 = vor.u32 %v1448_v2, %v6464_v29 }
 0x1d4   : > { %v986_v26 = vpop.permute.xlu1 %985  ;;  %v984_v20 = vpop.permute.xlu0 %983  ;;  %v1845_v53 = vld [vmem:[#allocation4 + $0xd0] sm:$0xff]  ;;  %v1463_v61 = vshll.u32 %v5598_v31, 16  ;;  %v1515_v52 = vshll.u32 %v6556_v39, 16  ;;  %v2208_v49 = vshll.u32 %v6574_v51, 16  ;;  %v2201_v36 = vshrl.u32 %v6548_v60, 16 }
 0x1d5   : > { %1150 = vst.msk [vmem:[#allocation4 + $0xf8] sm:$0xff] %vm1120_vm7, %v986_v26  ;;  %1149 = vst.msk [vmem:[#allocation4 + $0xf0] sm:$0xff] %vm1120_vm7, %v984_v20  ;;  %v1846_v56 = vsel %vm6217_vm10, %v1435_v14, %v1845_v53  ;;  %v2205_v6 = vrot.slane %v2203_v3, 1  ;;  %v2181_v13 = vsel %vm1989_vm8, %v2176_v47, %v2180_v17  ;;  %v1502_v29 = vor.u32 %v1500_v18, %v1499_v23  ;;  %v6630_v26 = vld [vmem:[#allocation3 + $0x130] sm:$0xff] }
 0x1d6   : > { %1856 = vst.msk [vmem:[#allocation4 + $0xf8] sm:$0xff] %vm548_vm0, %v1473_v33  ;;  %2516 = vrot.lane.b32.xlu1 %v2169_v44, %s5686_s30  ;;  %2514 = vrot.lane.b32.xlu0 %v2166_v15, %s5686_s30  ;;  %1847 = vst [vmem:[#allocation4 + $0xd0] sm:$0xff] %v1846_v56  ;;  %v2191_v11 = vor.u32 %v2190_v28, %v2186_v37  ;;  %v2218_v19 = vshll.u32 %v6484_v5, 16  ;;  %v1492_v32 = vrot.slane %v1490_v55, 7  ;;  %v1527_v12 = vshrl.u32 %v6594_v24, 16  ;;  %v6626_v28 = vld [vmem:[#allocation3 + $0x138] sm:$0xff] }
 0x1d7   : > { %v2199_v10 = vor.u32 %v2197_v0, %v2195_v59  ;;  %v1517_v30 = vor.u32 %v1515_v52, %v1514_v58  ;;  %v6606_v60 = vrot.slane %v1505_v34, 7  ;;  %v1465_v17 = vor.u32 %v1463_v61, %v6512_v21  ;;  %v6648_v61 = vld [vmem:[#allocation3 + $0x148] sm:$0xff] }
 0x1d8   : > { %v990_v33 = vpop.permute.xlu1 %989  ;;  %v988_v44 = vpop.permute.xlu0 %987  ;;  %v1849_v42 = vld [vmem:[#allocation4 + $0xe0] sm:$0xff]  ;;  %v2210_v22 = vrot.slane %v2208_v49, 1  ;;  %v2212_v45 = vshrl.u32 %v6574_v51, 16  ;;  %v2206_v15 = vor.u32 %v2205_v6, %v2201_v36  ;;  %v1529_v27 = vrot.slane %v1527_v12, 7 }
 0x1d9   : > { %1152 = vst.msk [vmem:[#allocation4 + $0x108] sm:$0xff] %vm1120_vm7, %v990_v33  ;;  %1151 = vst.msk [vmem:[#allocation4 + $0x100] sm:$0xff] %vm1120_vm7, %v988_v44  ;;  %v1850_v43 = vsel %vm6217_vm10, %v1450_v54, %v1849_v42  ;;  %v1503_v14 = vsel %vm590_vm2, %v1492_v32, %v1502_v29  ;;  %v2196_v62 = vsel %vm1989_vm8, %v2191_v11, %v2195_v59  ;;  %v2220_v2 = vrot.slane %v2218_v19, 1  ;;  %v6660_v11 = vld [vmem:[#allocation3 + $0x140] sm:$0xff] }
 0x1da   : > { %1860 = vst.msk [vmem:[#allocation4 + $0x108] sm:$0xff] %vm548_vm0, %v1488_v50  ;;  %2520 = vrot.lane.b32.xlu1 %v2184_v1, %s5686_s30  ;;  %2518 = vrot.lane.b32.xlu0 %v2181_v13, %s5686_s30  ;;  %1851 = vst [vmem:[#allocation4 + $0xe0] sm:$0xff] %v1850_v43  ;;  %v2233_v21 = vshll.u32 %v6524_v4, 16  ;;  %v1518_v47 = vsel %vm590_vm2, %v6606_v60, %v1517_v30  ;;  %v1520_v23 = vshrl.u32 %v6608_v41, 16  ;;  %v1530_v37 = vshll.u32 %v6594_v24, 16 }
 0x1db   : > { %v1542_v20 = vshrl.u32 %v6626_v28, 16  ;;  %v1480_v59 = vor.u32 %v2218_v19, %v6539_v46  ;;  %v2214_v0 = vor.u32 %v2212_v45, %v2210_v22  ;;  %v2211_v58 = vsel %vm1989_vm8, %v2206_v15, %v2210_v22  ;;  %v6678_v45 = vld [vmem:[#allocation3 + $0x150] sm:$0xff] }
 0x1dc   : > { %v994_v50 = vpop.permute.xlu1 %993  ;;  %v992_v3 = vpop.permute.xlu0 %991  ;;  %v1853_v51 = vld [vmem:[#allocation4 + $0xf0] sm:$0xff]  ;;  %v1532_v53 = vor.u32 %v1530_v37, %v1529_v27  ;;  %v2225_v56 = vrot.slane %v1485_v9, 1  ;;  %v2221_v54 = vor.u32 %v2220_v2, %v1475_v38  ;;  %v2235_v31 = vrot.slane %v2233_v21, 1 }
 0x1dd   : > { %1154 = vst.msk [vmem:[#allocation4 + $0x118] sm:$0xff] %vm1120_vm7, %v994_v50  ;;  %1153 = vst.msk [vmem:[#allocation4 + $0x110] sm:$0xff] %vm1120_vm7, %v992_v3  ;;  %v1854_v1 = vsel %vm6217_vm10, %v1465_v17, %v1853_v51  ;;  %v1544_v46 = vrot.slane %v1542_v20, 7  ;;  %v2248_v49 = vshll.u32 %v6567_v16, 16  ;;  %v6653_v13 = vrot.slane %v1520_v23, 7 }
 0x1de   : > { %1864 = vst.msk [vmem:[#allocation4 + $0x118] sm:$0xff] %vm548_vm0, %v1503_v14  ;;  %2524 = vrot.lane.b32.xlu1 %v2199_v10, %s5686_s30  ;;  %2522 = vrot.lane.b32.xlu0 %v2196_v62, %s5686_s30  ;;  %1855 = vst [vmem:[#allocation4 + $0xf0] sm:$0xff] %v1854_v1  ;;  %v1535_v9 = vshrl.u32 %v6630_v26, 16  ;;  %v1557_v29 = vshrl.u32 %v6648_v61, 16  ;;  %v1545_v38 = vshll.u32 %v6626_v28, 16  ;;  %v1495_v33 = vor.u32 %v2233_v21, %v1492_v32  ;;  %v6686_v62 = vld [vmem:[#allocation3 + $0x158] sm:$0xff] }
 0x1df   : > { %v1533_v44 = vsel %vm590_vm2, %v6653_v13, %v1532_v53  ;;  %v2229_v10 = vor.u32 %v2225_v56, %v1482_v48  ;;  %v2240_v30 = vrot.slane %v1500_v18, 1  ;;  %v2226_v32 = vsel %vm1989_vm8, %v2221_v54, %v2225_v56  ;;  %v6714_v56 = vld [vmem:[#allocation3 + $0x160] sm:$0xff]  ;;  %v6716_v54 = vld [vmem:[#allocation3 + $0x168] sm:$0xff]  ;;  %v6783_v28 = vld [vmem:[#allocation3 + $0x198] sm:$0xff] }
 0x1e0   : > { %v998_v36 = vpop.permute.xlu1 %997  ;;  %v996_v6 = vpop.permute.xlu0 %995  ;;  %v1857_v5 = vld [vmem:[#allocation4 + $0x100] sm:$0xff]  ;;  %v1559_v42 = vrot.slane %v1557_v29, 7  ;;  %v1547_v43 = vor.u32 %v1545_v38, %v1544_v46  ;;  %v2236_v17 = vor.u32 %v2235_v31, %v1490_v55  ;;  %v2250_v22 = vrot.slane %v2248_v49, 1  ;;  %v6721_v46 = vld [vmem:[#allocation3 + $0x178] sm:$0xff] }
 0x1e1   : > { %1156 = vst.msk [vmem:[#allocation4 + $0x128] sm:$0xff] %vm1120_vm7, %v998_v36  ;;  %1155 = vst.msk [vmem:[#allocation4 + $0x120] sm:$0xff] %vm1120_vm7, %v996_v6  ;;  %v1858_v19 = vsel %vm6217_vm10, %v1480_v59, %v1857_v5  ;;  %v1537_v57 = vrot.slane %v1535_v9, 7  ;;  %v8207_v48 = vshrl.u32 %v6660_v11, 16  ;;  %v1560_v18 = vshll.u32 %v6648_v61, 16 }
 0x1e2   : > { %1868 = vst.msk [vmem:[#allocation4 + $0x128] sm:$0xff] %vm548_vm0, %v1518_v47  ;;  %2528 = vrot.lane.b32.xlu1 %v2214_v0, %s5686_s30  ;;  %2526 = vrot.lane.b32.xlu0 %v2211_v58, %s5686_s30  ;;  %1859 = vst [vmem:[#allocation4 + $0x100] sm:$0xff] %v1858_v19  ;;  %v2255_v14 = vrot.slane %v1515_v52, 1  ;;  %v1572_v4 = vshrl.u32 %v6686_v62, 16  ;;  %v2263_v55 = vshll.u32 %v6608_v41, 16  ;;  %v1510_v50 = vor.u32 %v2248_v49, %v6606_v60 }
 0x1e3   : > { %v2244_v52 = vor.u32 %v2240_v30, %v1497_v63  ;;  %v1562_v3 = vor.u32 %v1560_v18, %v1559_v42  ;;  %v8210_v47 = vshrl.u32 %v6678_v45, 16  ;;  %v1548_v51 = vsel %vm590_vm2, %v1537_v57, %v1547_v43 }
 0x1e4   : > { %v1002_v15 = vpop.permute.xlu1 %1001  ;;  %v1000_v27 = vpop.permute.xlu0 %999  ;;  %v1861_v2 = vld [vmem:[#allocation4 + $0x110] sm:$0xff]  ;;  %v2241_v1 = vsel %vm1989_vm8, %v2236_v17, %v2240_v30  ;;  %v2251_v60 = vor.u32 %v2250_v22, %v1505_v34  ;;  %v1574_v59 = vrot.slane %v1572_v4, 7  ;;  %v6709_v8 = vrot.slane %v8207_v48, 7 }
 0x1e5   : > { %1158 = vst.msk [vmem:[#allocation4 + $0x138] sm:$0xff] %vm1120_vm7, %v1002_v15  ;;  %1157 = vst.msk [vmem:[#allocation4 + $0x130] sm:$0xff] %vm1120_vm7, %v1000_v27  ;;  %v1862_v21 = vsel %vm6217_vm10, %v1495_v33, %v1861_v2  ;;  %v2259_v63 = vor.u32 %v2255_v14, %v1512_v7  ;;  %v1575_v53 = vshll.u32 %v6686_v62, 16  ;;  %v1587_v34 = vshrl.u32 %v6716_v54, 16  ;;  %v6756_v17 = vld [vmem:[#allocation3 + $0x170] sm:$0xff] }
 0x1e6   : > { %1872 = vst.msk [vmem:[#allocation4 + $0x138] sm:$0xff] %vm548_vm0, %v1533_v44  ;;  %2532 = vrot.lane.b32.xlu1 %v2229_v10, %s5686_s30  ;;  %2530 = vrot.lane.b32.xlu0 %v2226_v32, %s5686_s30  ;;  %1863 = vst [vmem:[#allocation4 + $0x110] sm:$0xff] %v1862_v21  ;;  %v2278_v31 = vshll.u32 %v6630_v26, 16  ;;  %v1525_v7 = vor.u32 %v2263_v55, %v6653_v13  ;;  %v1563_v49 = vsel %vm590_vm2, %v6709_v8, %v1562_v3  ;;  %v6779_v3 = vld [vmem:[#allocation3 + $0x180] sm:$0xff] }
 0x1e7   : > { %v6736_v36 = vrot.slane %v8210_v47, 7  ;;  %v6738_v6 = vrot.slane %v1545_v38, 1  ;;  %v6742_v5 = vrot.slane %v1530_v37, 1  ;;  %v2256_v13 = vsel %vm1989_vm8, %v2251_v60, %v2255_v14 }
 0x1e8   : > { %v1006_v0 = vpop.permute.xlu1 %1005  ;;  %v1004_v58 = vpop.permute.xlu0 %1003  ;;  %v1865_v16 = vld [vmem:[#allocation4 + $0x120] sm:$0xff]  ;;  %v1577_v19 = vor.u32 %v1575_v53, %v1574_v59  ;;  %v8203_v33 = vshrl.u32 %v6714_v56, 16  ;;  %v1589_v44 = vrot.slane %v1587_v34, 7  ;;  %v1590_v42 = vshll.u32 %v6716_v54, 16 }
 0x1e9   : > { %1160 = vst.msk [vmem:[#allocation4 + $0x148] sm:$0xff] %vm1120_vm7, %v1006_v0  ;;  %1159 = vst.msk [vmem:[#allocation4 + $0x140] sm:$0xff] %vm1120_vm7, %v1004_v58  ;;  %v1866_v39 = vsel %vm6217_vm10, %v1510_v50, %v1865_v16  ;;  %v6749_v32 = vrot.slane %v1575_v53, 1  ;;  %v6751_v38 = vrot.slane %v1560_v18, 1  ;;  %v1605_v37 = vshll.u32 %v6721_v46, 16 }
 0x1ea   : > { %1876 = vst.msk [vmem:[#allocation4 + $0x148] sm:$0xff] %vm548_vm0, %v1548_v51  ;;  %2536 = vrot.lane.b32.xlu1 %v2244_v52, %s5686_s30  ;;  %2534 = vrot.lane.b32.xlu0 %v2241_v1, %s5686_s30  ;;  %1867 = vst [vmem:[#allocation4 + $0x120] sm:$0xff] %v1866_v39  ;;  %v1602_v22 = vshrl.u32 %v6721_v46, 16  ;;  %v2293_v15 = vshll.u32 %v6660_v11, 16  ;;  %v1540_v27 = vor.u32 %v2278_v31, %v1537_v57  ;;  %v6777_v21 = vrot.slane %v8203_v33, 7  ;;  %v6781_v51 = vld [vmem:[#allocation3 + $0x188] sm:$0xff] }
 0x1eb   : > { %v2289_v14 = vor.u32 %v6738_v6, %v1542_v20  ;;  %v2274_v2 = vor.u32 %v6742_v5, %v1527_v12  ;;  %v1578_v57 = vsel %vm590_vm2, %v6736_v36, %v1577_v19  ;;  %v1592_v50 = vor.u32 %v1590_v42, %v1589_v44  ;;  %v6813_v39 = vld [vmem:[#allocation3 + $0x1a8] sm:$0xff] }
 0x1ec   : > { %v1010_v10 = vpop.permute.xlu1 %1009  ;;  %v1008_v30 = vpop.permute.xlu0 %1007  ;;  %v1869_v43 = vld [vmem:[#allocation4 + $0x130] sm:$0xff]  ;;  %v1604_v52 = vrot.slane %v1602_v22, 7  ;;  %v2319_v12 = vor.u32 %v6749_v32, %v1572_v4  ;;  %v2304_v1 = vor.u32 %v6751_v38, %v1557_v29  ;;  %v8204_v60 = vshrl.u32 %v6756_v17, 16 }
 0x1ed   : > { %1162 = vst.msk [vmem:[#allocation4 + $0x158] sm:$0xff] %vm1120_vm7, %v1010_v10  ;;  %1161 = vst.msk [vmem:[#allocation4 + $0x150] sm:$0xff] %vm1120_vm7, %v1008_v30  ;;  %v1870_v18 = vsel %vm6217_vm10, %v1525_v7, %v1869_v43  ;;  %v6792_v59 = vrot.slane %v1605_v37, 1  ;;  %v1617_v58 = vshrl.u32 %v6781_v51, 16  ;;  %v2308_v62 = vshll.u32 %v6678_v45, 16 }
 0x1ee   : > { %1880 = vst.msk [vmem:[#allocation4 + $0x158] sm:$0xff] %vm548_vm0, %v1563_v49  ;;  %2540 = vrot.lane.b32.xlu1 %v2259_v63, %s5686_s30  ;;  %2538 = vrot.lane.b32.xlu0 %v2256_v13, %s5686_s30  ;;  %1871 = vst [vmem:[#allocation4 + $0x130] sm:$0xff] %v1870_v18  ;;  %v6797_v63 = vld [vmem:[#allocation3 + $0x1b8] sm:$0xff]  ;;  %v1555_v29 = vor.u32 %v2293_v15, %v6709_v8  ;;  %v6808_v4 = vrot.slane %v1590_v42, 1  ;;  %v8202_v53 = vshrl.u32 %v6779_v3, 16  ;;  %v1620_v16 = vshll.u32 %v6781_v51, 16 }
 0x1ef   : > { %v2373_v46 = vshll.u32 %v6783_v28, 16  ;;  %v1593_v8 = vsel %vm590_vm2, %v6777_v21, %v1592_v50  ;;  %v1607_v7 = vor.u32 %v1605_v37, %v1604_v52  ;;  %v1619_v49 = vrot.slane %v1617_v58, 7  ;;  %v6825_v42 = vld [vmem:[#allocation3 + $0x190] sm:$0xff]  ;;  %v6831_v18 = vld [vmem:[#allocation3 + $0x1d8] sm:$0xff] }
 0x1f0   : > { %v1014_v20 = vpop.permute.xlu1 %1013  ;;  %v1012_v24 = vpop.permute.xlu0 %1011  ;;  %v1873_v0 = vld [vmem:[#allocation4 + $0x140] sm:$0xff]  ;;  %v6821_v44 = vrot.slane %v8204_v60, 7  ;;  %v2349_v10 = vor.u32 %v6792_v59, %v1602_v22  ;;  %v2377_v30 = vshrl.u32 %v6783_v28, 16  ;;  %v2403_v43 = vshll.u32 %v6797_v63, 16 }
 0x1f1   : > { %1164 = vst.msk [vmem:[#allocation4 + $0x168] sm:$0xff] %vm1120_vm7, %v1014_v20  ;;  %1163 = vst.msk [vmem:[#allocation4 + $0x160] sm:$0xff] %vm1120_vm7, %v1012_v24  ;;  %v1874_v61 = vsel %vm6217_vm10, %v1540_v27, %v1873_v0  ;;  %v2388_v37 = vshll.u32 %v6813_v39, 16  ;;  %v1570_v22 = vor.u32 %v2308_v62, %v6736_v36  ;;  %v6847_v50 = vrot.slane %v8202_v53, 7 }
 0x1f2   : > { %1884 = vst.msk [vmem:[#allocation4 + $0x168] sm:$0xff] %vm548_vm0, %v1578_v57  ;;  %2548 = vrot.lane.b32.xlu1 %v2289_v14, %s5686_s30  ;;  %2544 = vrot.lane.b32.xlu0 %v2274_v2, %s5686_s30  ;;  %1875 = vst [vmem:[#allocation4 + $0x140] sm:$0xff] %v1874_v61  ;;  %v8206_v14 = vshll.u32 %v6714_v56, 16  ;;  %v2334_v57 = vor.u32 %v6808_v4, %v1587_v34  ;;  %v6849_v52 = vrot.slane %v2373_v46, 1  ;;  %v6851_v36 = vrot.slane %v1620_v16, 1 }
 0x1f3   : > { %v1608_v28 = vsel %vm590_vm2, %v6821_v44, %v1607_v7  ;;  %v1622_v20 = vor.u32 %v1620_v16, %v1619_v49  ;;  %v8205_v24 = vshrl.u32 %v6825_v42, 16  ;;  %v6860_v0 = vrot.slane %v2403_v43, 1 }
 0x1f4   : > { %v1018_v13 = vpop.permute.xlu1 %1017  ;;  %v1016_v19 = vpop.permute.xlu0 %1015  ;;  %v1877_v27 = vld [vmem:[#allocation4 + $0x150] sm:$0xff]  ;;  %v2407_v61 = vshrl.u32 %v6797_v63, 16  ;;  %v8212_v7 = vshll.u32 %v6831_v18, 16  ;;  %v6871_v49 = vrot.slane %v2388_v37, 1 }
 0x1f5   : > { %1166 = vst.msk [vmem:[#allocation4 + $0x178] sm:$0xff] %vm1120_vm7, %v1018_v13  ;;  %1165 = vst.msk [vmem:[#allocation4 + $0x170] sm:$0xff] %vm1120_vm7, %v1016_v19  ;;  %v1878_v2 = vsel %vm6217_vm10, %v1555_v29, %v1877_v27  ;;  %v2392_v29 = vshrl.u32 %v6813_v39, 16  ;;  %v6873_v13 = vld [vmem:[#allocation3 + $0x1f8] sm:$0xff]  ;;  %v8208_v19 = vshll.u32 %v6756_v17, 16  ;;  %v6979_v63 = vld [vmem:[#allocation3 + $0x1d0] sm:$0xff] }
 0x1f6   : > { %1888 = vst.msk [vmem:[#allocation4 + $0x178] sm:$0xff] %vm548_vm0, %v1593_v8  ;;  %2556 = vrot.lane.b32.xlu1 %v2319_v12, %s5686_s30  ;;  %2552 = vrot.lane.b32.xlu0 %v2304_v1, %s5686_s30  ;;  %1879 = vst [vmem:[#allocation4 + $0x150] sm:$0xff] %v1878_v2  ;;  %v1634_v12 = vrot.slane %v2377_v30, 7  ;;  %v6856_v1 = vld [vmem:[#allocation3 + $0x1c8] sm:$0xff]  ;;  %v6864_v8 = vld [vmem:[#allocation3 + $0x1a0] sm:$0xff]  ;;  %v1585_v2 = vor.u32 %v8206_v14, %v6777_v21  ;;  %v6893_v21 = vrot.slane %v8205_v24, 7 }
 0x1f7   : > { %v1649_v53 = vrot.slane %v2392_v29, 7  ;;  %v2418_v33 = vshll.u32 %v6856_v1, 16  ;;  %v8213_v24 = vshll.u32 %v6779_v3, 16  ;;  %v1600_v14 = vor.u32 %v8208_v19, %v6821_v44 }
 0x1f8   : > { %v1022_v54 = vpop.permute.xlu1 %1021  ;;  %v1020_v34 = vpop.permute.xlu0 %1019  ;;  %v1881_v16 = vld [vmem:[#allocation4 + $0x160] sm:$0xff] }
 0x1f9   : > { %1168 = vst.msk [vmem:[#allocation4 + $0x188] sm:$0xff] %vm1120_vm7, %v1022_v54  ;;  %1167 = vst.msk [vmem:[#allocation4 + $0x180] sm:$0xff] %vm1120_vm7, %v1020_v34  ;;  %v1882_v27 = vsel %vm6217_vm10, %v1570_v22, %v1881_v16  ;;  %v2379_v54 = vor.u32 %v2377_v30, %v6849_v52  ;;  %v2364_v34 = vor.u32 %v6851_v36, %v1617_v58  ;;  %v6901_v16 = vrot.slane %v8212_v7, 1 }
 0x1fa   : > { %1892 = vst.msk [vmem:[#allocation4 + $0x188] sm:$0xff] %vm548_vm0, %v1608_v28  ;;  %2564 = vrot.lane.b32.xlu1 %v2349_v10, %s5686_s30  ;;  %2560 = vrot.lane.b32.xlu0 %v2334_v57, %s5686_s30  ;;  %1883 = vst [vmem:[#allocation4 + $0x160] sm:$0xff] %v1882_v27  ;;  %v1623_v22 = vsel %vm590_vm2, %v6847_v50, %v1622_v20  ;;  %v1637_v10 = vor.u32 %v2373_v46, %v1634_v12  ;;  %v8209_v57 = vshrl.u32 %v6864_v8, 16  ;;  %v6896_v28 = vld [vmem:[#allocation3 + $0x1e8] sm:$0xff]  ;;  %v6908_v12 = vld [vmem:[#allocation3 + $0x1b0] sm:$0xff] }
 0x1fb   : > { %v2409_v58 = vor.u32 %v2407_v61, %v6860_v0  ;;  %v2437_v27 = vshrl.u32 %v6831_v18, 16  ;;  %v8211_v20 = vshll.u32 %v6873_v13, 16  ;;  %v2394_v46 = vor.u32 %v2392_v29, %v6871_v49 }
 0x1fc   : > { %v1026_v30 = vpop.permute.xlu1 %1025  ;;  %v1024_v51 = vpop.permute.xlu0 %1023  ;;  %v1885_v60 = vld [vmem:[#allocation4 + $0x170] sm:$0xff]  ;;  %v1652_v29 = vor.u32 %v2388_v37, %v1649_v53  ;;  %v2448_v44 = vshll.u32 %v6896_v28, 16  ;;  %v1655_v37 = vshrl.u32 %v6908_v12, 16  ;;  %v2398_v26 = vshll.u32 %v6908_v12, 16  ;;  %v2666_v12 = vld [vmem:[#allocation4 + $0x18] sm:$0xff] }
 0x1fd   : > { %1170 = vst.msk [vmem:[#allocation4 + $0x198] sm:$0xff] %vm1120_vm7, %v1026_v30  ;;  %1169 = vst.msk [vmem:[#allocation4 + $0x190] sm:$0xff] %vm1120_vm7, %v1024_v51  ;;  %v1886_v48 = vsel %vm6217_vm10, %v1585_v2, %v1885_v60  ;;  %v6923_v30 = vrot.slane %v2418_v33, 1  ;;  %v2422_v51 = vshrl.u32 %v6856_v1, 16  ;;  %v1638_v60 = vsel %vm590_vm2, %v6893_v21, %v1637_v10  ;;  %v6942_v10 = vld [vmem:[#allocation3 + $0x1c0] sm:$0xff] }
 0x1fe   : > { %1896 = vst.msk [vmem:[#allocation4 + $0x198] sm:$0xff] %vm548_vm0, %v1623_v22  ;;  %2572 = vrot.lane.b32.xlu1 %v2379_v54, %s5686_s30  ;;  %2568 = vrot.lane.b32.xlu0 %v2364_v34, %s5686_s30  ;;  %1887 = vst [vmem:[#allocation4 + $0x170] sm:$0xff] %v1886_v48  ;;  %v6931_v2 = vrot.slane %v8209_v57, 7  ;;  %v1664_v54 = vrot.slane %v2407_v61, 7  ;;  %v2439_v53 = vor.u32 %v2437_v27, %v6901_v16  ;;  %v6939_v22 = vrot.slane %v8211_v20, 1 }
 0x1ff   : > { %v2467_v48 = vshrl.u32 %v6873_v13, 16  ;;  %v1679_v61 = vrot.slane %v2422_v51, 7  ;;  %v2368_v57 = vshll.u32 %v6825_v42, 16  ;;  %v1615_v20 = vor.u32 %v8213_v24, %v6847_v50 }
 0x200   : > { %v1030_v34 = vpop.permute.xlu1 %1029  ;;  %v1028_v39 = vpop.permute.xlu0 %1027  ;;  %v1889_v19 = vld [vmem:[#allocation4 + $0x180] sm:$0xff]  ;;  %v6960_v7 = vrot.slane %v2448_v44, 1  ;;  %v1667_v50 = vor.u32 %v2403_v43, %v1664_v54 }
 0x201   : > { %1172 = vst.msk [vmem:[#allocation4 + $0x1a8] sm:$0xff] %vm1120_vm7, %v1030_v34  ;;  %1171 = vst.msk [vmem:[#allocation4 + $0x1a0] sm:$0xff] %vm1120_vm7, %v1028_v39  ;;  %v1890_v47 = vsel %vm6217_vm10, %v1600_v14, %v1889_v19  ;;  %v1653_v34 = vsel %vm590_vm2, %v6931_v2, %v1652_v29  ;;  %v2424_v39 = vor.u32 %v2422_v51, %v6923_v30  ;;  %v2452_v14 = vshrl.u32 %v6896_v28, 16 }
 0x202   : > { %1900 = vst.msk [vmem:[#allocation4 + $0x1a8] sm:$0xff] %vm548_vm0, %v1638_v60  ;;  %2580 = vrot.lane.b32.xlu1 %v2409_v58, %s5686_s30  ;;  %2576 = vrot.lane.b32.xlu0 %v2394_v46, %s5686_s30  ;;  %1891 = vst [vmem:[#allocation4 + $0x180] sm:$0xff] %v1890_v47  ;;  %v1670_v19 = vshrl.u32 %v6942_v10, 16  ;;  %v2280_v58 = vrot.slane %v2278_v31, 1  ;;  %v2265_v46 = vrot.slane %v2263_v55, 1  ;;  %v1657_v60 = vrot.slane %v1655_v37, 7 }
 0x203   : > { %v2469_v47 = vor.u32 %v2467_v48, %v6939_v22  ;;  %v1682_v31 = vor.u32 %v2418_v33, %v1679_v61  ;;  %v2383_v55 = vshll.u32 %v6864_v8, 16  ;;  %v1630_v43 = vor.u32 %v2368_v57, %v6893_v21 }
 0x204   : > { %v1034_v29 = vpop.permute.xlu1 %1033  ;;  %v1032_v51 = vpop.permute.xlu0 %1031  ;;  %v1893_v24 = vld [vmem:[#allocation4 + $0x190] sm:$0xff]  ;;  %v2454_v1 = vor.u32 %v2452_v14, %v6960_v7  ;;  %v1694_v33 = vrot.slane %v2437_v27, 7  ;;  %v2310_v61 = vrot.slane %v2308_v62, 1  ;;  %v2295_v21 = vrot.slane %v2293_v15, 1 }
 0x205   : > { %1174 = vst.msk [vmem:[#allocation4 + $0x1b8] sm:$0xff] %vm1120_vm7, %v1034_v29  ;;  %1173 = vst.msk [vmem:[#allocation4 + $0x1b0] sm:$0xff] %vm1120_vm7, %v1032_v51  ;;  %v1894_v54 = vsel %vm6217_vm10, %v1615_v20, %v1893_v24  ;;  %v1668_v24 = vsel %vm590_vm2, %v1657_v60, %v1667_v50  ;;  %v1672_v20 = vrot.slane %v1670_v19, 7  ;;  %v1685_v62 = vshrl.u32 %v6979_v63, 16 }
 0x206   : > { %1904 = vst.msk [vmem:[#allocation4 + $0x1b8] sm:$0xff] %vm548_vm0, %v1653_v34  ;;  %2588 = vrot.lane.b32.xlu1 %v2439_v53, %s5686_s30  ;;  %2584 = vrot.lane.b32.xlu0 %v2424_v39, %s5686_s30  ;;  %1895 = vst [vmem:[#allocation4 + $0x190] sm:$0xff] %v1894_v54  ;;  %v2281_v53 = vor.u32 %v2280_v58, %v1535_v9  ;;  %v2266_v34 = vor.u32 %v2265_v46, %v1520_v23  ;;  %v7004_v39 = vld [vmem:[#allocation3 + $0x1e0] sm:$0xff]  ;;  %v1709_v51 = vrot.slane %v2452_v14, 7 }
 0x207   : > { %v1683_v50 = vsel %vm590_vm2, %v1672_v20, %v1682_v31  ;;  %v1645_v23 = vor.u32 %v2383_v55, %v6931_v2  ;;  %v8244_v9 = vshll.u32 %v6831_v18, 16  ;;  %v8245_v58 = vshrl.u32 %v6678_v45, 16 }
 0x208   : > { %v1038_v27 = vpop.permute.xlu1 %1037  ;;  %v1036_v29 = vpop.permute.xlu0 %1035  ;;  %v1897_v15 = vld [vmem:[#allocation4 + $0x1a0] sm:$0xff]  ;;  %v8246_v31 = vshrl.u32 %v6660_v11, 16  ;;  %v2286_v2 = vsel %vm1989_vm8, %v2281_v53, %v6738_v6  ;;  %v8248_v18 = vshll.u32 %v6714_v56, 16  ;;  %v1687_v11 = vrot.slane %v1685_v62, 7  ;;  %v7040_v6 = vld [vmem:[#allocation3 + $0x1f0] sm:$0xff] }
 0x209   : > { %1176 = vst.msk [vmem:[#allocation4 + $0x1c8] sm:$0xff] %vm1120_vm7, %v1038_v27  ;;  %1175 = vst.msk [vmem:[#allocation4 + $0x1c0] sm:$0xff] %vm1120_vm7, %v1036_v29  ;;  %v1898_v41 = vsel %vm6217_vm10, %v1630_v43, %v1897_v15  ;;  %v1697_v14 = vor.u32 %v8244_v9, %v1694_v33  ;;  %v2311_v46 = vor.u32 %v2310_v61, %v8245_v58  ;;  %v1700_v43 = vshrl.u32 %v7004_v39, 16 }
 0x20a   : > { %1908 = vst.msk [vmem:[#allocation4 + $0x1c8] sm:$0xff] %vm548_vm0, %v1668_v24  ;;  %2596 = vrot.lane.b32.xlu1 %v2469_v47, %s5686_s30  ;;  %2592 = vrot.lane.b32.xlu0 %v2454_v1, %s5686_s30  ;;  %v2296_v54 = vor.u32 %v2295_v21, %v8246_v31  ;;  %1899 = vst [vmem:[#allocation4 + $0x1a0] sm:$0xff] %v1898_v41  ;;  %v2271_v47 = vsel %vm1989_vm8, %v2266_v34, %v6742_v5  ;;  %v8247_v1 = vshll.u32 %v6756_v17, 16 }
 0x20b   : > { %v2325_v33 = vrot.slane %v8248_v18, 1  ;;  %v1712_v21 = vor.u32 %v2448_v44, %v1709_v51  ;;  %v1724_v5 = vrot.slane %v2467_v48, 7  ;;  %v2413_v53 = vshll.u32 %v6942_v10, 16 }
 0x20c   : > { %v2340_v24 = vrot.slane %v8247_v1, 1  ;;  %v1042_v45 = vpop.permute.xlu1 %1041  ;;  %v1040_v61 = vpop.permute.xlu0 %1039  ;;  %v1901_v27 = vld [vmem:[#allocation4 + $0x1b0] sm:$0xff]  ;;  %v1660_v34 = vor.u32 %v2398_v26, %v1657_v60  ;;  %v1698_v28 = vsel %vm590_vm2, %v1687_v11, %v1697_v14  ;;  %v2316_v44 = vsel %vm1989_vm8, %v2311_v46, %v6749_v32 }
 0x20d   : > { %1178 = vst.msk [vmem:[#allocation4 + $0x1d8] sm:$0xff] %vm1120_vm7, %v1042_v45  ;;  %1177 = vst.msk [vmem:[#allocation4 + $0x1d0] sm:$0xff] %vm1120_vm7, %v1040_v61  ;;  %v1902_v29 = vsel %vm6217_vm10, %v1645_v23, %v1901_v27  ;;  %v2301_v48 = vsel %vm1989_vm8, %v2296_v54, %v6751_v38  ;;  %v7057_v60 = vrot.slane %v1700_v43, 7  ;;  %v8249_v51 = vshrl.u32 %v6756_v17, 16 }
 0x20e   : > { %1912 = vst.msk [vmem:[#allocation4 + $0x1d8] sm:$0xff] %vm548_vm0, %v1683_v50  ;;  %2546 = vrot.lane.b32.xlu1 %v2286_v2, %s5686_s30  ;;  %2542 = vrot.lane.b32.xlu0 %v2271_v47, %s5686_s30  ;;  %1903 = vst [vmem:[#allocation4 + $0x1b0] sm:$0xff] %v1902_v29  ;;  %v8250_v50 = vshrl.u32 %v6714_v56, 16  ;;  %v2370_v23 = vrot.slane %v2368_v57, 1  ;;  %v8251_v9 = vshll.u32 %v6779_v3, 16  ;;  %v1715_v46 = vshrl.u32 %v7040_v6, 16 }
 0x20f   : > { %v2341_v15 = vor.u32 %v2340_v24, %v8249_v51  ;;  %v1713_v38 = vsel %vm590_vm2, %v7057_v60, %v1712_v21  ;;  %v8252_v56 = vshll.u32 %v6873_v13, 16  ;;  %v2428_v57 = vshll.u32 %v6979_v63, 16 }
 0x210   : > { %v2326_v41 = vor.u32 %v2325_v33, %v8250_v50  ;;  %v2355_v32 = vrot.slane %v8251_v9, 1  ;;  %v1046_v14 = vpop.permute.xlu1 %1045  ;;  %v1044_v58 = vpop.permute.xlu0 %1043  ;;  %v1905_v31 = vld [vmem:[#allocation4 + $0x1c0] sm:$0xff]  ;;  %v1675_v2 = vor.u32 %v2413_v53, %v1672_v20  ;;  %v2400_v47 = vrot.slane %v2398_v26, 1 }
 0x211   : > { %1180 = vst.msk [vmem:[#allocation4 + $0x1e8] sm:$0xff] %vm1120_vm7, %v1046_v14  ;;  %1179 = vst.msk [vmem:[#allocation4 + $0x1e0] sm:$0xff] %vm1120_vm7, %v1044_v58  ;;  %v1727_v17 = vor.u32 %v8252_v56, %v1724_v5  ;;  %v1906_v54 = vsel %vm6217_vm10, %v1660_v34, %v1905_v31  ;;  %v2385_v1 = vrot.slane %v2383_v55, 1  ;;  %v2346_v13 = vsel %vm1989_vm8, %v2341_v15, %v6792_v59 }
 0x212   : > { %1916 = vst.msk [vmem:[#allocation4 + $0x1e8] sm:$0xff] %vm548_vm0, %v1698_v28  ;;  %2554 = vrot.lane.b32.xlu1 %v2316_v44, %s5686_s30  ;;  %2550 = vrot.lane.b32.xlu0 %v2301_v48, %s5686_s30  ;;  %1907 = vst [vmem:[#allocation4 + $0x1c0] sm:$0xff] %v1906_v54  ;;  %v2331_v24 = vsel %vm1989_vm8, %v2326_v41, %v6808_v4  ;;  %v8253_v20 = vshrl.u32 %v6825_v42, 16  ;;  %v8254_v33 = vshrl.u32 %v6779_v3, 16  ;;  %v5687_v61 = vmov 0   ;;  %v2670_v54 = vld [vmem:[#allocation4 + $0x28] sm:$0xff] }
 0x213   : > { %584 = vst.msk [vmem:[#allocation4] sm:$0xff] %vm583_vm11, %v5687_v61  ;;  %585 = vst.msk [vmem:[#allocation4 + $0x8] sm:$0xff] %vm583_vm11, %v5687_v61  ;;  %v1717_v42 = vrot.slane %v1715_v46, 7  ;;  %v2430_v55 = vrot.slane %v2428_v57, 1  ;;  %v2443_v26 = vshll.u32 %v7004_v39, 16  ;;  %v1690_v21 = vor.u32 %v2428_v57, %v1687_v11 }
 0x214   : > { %v2371_v18 = vor.u32 %v2370_v23, %v8253_v20  ;;  %v2356_v45 = vor.u32 %v2355_v32, %v8254_v33  ;;  %587 = vst.msk [vmem:[#allocation4 + $0x210] sm:$0xff] %vm583_vm11, %v5687_v61  ;;  %588 = vst.msk [vmem:[#allocation4 + $0x218] sm:$0xff] %vm583_vm11, %v5687_v61  ;;  %v1050_v59 = vpop.permute.xlu1 %1049  ;;  %v1048_v4 = vpop.permute.xlu0 %1047  ;;  %v1909_v3 = vld [vmem:[#allocation4 + $0x1d0] sm:$0xff]  ;;  %v2401_v5 = vor.u32 %v2400_v47, %v1655_v37  ;;  %v8255_v34 = vshrl.u32 %v6864_v8, 16 }
 0x215   : > { %1182 = vst.msk [vmem:[#allocation4 + $0x1f8] sm:$0xff] %vm1120_vm7, %v1050_v59  ;;  %1181 = vst.msk [vmem:[#allocation4 + $0x1f0] sm:$0xff] %vm1120_vm7, %v1048_v4  ;;  %v1910_v27 = vsel %vm6217_vm10, %v1675_v2, %v1909_v3  ;;  %v2415_v28 = vrot.slane %v2413_v53, 1  ;;  %v1728_v11 = vsel %vm590_vm2, %v1717_v42, %v1727_v17  ;;  %v2458_v51 = vshll.u32 %v7040_v6, 16 }
 0x216   : > { %1920 = vst.msk [vmem:[#allocation4 + $0x1f8] sm:$0xff] %vm548_vm0, %v1713_v38  ;;  %2562 = vrot.lane.b32.xlu1 %v2346_v13, %s5686_s30  ;;  %2558 = vrot.lane.b32.xlu0 %v2331_v24, %s5686_s30  ;;  %v2386_v29 = vor.u32 %v2385_v1, %v8255_v34  ;;  %1911 = vst [vmem:[#allocation4 + $0x1d0] sm:$0xff] %v1910_v27  ;;  %v2376_v44 = vsel %vm1989_vm8, %v2371_v18, %v6849_v52 }
 0x217   : > { %v2361_v48 = vsel %vm1989_vm8, %v2356_v45, %v6851_v36  ;;  %v2431_v52 = vor.u32 %v2430_v55, %v1685_v62  ;;  %v2460_v36 = vrot.slane %v2458_v51, 1  ;;  %v1705_v53 = vor.u32 %v2443_v26, %v7057_v60  ;;  %v2686_v55 = vld [vmem:[#allocation4 + $0x68] sm:$0xff] }
 0x218   : > { %v1054_v15 = vpop.permute.xlu1 %1053  ;;  %v1052_v50 = vpop.permute.xlu0 %1051  ;;  %v1913_v41 = vld [vmem:[#allocation4 + $0x1e0] sm:$0xff]  ;;  %v2406_v23 = vsel %vm1989_vm8, %v2401_v5, %v6860_v0  ;;  %v2391_v9 = vsel %vm1989_vm8, %v2386_v29, %v6871_v49  ;;  %v2416_v63 = vor.u32 %v2415_v28, %v1670_v19  ;;  %v2445_v60 = vrot.slane %v2443_v26, 1  ;;  %v2690_v5 = vld [vmem:[#allocation4 + $0x78] sm:$0xff] }
 0x219   : > { %1184 = vst.msk [vmem:[#allocation4 + $0x208] sm:$0xff] %vm1120_vm7, %v1054_v15  ;;  %1183 = vst.msk [vmem:[#allocation4 + $0x200] sm:$0xff] %vm1120_vm7, %v1052_v50  ;;  %v1914_v37 = vsel %vm6217_vm10, %v1690_v21, %v1913_v41  ;;  %v1720_v35 = vor.u32 %v2458_v51, %v1717_v42  ;;  %v2436_v40 = vsel %vm1989_vm8, %v2431_v52, %v6901_v16  ;;  %v2698_v15 = vld [vmem:[#allocation4 + $0x98] sm:$0xff]  ;;  %v2702_v52 = vld [vmem:[#allocation4 + $0xa8] sm:$0xff] }
 0x21a   : > { %1924 = vst.msk [vmem:[#allocation4 + $0x208] sm:$0xff] %vm548_vm0, %v1728_v11  ;;  %2570 = vrot.lane.b32.xlu1 %v2376_v44, %s5686_s30  ;;  %2566 = vrot.lane.b32.xlu0 %v2361_v48, %s5686_s30  ;;  %1915 = vst [vmem:[#allocation4 + $0x1e0] sm:$0xff] %v1914_v37  ;;  %v592_v62 = vld [vmem:[#allocation4] sm:$0x1]  ;;  %v697_v14 = vld [vmem:[#allocation4 + $0x8] sm:$0x80]  ;;  %v2421_v2 = vsel %vm1989_vm8, %v2416_v63, %v6923_v30  ;;  %v2461_v47 = vor.u32 %v2460_v36, %v1715_v46 }
 0x21b   : > { %v691_v32 = vld [vmem:[#allocation4 + $0x210] sm:$0x1]  ;;  %v593_v58 = vsel %vm5872_vm5, 0, %v592_v62  ;;  %v698_v0 = vsel %vm5885_vm6, 0, %v697_v14  ;;  %v796_v31 = vld [vmem:[#allocation4 + $0x218] sm:$0x80]  ;;  %v2446_v1 = vor.u32 %v2445_v60, %v1700_v43 }
 0x21c   : > { %v692_v38 = vsel %vm5872_vm5, 0, %v691_v32  ;;  %v2473_v56 = vpop.permute.xlu1 %2472  ;;  %v2471_v49 = vpop.permute.xlu0 %2470  ;;  %v1917_v17 = vld [vmem:[#allocation4 + $0x1f0] sm:$0xff]  ;;  %594 = vst [vmem:[#allocation4] sm:$0x1] %v593_v58  ;;  %699 = vst [vmem:[#allocation4 + $0x8] sm:$0x80] %v698_v0  ;;  %v2466_v39 = vsel %vm1989_vm8, %v2461_v47, %v6939_v22 }
 0x21d   : > { %693 = vst [vmem:[#allocation4 + $0x210] sm:$0x1] %v692_v38  ;;  %v797_v10 = vsel %vm5885_vm6, 0, %v796_v31  ;;  %v2667_v19 = vsel %vm7122_vm13, %v2473_v56, %v2666_v12  ;;  %2663 = vst.msk [vmem:[#allocation4 + $0x10] sm:$0xff] %vm2662_vm12, %v2471_v49  ;;  %v1918_v57 = vsel %vm6217_vm10, %v1705_v53, %v1917_v17  ;;  %v2674_v30 = vld [vmem:[#allocation4 + $0x38] sm:$0xff]  ;;  %v2451_v43 = vsel %vm1989_vm8, %v2446_v1, %v6960_v7  ;;  %v2694_v11 = vld [vmem:[#allocation4 + $0x88] sm:$0xff] }
 0x21e   : > { %798 = vst [vmem:[#allocation4 + $0x218] sm:$0x80] %v797_v10  ;;  %2668 = vst [vmem:[#allocation4 + $0x18] sm:$0xff] %v2667_v19  ;;  %2578 = vrot.lane.b32.xlu1 %v2406_v23, %s5686_s30  ;;  %2574 = vrot.lane.b32.xlu0 %v2391_v9, %s5686_s30  ;;  %v2682_v7 = vld [vmem:[#allocation4 + $0x58] sm:$0xff]  ;;  %v2710_v32 = vld [vmem:[#allocation4 + $0xc8] sm:$0xff] }
 0x21f   : > { %1919 = vst [vmem:[#allocation4 + $0x1f0] sm:$0xff] %v1918_v57  ;;  %v2706_v23 = vld [vmem:[#allocation4 + $0xb8] sm:$0xff]  ;;  %v2718_v49 = vld [vmem:[#allocation4 + $0xe8] sm:$0xff] }
 0x220   : > { %v2477_v13 = vpop.permute.xlu1 %2476  ;;  %v2475_v24 = vpop.permute.xlu0 %2474  ;;  %v1921_v20 = vld [vmem:[#allocation4 + $0x200] sm:$0xff]  ;;  %v2714_v38 = vld [vmem:[#allocation4 + $0xd8] sm:$0xff] }
 0x221   : > { %v2671_v18 = vsel %vm7122_vm13, %v2477_v13, %v2670_v54  ;;  %2669 = vst.msk [vmem:[#allocation4 + $0x20] sm:$0xff] %vm2662_vm12, %v2475_v24  ;;  %v1922_v16 = vsel %vm6217_vm10, %v1720_v35, %v1921_v20  ;;  %v2722_v35 = vld [vmem:[#allocation4 + $0xf8] sm:$0xff] }
 0x222   : > { %2672 = vst [vmem:[#allocation4 + $0x28] sm:$0xff] %v2671_v18  ;;  %2586 = vrot.lane.b32.xlu1 %v2436_v40, %s5686_s30  ;;  %2582 = vrot.lane.b32.xlu0 %v2421_v2, %s5686_s30  ;;  %1923 = vst [vmem:[#allocation4 + $0x200] sm:$0xff] %v1922_v16  ;;  %v2726_v2 = vld [vmem:[#allocation4 + $0x108] sm:$0xff]  ;;  %v2730_v24 = vld [vmem:[#allocation4 + $0x118] sm:$0xff] }
 0x224   : > { %v2481_v6 = vpop.permute.xlu1 %2480  ;;  %v2479_v46 = vpop.permute.xlu0 %2478 }
 0x225   : > { %v2675_v33 = vsel %vm7122_vm13, %v2481_v6, %v2674_v30  ;;  %2673 = vst.msk [vmem:[#allocation4 + $0x30] sm:$0xff] %vm2662_vm12, %v2479_v46  ;;  %v2734_v30 = vld [vmem:[#allocation4 + $0x128] sm:$0xff] }
 0x226   : > { %2676 = vst [vmem:[#allocation4 + $0x38] sm:$0xff] %v2675_v33  ;;  %2594 = vrot.lane.b32.xlu1 %v2466_v39, %s5686_s30  ;;  %2590 = vrot.lane.b32.xlu0 %v2451_v43, %s5686_s30  ;;  %v2742_v46 = vld [vmem:[#allocation4 + $0x148] sm:$0xff]  ;;  %v2738_v33 = vld [vmem:[#allocation4 + $0x138] sm:$0xff] }
 0x228   : > { %v2485_v45 = vpop.permute.xlu1 %2484  ;;  %v2483_v59 = vpop.permute.xlu0 %2482 }
 0x229   : > { %v2679_v22 = vsel %vm7122_vm13, %v2485_v45, %v2678_v25  ;;  %2677 = vst.msk [vmem:[#allocation4 + $0x40] sm:$0xff] %vm2662_vm12, %v2483_v59 }
 0x22a   : > { %2680 = vst [vmem:[#allocation4 + $0x48] sm:$0xff] %v2679_v22 }
 0x22c   : > { %v2489_v4 = vpop.permute.xlu1 %2488  ;;  %v2487_v42 = vpop.permute.xlu0 %2486 }
 0x22d   : > { %v2683_v3 = vsel %vm7122_vm13, %v2489_v4, %v2682_v7  ;;  %2681 = vst.msk [vmem:[#allocation4 + $0x50] sm:$0xff] %vm2662_vm12, %v2487_v42  ;;  %v2750_v7 = vld [vmem:[#allocation4 + $0x168] sm:$0xff]  ;;  %v2746_v4 = vld [vmem:[#allocation4 + $0x158] sm:$0xff] }
 0x22e   : > { %2684 = vst [vmem:[#allocation4 + $0x58] sm:$0xff] %v2683_v3 }
 0x230   : > { %v2493_v26 = vpop.permute.xlu1 %2492  ;;  %v2491_v21 = vpop.permute.xlu0 %2490 }
 0x231   : > { %v2687_v27 = vsel %vm7122_vm13, %v2493_v26, %v2686_v55  ;;  %2685 = vst.msk [vmem:[#allocation4 + $0x60] sm:$0xff] %vm2662_vm12, %v2491_v21  ;;  %v2758_v21 = vld [vmem:[#allocation4 + $0x188] sm:$0xff] }
 0x232   : > { %2688 = vst [vmem:[#allocation4 + $0x68] sm:$0xff] %v2687_v27  ;;  %v2754_v27 = vld [vmem:[#allocation4 + $0x178] sm:$0xff] }
 0x234   : > { %v2497_v34 = vpop.permute.xlu1 %2496  ;;  %v2495_v29 = vpop.permute.xlu0 %2494 }
 0x235   : > { %v2691_v28 = vsel %vm7122_vm13, %v2497_v34, %v2690_v5  ;;  %2689 = vst.msk [vmem:[#allocation4 + $0x70] sm:$0xff] %vm2662_vm12, %v2495_v29 }
 0x236   : > { %2692 = vst [vmem:[#allocation4 + $0x78] sm:$0xff] %v2691_v28 }
 0x238   : > { %v2501_v44 = vpop.permute.xlu1 %2500  ;;  %v2499_v48 = vpop.permute.xlu0 %2498 }
 0x239   : > { %v2695_v51 = vsel %vm7122_vm13, %v2501_v44, %v2694_v11  ;;  %2693 = vst.msk [vmem:[#allocation4 + $0x80] sm:$0xff] %vm2662_vm12, %v2499_v48  ;;  %v2766_v11 = vld [vmem:[#allocation4 + $0x1a8] sm:$0xff]  ;;  %v2762_v44 = vld [vmem:[#allocation4 + $0x198] sm:$0xff] }
 0x23a   : > { %2696 = vst [vmem:[#allocation4 + $0x88] sm:$0xff] %v2695_v51 }
 0x23c   : > { %v2505_v50 = vpop.permute.xlu1 %2504  ;;  %v2503_v41 = vpop.permute.xlu0 %2502 }
 0x23d   : > { %v2699_v12 = vsel %vm7122_vm13, %v2505_v50, %v2698_v15  ;;  %2697 = vst.msk [vmem:[#allocation4 + $0x90] sm:$0xff] %vm2662_vm12, %v2503_v41  ;;  %v2774_v41 = vld [vmem:[#allocation4 + $0x1c8] sm:$0xff] }
 0x23e   : > { %2700 = vst [vmem:[#allocation4 + $0x98] sm:$0xff] %v2699_v12  ;;  %v2770_v12 = vld [vmem:[#allocation4 + $0x1b8] sm:$0xff] }
 0x240   : > { %v2509_v36 = vpop.permute.xlu1 %2508  ;;  %v2507_v37 = vpop.permute.xlu0 %2506 }
 0x241   : > { %v2703_v53 = vsel %vm7122_vm13, %v2509_v36, %v2702_v52  ;;  %2701 = vst.msk [vmem:[#allocation4 + $0xa0] sm:$0xff] %vm2662_vm12, %v2507_v37 }
 0x242   : > { %2704 = vst [vmem:[#allocation4 + $0xa8] sm:$0xff] %v2703_v53 }
 0x244   : > { %v2513_v9 = vpop.permute.xlu1 %2512  ;;  %v2511_v63 = vpop.permute.xlu0 %2510 }
 0x245   : > { %v2707_v62 = vsel %vm7122_vm13, %v2513_v9, %v2706_v23  ;;  %2705 = vst.msk [vmem:[#allocation4 + $0xb0] sm:$0xff] %vm2662_vm12, %v2511_v63  ;;  %v2782_v23 = vld [vmem:[#allocation4 + $0x1e8] sm:$0xff]  ;;  %v2778_v9 = vld [vmem:[#allocation4 + $0x1d8] sm:$0xff] }
 0x246   : > { %2708 = vst [vmem:[#allocation4 + $0xb8] sm:$0xff] %v2707_v62 }
 0x248   : > { %v2517_v14 = vpop.permute.xlu1 %2516  ;;  %v2515_v60 = vpop.permute.xlu0 %2514 }
 0x249   : > { %v2711_v58 = vsel %vm7122_vm13, %v2517_v14, %v2710_v32  ;;  %2709 = vst.msk [vmem:[#allocation4 + $0xc0] sm:$0xff] %vm2662_vm12, %v2515_v60  ;;  %v2790_v60 = vld [vmem:[#allocation4 + $0x208] sm:$0xff] }
 0x24a   : > { %2712 = vst [vmem:[#allocation4 + $0xc8] sm:$0xff] %v2711_v58  ;;  %v2786_v58 = vld [vmem:[#allocation4 + $0x1f8] sm:$0xff] }
 0x24c   : > { %v2521_v0 = vpop.permute.xlu1 %2520  ;;  %v2519_v31 = vpop.permute.xlu0 %2518 }
 0x24d   : > { %v2715_v56 = vsel %vm7122_vm13, %v2521_v0, %v2714_v38  ;;  %2713 = vst.msk [vmem:[#allocation4 + $0xd0] sm:$0xff] %vm2662_vm12, %v2519_v31 }
 0x24e   : > { %2716 = vst [vmem:[#allocation4 + $0xd8] sm:$0xff] %v2715_v56 }
 0x250   : > { %v2525_v17 = vpop.permute.xlu1 %2524  ;;  %v2523_v10 = vpop.permute.xlu0 %2522 }
 0x251   : > { %v2719_v19 = vsel %vm7122_vm13, %v2525_v17, %v2718_v49  ;;  %2717 = vst.msk [vmem:[#allocation4 + $0xe0] sm:$0xff] %vm2662_vm12, %v2523_v10 }
 0x252   : > { %2720 = vst [vmem:[#allocation4 + $0xe8] sm:$0xff] %v2719_v19 }
 0x254   : > { %v2529_v57 = vpop.permute.xlu1 %2528  ;;  %v2527_v54 = vpop.permute.xlu0 %2526 }
 0x255   : > { %v2723_v40 = vsel %vm7122_vm13, %v2529_v57, %v2722_v35  ;;  %2721 = vst.msk [vmem:[#allocation4 + $0xf0] sm:$0xff] %vm2662_vm12, %v2527_v54 }
 0x256   : > { %2724 = vst [vmem:[#allocation4 + $0xf8] sm:$0xff] %v2723_v40 }
 0x258   : > { %v2533_v47 = vpop.permute.xlu1 %2532  ;;  %v2531_v1 = vpop.permute.xlu0 %2530 }
 0x259   : > { %v2727_v13 = vsel %vm7122_vm13, %v2533_v47, %v2726_v2  ;;  %2725 = vst.msk [vmem:[#allocation4 + $0x100] sm:$0xff] %vm2662_vm12, %v2531_v1 }
 0x25a   : > { %2728 = vst [vmem:[#allocation4 + $0x108] sm:$0xff] %v2727_v13 }
 0x25c   : > { %v2537_v20 = vpop.permute.xlu1 %2536  ;;  %v2535_v18 = vpop.permute.xlu0 %2534 }
 0x25d   : > { %v2731_v16 = vsel %vm7122_vm13, %v2537_v20, %v2730_v24  ;;  %2729 = vst.msk [vmem:[#allocation4 + $0x110] sm:$0xff] %vm2662_vm12, %v2535_v18 }
 0x25e   : > { %2732 = vst [vmem:[#allocation4 + $0x118] sm:$0xff] %v2731_v16 }
 0x260   : > { %v2541_v39 = vpop.permute.xlu1 %2540  ;;  %v2539_v43 = vpop.permute.xlu0 %2538 }
 0x261   : > { %v2735_v6 = vsel %vm7122_vm13, %v2541_v39, %v2734_v30  ;;  %2733 = vst.msk [vmem:[#allocation4 + $0x120] sm:$0xff] %vm2662_vm12, %v2539_v43 }
 0x262   : > { %2736 = vst [vmem:[#allocation4 + $0x128] sm:$0xff] %v2735_v6 }
 0x264   : > { %v2549_v25 = vpop.permute.xlu1 %2548  ;;  %v2545_v45 = vpop.permute.xlu0 %2544 }
 0x265   : > { %v2743_v59 = vsel %vm7122_vm13, %v2549_v25, %v2742_v46  ;;  %v2739_v22 = vsel %vm7122_vm13, %v2545_v45, %v2738_v33 }
 0x266   : > { %2744 = vst [vmem:[#allocation4 + $0x148] sm:$0xff] %v2743_v59  ;;  %2740 = vst [vmem:[#allocation4 + $0x138] sm:$0xff] %v2739_v22 }
 0x268   : > { %v2557_v42 = vpop.permute.xlu1 %2556  ;;  %v2553_v3 = vpop.permute.xlu0 %2552 }
 0x269   : > { %v2751_v55 = vsel %vm7122_vm13, %v2557_v42, %v2750_v7  ;;  %v2747_v26 = vsel %vm7122_vm13, %v2553_v3, %v2746_v4 }
 0x26a   : > { %2752 = vst [vmem:[#allocation4 + $0x168] sm:$0xff] %v2751_v55  ;;  %2748 = vst [vmem:[#allocation4 + $0x158] sm:$0xff] %v2747_v26 }
 0x26c   : > { %v2565_v5 = vpop.permute.xlu1 %2564  ;;  %v2561_v34 = vpop.permute.xlu0 %2560 }
 0x26d   : > { %v2759_v29 = vsel %vm7122_vm13, %v2565_v5, %v2758_v21  ;;  %v2755_v28 = vsel %vm7122_vm13, %v2561_v34, %v2754_v27 }
 0x26e   : > { %2760 = vst [vmem:[#allocation4 + $0x188] sm:$0xff] %v2759_v29  ;;  %2756 = vst [vmem:[#allocation4 + $0x178] sm:$0xff] %v2755_v28 }
 0x270   : > { %v2573_v48 = vpop.permute.xlu1 %2572  ;;  %v2569_v51 = vpop.permute.xlu0 %2568 }
 0x271   : > { %v2767_v15 = vsel %vm7122_vm13, %v2573_v48, %v2766_v11  ;;  %v2763_v50 = vsel %vm7122_vm13, %v2569_v51, %v2762_v44 }
 0x272   : > { %2768 = vst [vmem:[#allocation4 + $0x1a8] sm:$0xff] %v2767_v15  ;;  %2764 = vst [vmem:[#allocation4 + $0x198] sm:$0xff] %v2763_v50 }
 0x274   : > { %v2581_v52 = vpop.permute.xlu1 %2580  ;;  %v2577_v36 = vpop.permute.xlu0 %2576 }
 0x275   : > { %v2775_v37 = vsel %vm7122_vm13, %v2581_v52, %v2774_v41  ;;  %v2771_v53 = vsel %vm7122_vm13, %v2577_v36, %v2770_v12 }
 0x276   : > { %2776 = vst [vmem:[#allocation4 + $0x1c8] sm:$0xff] %v2775_v37  ;;  %2772 = vst [vmem:[#allocation4 + $0x1b8] sm:$0xff] %v2771_v53 }
 0x278   : > { %v2589_v63 = vpop.permute.xlu1 %2588  ;;  %v2585_v62 = vpop.permute.xlu0 %2584 }
 0x279   : > { %v2783_v32 = vsel %vm7122_vm13, %v2589_v63, %v2782_v23  ;;  %v2779_v14 = vsel %vm7122_vm13, %v2585_v62, %v2778_v9 }
 0x27a   : > { %2784 = vst [vmem:[#allocation4 + $0x1e8] sm:$0xff] %v2783_v32  ;;  %2780 = vst [vmem:[#allocation4 + $0x1d8] sm:$0xff] %v2779_v14 }
 0x27c   : > { %v2597_v38 = vpop.permute.xlu1 %2596  ;;  %v2593_v0 = vpop.permute.xlu0 %2592 }
 0x27d   : > { %v2791_v31 = vsel %vm7122_vm13, %v2597_v38, %v2790_v60  ;;  %v2787_v56 = vsel %vm7122_vm13, %v2593_v0, %v2786_v58 }
 0x27e   : > { %2792 = vst [vmem:[#allocation4 + $0x208] sm:$0xff] %v2791_v31  ;;  %2788 = vst [vmem:[#allocation4 + $0x1f8] sm:$0xff] %v2787_v56 }
 0x280   : > { %v2547_v49 = vpop.permute.xlu1 %2546  ;;  %v2543_v17 = vpop.permute.xlu0 %2542 }
 0x281   : > { %2741 = vst.msk [vmem:[#allocation4 + $0x140] sm:$0xff] %vm2662_vm12, %v2547_v49  ;;  %2737 = vst.msk [vmem:[#allocation4 + $0x130] sm:$0xff] %vm2662_vm12, %v2543_v17 }
 0x284   : > { %v2555_v10 = vpop.permute.xlu1 %2554  ;;  %v2551_v19 = vpop.permute.xlu0 %2550 }
 0x285   : > { %2749 = vst.msk [vmem:[#allocation4 + $0x160] sm:$0xff] %vm2662_vm12, %v2555_v10  ;;  %2745 = vst.msk [vmem:[#allocation4 + $0x150] sm:$0xff] %vm2662_vm12, %v2551_v19 }
 0x288   : > { %v2563_v35 = vpop.permute.xlu1 %2562  ;;  %v2559_v57 = vpop.permute.xlu0 %2558 }
 0x289   : > { %2757 = vst.msk [vmem:[#allocation4 + $0x180] sm:$0xff] %vm2662_vm12, %v2563_v35  ;;  %2753 = vst.msk [vmem:[#allocation4 + $0x170] sm:$0xff] %vm2662_vm12, %v2559_v57 }
 0x28c   : > { %v2571_v8 = vpop.permute.xlu1 %2570  ;;  %v2567_v54 = vpop.permute.xlu0 %2566 }
 0x28d   : > { %2765 = vst.msk [vmem:[#allocation4 + $0x1a0] sm:$0xff] %vm2662_vm12, %v2571_v8  ;;  %2761 = vst.msk [vmem:[#allocation4 + $0x190] sm:$0xff] %vm2662_vm12, %v2567_v54 }
 0x290   : > { %v2579_v40 = vpop.permute.xlu1 %2578  ;;  %v2575_v2 = vpop.permute.xlu0 %2574 }
 0x291   : > { %2773 = vst.msk [vmem:[#allocation4 + $0x1c0] sm:$0xff] %vm2662_vm12, %v2579_v40  ;;  %2769 = vst.msk [vmem:[#allocation4 + $0x1b0] sm:$0xff] %vm2662_vm12, %v2575_v2 }
 0x294   : > { %v2587_v47 = vpop.permute.xlu1 %2586  ;;  %v2583_v1 = vpop.permute.xlu0 %2582 }
 0x295   : > { %2781 = vst.msk [vmem:[#allocation4 + $0x1e0] sm:$0xff] %vm2662_vm12, %v2587_v47  ;;  %2777 = vst.msk [vmem:[#allocation4 + $0x1d0] sm:$0xff] %vm2662_vm12, %v2583_v1 }
 0x298   : > { %v2595_v13 = vpop.permute.xlu1 %2594  ;;  %v2591_v24 = vpop.permute.xlu0 %2590 }
 0x299   : > { %2789 = vst.msk [vmem:[#allocation4 + $0x200] sm:$0xff] %vm2662_vm12, %v2595_v13  ;;  %2785 = vst.msk [vmem:[#allocation4 + $0x1f0] sm:$0xff] %vm2662_vm12, %v2591_v24 }
 0x29a LB: >> { %v5599_v20 = vld [vmem:[%s8186_s3 + $0x30] sm:$0xff]   ;;  %v5600_v18 = vld [vmem:[%s8186_s3] sm:$0xff]   ;;  %v5601_v16 = vld [vmem:[%s8186_s3 + $0x38] sm:$0xff]   ;;  %s5274_s8 = sshll.u32 %s5679_s11, 6  ;;  %vm3410_vm14 = vcmask 523264   ;;  %s5679_s11 = sphi %s7266_s11, %s2798_s11  }
 0x29b   : >> { %5375 = vmatprep.subr.bf16.mxu1 %v5599_v20  ;;  %5403 = vmatprep.subr.bf16.mxu0 %v5600_v18  ;;  %v5602_v30 = vld [vmem:[%s8186_s3 + $0x8] sm:$0xff]   ;;  %v5603_v39 = vld [vmem:[%s8186_s3 + $0x40] sm:$0xff]   ;;  %v5604_v43 = vld [vmem:[%s8186_s3 + $0x10] sm:$0xff]   ;;  %s7301_s17 = scalar_lea.vmem [#allocation4], %s5274_s8  ;;  %s3409_s20 = scalar_lea.vmem [#allocation5], %s5274_s8 }
 0x29c   : >> { %5376 = vmatpush3.bf16.msra.mxu1 %v5599_v20  ;;  %5404 = vmatpush3.bf16.msra.mxu0 %v5600_v18  ;;  %v5605_v6 = vld [vmem:[%s8186_s3 + $0x48] sm:$0xff]   ;;  %v5606_v46 = vld [vmem:[%s8186_s3 + $0x18] sm:$0xff]   ;;  %v5607_v33 = vld [vmem:[%s8186_s3 + $0x50] sm:$0xff]   ;;  %s5278_s8 = sshll.u32 %s5679_s11, 4  ;;  %s2798_s11 = sadd.s32 1, %s5679_s11  }
 0x29d   : >> { %5377 = vmatprep.subr.bf16.mxu1 %v5601_v16  ;;  %5405 = vmatprep.subr.bf16.mxu0 %v5602_v30  ;;  %v5608_v59 = vld [vmem:[%s8186_s3 + $0x20] sm:$0xff]   ;;  %v5609_v22 = vld [vmem:[%s8186_s3 + $0x58] sm:$0xff]   ;;  %v5610_v7 = vld [vmem:[%s8186_s3 + $0x28] sm:$0xff]   ;;  %s3441_s21 = scalar_lea.vmem [#allocation6], %s5278_s8  ;;  %p2795_p5 = scmp.ge.s32.totalorder %s2798_s11, 8  }
 0x29e   : >> { %v5611_v4 = vld [vmem:[%s8186_s3 + $0x60] sm:$0xff]   ;;  %v5612_v55 = vld [vmem:[%s8186_s3 + $0x68] sm:$0xff]   ;;  %v5613_v21 = vld [vmem:[%s8186_s3 + $0x70] sm:$0xff]   ;;  %3444 = vst [vmem:[#allocation7] sm:$0xff] (%p2795_p5), %v5687_v61  ;;  %vm3450_vm15 = vcmask (%p2795_p5), 516096   ;;  %vm3506_vm1 = vcmask (%p2795_p5), 523271  }
 0x29f   : >> { %v5614_v34 = vld [vmem:[%s8186_s3 + $0x78] sm:$0xff]   ;;  %v5615_v29 = vld [vmem:[%s8186_s3 + $0x80] sm:$0xff]   ;;  %v5616_v44 = vld [vmem:[%s8186_s3 + $0x88] sm:$0xff]   ;;  %3448 = vst [vmem:[#allocation7 + $0x110] sm:$0xff] (%p2795_p5), %v5687_v61 }
 0x2a0   : >> { %5378 = vmatpush3.bf16.msra.mxu1 %v5601_v16  ;;  %5406 = vmatpush3.bf16.msra.mxu0 %v5602_v30  ;;  %v5013_v25 = vld [vmem:[%s7301_s17 + $0x10] sm:$0xff]  ;;  %v2803_v45 = vld [vmem:[%s7301_s17] sm:$0xff]  ;;  %v5014_v42 = vld [vmem:[%s7301_s17 + $0x18] sm:$0xff]  ;;  %3446 = vst.msk [vmem:[#allocation7 + $0x8] sm:$0xff] (%p2795_p5), %vm3410_vm14, %v5687_v61 }
 0x2a1   : >> { %5379 = vmatprep.subr.bf16.mxu1 %v5603_v39  ;;  %5407 = vmatprep.subr.bf16.mxu0 %v5604_v43  ;;  %v2804_v3 = vld [vmem:[%s7301_s17 + $0x8] sm:$0xff]  ;;  %v5015_v26 = vld [vmem:[%s7301_s17 + $0x20] sm:$0xff]  ;;  %v5017_v5 = vld [vmem:[%s7301_s17 + $0x30] sm:$0xff]  ;;  %3449 = vst.msk [vmem:[#allocation7 + $0x118] sm:$0xff] (%p2795_p5), %vm3410_vm14, %v5687_v61 }
 0x2a2   : >> { %5387 = vmatprep.mubr.msk.bf16.mxu1 %vm583_vm11, %v5013_v25  ;;  %5415 = vmatprep.mubr.msk.bf16.mxu0 %vm583_vm11, %v2803_v45  ;;  %v5016_v27 = vld [vmem:[%s7301_s17 + $0x28] sm:$0xff]  ;;  %v5018_v28 = vld [vmem:[%s7301_s17 + $0x38] sm:$0xff]  ;;  %v5019_v11 = vld [vmem:[%s7301_s17 + $0x40] sm:$0xff] }
 0x2a3   : >> { %v5020_v48 = vld [vmem:[%s7301_s17 + $0x48] sm:$0xff]  ;;  %v5069_v51 = vld [vmem:[%s7301_s17 + $0x50] sm:$0xff]  ;;  %v5070_v15 = vld [vmem:[%s7301_s17 + $0x58] sm:$0xff] }
 0x2a4   : >> { %5380 = vmatpush3.bf16.msra.mxu1 %v5603_v39  ;;  %5408 = vmatpush3.bf16.msra.mxu0 %v5604_v43  ;;  %v5097_v18 = vld [vmem:[%s8187_s4] ss:$0 sm:$0xff]  ;;  %vm7453_vm0 = vmand (%p2795_p5), %vm3450_vm15, %vm590_vm2 }
 0x2a5   : >> { %5381 = vmatprep.subr.bf16.mxu1 %v5605_v6  ;;  %5409 = vmatprep.subr.bf16.mxu0 %v5606_v46  ;;  %vm7622_vm2 = vmand (%p2795_p5), %vm3506_vm1, %vm695_vm4  ;;  %vm3643_vm4 = vcmask (%p2795_p5), 1048064  }
 0x2a6   : > { %vm7712_vm3 = vmand (%p2795_p5), %vm3410_vm14, %vm1989_vm8 }
 0x2a7   : > { %vm7786_vm5 = vmand (%p2795_p5), %vm3410_vm14, %vm1794_vm9 }
 0x2a8   : >> { %5382 = vmatpush3.bf16.msra.mxu1 %v5605_v6  ;;  %5410 = vmatpush3.bf16.msra.mxu0 %v5606_v46 }
 0x2a9   : >> { %5383 = vmatprep.subr.bf16.mxu1 %v5607_v33  ;;  %5411 = vmatprep.subr.bf16.mxu0 %v5608_v59 }
 0x2ac   : >> { %5384 = vmatpush3.bf16.msra.mxu1 %v5607_v33  ;;  %5412 = vmatpush3.bf16.msra.mxu0 %v5608_v59 }
 0x2ad   : >> { %5385 = vmatprep.subr.bf16.mxu1 %v5609_v22  ;;  %5413 = vmatprep.subr.bf16.mxu0 %v5610_v7 }
 0x2b0   : >> { %5386 = vmatpush3.bf16.msra.mxu1 %v5609_v22  ;;  %5414 = vmatpush3.bf16.msra.mxu0 %v5610_v7 }
 0x2b1   : >> { %5475 = vmatprep.subr.bf16.mxu1 %v5611_v4  ;;  %5431 = vmatprep.subr.bf16.mxu0 %v5611_v4 }
 0x2b3   : >> { %5388 = vmatmul.mubr.msk.bf16.vlgmr.msra.gmra.mrb[0].mxu1 %vm583_vm11, %v5014_v42  ;;  %5416 = vmatmul.mubr.msk.bf16.vlgmr.msra.gmra.mrb[0].mxu0 %vm583_vm11, %v2804_v3 }
 0x2b4   : >> { %5481 = vmatpush3.bf16.msra.mxu1 %v5611_v4  ;;  %5432 = vmatpush3.bf16.msra.mxu0 %v5611_v4 }
 0x2b5   : >> { %5476 = vmatprep.subr.bf16.mxu1 %v5612_v55  ;;  %5433 = vmatprep.subr.bf16.mxu0 %v5612_v55 }
 0x2b6   : >> { %5391 = vmatprep.mubr.msk.bf16.mxu1 %vm583_vm11, %v5015_v26  ;;  %5419 = vmatprep.mubr.msk.bf16.mxu0 %vm583_vm11, %v5013_v25 }
 0x2b8   : >> { %5482 = vmatpush3.bf16.msra.mxu1 %v5612_v55  ;;  %5434 = vmatpush3.bf16.msra.mxu0 %v5612_v55 }
 0x2b9   : >> { %5477 = vmatprep.subr.bf16.mxu1 %v5613_v21  ;;  %5435 = vmatprep.subr.bf16.mxu0 %v5613_v21 }
 0x2bb   : >> { %5392 = vmatmul.mubr.msk.bf16.gmra.mrb[4].mxu1 %vm583_vm11, %v5016_v27  ;;  %5420 = vmatmul.mubr.msk.bf16.gmra.mrb[4].mxu0 %vm583_vm11, %v5014_v42 }
 0x2bc   : >> { %5483 = vmatpush3.bf16.msra.mxu1 %v5613_v21  ;;  %5436 = vmatpush3.bf16.msra.mxu0 %v5613_v21 }
 0x2bd   : >> { %5395 = vmatprep.mubr.msk.bf16.mxu1 %vm583_vm11, %v5017_v5  ;;  %5423 = vmatprep.mubr.msk.bf16.mxu0 %vm583_vm11, %v5015_v26 }
 0x2be   : >> { %5437 = vmatprep.subr.bf16.mxu0 %v5614_v34  ;;  %5478 = vmatprep.subr.bf16.mxu1 %v5614_v34 }
 0x2c0   : >> { %5484 = vmatpush3.bf16.msra.mxu1 %v5614_v34  ;;  %5438 = vmatpush3.bf16.msra.mxu0 %v5614_v34 }
 0x2c1   : >> { %5479 = vmatprep.subr.bf16.mxu1 %v5615_v29  ;;  %5439 = vmatprep.subr.bf16.mxu0 %v5615_v29 }
 0x2c3   : >> { %5396 = vmatmul.mubr.msk.bf16.gmra.mrb[8].mxu1 %vm583_vm11, %v5018_v28  ;;  %5424 = vmatmul.mubr.msk.bf16.gmra.mrb[8].mxu0 %vm583_vm11, %v5016_v27 }
 0x2c4   : >> { %5399 = vmatprep.mubr.msk.bf16.mxu1 %vm583_vm11, %v5019_v11  ;;  %5427 = vmatprep.mubr.msk.bf16.mxu0 %vm583_vm11, %v5017_v5 }
 0x2c5   : >> { %5440 = vmatpush3.bf16.msra.mxu0 %v5615_v29  ;;  %5485 = vmatpush3.bf16.msra.mxu1 %v5615_v29 }
 0x2c6   : >> { %5441 = vmatprep.subr.bf16.mxu0 %v5616_v44  ;;  %5480 = vmatprep.subr.bf16.mxu1 %v5616_v44 }
 0x2c9   : >> { %5442 = vmatpush3.bf16.msra.mxu0 %v5616_v44  ;;  %5486 = vmatpush3.bf16.msra.mxu1 %v5616_v44 }
 0x2cb   : >> { %5400 = vmatmul.mubr.msk.bf16.gmra.mrb[12].mxu1 %vm583_vm11, %v5020_v48  ;;  %5428 = vmatmul.mubr.msk.bf16.gmra.mrb[12].mxu0 %vm583_vm11, %v5018_v28 }
 0x2cc   : >> { %5451 = vmatprep.mubr.msk.bf16.mxu1 %vm583_vm11, %v5019_v11  ;;  %5443 = vmatprep.mubr.msk.bf16.mxu0 %vm583_vm11, %v5015_v26 }
 0x2d3   : >> { %5452 = vmatmul.mubr.msk.bf16.vlgmr.msra.gmra.mrb[16].mxu1 %vm583_vm11, %v5020_v48  ;;  %5444 = vmatmul.mubr.msk.bf16.vlgmr.msra.gmra.mrb[0].mxu0 %vm583_vm11, %v5016_v27 }
 0x2d4   : >> { %5455 = vmatprep.mubr.msk.bf16.mxu1 %vm583_vm11, %v5069_v51  ;;  %5447 = vmatprep.mubr.msk.bf16.mxu0 %vm583_vm11, %v5017_v5 }
 0x2db   : >> { %5456 = vmatmul.mubr.msk.bf16.gmra.mrb[20].mxu1 %vm583_vm11, %v5070_v15  ;;  %5448 = vmatmul.mubr.msk.bf16.gmra.mrb[4].mxu0 %vm583_vm11, %v5018_v28 }
 0x386   : >> { %v5389_v50 = vpop.f32.mrb[0].mxu1 }
 0x387   : >> { %v2942_v41 = vpop.f32.mrb[1].mxu1 }
 0x388   : >> { %v5390_v12 = vpop.f32.mrb[2].mxu1 }
 0x389   : >> { %v2945_v52 = vpop.f32.mrb[3].mxu1 }
 0x38e   : >> { %v7366_v36 = vpop.f32.mrb[4].mxu1 }
 0x38f   : >> { %v7368_v37 = vpop.f32.mrb[5].mxu1 }
 0x390   : >> { %v7370_v53 = vpop.f32.mrb[6].mxu1 }
 0x391   : >> { %v7372_v23 = vpop.f32.mrb[7].mxu1 }
 0x396   : >> { %v5397_v9 = vpop.f32.mrb[8].mxu1  ;;  %v5425_v63 = vpop.f32.mrb[8].mxu0 }
 0x397   : >> { %v2974_v62 = vpop.f32.mrb[9].mxu1  ;;  %v3140_v32 = vadd.f32 %v5425_v63, %v5397_v9  ;;  %v3131_v14 = vpop.f32.mrb[9].mxu0 }
 0x398   : >> { %v5398_v60 = vpop.f32.mrb[10].mxu1  ;;  %v3132_v58 = vadd.f32 %v3131_v14, %v2974_v62  ;;  %v5426_v38 = vpop.f32.mrb[10].mxu0 }
 0x399   : >> { %v2977_v0 = vpop.f32.mrb[11].mxu1  ;;  %v3143_v31 = vadd.f32 %v5426_v38, %v5398_v60  ;;  %v3134_v56 = vpop.f32.mrb[11].mxu0 }
 0x39a   : >> { %v3135_v49 = vadd.f32 %v3134_v56, %v2977_v0 }
 0x39e   : >> { %v5401_v17 = vpop.f32.mrb[12].mxu1  ;;  %v5429_v10 = vpop.f32.mrb[12].mxu0 }
 0x39f   : >> { %v2990_v19 = vpop.f32.mrb[13].mxu1  ;;  %v3156_v35 = vadd.f32 %v5429_v10, %v5401_v17  ;;  %v3147_v57 = vpop.f32.mrb[13].mxu0 }
 0x3a0   : >> { %v5402_v8 = vpop.f32.mrb[14].mxu1  ;;  %v3148_v54 = vadd.f32 %v3147_v57, %v2990_v19  ;;  %v5430_v40 = vpop.f32.mrb[14].mxu0 }
 0x3a1   : >> { %v2993_v2 = vpop.f32.mrb[15].mxu1  ;;  %v3159_v47 = vadd.f32 %v5430_v40, %v5402_v8  ;;  %v3150_v1 = vpop.f32.mrb[15].mxu0 }
 0x3a2   : >> { %v3151_v13 = vadd.f32 %v3150_v1, %v2993_v2 }
 0x3a6   : >> { %v5453_v24 = vpop.f32.mrb[16].mxu1  ;;  %v5445_v20 = vpop.f32.mrb[0].mxu0 }
 0x3a7   : >> { %v3354_v16 = vadd.f32 %v5453_v24, %v3140_v32  ;;  %v3313_v30 = vpop.f32.mrb[17].mxu1  ;;  %v5487_v39 = vadd.f32 %v5445_v20, %v5389_v50  ;;  %v3281_v43 = vpop.f32.mrb[1].mxu0 }
 0x3a8   : >> { %v3352_v6 = vadd.f32 %v3313_v30, %v3132_v58  ;;  %v5454_v46 = vpop.f32.mrb[18].mxu1  ;;  %v5488_v33 = vadd.f32 %v3281_v43, %v2942_v41  ;;  %v5446_v25 = vpop.f32.mrb[2].mxu0 }
 0x3a9   : >> { %v3355_v45 = vadd.f32 %v5454_v46, %v3143_v31  ;;  %v3316_v59 = vpop.f32.mrb[19].mxu1  ;;  %v3369_v22 = vadd.f32 %v5487_v39, %v5097_v18  ;;  %v3377_v7 = vadd.f32 %v5097_v18, %v3354_v16  ;;  %v5489_v4 = vadd.f32 %v5446_v25, %v5390_v12  ;;  %v3284_v42 = vpop.f32.mrb[3].mxu0 }
 0x3aa   : >> { %v3353_v3 = vadd.f32 %v3316_v59, %v3135_v49  ;;  %v3367_v55 = vadd.f32 %v5488_v33, %v5097_v18  ;;  %v3375_v26 = vadd.f32 %v5097_v18, %v3352_v6  ;;  %v5490_v27 = vadd.f32 %v3284_v42, %v2945_v52 }
 0x3ab   : >> { %v3378_v21 = vadd.f32 %v5097_v18, %v3355_v45  ;;  %v3370_v5 = vadd.f32 %v5489_v4, %v5097_v18  ;;  %v3385_v29 = vmax.f32 %v3369_v22, 0.0  ;;  %v3393_v28 = vmax.f32 %v3377_v7, 0.0 }
 0x3ac   : >> { %v3376_v34 = vadd.f32 %v5097_v18, %v3353_v3  ;;  %v3383_v44 = vmax.f32 %v3367_v55, 0.0  ;;  %v3391_v48 = vmax.f32 %v3375_v26, 0.0  ;;  %v3368_v12 = vadd.f32 %v5490_v27, %v5097_v18 }
 0x3ad   : >> { %v3394_v51 = vmax.f32 %v3378_v21, 0.0  ;;  %v3386_v9 = vmax.f32 %v3370_v5, 0.0 }
 0x3ae   : >> { %v5457_v11 = vpop.f32.mrb[20].mxu1  ;;  %v5449_v15 = vpop.f32.mrb[4].mxu0  ;;  %v3392_v52 = vmax.f32 %v3376_v34, 0.0  ;;  %v3384_v43 = vmax.f32 %v3368_v12, 0.0 }
 0x3af   : >> { %v3358_v50 = vadd.f32 %v5457_v11, %v3156_v35  ;;  %v3329_v41 = vpop.f32.mrb[21].mxu1  ;;  %v5491_v63 = vadd.f32 %v5449_v15, %v7366_v36  ;;  %v3297_v62 = vpop.f32.mrb[5].mxu0 }
 0x3b0   : >> { %v3356_v32 = vadd.f32 %v3329_v41, %v3148_v54  ;;  %v5458_v14 = vpop.f32.mrb[22].mxu1  ;;  %v5492_v58 = vadd.f32 %v3297_v62, %v7368_v37  ;;  %v5450_v38 = vpop.f32.mrb[6].mxu0 }
 0x3b1   : >> { %v3381_v60 = vadd.f32 %v5097_v18, %v3358_v50  ;;  %v3359_v0 = vadd.f32 %v5458_v14, %v3159_v47  ;;  %v3332_v31 = vpop.f32.mrb[23].mxu1  ;;  %v3373_v56 = vadd.f32 %v5491_v63, %v5097_v18  ;;  %v5493_v17 = vadd.f32 %v5450_v38, %v7370_v53  ;;  %v3300_v10 = vpop.f32.mrb[7].mxu0  ;;  %v3461_v38 = vld [vmem:[#allocation7 + $0x30] sm:$0x1] (%p2795_p5) }
 0x3b2   : >> { %v3379_v49 = vadd.f32 %v5097_v18, %v3356_v32  ;;  %v3357_v19 = vadd.f32 %v3332_v31, %v3151_v13  ;;  %v3371_v57 = vadd.f32 %v5492_v58, %v5097_v18  ;;  %v5494_v8 = vadd.f32 %v3300_v10, %v7372_v23  ;;  %v3455_v10 = vld [vmem:[#allocation7 + $0x10] sm:$0x1] (%p2795_p5) }
 0x3b3   : >> { %v3397_v35 = vmax.f32 %v3381_v60, 0.0  ;;  %v3382_v36 = vadd.f32 %v5097_v18, %v3359_v0  ;;  %v3389_v54 = vmax.f32 %v3373_v56, 0.0  ;;  %v3374_v2 = vadd.f32 %v5493_v17, %v5097_v18 }
 0x3b4   : >> { %v3395_v40 = vmax.f32 %v3379_v49, 0.0  ;;  %v3380_v1 = vadd.f32 %v5097_v18, %v3357_v19  ;;  %v3387_v24 = vmax.f32 %v3371_v57, 0.0  ;;  %v3372_v20 = vadd.f32 %v5494_v8, %v5097_v18  ;;  %v3452_v8 = vld [vmem:[#allocation7] sm:$0x1] (%p2795_p5) }
 0x3b5   : >> { %v3405_v37 = vmax.f32 %v3393_v28, %v3397_v35  ;;  %v3398_v47 = vmax.f32 %v3382_v36, 0.0  ;;  %v3401_v16 = vmax.f32 %v3385_v29, %v3389_v54  ;;  %v3390_v39 = vmax.f32 %v3374_v2, 0.0  ;;  %v3464_v35 = vld [vmem:[#allocation7 + $0x40] sm:$0x1] (%p2795_p5) }
 0x3b6   : >> { %v3403_v30 = vmax.f32 %v3391_v48, %v3395_v40  ;;  %v3396_v53 = vmax.f32 %v3380_v1, 0.0  ;;  %v3399_v13 = vmax.f32 %v3383_v44, %v3387_v24  ;;  %v3388_v6 = vmax.f32 %v3372_v20, 0.0  ;;  %v3503_v40 = vld [vmem:[#allocation7 + $0x110] sm:$0x1] (%p2795_p5) }
 0x3b7   : >> { %3417 = vst.msk [vmem:[%s3409_s20 + $0x30] sm:$0xff] %vm3410_vm14, %v3405_v37  ;;  %v3406_v23 = vmax.f32 %v3394_v51, %v3398_v47  ;;  %3413 = vst.msk [vmem:[%s3409_s20 + $0x10] sm:$0xff] %vm3410_vm14, %v3401_v16  ;;  %v3402_v46 = vmax.f32 %v3386_v9, %v3390_v39  ;;  %v3462_v54 = vsel (%p2795_p5), %vm7453_vm0, 0, %v3461_v38  ;;  %v3456_v2 = vsel (%p2795_p5), %vm7453_vm0, 0, %v3455_v10  ;;  %v3458_v16 = vld [vmem:[#allocation7 + $0x20] sm:$0x1] (%p2795_p5) }
 0x3b8   : >> { %3415 = vst.msk [vmem:[%s3409_s20 + $0x20] sm:$0xff] %vm3410_vm14, %v3403_v30  ;;  %v3404_v33 = vmax.f32 %v3392_v52, %v3396_v53  ;;  %3411 = vst.msk [vmem:[%s3409_s20] sm:$0xff] %vm3410_vm14, %v3399_v13  ;;  %v3400_v18 = vmax.f32 %v3384_v43, %v3388_v6  ;;  %v3453_v24 = vsel (%p2795_p5), %vm7453_vm0, 0, %v3452_v8  ;;  %v3504_v47 = vsel (%p2795_p5), %vm7453_vm0, 0, %v3503_v40  ;;  %v3470_v43 = vld [vmem:[#allocation7 + $0x60] sm:$0x1] (%p2795_p5) }
 0x3b9   : >> { %3418 = vst.msk [vmem:[%s3409_s20 + $0x38] sm:$0xff] %vm3410_vm14, %v3406_v23  ;;  %3414 = vst.msk [vmem:[%s3409_s20 + $0x18] sm:$0xff] %vm3410_vm14, %v3402_v46  ;;  %v3465_v20 = vsel (%p2795_p5), %vm7453_vm0, 0, %v3464_v35  ;;  %v3459_v53 = vsel (%p2795_p5), %vm7453_vm0, 0, %v3458_v16  ;;  %v3471_v46 = vsel (%p2795_p5), %vm7453_vm0, 0, %v3470_v43 }
 0x3ba   : >> { %3416 = vst.msk [vmem:[%s3409_s20 + $0x28] sm:$0xff] %vm3410_vm14, %v3404_v33  ;;  %3412 = vst.msk [vmem:[%s3409_s20 + $0x8] sm:$0xff] %vm3410_vm14, %v3400_v18  ;;  %v3467_v33 = vld [vmem:[#allocation7 + $0x50] sm:$0x1] (%p2795_p5)  ;;  %v3488_v40 = vld [vmem:[#allocation7 + $0xc0] sm:$0x1] (%p2795_p5) }
 0x3bb   : > { %3463 = vst [vmem:[#allocation7 + $0x30] sm:$0x1] (%p2795_p5), %v3462_v54  ;;  %3457 = vst [vmem:[#allocation7 + $0x10] sm:$0x1] (%p2795_p5), %v3456_v2  ;;  %v3485_v16 = vld [vmem:[#allocation7 + $0xb0] sm:$0x1] (%p2795_p5) }
 0x3bc   : > { %3454 = vst [vmem:[#allocation7] sm:$0x1] (%p2795_p5), %v3453_v24  ;;  %3505 = vst [vmem:[#allocation7 + $0x110] sm:$0x1] (%p2795_p5), %v3504_v47 }
 0x3bd   : > { %3466 = vst [vmem:[#allocation7 + $0x40] sm:$0x1] (%p2795_p5), %v3465_v20  ;;  %3460 = vst [vmem:[#allocation7 + $0x20] sm:$0x1] (%p2795_p5), %v3459_v53  ;;  %v3489_v20 = vsel (%p2795_p5), %vm7453_vm0, 0, %v3488_v40 }
 0x3be   : > { %3472 = vst [vmem:[#allocation7 + $0x60] sm:$0x1] (%p2795_p5), %v3471_v46  ;;  %3490 = vst [vmem:[#allocation7 + $0xc0] sm:$0x1] (%p2795_p5), %v3489_v20 }
 0x3c0   : >> { %v5102_v25 = vld [vmem:[%s3409_s20 + $0x30] ss:$2 sm:$0xff]  ;;  %v5106_v45 = vld [vmem:[%s3409_s20 + $0x31] ss:$2 sm:$0xff] }
 0x3c1   : >> { %v5100_v59 = vld [vmem:[%s3409_s20 + $0x10] ss:$2 sm:$0xff]  ;;  %v5104_v22 = vld [vmem:[%s3409_s20 + $0x11] ss:$2 sm:$0xff]  ;;  %v3437_v7 = vmax.f32 %v5102_v25, %v5106_v45  ;;  %v5101_v4 = vld [vmem:[%s3409_s20 + $0x20] ss:$2 sm:$0xff] }
 0x3c2   : >> { %v3435_v42 = vmax.f32 %v5100_v59, %v5104_v22  ;;  %v3419_v3 = vld [vmem:[%s3409_s20] ss:$2 sm:$0xff]  ;;  %v5103_v55 = vld [vmem:[%s3409_s20 + $0x1] ss:$2 sm:$0xff]  ;;  %2797 = sbr.rel (!%p2795_p5) target bundleno = 666 (0x29a), region = 152  ;;  %v3468_v22 = vsel (%p2795_p5), %vm7453_vm0, 0, %v3467_v33 }
 0x3c3   : >> { %v5105_v26 = vld [vmem:[%s3409_s20 + $0x21] ss:$2 sm:$0xff]  ;;  %v3434_v21 = vmax.f32 %v3419_v3, %v5103_v55  ;;  %v3476_v25 = vld [vmem:[#allocation7 + $0x80] sm:$0x1] (%p2795_p5)  ;;  %3469 = vst [vmem:[#allocation7 + $0x50] sm:$0x1] (%p2795_p5), %v3468_v22 }
 0x3c4   : >> { %v3436_v27 = vmax.f32 %v5101_v4, %v5105_v26  ;;  %v3477_v4 = vsel (%p2795_p5), %vm7453_vm0, 0, %v3476_v25  ;;  %v3494_v33 = vld [vmem:[#allocation7 + $0xe0] sm:$0x1] (%p2795_p5)  ;;  %v3491_v25 = vld [vmem:[#allocation7 + $0xd0] sm:$0x1] (%p2795_p5) }
 0x3c5   : >> { %v3438_v5 = vpack.c.bf16 %v3435_v42, %v3434_v21  ;;  %v3473_v42 = vld [vmem:[#allocation7 + $0x70] sm:$0x1] (%p2795_p5)  ;;  %3478 = vst [vmem:[#allocation7 + $0x80] sm:$0x1] (%p2795_p5), %v3477_v4 }
 0x3c6   : >> { %v3439_v34 = vpack.c.bf16 %v3437_v7, %v3436_v27  ;;  %v3474_v21 = vsel (%p2795_p5), %vm7453_vm0, 0, %v3473_v42  ;;  %v3486_v42 = vsel (%p2795_p5), %vm7453_vm0, 0, %v3485_v16 }
 0x3c7   : >> { %3442 = vst.msk [vmem:[%s3441_s21] sm:$0xff] %vm3410_vm14, %v3438_v5  ;;  %v3482_v5 = vld [vmem:[#allocation7 + $0xa0] sm:$0x1] (%p2795_p5)  ;;  %3475 = vst [vmem:[#allocation7 + $0x70] sm:$0x1] (%p2795_p5), %v3474_v21 }
 0x3c8   : >> { %3443 = vst.msk [vmem:[%s3441_s21 + $0x8] sm:$0xff] %vm3410_vm14, %v3439_v34  ;;  %3487 = vst [vmem:[#allocation7 + $0xb0] sm:$0x1] (%p2795_p5), %v3486_v42  ;;  %v3492_v42 = vsel (%p2795_p5), %vm7453_vm0, 0, %v3491_v25 }
 0x3c9   : > { %3493 = vst [vmem:[#allocation7 + $0xd0] sm:$0x1] %v3492_v42 }
 0x3cf   : > { %v7397_v29 = vld [vmem:[#allocation6 + $0x10] sm:$0xff]  ;;  %v7399_v28 = vld [vmem:[#allocation6] sm:$0xff]  ;;  %v7411_v11 = vld [vmem:[#allocation6 + $0x18] sm:$0xff] }
 0x3d0   : > { %3598 = vrot.lane.b32.xlu1 %v7397_v29, %s5686_s30  ;;  %3594 = vrot.lane.b32.xlu0 %v7399_v28, %s5686_s30  ;;  %v3691_v44 = vshrl.u32 %v7397_v29, 16  ;;  %v3694_v48 = vshll.u32 %v7397_v29, 16  ;;  %v3677_v51 = vshrl.u32 %v7399_v28, 16  ;;  %v7416_v15 = vld [vmem:[#allocation6 + $0x8] sm:$0xff]  ;;  %v3680_v50 = vshll.u32 %v7399_v28, 16  ;;  %v7436_v60 = vld [vmem:[#allocation6 + $0x20] sm:$0xff] }
 0x3d1   : > { %v3698_v61 = vshrl.u32 %v7411_v11, 16  ;;  %v3701_v41 = vshll.u32 %v7411_v11, 16  ;;  %v7421_v9 = vld [vmem:[#allocation6 + $0x28] sm:$0xff]  ;;  %v3684_v62 = vshrl.u32 %v7416_v15, 16  ;;  %v3687_v14 = vshll.u32 %v7416_v15, 16  ;;  %v7449_v49 = vld [vmem:[#allocation6 + $0x38] sm:$0xff] }
 0x3d2   : > { %v3693_v12 = vrot.slane %v3691_v44, 7  ;;  %v3679_v63 = vrot.slane %v3677_v51, 7  ;;  %v3712_v52 = vshrl.u32 %v7421_v9, 16  ;;  %v3715_v56 = vshll.u32 %v7421_v9, 16  ;;  %v7472_v37 = vld [vmem:[#allocation6 + $0x30] sm:$0xff]  ;;  %v7488_v39 = vld [vmem:[#allocation6 + $0x48] sm:$0xff] }
 0x3d3   : > { %v3700_v32 = vrot.slane %v3698_v61, 7  ;;  %v3686_v31 = vrot.slane %v3684_v62, 7  ;;  %v3705_v36 = vshrl.u32 %v7436_v60, 16  ;;  %v3708_v23 = vshll.u32 %v7436_v60, 16  ;;  %v7499_v45 = vld [vmem:[#allocation6 + $0x40] sm:$0xff]  ;;  %v7511_v3 = vld [vmem:[#allocation6 + $0x58] sm:$0xff] }
 0x3d4   : > { %3600 = vrot.lane.b32.xlu1 %v7411_v11, %s5686_s30  ;;  %3596 = vrot.lane.b32.xlu0 %v7416_v15, %s5686_s30  ;;  %v7440_v58 = vor.u32 %v3694_v48, %v3693_v12  ;;  %v7444_v0 = vor.u32 %v3680_v50, %v3679_v63  ;;  %v3714_v57 = vrot.slane %v3712_v52, 7  ;;  %v3726_v6 = vshrl.u32 %v7449_v49, 16  ;;  %v7522_v34 = vld [vmem:[#allocation6 + $0x50] sm:$0xff]  ;;  %v7532_v10 = vld [vmem:[#allocation6 + $0x68] sm:$0xff]  ;;  %v7561_v22 = vld [vmem:[#allocation6 + $0x60] sm:$0xff] }
 0x3d5   : > { %v7459_v19 = vor.u32 %v3701_v41, %v3700_v32  ;;  %v7470_v1 = vor.u32 %v3687_v14, %v3686_v31  ;;  %v3707_v13 = vrot.slane %v3705_v36, 7  ;;  %v3729_v18 = vshll.u32 %v7449_v49, 16  ;;  %v3479_v31 = vld [vmem:[#allocation7 + $0x90] sm:$0x1]  ;;  %v7578_v40 = vld [vmem:[#allocation6 + $0x78] sm:$0xff] }
 0x3d6   : > { %v7482_v30 = vor.u32 %v3715_v56, %v3714_v57  ;;  %v3728_v7 = vrot.slane %v3726_v6, 7  ;;  %v3719_v55 = vshrl.u32 %v7472_v37, 16  ;;  %v3722_v26 = vshll.u32 %v7472_v37, 16 }
 0x3d7   : > { %v7503_v59 = vor.u32 %v3708_v23, %v3707_v13  ;;  %v8216_v27 = vshrl.u32 %v7488_v39, 16  ;;  %v8221_v63 = vshll.u32 %v7488_v39, 16  ;;  %v3483_v32 = vsel %vm7453_vm0, 0, %v3482_v5  ;;  %v3500_v5 = vld [vmem:[#allocation7 + $0x100] sm:$0x1] }
 0x3d8   : > { %3604 = vrot.lane.b32.xlu1 %v7421_v9, %s5686_s30  ;;  %3602 = vrot.lane.b32.xlu0 %v7436_v60, %s5686_s30  ;;  %v7526_v12 = vor.u32 %v3729_v18, %v3728_v7  ;;  %v8223_v38 = vshrl.u32 %v7499_v45, 16  ;;  %v3721_v35 = vrot.slane %v3719_v55, 7  ;;  %3484 = vst [vmem:[#allocation7 + $0xa0] sm:$0x1] %v3483_v32  ;;  %v3736_v8 = vshll.u32 %v7499_v45, 16 }
 0x3d9   : > { %v3742_v57 = vrot.slane %v8216_v27, 7  ;;  %v3480_v54 = vsel %vm7453_vm0, 0, %v3479_v31  ;;  %v8214_v24 = vshrl.u32 %v7511_v3, 16  ;;  %v8219_v47 = vshll.u32 %v7511_v3, 16 }
 0x3da   : > { %v3735_v2 = vrot.slane %v8223_v38, 7  ;;  %3481 = vst [vmem:[#allocation7 + $0x90] sm:$0x1] %v3480_v54  ;;  %v7549_v53 = vor.u32 %v3722_v26, %v3721_v35  ;;  %v8215_v13 = vshrl.u32 %v7522_v34, 16  ;;  %v8220_v46 = vshll.u32 %v7522_v34, 16 }
 0x3db   : > { %v7553_v43 = vor.u32 %v8221_v63, %v3742_v57  ;;  %v3756_v4 = vrot.slane %v8214_v24, 7  ;;  %v8217_v21 = vshrl.u32 %v7532_v10, 16  ;;  %v8222_v31 = vshll.u32 %v7532_v10, 16  ;;  %v3497_v54 = vld [vmem:[#allocation7 + $0xf0] sm:$0x1] }
 0x3dc   : > { %3608 = vrot.lane.b32.xlu1 %v7449_v49, %s5686_s30  ;;  %3606 = vrot.lane.b32.xlu0 %v7472_v37, %s5686_s30  ;;  %v7565_v7 = vor.u32 %v3736_v8, %v3735_v2  ;;  %v3749_v32 = vrot.slane %v8215_v13, 7  ;;  %v3495_v35 = vsel %vm7453_vm0, 0, %v3494_v33  ;;  %v8218_v57 = vshrl.u32 %v7561_v22, 16  ;;  %v3511_v24 = vld [vmem:[#allocation7 + $0x18] sm:$0x80]  ;;  %v7589_v33 = vld [vmem:[#allocation6 + $0x70] sm:$0xff] }
 0x3dd   : > { %v7582_v2 = vor.u32 %v8219_v47, %v3756_v4  ;;  %v3770_v20 = vrot.slane %v8217_v21, 7  ;;  %3496 = vst [vmem:[#allocation7 + $0xe0] sm:$0x1] %v3495_v35  ;;  %v8224_v16 = vshll.u32 %v7561_v22, 16  ;;  %v8225_v27 = vshrl.u32 %v7578_v40, 16 }
 0x3de   : > { %v7593_v13 = vor.u32 %v8220_v46, %v3749_v32  ;;  %v3763_v4 = vrot.slane %v8218_v57, 7  ;;  %v3785_v35 = vshll.u32 %v7578_v40, 16  ;;  %v3514_v21 = vld [vmem:[#allocation7 + $0x28] sm:$0x80]  ;;  %v3501_v32 = vsel %vm7453_vm0, 0, %v3500_v5 }
 0x3df   : > { %v7605_v25 = vor.u32 %v8222_v31, %v3770_v20  ;;  %v8226_v42 = vshrl.u32 %v7589_v33, 16  ;;  %v3778_v57 = vshll.u32 %v7589_v33, 16  ;;  %v3517_v47 = vld [vmem:[#allocation7 + $0x38] sm:$0x80]  ;;  %v3784_v63 = vrot.slane %v8225_v27, 7 }
 0x3e0   : > { %3612 = vrot.lane.b32.xlu1 %v7488_v39, %s5686_s30  ;;  %3610 = vrot.lane.b32.xlu0 %v7499_v45, %s5686_s30  ;;  %v7613_v46 = vor.u32 %v8224_v16, %v3763_v4  ;;  %3502 = vst [vmem:[#allocation7 + $0x100] sm:$0x1] %v3501_v32  ;;  %v3498_v20 = vsel %vm7453_vm0, 0, %v3497_v54  ;;  %v3520_v31 = vld [vmem:[#allocation7 + $0x48] sm:$0x80]  ;;  %v3875_v27 = vrot.slane %v3680_v50, 1 }
 0x3e1   : > { %v3777_v5 = vrot.slane %v8226_v42, 7  ;;  %3499 = vst [vmem:[#allocation7 + $0xf0] sm:$0x1] %v3498_v20  ;;  %v3508_v4 = vld [vmem:[#allocation7 + $0x8] sm:$0x80]  ;;  %v7630_v17 = vor.u32 %v3785_v35, %v3784_v63  ;;  %v3512_v32 = vsel %vm7622_vm2, 0, %v3511_v24 }
 0x3e2   : > { %v3523_v16 = vld [vmem:[#allocation7 + $0x58] sm:$0x80]  ;;  %v3509_v54 = vsel %vm7622_vm2, 0, %v3508_v4  ;;  %v3515_v20 = vsel %vm7622_vm2, 0, %v3514_v21  ;;  %v3526_v42 = vld [vmem:[#allocation7 + $0x68] sm:$0x80] }
 0x3e3   : > { %v7644_v50 = vor.u32 %v3778_v57, %v3777_v5  ;;  %3510 = vst [vmem:[#allocation7 + $0x8] sm:$0x80] %v3509_v54  ;;  %3513 = vst [vmem:[#allocation7 + $0x18] sm:$0x80] %v3512_v32  ;;  %v3518_v63 = vsel %vm7622_vm2, 0, %v3517_v47  ;;  %v3521_v24 = vsel %vm7622_vm2, 0, %v3520_v31 }
 0x3e4   : > { %3616 = vrot.lane.b32.xlu1 %v7511_v3, %s5686_s30  ;;  %3614 = vrot.lane.b32.xlu0 %v7522_v34, %s5686_s30  ;;  %3516 = vst [vmem:[#allocation7 + $0x28] sm:$0x80] %v3515_v20  ;;  %v3524_v21 = vsel %vm7622_vm2, 0, %v3523_v16  ;;  %v3529_v4 = vld [vmem:[#allocation7 + $0x78] sm:$0x80]  ;;  %v3527_v5 = vsel %vm7622_vm2, 0, %v3526_v42 }
 0x3e5   : > { %3519 = vst [vmem:[#allocation7 + $0x38] sm:$0x80] %v3518_v63  ;;  %3522 = vst [vmem:[#allocation7 + $0x48] sm:$0x80] %v3521_v24  ;;  %v3530_v54 = vsel %vm7622_vm2, 0, %v3529_v4  ;;  %v3896_v28 = vrot.slane %v3701_v41, 1 }
 0x3e6   : > { %3525 = vst [vmem:[#allocation7 + $0x58] sm:$0x80] %v3524_v21  ;;  %v3532_v32 = vld [vmem:[#allocation7 + $0x88] sm:$0x80]  ;;  %v3535_v20 = vld [vmem:[#allocation7 + $0x98] sm:$0x80] }
 0x3e7   : > { %3528 = vst [vmem:[#allocation7 + $0x68] sm:$0x80] %v3527_v5  ;;  %3531 = vst [vmem:[#allocation7 + $0x78] sm:$0x80] %v3530_v54  ;;  %v3533_v47 = vsel %vm7622_vm2, 0, %v3532_v32  ;;  %v3536_v31 = vsel %vm7622_vm2, 0, %v3535_v20 }
 0x3e8   : > { %3620 = vrot.lane.b32.xlu1 %v7532_v10, %s5686_s30  ;;  %3618 = vrot.lane.b32.xlu0 %v7561_v22, %s5686_s30  ;;  %v3538_v16 = vld [vmem:[#allocation7 + $0xa8] sm:$0x80]  ;;  %v3541_v63 = vld [vmem:[#allocation7 + $0xb8] sm:$0x80]  ;;  %3534 = vst [vmem:[#allocation7 + $0x88] sm:$0x80] %v3533_v47 }
 0x3e9   : > { %3537 = vst [vmem:[#allocation7 + $0x98] sm:$0x80] %v3536_v31  ;;  %v3539_v42 = vsel %vm7622_vm2, 0, %v3538_v16  ;;  %v3542_v24 = vsel %vm7622_vm2, 0, %v3541_v63  ;;  %v3544_v21 = vld [vmem:[#allocation7 + $0xc8] sm:$0x80] }
 0x3ea   : > { %v3547_v4 = vld [vmem:[#allocation7 + $0xd8] sm:$0x80]  ;;  %3540 = vst [vmem:[#allocation7 + $0xa8] sm:$0x80] %v3539_v42  ;;  %3543 = vst [vmem:[#allocation7 + $0xb8] sm:$0x80] %v3542_v24  ;;  %v3876_v42 = vor.u32 %v3875_v27, %v3677_v51 }
 0x3eb   : > { %v3545_v5 = vsel %vm7622_vm2, 0, %v3544_v21  ;;  %v3548_v54 = vsel %vm7622_vm2, 0, %v3547_v4  ;;  %v3550_v32 = vld [vmem:[#allocation7 + $0xe8] sm:$0x80]  ;;  %v3553_v20 = vld [vmem:[#allocation7 + $0xf8] sm:$0x80] }
 0x3ec   : > { %3624 = vrot.lane.b32.xlu1 %v7578_v40, %s5686_s30  ;;  %3622 = vrot.lane.b32.xlu0 %v7589_v33, %s5686_s30  ;;  %3546 = vst [vmem:[#allocation7 + $0xc8] sm:$0x80] %v3545_v5  ;;  %3549 = vst [vmem:[#allocation7 + $0xd8] sm:$0x80] %v3548_v54  ;;  %v3551_v47 = vsel %vm7622_vm2, 0, %v3550_v32  ;;  %v3554_v31 = vsel %vm7622_vm2, 0, %v3553_v20 }
 0x3ed   : > { %v3556_v16 = vld [vmem:[#allocation7 + $0x108] sm:$0x80]  ;;  %v3559_v63 = vld [vmem:[#allocation7 + $0x118] sm:$0x80]  ;;  %3552 = vst [vmem:[#allocation7 + $0xe8] sm:$0x80] %v3551_v47 }
 0x3ee   : > { %3555 = vst [vmem:[#allocation7 + $0xf8] sm:$0x80] %v3554_v31  ;;  %v3557_v24 = vsel %vm7622_vm2, 0, %v3556_v16  ;;  %v3560_v21 = vsel %vm7622_vm2, 0, %v3559_v63  ;;  %v3882_v4 = vrot.slane %v3687_v14, 1  ;;  %v3889_v5 = vrot.slane %v3694_v48, 1 }
 0x3ef   : > { %3558 = vst [vmem:[#allocation7 + $0x108] sm:$0x80] %v3557_v24  ;;  %3561 = vst [vmem:[#allocation7 + $0x118] sm:$0x80] %v3560_v21  ;;  %v3903_v51 = vrot.slane %v3708_v23, 1  ;;  %v3910_v27 = vrot.slane %v3715_v56, 1  ;;  %v3897_v23 = vor.u32 %v3896_v28, %v3698_v61 }
 0x3f0   : > { %v3917_v38 = vrot.slane %v3722_v26, 1  ;;  %v3883_v14 = vor.u32 %v3882_v4, %v3684_v62  ;;  %v3890_v48 = vor.u32 %v3889_v5, %v3691_v44  ;;  %v3924_v54 = vrot.slane %v3729_v18, 1  ;;  %v3999_v44 = vld [vmem:[#allocation7 + $0x18] sm:$0xff]  ;;  %v4002_v62 = vld [vmem:[#allocation7 + $0x28] sm:$0xff]  ;;  %s7850_s30 = smov 0  }
 0x3f1   : > { %v3931_v41 = vrot.slane %v3736_v8, 1  ;;  %v3904_v56 = vor.u32 %v3903_v51, %v3705_v36  ;;  %v3911_v26 = vor.u32 %v3910_v27, %v3712_v52  ;;  %v8264_v61 = vshrl.u32 %v7499_v45, 16  ;;  %v4005_v18 = vld [vmem:[#allocation7 + $0x38] sm:$0xff]  ;;  %v4014_v16 = vld [vmem:[#allocation7 + $0x68] sm:$0xff] }
 0x3f2   : > { %v3918_v15 = vor.u32 %v3917_v38, %v3719_v55  ;;  %v3925_v11 = vor.u32 %v3924_v54, %v3726_v6  ;;  %v8265_v9 = vshll.u32 %v7488_v39, 16  ;;  %v8266_v36 = vshll.u32 %v7522_v34, 16  ;;  %v4008_v55 = vld [vmem:[#allocation7 + $0x48] sm:$0xff]  ;;  %v4011_v8 = vld [vmem:[#allocation7 + $0x58] sm:$0xff] }
 0x3f3   : > { %v3932_v60 = vor.u32 %v3931_v41, %v8264_v61  ;;  %v8267_v32 = vshll.u32 %v7511_v3, 16  ;;  %v8268_v47 = vshll.u32 %v7561_v22, 16  ;;  %v8269_v49 = vshll.u32 %v7532_v10, 16  ;;  %v4017_v63 = vld [vmem:[#allocation7 + $0x78] sm:$0xff]  ;;  %v4020_v27 = vld [vmem:[#allocation7 + $0x88] sm:$0xff] }
 0x3f4   : > { %v3938_v52 = vrot.slane %v8265_v9, 1  ;;  %v3945_v37 = vrot.slane %v8266_v36, 1  ;;  %v3973_v45 = vrot.slane %v3778_v57, 1  ;;  %v8270_v24 = vshrl.u32 %v7488_v39, 16  ;;  %v4023_v38 = vld [vmem:[#allocation7 + $0x98] sm:$0xff]  ;;  %v4026_v54 = vld [vmem:[#allocation7 + $0xa8] sm:$0xff] }
 0x3f5   : > { %v3952_v20 = vrot.slane %v8267_v32, 1  ;;  %v3959_v31 = vrot.slane %v8268_v47, 1  ;;  %v3966_v6 = vrot.slane %v8269_v49, 1  ;;  %v8271_v4 = vshrl.u32 %v7522_v34, 16  ;;  %v4035_v32 = vld [vmem:[#allocation7 + $0xd8] sm:$0xff] }
 0x3f6   : > { %v3939_v21 = vor.u32 %v3938_v52, %v8270_v24  ;;  %v3980_v28 = vrot.slane %v3785_v35, 1  ;;  %v4000_v51 = vsel %vm7712_vm3, %v3876_v42, %v3999_v44  ;;  %v8272_v41 = vshrl.u32 %v7511_v3, 16  ;;  %v4029_v35 = vld [vmem:[#allocation7 + $0xb8] sm:$0xff] }
 0x3f7   : > { %v3946_v5 = vor.u32 %v3945_v37, %v8271_v4  ;;  %v8273_v61 = vshrl.u32 %v7561_v22, 16  ;;  %v8274_v39 = vshrl.u32 %v7532_v10, 16  ;;  %v8275_v34 = vshrl.u32 %v7589_v33, 16  ;;  %4001 = vst [vmem:[#allocation7 + $0x18] sm:$0xff] %v4000_v51  ;;  %v4032_v37 = vld [vmem:[#allocation7 + $0xc8] sm:$0xff]  ;;  %v4041_v47 = vld [vmem:[#allocation7 + $0xf8] sm:$0xff] }
 0x3f8   : > { %v3953_v57 = vor.u32 %v3952_v20, %v8272_v41  ;;  %v8276_v42 = vshrl.u32 %v7578_v40, 16  ;;  %v4003_v3 = vsel %vm7712_vm3, %v3883_v14, %v4002_v62  ;;  %v4006_v22 = vsel %vm7712_vm3, %v3890_v48, %v4005_v18  ;;  %v4038_v20 = vld [vmem:[#allocation7 + $0xe8] sm:$0xff] }
 0x3f9   : > { %v3960_v9 = vor.u32 %v3959_v31, %v8273_v61  ;;  %v3967_v52 = vor.u32 %v3966_v6, %v8274_v39  ;;  %v3974_v36 = vor.u32 %v3973_v45, %v8275_v34  ;;  %v4009_v10 = vsel %vm7712_vm3, %v3897_v23, %v4008_v55  ;;  %v4044_v33 = vld [vmem:[#allocation7 + $0x108] sm:$0xff]  ;;  %4004 = vst [vmem:[#allocation7 + $0x28] sm:$0xff] %v4003_v3 }
 0x3fa   : > { %v3981_v44 = vor.u32 %v3980_v28, %v8276_v42  ;;  %4007 = vst [vmem:[#allocation7 + $0x38] sm:$0xff] %v4006_v22  ;;  %4010 = vst [vmem:[#allocation7 + $0x48] sm:$0xff] %v4009_v10  ;;  %v4012_v31 = vsel %vm7712_vm3, %v3904_v56, %v4011_v8  ;;  %v4015_v40 = vsel %vm7712_vm3, %v3911_v26, %v4014_v16 }
 0x3fb   : > { %v4018_v14 = vsel %vm7712_vm3, %v3918_v15, %v4017_v63  ;;  %v4021_v48 = vsel %vm7712_vm3, %v3925_v11, %v4020_v27  ;;  %4013 = vst [vmem:[#allocation7 + $0x58] sm:$0xff] %v4012_v31  ;;  %4016 = vst [vmem:[#allocation7 + $0x68] sm:$0xff] %v4015_v40  ;;  %v4024_v23 = vsel %vm7712_vm3, %v3932_v60, %v4023_v38 }
 0x3fc   : > { %4019 = vst [vmem:[#allocation7 + $0x78] sm:$0xff] %v4018_v14  ;;  %4022 = vst [vmem:[#allocation7 + $0x88] sm:$0xff] %v4021_v48  ;;  %v4027_v62 = vsel %vm7712_vm3, %v3939_v21, %v4026_v54  ;;  %v4030_v56 = vsel %vm7712_vm3, %v3946_v5, %v4029_v35  ;;  %v4033_v26 = vsel %vm7712_vm3, %v3953_v57, %v4032_v37 }
 0x3fd   : > { %4025 = vst [vmem:[#allocation7 + $0x98] sm:$0xff] %v4024_v23  ;;  %4028 = vst [vmem:[#allocation7 + $0xa8] sm:$0xff] %v4027_v62  ;;  %v4036_v15 = vsel %vm7712_vm3, %v3960_v9, %v4035_v32  ;;  %v4039_v11 = vsel %vm7712_vm3, %v3967_v52, %v4038_v20  ;;  %v4042_v60 = vsel %vm7712_vm3, %v3974_v36, %v4041_v47 }
 0x3fe   : > { %4031 = vst [vmem:[#allocation7 + $0xb8] sm:$0xff] %v4030_v56  ;;  %4034 = vst [vmem:[#allocation7 + $0xc8] sm:$0xff] %v4033_v26  ;;  %v4045_v18 = vsel %vm7712_vm3, %v3981_v44, %v4044_v33 }
 0x3ff   : > { %4037 = vst [vmem:[#allocation7 + $0xd8] sm:$0xff] %v4036_v15  ;;  %4040 = vst [vmem:[#allocation7 + $0xe8] sm:$0xff] %v4039_v11 }
 0x400   : > { %4043 = vst [vmem:[#allocation7 + $0xf8] sm:$0xff] %v4042_v60  ;;  %4046 = vst [vmem:[#allocation7 + $0x108] sm:$0xff] %v4045_v18 }
 0x442   : > { %v3599_v55 = vpop.permute.xlu1 %3598  ;;  %v3595_v8 = vpop.permute.xlu0 %3594 }
 0x443   : > { %3646 = vst.msk [vmem:[#allocation7 + $0x30] sm:$0xff] %vm3643_vm4, %v3599_v55  ;;  %3644 = vst.msk [vmem:[#allocation7 + $0x10] sm:$0xff] %vm3643_vm4, %v3595_v8 }
 0x446   : > { %v3601_v49 = vpop.permute.xlu1 %3600  ;;  %v3597_v6 = vpop.permute.xlu0 %3596 }
 0x447   : > { %3647 = vst.msk [vmem:[#allocation7 + $0x40] sm:$0xff] %vm3643_vm4, %v3601_v49  ;;  %3645 = vst.msk [vmem:[#allocation7 + $0x20] sm:$0xff] %vm3643_vm4, %v3597_v6 }
 0x44a   : > { %v3812_v45 = vld [vmem:[#allocation7 + $0x30] sm:$0xff]  ;;  %v3605_v63 = vpop.permute.xlu1 %3604  ;;  %v3603_v24 = vpop.permute.xlu0 %3602 }
 0x44b   : > { %v3806_v16 = vld [vmem:[#allocation7 + $0x10] sm:$0xff]  ;;  %v3813_v21 = vsel %vm7786_vm5, %v7440_v58, %v3812_v45  ;;  %3649 = vst.msk [vmem:[#allocation7 + $0x60] sm:$0xff] %vm3643_vm4, %v3605_v63  ;;  %3648 = vst.msk [vmem:[#allocation7 + $0x50] sm:$0xff] %vm3643_vm4, %v3603_v24 }
 0x44c   : > { %v3807_v4 = vsel %vm7786_vm5, %v7444_v0, %v3806_v16  ;;  %3814 = vst [vmem:[#allocation7 + $0x30] sm:$0xff] %v3813_v21 }
 0x44d   : > { %3808 = vst [vmem:[#allocation7 + $0x10] sm:$0xff] %v3807_v4 }
 0x44e   : > { %v3815_v5 = vld [vmem:[#allocation7 + $0x40] sm:$0xff]  ;;  %v3609_v51 = vpop.permute.xlu1 %3608  ;;  %v3607_v27 = vpop.permute.xlu0 %3606 }
 0x44f   : > { %v3809_v28 = vld [vmem:[#allocation7 + $0x20] sm:$0xff]  ;;  %v3816_v38 = vsel %vm7786_vm5, %v7459_v19, %v3815_v5  ;;  %3651 = vst.msk [vmem:[#allocation7 + $0x80] sm:$0xff] %vm3643_vm4, %v3609_v51  ;;  %3650 = vst.msk [vmem:[#allocation7 + $0x70] sm:$0xff] %vm3643_vm4, %v3607_v27 }
 0x450   : > { %v3810_v58 = vsel %vm7786_vm5, %v7470_v1, %v3809_v28  ;;  %3817 = vst [vmem:[#allocation7 + $0x40] sm:$0xff] %v3816_v38 }
 0x451   : > { %3811 = vst [vmem:[#allocation7 + $0x20] sm:$0xff] %v3810_v58 }
 0x452   : > { %v3821_v0 = vld [vmem:[#allocation7 + $0x60] sm:$0xff]  ;;  %v3818_v54 = vld [vmem:[#allocation7 + $0x50] sm:$0xff]  ;;  %v3613_v41 = vpop.permute.xlu1 %3612  ;;  %v3611_v57 = vpop.permute.xlu0 %3610 }
 0x453   : > { %v3822_v61 = vsel %vm7786_vm5, %v7482_v30, %v3821_v0  ;;  %v3819_v19 = vsel %vm7786_vm5, %v7503_v59, %v3818_v54  ;;  %3653 = vst.msk [vmem:[#allocation7 + $0xa0] sm:$0xff] %vm3643_vm4, %v3613_v41  ;;  %3652 = vst.msk [vmem:[#allocation7 + $0x90] sm:$0xff] %vm3643_vm4, %v3611_v57 }
 0x454   : > { %3823 = vst [vmem:[#allocation7 + $0x60] sm:$0xff] %v3822_v61  ;;  %3820 = vst [vmem:[#allocation7 + $0x50] sm:$0xff] %v3819_v19 }
 0x456   : > { %v3827_v1 = vld [vmem:[#allocation7 + $0x80] sm:$0xff]  ;;  %v3824_v9 = vld [vmem:[#allocation7 + $0x70] sm:$0xff]  ;;  %v3617_v39 = vpop.permute.xlu1 %3616  ;;  %v3615_v52 = vpop.permute.xlu0 %3614 }
 0x457   : > { %v3828_v34 = vsel %vm7786_vm5, %v7526_v12, %v3827_v1  ;;  %v3825_v30 = vsel %vm7786_vm5, %v7549_v53, %v3824_v9  ;;  %3655 = vst.msk [vmem:[#allocation7 + $0xc0] sm:$0xff] %vm3643_vm4, %v3617_v39  ;;  %3654 = vst.msk [vmem:[#allocation7 + $0xb0] sm:$0xff] %vm3643_vm4, %v3615_v52 }
 0x458   : > { %3829 = vst [vmem:[#allocation7 + $0x80] sm:$0xff] %v3828_v34  ;;  %3826 = vst [vmem:[#allocation7 + $0x70] sm:$0xff] %v3825_v30 }
 0x45a   : > { %v3833_v59 = vld [vmem:[#allocation7 + $0xa0] sm:$0xff]  ;;  %v3830_v36 = vld [vmem:[#allocation7 + $0x90] sm:$0xff]  ;;  %v3621_v35 = vpop.permute.xlu1 %3620  ;;  %v3619_v37 = vpop.permute.xlu0 %3618 }
 0x45b   : > { %v3834_v32 = vsel %vm7786_vm5, %v7553_v43, %v3833_v59  ;;  %v3831_v12 = vsel %vm7786_vm5, %v7565_v7, %v3830_v36  ;;  %3657 = vst.msk [vmem:[#allocation7 + $0xe0] sm:$0xff] %vm3643_vm4, %v3621_v35  ;;  %3656 = vst.msk [vmem:[#allocation7 + $0xd0] sm:$0xff] %vm3643_vm4, %v3619_v37 }
 0x45c   : > { %3835 = vst [vmem:[#allocation7 + $0xa0] sm:$0xff] %v3834_v32  ;;  %3832 = vst [vmem:[#allocation7 + $0x90] sm:$0xff] %v3831_v12 }
 0x45e   : > { %v3839_v53 = vld [vmem:[#allocation7 + $0xc0] sm:$0xff]  ;;  %v3836_v42 = vld [vmem:[#allocation7 + $0xb0] sm:$0xff]  ;;  %v3625_v44 = vpop.permute.xlu1 %3624  ;;  %v3623_v3 = vpop.permute.xlu0 %3622 }
 0x45f   : > { %v3840_v22 = vsel %vm7786_vm5, %v7582_v2, %v3839_v53  ;;  %v3837_v43 = vsel %vm7786_vm5, %v7593_v13, %v3836_v42  ;;  %3659 = vst.msk [vmem:[#allocation7 + $0x100] sm:$0xff] %vm3643_vm4, %v3625_v44  ;;  %3658 = vst.msk [vmem:[#allocation7 + $0xf0] sm:$0xff] %vm3643_vm4, %v3623_v3 }
 0x460   : > { %3841 = vst [vmem:[#allocation7 + $0xc0] sm:$0xff] %v3840_v22  ;;  %3838 = vst [vmem:[#allocation7 + $0xb0] sm:$0xff] %v3837_v43 }
 0x462   : > { %v3845_v7 = vld [vmem:[#allocation7 + $0xe0] sm:$0xff]  ;;  %v3842_v10 = vld [vmem:[#allocation7 + $0xd0] sm:$0xff] }
 0x463   : > { %v3846_v20 = vsel %vm7786_vm5, %v7605_v25, %v3845_v7  ;;  %v3843_v2 = vsel %vm7786_vm5, %v7613_v46, %v3842_v10 }
 0x464   : > { %3847 = vst [vmem:[#allocation7 + $0xe0] sm:$0xff] %v3846_v20  ;;  %3844 = vst [vmem:[#allocation7 + $0xd0] sm:$0xff] %v3843_v2 }
 0x466   : > { %v3851_v47 = vld [vmem:[#allocation7 + $0x100] sm:$0xff]  ;;  %v3848_v13 = vld [vmem:[#allocation7 + $0xf0] sm:$0xff] }
 0x467   : > { %v3852_v33 = vsel %vm7786_vm5, %v7630_v17, %v3851_v47  ;;  %v3849_v31 = vsel %vm7786_vm5, %v7644_v50, %v3848_v13 }
 0x468   : > { %3853 = vst [vmem:[#allocation7 + $0x100] sm:$0xff] %v3852_v33  ;;  %3850 = vst [vmem:[#allocation7 + $0xf0] sm:$0xff] %v3849_v31 }
 0x469 LB: >> { %v5617_v46 = vld [vmem:[%s8188_s5 + $0x60] sm:$0xff]   ;;  %v5688_v25 = vmov 0   ;;  %v5619_v50 = vld [vmem:[%s8188_s5 + $0x68] sm:$0xff]   ;;  %v5621_v14 = vld [vmem:[%s8188_s5 + $0x70] sm:$0xff]   ;;  %s5280_s23 = sshll.u32 %s5683_s30, 7  ;;  %s5283_s20 = sshll.u32 %s5683_s30, 6  ;;  %s5683_s30 = sphi %s7850_s30, %s4052_s30  }
 0x46a   : >> { %4238 = vmatprep.subr.bf16.mxu0 %v5688_v25  ;;  %4431 = vmatprep.subr.bf16.mxu1 %v5688_v25  ;;  %v5618_v17 = vld [vmem:[%s8188_s5] sm:$0xff]   ;;  %v5620_v40 = vld [vmem:[%s8188_s5 + $0x8] sm:$0xff]   ;;  %v5622_v48 = vld [vmem:[%s8188_s5 + $0x10] sm:$0xff]   ;;  %s7912_s12 = scalar_lea.vmem [#allocation7], %s5280_s23  ;;  %s8135_s8 = scalar_lea.vmem [#allocation8], %s5283_s20 }
 0x46b   : >> { %4239 = vmatpush1.bf16.msra.mxu0 %v5617_v46  ;;  %4432 = vmatpush1.bf16.msra.mxu1 %v5618_v17  ;;  %v5623_v23 = vld [vmem:[%s8188_s5 + $0x78] sm:$0xff]   ;;  %v5625_v56 = vld [vmem:[%s8188_s5 + $0x80] sm:$0xff]   ;;  %v5627_v15 = vld [vmem:[%s8188_s5 + $0x88] sm:$0xff]   ;;  %s5284_s21 = sshll.u32 %s5683_s30, 5  ;;  %s4052_s30 = sadd.s32 1, %s5683_s30  }
 0x46c   : >> { %4240 = vmatprep.subr.bf16.mxu0 %v5688_v25  ;;  %4433 = vmatprep.subr.bf16.mxu1 %v5688_v25  ;;  %v5624_v62 = vld [vmem:[%s8188_s5 + $0x18] sm:$0xff]   ;;  %v5626_v26 = vld [vmem:[%s8188_s5 + $0x20] sm:$0xff]   ;;  %v5628_v11 = vld [vmem:[%s8188_s5 + $0x28] sm:$0xff]   ;;  %s8151_s11 = scalar_lea.vmem %s5745_s10, %s5284_s21  ;;  %p4049_p6 = scmp.ge.s32.totalorder %s4052_s30, 2  }
 0x46d   : >> { %v5629_v60 = vld [vmem:[%s8188_s5 + $0x90] sm:$0xff]   ;;  %v5631_v49 = vld [vmem:[%s8188_s5 + $0x98] sm:$0xff]   ;;  %v5633_v29 = vld [vmem:[%s8188_s5 + $0xa0] sm:$0xff]  }
 0x46e   : >> { %v5630_v18 = vld [vmem:[%s8188_s5 + $0x30] sm:$0xff]   ;;  %v5632_v6 = vld [vmem:[%s8188_s5 + $0x38] sm:$0xff]   ;;  %v5634_v45 = vld [vmem:[%s8188_s5 + $0x40] sm:$0xff]  }
 0x46f   : >> { %4241 = vmatpush1.bf16.msra.mxu0 %v5619_v50  ;;  %4434 = vmatpush1.bf16.msra.mxu1 %v5620_v40  ;;  %v5114_v55 = vld [vmem:[%s7912_s12 + $0x18] sm:$0xff]  ;;  %v4058_v8 = vld [vmem:[%s7912_s12 + $0x8] sm:$0xff]  ;;  %v5637_v24 = vld [vmem:[%s8188_s5 + $0xb0] sm:$0xff]  }
 0x470   : >> { %4242 = vmatprep.subr.bf16.mxu0 %v5688_v25  ;;  %4435 = vmatprep.subr.bf16.mxu1 %v5688_v25  ;;  %v5635_v16 = vld [vmem:[%s8188_s5 + $0xa8] sm:$0xff]   ;;  %v5638_v21 = vld [vmem:[%s8188_s5 + $0x50] sm:$0xff]   ;;  %v5639_v4 = vld [vmem:[%s8188_s5 + $0xb8] sm:$0xff]  }
 0x471   : >> { %5165 = vmatprep.mubr.msk.bf16.mxu0 %vm3410_vm14, %v5114_v55  ;;  %5185 = vmatprep.mubr.msk.bf16.mxu1 %vm3410_vm14, %v4058_v8  ;;  %v5636_v63 = vld [vmem:[%s8188_s5 + $0x48] sm:$0xff]   ;;  %v5640_v5 = vld [vmem:[%s8188_s5 + $0x58] sm:$0xff]   ;;  %v5113_v28 = vld [vmem:[%s7912_s12 + $0x10] sm:$0xff] }
 0x472   : >> { %v5641_v51 = vld [vmem:[%s8188_s5 + $0xc0] sm:$0xff]   ;;  %v7966_v38 = vld [vmem:[%s7912_s12 + $0x28] sm:$0xff]  ;;  %v5643_v54 = vld [vmem:[%s8188_s5 + $0xd0] sm:$0xff]  }
 0x473   : >> { %4243 = vmatpush1.bf16.msra.mxu0 %v5621_v14  ;;  %4436 = vmatpush1.bf16.msra.mxu1 %v5622_v48  ;;  %v4057_v27 = vld [vmem:[%s7912_s12] sm:$0xff]  ;;  %v5642_v58 = vld [vmem:[%s8188_s5 + $0xc8] sm:$0xff]   ;;  %v7985_v41 = vld [vmem:[%s7912_s12 + $0x38] sm:$0xff] }
 0x474   : >> { %4244 = vmatprep.subr.bf16.mxu0 %v5688_v25  ;;  %4437 = vmatprep.subr.bf16.mxu1 %v5688_v25  ;;  %v7977_v0 = vld [vmem:[%s7912_s12 + $0x20] sm:$0xff]  ;;  %v5644_v57 = vld [vmem:[%s8188_s5 + $0xd8] sm:$0xff]   ;;  %v7998_v61 = vld [vmem:[%s7912_s12 + $0x30] sm:$0xff] }
 0x475   : >> { %v8002_v19 = vld [vmem:[%s7912_s12 + $0x48] sm:$0xff]  ;;  %v5645_v1 = vld [vmem:[%s8188_s5 + $0xe0] sm:$0xff]   ;;  %v8023_v52 = vld [vmem:[%s7912_s12 + $0x58] sm:$0xff] }
 0x476   : >> { %v5646_v9 = vld [vmem:[%s8188_s5 + $0xe8] sm:$0xff]   ;;  %v8020_v39 = vld [vmem:[%s7912_s12 + $0x40] sm:$0xff]  ;;  %v5647_v34 = vld [vmem:[%s8188_s5 + $0xf0] sm:$0xff]  }
 0x477   : >> { %4245 = vmatpush1.bf16.msra.mxu0 %v5623_v23  ;;  %4438 = vmatpush1.bf16.msra.mxu1 %v5624_v62  ;;  %v5648_v30 = vld [vmem:[%s8188_s5 + $0xf8] sm:$0xff]   ;;  %v5121_v59 = vld [vmem:[%s7912_s12 + $0x50] sm:$0xff]  ;;  %v5124_v36 = vld [vmem:[%s7912_s12 + $0x68] sm:$0xff] }
 0x478   : >> { %4246 = vmatprep.subr.bf16.mxu0 %v5688_v25  ;;  %4439 = vmatprep.subr.bf16.mxu1 %v5688_v25  ;;  %v5649_v35 = vld [vmem:[%s8188_s5 + $0x100] sm:$0xff]   ;;  %v5650_v37 = vld [vmem:[%s8188_s5 + $0x108] sm:$0xff]   ;;  %v5126_v12 = vld [vmem:[%s7912_s12 + $0x78] sm:$0xff] }
 0x479   : >> { %v5123_v32 = vld [vmem:[%s7912_s12 + $0x60] sm:$0xff]  ;;  %v5651_v53 = vld [vmem:[%s8188_s5 + $0x110] sm:$0xff]   ;;  %v5652_v42 = vld [vmem:[%s8188_s5 + $0x118] sm:$0xff]  }
 0x47a   : >> { %v5125_v44 = vld [vmem:[%s7912_s12 + $0x70] sm:$0xff]  ;;  %v5128_v3 = vld [vmem:[%s7912_s12 + $0x88] sm:$0xff]  ;;  %v5127_v22 = vld [vmem:[%s7912_s12 + $0x80] sm:$0xff] }
 0x47b   : >> { %4247 = vmatpush1.bf16.msra.mxu0 %v5625_v56  ;;  %4440 = vmatpush1.bf16.msra.mxu1 %v5626_v26  ;;  %v5210_v43 = vld [vmem:[%s7912_s12 + $0x98] sm:$0xff]  ;;  %v5209_v7 = vld [vmem:[%s7912_s12 + $0x90] sm:$0xff] }
 0x47c   : >> { %4248 = vmatprep.subr.bf16.mxu0 %v5688_v25  ;;  %4441 = vmatprep.subr.bf16.mxu1 %v5688_v25 }
 0x47f   : >> { %4249 = vmatpush1.bf16.msra.mxu0 %v5627_v15  ;;  %4442 = vmatpush1.bf16.msra.mxu1 %v5628_v11 }
 0x480   : >> { %4250 = vmatprep.subr.bf16.mxu0 %v5688_v25  ;;  %4443 = vmatprep.subr.bf16.mxu1 %v5688_v25 }
 0x483   : >> { %4251 = vmatpush1.bf16.msra.mxu0 %v5629_v60  ;;  %4444 = vmatpush1.bf16.msra.mxu1 %v5630_v18 }
 0x484   : >> { %4252 = vmatprep.subr.bf16.mxu0 %v5688_v25  ;;  %4445 = vmatprep.subr.bf16.mxu1 %v5688_v25 }
 0x487   : >> { %4253 = vmatpush1.bf16.msra.mxu0 %v5631_v49  ;;  %4446 = vmatpush1.bf16.msra.mxu1 %v5632_v6 }
 0x488   : >> { %4254 = vmatprep.subr.bf16.mxu0 %v5688_v25  ;;  %4447 = vmatprep.subr.bf16.mxu1 %v5688_v25 }
 0x48b   : >> { %4255 = vmatpush1.bf16.msra.mxu0 %v5633_v29  ;;  %4448 = vmatpush1.bf16.msra.mxu1 %v5634_v45 }
 0x48c   : >> { %4256 = vmatprep.subr.bf16.mxu0 %v5688_v25  ;;  %4449 = vmatprep.subr.bf16.mxu1 %v5688_v25 }
 0x48f   : >> { %4257 = vmatpush1.bf16.msra.mxu0 %v5635_v16  ;;  %4450 = vmatpush1.bf16.msra.mxu1 %v5636_v63 }
 0x490   : >> { %4258 = vmatprep.subr.bf16.mxu0 %v5688_v25  ;;  %4451 = vmatprep.subr.bf16.mxu1 %v5688_v25 }
 0x493   : >> { %4259 = vmatpush1.bf16.msra.mxu0 %v5637_v24  ;;  %4452 = vmatpush1.bf16.msra.mxu1 %v5638_v21 }
 0x494   : >> { %4260 = vmatprep.subr.bf16.mxu0 %v5688_v25  ;;  %4453 = vmatprep.subr.bf16.mxu1 %v5688_v25 }
 0x497   : >> { %4261 = vmatpush1.bf16.msra.mxu0 %v5639_v4  ;;  %4454 = vmatpush1.bf16.msra.mxu1 %v5640_v5 }
 0x498   : >> { %4669 = vmatprep.subr.bf16.mxu0 %v5688_v25  ;;  %5519 = vmatprep.subr.bf16.mxu1 %v5688_v25 }
 0x49a   : >> { %4271 = vmatmul.mubr.bf16.vlgmr.msra.gmra.mrb[0].mxu0 %v5113_v28  ;;  %4464 = vmatmul.mubr.bf16.vlgmr.msra.gmra.mrb[0].mxu1 %v4057_v27 }
 0x49b   : >> { %4670 = vmatpush1.bf16.msra.mxu0 %v5641_v51  ;;  %5531 = vmatpush1.bf16.msra.mxu1 %v5641_v51 }
 0x49c   : >> { %4671 = vmatprep.subr.bf16.mxu0 %v5688_v25  ;;  %5520 = vmatprep.subr.bf16.mxu1 %v5688_v25 }
 0x49d   : >> { %5166 = vmatprep.mubr.msk.bf16.mxu0 %vm3410_vm14, %v7966_v38  ;;  %5186 = vmatprep.mubr.msk.bf16.mxu1 %vm3410_vm14, %v5114_v55 }
 0x49f   : >> { %4672 = vmatpush1.bf16.msra.mxu0 %v5642_v58  ;;  %5532 = vmatpush1.bf16.msra.mxu1 %v5642_v58 }
 0x4a0   : >> { %4673 = vmatprep.subr.bf16.mxu0 %v5688_v25  ;;  %5521 = vmatprep.subr.bf16.mxu1 %v5688_v25 }
 0x4a2   : >> { %4279 = vmatmul.mubr.bf16.gmra.mrb[4].mxu0 %v7977_v0  ;;  %4472 = vmatmul.mubr.bf16.gmra.mrb[4].mxu1 %v5113_v28 }
 0x4a3   : >> { %4674 = vmatpush1.bf16.msra.mxu0 %v5643_v54  ;;  %5533 = vmatpush1.bf16.msra.mxu1 %v5643_v54 }
 0x4a4   : >> { %5167 = vmatprep.mubr.msk.bf16.mxu0 %vm3410_vm14, %v7985_v41  ;;  %5187 = vmatprep.mubr.msk.bf16.mxu1 %vm3410_vm14, %v7966_v38 }
 0x4a5   : >> { %4675 = vmatprep.subr.bf16.mxu0 %v5688_v25  ;;  %5522 = vmatprep.subr.bf16.mxu1 %v5688_v25 }
 0x4a7   : >> { %4676 = vmatpush1.bf16.msra.mxu0 %v5644_v57  ;;  %5534 = vmatpush1.bf16.msra.mxu1 %v5644_v57 }
 0x4a8   : >> { %4677 = vmatprep.subr.bf16.mxu0 %v5688_v25  ;;  %5523 = vmatprep.subr.bf16.mxu1 %v5688_v25 }
 0x4aa   : >> { %4287 = vmatmul.mubr.bf16.gmra.mrb[8].mxu0 %v7998_v61  ;;  %4480 = vmatmul.mubr.bf16.gmra.mrb[8].mxu1 %v7977_v0 }
 0x4ab   : >> { %5168 = vmatprep.mubr.msk.bf16.mxu0 %vm3410_vm14, %v8002_v19  ;;  %5188 = vmatprep.mubr.msk.bf16.mxu1 %vm3410_vm14, %v7985_v41 }
 0x4ac   : >> { %4678 = vmatpush1.bf16.msra.mxu0 %v5645_v1  ;;  %5535 = vmatpush1.bf16.msra.mxu1 %v5645_v1 }
 0x4ad   : >> { %4679 = vmatprep.subr.bf16.mxu0 %v5688_v25  ;;  %5524 = vmatprep.subr.bf16.mxu1 %v5688_v25 }
 0x4b0   : >> { %4680 = vmatpush1.bf16.msra.mxu0 %v5646_v9  ;;  %5536 = vmatpush1.bf16.msra.mxu1 %v5646_v9 }
 0x4b1   : >> { %4681 = vmatprep.subr.bf16.mxu0 %v5688_v25  ;;  %5525 = vmatprep.subr.bf16.mxu1 %v5688_v25 }
 0x4b2   : >> { %4295 = vmatmul.mubr.bf16.gmra.mrb[12].mxu0 %v8020_v39  ;;  %4488 = vmatmul.mubr.bf16.gmra.mrb[12].mxu1 %v7998_v61 }
 0x4b3   : >> { %5169 = vmatprep.mubr.msk.bf16.mxu0 %vm3410_vm14, %v8023_v52  ;;  %5189 = vmatprep.mubr.msk.bf16.mxu1 %vm3410_vm14, %v8002_v19 }
 0x4b4   : >> { %4682 = vmatpush1.bf16.msra.mxu0 %v5647_v34  ;;  %5537 = vmatpush1.bf16.msra.mxu1 %v5647_v34 }
 0x4b5   : >> { %4683 = vmatprep.subr.bf16.mxu0 %v5688_v25  ;;  %5526 = vmatprep.subr.bf16.mxu1 %v5688_v25 }
 0x4b8   : >> { %4684 = vmatpush1.bf16.msra.mxu0 %v5648_v30  ;;  %5538 = vmatpush1.bf16.msra.mxu1 %v5648_v30 }
 0x4b9   : >> { %4685 = vmatprep.subr.bf16.mxu0 %v5688_v25  ;;  %5527 = vmatprep.subr.bf16.mxu1 %v5688_v25 }
 0x4ba   : >> { %4303 = vmatmul.mubr.bf16.gmra.mrb[16].mxu0 %v5121_v59  ;;  %4496 = vmatmul.mubr.bf16.gmra.mrb[16].mxu1 %v8020_v39 }
 0x4bb   : >> { %5170 = vmatprep.mubr.msk.bf16.mxu0 %vm3410_vm14, %v5124_v36  ;;  %5190 = vmatprep.mubr.msk.bf16.mxu1 %vm3410_vm14, %v8023_v52 }
 0x4bc   : >> { %4686 = vmatpush1.bf16.msra.mxu0 %v5649_v35  ;;  %5539 = vmatpush1.bf16.msra.mxu1 %v5649_v35 }
 0x4bd   : >> { %4687 = vmatprep.subr.bf16.mxu0 %v5688_v25  ;;  %5528 = vmatprep.subr.bf16.mxu1 %v5688_v25 }
 0x4c0   : >> { %4688 = vmatpush1.bf16.msra.mxu0 %v5650_v37  ;;  %5540 = vmatpush1.bf16.msra.mxu1 %v5650_v37 }
 0x4c1   : >> { %4689 = vmatprep.subr.bf16.mxu0 %v5688_v25  ;;  %5529 = vmatprep.subr.bf16.mxu1 %v5688_v25 }
 0x4c2   : >> { %4311 = vmatmul.mubr.bf16.gmra.mrb[20].mxu0 %v5123_v32  ;;  %4504 = vmatmul.mubr.bf16.gmra.mrb[20].mxu1 %v5121_v59 }
 0x4c3   : >> { %5171 = vmatprep.mubr.msk.bf16.mxu0 %vm3410_vm14, %v5126_v12  ;;  %5191 = vmatprep.mubr.msk.bf16.mxu1 %vm3410_vm14, %v5124_v36 }
 0x4c4   : >> { %4690 = vmatpush1.bf16.msra.mxu0 %v5651_v53  ;;  %5541 = vmatpush1.bf16.msra.mxu1 %v5651_v53 }
 0x4c5   : >> { %4691 = vmatprep.subr.bf16.mxu0 %v5688_v25  ;;  %5530 = vmatprep.subr.bf16.mxu1 %v5688_v25 }
 0x4c8   : >> { %4692 = vmatpush1.bf16.msra.mxu0 %v5652_v42  ;;  %5542 = vmatpush1.bf16.msra.mxu1 %v5652_v42 }
 0x4ca   : >> { %4319 = vmatmul.mubr.bf16.gmra.mrb[24].mxu0 %v5125_v44  ;;  %4512 = vmatmul.mubr.bf16.gmra.mrb[24].mxu1 %v5123_v32 }
 0x4cb   : >> { %5172 = vmatprep.mubr.msk.bf16.mxu0 %vm3410_vm14, %v5128_v3  ;;  %5192 = vmatprep.mubr.msk.bf16.mxu1 %vm3410_vm14, %v5126_v12 }
 0x4d2   : >> { %4327 = vmatmul.mubr.bf16.gmra.mrb[28].mxu0 %v5127_v22  ;;  %4520 = vmatmul.mubr.bf16.gmra.mrb[28].mxu1 %v5125_v44 }
 0x4d3   : >> { %5247 = vmatprep.mubr.msk.bf16.mxu0 %vm3410_vm14, %v7966_v38  ;;  %5251 = vmatprep.mubr.msk.bf16.mxu1 %vm3410_vm14, %v5124_v36 }
 0x4da   : >> { %4702 = vmatmul.mubr.bf16.vlgmr.msra.gmra.mrb[32].mxu0 %v7977_v0  ;;  %4734 = vmatmul.mubr.bf16.vlgmr.msra.gmra.mrb[32].mxu1 %v5123_v32 }
 0x4db   : >> { %5248 = vmatprep.mubr.msk.bf16.mxu0 %vm3410_vm14, %v7985_v41  ;;  %5252 = vmatprep.mubr.msk.bf16.mxu1 %vm3410_vm14, %v5126_v12 }
 0x4e2   : >> { %4710 = vmatmul.mubr.bf16.gmra.mrb[36].mxu0 %v7998_v61  ;;  %4742 = vmatmul.mubr.bf16.gmra.mrb[36].mxu1 %v5125_v44 }
 0x4e3   : >> { %5249 = vmatprep.mubr.msk.bf16.mxu0 %vm3410_vm14, %v8002_v19  ;;  %5253 = vmatprep.mubr.msk.bf16.mxu1 %vm3410_vm14, %v5128_v3 }
 0x4ea   : >> { %4718 = vmatmul.mubr.bf16.gmra.mrb[40].mxu0 %v8020_v39  ;;  %4750 = vmatmul.mubr.bf16.gmra.mrb[40].mxu1 %v5127_v22 }
 0x4eb   : >> { %5250 = vmatprep.mubr.msk.bf16.mxu0 %vm3410_vm14, %v8023_v52  ;;  %5254 = vmatprep.mubr.msk.bf16.mxu1 %vm3410_vm14, %v5210_v43 }
 0x4f2   : >> { %4726 = vmatmul.mubr.bf16.gmra.mrb[44].mxu0 %v5121_v59  ;;  %4758 = vmatmul.mubr.bf16.gmra.mrb[44].mxu1 %v5209_v7 }
 0x56d   : >> { %v4272_v10 = vpop.f32.mrb[0].mxu0  ;;  %v4465_v20 = vpop.f32.mrb[0].mxu1 }
 0x56e   : >> { %v4274_v2 = vpop.f32.mrb[1].mxu0  ;;  %v8093_v47 = vadd.f32 %v4465_v20, %v4272_v10  ;;  %v4467_v13 = vpop.f32.mrb[1].mxu1 }
 0x56f   : >> { %v4275_v33 = vpop.f32.mrb[2].mxu0  ;;  %v4468_v31 = vpop.f32.mrb[2].mxu1 }
 0x570   : >> { %v4277_v46 = vpop.f32.mrb[3].mxu0  ;;  %v8095_v25 = vadd.f32 %v4468_v31, %v4275_v33  ;;  %v4470_v17 = vpop.f32.mrb[3].mxu1 }
 0x575   : >> { %v4280_v50 = vpop.f32.mrb[4].mxu0  ;;  %v4473_v40 = vpop.f32.mrb[4].mxu1 }
 0x576   : >> { %v4282_v14 = vpop.f32.mrb[5].mxu0  ;;  %v8097_v48 = vadd.f32 %v4473_v40, %v4280_v50  ;;  %v4475_v23 = vpop.f32.mrb[5].mxu1 }
 0x577   : >> { %v4283_v62 = vpop.f32.mrb[6].mxu0  ;;  %v4476_v56 = vpop.f32.mrb[6].mxu1 }
 0x578   : >> { %v4285_v26 = vpop.f32.mrb[7].mxu0  ;;  %v8099_v15 = vadd.f32 %v4476_v56, %v4283_v62  ;;  %v4478_v11 = vpop.f32.mrb[7].mxu1 }
 0x57d   : >> { %v4288_v60 = vpop.f32.mrb[8].mxu0  ;;  %v4481_v18 = vpop.f32.mrb[8].mxu1 }
 0x57e   : >> { %v4290_v55 = vpop.f32.mrb[9].mxu0  ;;  %v8101_v8 = vadd.f32 %v4481_v18, %v4288_v60  ;;  %v4483_v49 = vpop.f32.mrb[9].mxu1 }
 0x57f   : >> { %v4291_v6 = vpop.f32.mrb[10].mxu0  ;;  %v4484_v29 = vpop.f32.mrb[10].mxu1 }
 0x580   : >> { %v4293_v45 = vpop.f32.mrb[11].mxu0  ;;  %v8103_v16 = vadd.f32 %v4484_v29, %v4291_v6  ;;  %v4486_v63 = vpop.f32.mrb[11].mxu1 }
 0x585   : >> { %v4296_v24 = vpop.f32.mrb[12].mxu0  ;;  %v4489_v21 = vpop.f32.mrb[12].mxu1 }
 0x586   : >> { %v4298_v4 = vpop.f32.mrb[13].mxu0  ;;  %v8105_v5 = vadd.f32 %v4489_v21, %v4296_v24  ;;  %v4491_v28 = vpop.f32.mrb[13].mxu1 }
 0x587   : >> { %v4299_v51 = vpop.f32.mrb[14].mxu0  ;;  %v4492_v27 = vpop.f32.mrb[14].mxu1 }
 0x588   : >> { %v4301_v38 = vpop.f32.mrb[15].mxu0  ;;  %v8107_v58 = vadd.f32 %v4492_v27, %v4299_v51  ;;  %v4494_v0 = vpop.f32.mrb[15].mxu1  ;;  %v8122_v51 = vld [vmem:[%s8189_s6] ss:$0 sm:$0xff] }
 0x58d   : >> { %v4304_v54 = vpop.f32.mrb[16].mxu0  ;;  %v4497_v41 = vpop.f32.mrb[16].mxu1 }
 0x58e   : >> { %v4306_v57 = vpop.f32.mrb[17].mxu0  ;;  %v4498_v61 = vadd.f32 %v4497_v41, %v4304_v54  ;;  %v4499_v19 = vpop.f32.mrb[17].mxu1 }
 0x58f   : >> { %v4307_v1 = vpop.f32.mrb[18].mxu0  ;;  %v4500_v9 = vpop.f32.mrb[18].mxu1 }
 0x590   : >> { %v4309_v39 = vpop.f32.mrb[19].mxu0  ;;  %v4501_v52 = vadd.f32 %v4500_v9, %v4307_v1  ;;  %v4502_v34 = vpop.f32.mrb[19].mxu1 }
 0x595   : >> { %v4312_v30 = vpop.f32.mrb[20].mxu0  ;;  %v4505_v59 = vpop.f32.mrb[20].mxu1 }
 0x596   : >> { %v4314_v36 = vpop.f32.mrb[21].mxu0  ;;  %v4506_v35 = vadd.f32 %v4505_v59, %v4312_v30  ;;  %v4507_v37 = vpop.f32.mrb[21].mxu1 }
 0x597   : >> { %v4315_v32 = vpop.f32.mrb[22].mxu0  ;;  %v4508_v12 = vpop.f32.mrb[22].mxu1 }
 0x598   : >> { %v4317_v53 = vpop.f32.mrb[23].mxu0  ;;  %v4509_v42 = vadd.f32 %v4508_v12, %v4315_v32  ;;  %v4510_v44 = vpop.f32.mrb[23].mxu1 }
 0x59d   : >> { %v4320_v3 = vpop.f32.mrb[24].mxu0  ;;  %v4513_v22 = vpop.f32.mrb[24].mxu1 }
 0x59e   : >> { %v4322_v43 = vpop.f32.mrb[25].mxu0  ;;  %v8109_v7 = vadd.f32 %v4513_v22, %v4320_v3  ;;  %v4515_v10 = vpop.f32.mrb[25].mxu1 }
 0x59f   : >> { %v4323_v20 = vpop.f32.mrb[26].mxu0  ;;  %v4516_v2 = vpop.f32.mrb[26].mxu1 }
 0x5a0   : >> { %v4325_v13 = vpop.f32.mrb[27].mxu0  ;;  %v8111_v33 = vadd.f32 %v4516_v2, %v4323_v20  ;;  %v4518_v31 = vpop.f32.mrb[27].mxu1 }
 0x5a5   : >> { %v4328_v46 = vpop.f32.mrb[28].mxu0  ;;  %v4521_v17 = vpop.f32.mrb[28].mxu1 }
 0x5a6   : >> { %v4330_v50 = vpop.f32.mrb[29].mxu0  ;;  %v8113_v40 = vadd.f32 %v4521_v17, %v4328_v46  ;;  %v4523_v14 = vpop.f32.mrb[29].mxu1 }
 0x5a7   : >> { %v4331_v23 = vpop.f32.mrb[30].mxu0  ;;  %v4524_v62 = vpop.f32.mrb[30].mxu1 }
 0x5a8   : >> { %v4333_v56 = vpop.f32.mrb[31].mxu0  ;;  %v8115_v26 = vadd.f32 %v4524_v62, %v4331_v23  ;;  %v4526_v11 = vpop.f32.mrb[31].mxu1 }
 0x5ad   : >> { %v4703_v60 = vpop.f32.mrb[32].mxu0  ;;  %v4735_v55 = vpop.f32.mrb[32].mxu1 }
 0x5ae   : >> { %v4766_v18 = vadd.f32 %v4703_v60, %v8093_v47  ;;  %v4705_v49 = vpop.f32.mrb[33].mxu0  ;;  %v4774_v6 = vadd.f32 %v4735_v55, %v4498_v61  ;;  %v4737_v29 = vpop.f32.mrb[33].mxu1 }
 0x5af   : >> { %v4706_v45 = vpop.f32.mrb[34].mxu0  ;;  %v4738_v24 = vpop.f32.mrb[34].mxu1 }
 0x5b0   : >> { %v4767_v63 = vadd.f32 %v4706_v45, %v8095_v25  ;;  %v4708_v21 = vpop.f32.mrb[35].mxu0  ;;  %v4775_v4 = vadd.f32 %v4738_v24, %v4501_v52  ;;  %v4740_v28 = vpop.f32.mrb[35].mxu1  ;;  %v4789_v47 = vadd.f32 %v8122_v51, %v4766_v18  ;;  %v4797_v41 = vadd.f32 %v8122_v51, %v4774_v6 }
 0x5b2   : >> { %v4790_v19 = vadd.f32 %v8122_v51, %v4767_v63  ;;  %v4798_v34 = vadd.f32 %v8122_v51, %v4775_v4  ;;  %v4805_v36 = vmax.f32 %v4789_v47, 0.0  ;;  %v4813_v32 = vmax.f32 %v4797_v41, 0.0 }
 0x5b4   : >> { %v4806_v44 = vmax.f32 %v4790_v19, 0.0 }
 0x5b5   : >> { %v4711_v27 = vpop.f32.mrb[36].mxu0  ;;  %v4743_v0 = vpop.f32.mrb[36].mxu1 }
 0x5b6   : >> { %v4768_v38 = vadd.f32 %v4711_v27, %v8097_v48  ;;  %v4713_v54 = vpop.f32.mrb[37].mxu0  ;;  %v4776_v25 = vadd.f32 %v4743_v0, %v4506_v35  ;;  %v4745_v57 = vpop.f32.mrb[37].mxu1 }
 0x5b7   : >> { %v4714_v61 = vpop.f32.mrb[38].mxu0  ;;  %v4746_v39 = vpop.f32.mrb[38].mxu1 }
 0x5b8   : >> { %v4791_v1 = vadd.f32 %v8122_v51, %v4768_v38  ;;  %v4769_v9 = vadd.f32 %v4714_v61, %v8099_v15  ;;  %v4716_v52 = vpop.f32.mrb[39].mxu0  ;;  %v4799_v48 = vadd.f32 %v8122_v51, %v4776_v25  ;;  %v4777_v30 = vadd.f32 %v4746_v39, %v4509_v42  ;;  %v4748_v59 = vpop.f32.mrb[39].mxu1 }
 0x5b9   : >> { %v4814_v15 = vmax.f32 %v4798_v34, 0.0 }
 0x5ba   : >> { %v4807_v37 = vmax.f32 %v4791_v1, 0.0  ;;  %v4792_v35 = vadd.f32 %v8122_v51, %v4769_v9  ;;  %v4815_v12 = vmax.f32 %v4799_v48, 0.0  ;;  %v4800_v53 = vadd.f32 %v8122_v51, %v4777_v30 }
 0x5bc   : >> { %v4821_v3 = vmax.f32 %v4805_v36, %v4807_v37  ;;  %v4808_v22 = vmax.f32 %v4792_v35, 0.0  ;;  %v4825_v43 = vmax.f32 %v4813_v32, %v4815_v12  ;;  %v4816_v10 = vmax.f32 %v4800_v53, 0.0 }
 0x5bd   : >> { %v4719_v20 = vpop.f32.mrb[40].mxu0  ;;  %v4751_v13 = vpop.f32.mrb[40].mxu1 }
 0x5be   : >> { %4832 = vst [vmem:[%s8135_s8] sm:$0xff] %v4821_v3  ;;  %v4822_v42 = vmax.f32 %v4806_v44, %v4808_v22  ;;  %v4770_v2 = vadd.f32 %v4719_v20, %v8101_v8  ;;  %v4721_v31 = vpop.f32.mrb[41].mxu0  ;;  %4836 = vst [vmem:[%s8135_s8 + $0x20] sm:$0xff] %v4825_v43  ;;  %v4826_v46 = vmax.f32 %v4814_v15, %v4816_v10  ;;  %v4753_v50 = vpop.f32.mrb[41].mxu1 }
 0x5bf   : >> { %v4778_v17 = vadd.f32 %v4751_v13, %v8109_v7  ;;  %v4722_v14 = vpop.f32.mrb[42].mxu0  ;;  %v4754_v62 = vpop.f32.mrb[42].mxu1 }
 0x5c0   : >> { %4833 = vst [vmem:[%s8135_s8 + $0x8] sm:$0xff] %v4822_v42  ;;  %v4771_v23 = vadd.f32 %v4722_v14, %v8103_v16  ;;  %v4724_v56 = vpop.f32.mrb[43].mxu0  ;;  %4837 = vst [vmem:[%s8135_s8 + $0x28] sm:$0xff] %v4826_v46  ;;  %v4779_v11 = vadd.f32 %v4754_v62, %v8111_v33  ;;  %v4756_v8 = vpop.f32.mrb[43].mxu1  ;;  %v4793_v7 = vadd.f32 %v8122_v51, %v4770_v2 }
 0x5c1   : >> { %v4801_v16 = vadd.f32 %v8122_v51, %v4778_v17 }
 0x5c2   : >> { %v4794_v28 = vadd.f32 %v8122_v51, %v4771_v23  ;;  %v4802_v54 = vadd.f32 %v8122_v51, %v4779_v11  ;;  %v4809_v57 = vmax.f32 %v4793_v7, 0.0 }
 0x5c4   : >> { %v4810_v39 = vmax.f32 %v4794_v28, 0.0  ;;  %v4818_v34 = vmax.f32 %v4802_v54, 0.0 }
 0x5c5   : >> { %v4727_v60 = vpop.f32.mrb[44].mxu0  ;;  %v4759_v55 = vpop.f32.mrb[44].mxu1 }
 0x5c6   : >> { %v4772_v18 = vadd.f32 %v4727_v60, %v8105_v5  ;;  %v4729_v49 = vpop.f32.mrb[45].mxu0  ;;  %v4780_v45 = vadd.f32 %v4759_v55, %v8113_v40  ;;  %v4761_v33 = vpop.f32.mrb[45].mxu1 }
 0x5c7   : >> { %v4840_v6 = vld [vmem:[%s8135_s8] ss:$2 sm:$0xff]  ;;  %v5261_v29 = vld [vmem:[%s8135_s8 + $0x1] ss:$2 sm:$0xff]  ;;  %v4730_v63 = vpop.f32.mrb[46].mxu0  ;;  %v4762_v47 = vpop.f32.mrb[46].mxu1 }
 0x5c8   : >> { %v4855_v24 = vmax.f32 %v4840_v6, %v5261_v29  ;;  %v5259_v21 = vld [vmem:[%s8135_s8 + $0x20] ss:$2 sm:$0xff]  ;;  %v5263_v4 = vld [vmem:[%s8135_s8 + $0x21] ss:$2 sm:$0xff]  ;;  %v4795_v5 = vadd.f32 %v8122_v51, %v4772_v18  ;;  %v4773_v27 = vadd.f32 %v4730_v63, %v8107_v58  ;;  %v4732_v38 = vpop.f32.mrb[47].mxu0  ;;  %v4803_v40 = vadd.f32 %v8122_v51, %v4780_v45  ;;  %v4764_v25 = vpop.f32.mrb[47].mxu1 }
 0x5c9   : >> { %v4857_v0 = vmax.f32 %v5259_v21, %v5263_v4  ;;  %v4781_v41 = vadd.f32 %v4762_v47, %v8115_v26  ;;  %v4817_v58 = vmax.f32 %v4801_v16, 0.0 }
 0x5ca   : >> { %4861 = vst [vmem:[%s8151_s11] sm:$0xff] %v4855_v24  ;;  %v4811_v61 = vmax.f32 %v4795_v5, 0.0  ;;  %v4796_v19 = vadd.f32 %v8122_v51, %v4773_v27  ;;  %v4819_v1 = vmax.f32 %v4803_v40, 0.0 }
 0x5cb   : >> { %4863 = vst [vmem:[%s8151_s11 + $0x10] sm:$0xff] %v4857_v0  ;;  %v4804_v9 = vadd.f32 %v8122_v51, %v4781_v41 }
 0x5cc   : >> { %v4823_v26 = vmax.f32 %v4809_v57, %v4811_v61  ;;  %v4812_v52 = vmax.f32 %v4796_v19, 0.0  ;;  %v4827_v48 = vmax.f32 %v4817_v58, %v4819_v1 }
 0x5cd   : >> { %v4820_v30 = vmax.f32 %v4804_v9, 0.0 }
 0x5ce   : >> { %4834 = vst [vmem:[%s8135_s8 + $0x10] sm:$0xff] %v4823_v26  ;;  %v4824_v59 = vmax.f32 %v4810_v39, %v4812_v52  ;;  %4838 = vst [vmem:[%s8135_s8 + $0x30] sm:$0xff] %v4827_v48 }
 0x5cf   : >> { %v4828_v36 = vmax.f32 %v4818_v34, %v4820_v30 }
 0x5d0   : >> { %4835 = vst [vmem:[%s8135_s8 + $0x18] sm:$0xff] %v4824_v59 }
 0x5d1   : >> { %4839 = vst [vmem:[%s8135_s8 + $0x38] sm:$0xff] %v4828_v36 }
 0x5d5   : > { %4051 = sbr.rel (!%p4049_p6) target bundleno = 1129 (0x469), region = 163 }
 0x5d7   : >> { %v5258_v37 = vld [vmem:[%s8135_s8 + $0x10] ss:$2 sm:$0xff]  ;;  %v5262_v35 = vld [vmem:[%s8135_s8 + $0x11] ss:$2 sm:$0xff] }
 0x5d8   : >> { %v4856_v32 = vmax.f32 %v5258_v37, %v5262_v35  ;;  %v5260_v51 = vld [vmem:[%s8135_s8 + $0x30] ss:$2 sm:$0xff]  ;;  %v5264_v12 = vld [vmem:[%s8135_s8 + $0x31] ss:$2 sm:$0xff] }
 0x5d9   : >> { %v4858_v53 = vmax.f32 %v5260_v51, %v5264_v12 }
 0x5da   : >> { %4862 = vst [vmem:[%s8151_s11 + $0x8] sm:$0xff] %v4856_v32 }
 0x5db   : >> { %4864 = vst [vmem:[%s8151_s11 + $0x18] sm:$0xff] %v4858_v53 }
 0x5dc PF: > { %s17_s24 = sadd.s32 1, %s5671_s24  }
 0x5dd   : > { %p14_p7 = scmp.ge.s32.totalorder %s17_s24, 4  }
 0x5df   :  { %16 = sbr.rel (!%p14_p7) target bundleno = 1 (0x1), region = 174 }

// kernel: rice_leaf_cnn_forward.3
= control target key start
LH: loop header
LB: loop body
LE: loop exit
PB: predicated region body
PF: predicated region fallthrough
CT: control target
= control target key end

     0   :  { %s11395_s15 = smov 0   ;;  %s11397_s16 = smov 0   ;;  %s12728_s0 = inlined_call_operand.vmem [shape: f32[2,8192], index: 0, kind: input, shape index: {}]   ;;  %s12729_s1 = inlined_call_operand.vmem [shape: bf16[8192,512], index: 1, kind: input, shape index: {}]   ;;  %s12730_s2 = inlined_call_operand.vmem [shape: f32[1,512], index: 2, kind: input, shape index: {}]   ;;  %s12731_s3 = inlined_call_operand.vmem [shape: bf16[512,128], index: 3, kind: input, shape index: {}]   ;;  %s12732_s4 = inlined_call_operand.vmem [shape: f32[1,2,128], index: 4, kind: output, shape index: {}]  }
   0x1   :  { %s11399_s17 = smov 0  }
   0x2 LB: > { %s23_s18 = sadd.s32 1, %s11362_s16  ;;  %p8510_p0 = scmp.ge.s32.totalorder %s11366_s17, 1  ;;  %s11366_s17 = sphi %s11399_s17, %s14_s17   ;;  %s11362_s16 = sphi %s11397_s16, %s12734_s16   ;;  %s11358_s15 = sphi %s11395_s15, %s12733_s15  }
   0x3   : > { %p24_p1 = scmp.ge.s32.totalorder %s23_s18, 2  ;;  %p215_p2 = scmp.lt.s32.totalorder %s11366_s17, 3 }
   0x5   : > { %s12736_s18 = smov (%p24_p1, %s23_s18), 0  ;;  %p216_p3 = pnand %p8510_p0, %p215_p2 }
   0x6   : > { %s8511_s19 = sshll.u32 (!%p216_p3), %s11358_s15, 5  ;;  %s8513_s20 = sshll.u32 (!%p216_p3), %s11358_s15, 9 }
   0x7   : > { %219 = sbr.rel (%p216_p3) target bundleno = 1509 (0x5e5), region = 36  ;;  %p260_p4 = scmp.lt.s32.totalorder (!%p216_p3), %s8511_s19, 63 }
   0x8   : > { %p267_p5 = scmp.lt.s32.totalorder (!%p216_p3), %s8513_s20, 1023  ;;  %p8516_p6 = scmp.ne.s32.totalorder (!%p216_p3), %s11358_s15, 0 }
   0xe   : > { %s12738_s19 = smov (!%p260_p4, %s8511_s19), 63  ;;  %s12740_s20 = smov (!%p267_p5, %s8513_s20), 1023 }
   0xf   : > { %s8512_s21 = sshll.u32 %s12738_s19, 1  ;;  %s9577_s25 = sshll.u32 %s12740_s20, 4  ;;  %v11368_v0 = vmov (!%p8516_p6), 0.0  }
  0x10   : > { %s11420_s24 = scalar_lea.vmem %s12728_s0, %s8512_s21  ;;  %s11425_s28 = scalar_lea.vmem %s12729_s1, %s9577_s25  ;;  %297 = vst [vmem:[#allocation2] sm:$0xff] (!%p8516_p6), %v11368_v0 }
  0x11   : > { %296 = sbr.rel (%p8516_p6) target bundleno = 24 (0x18), region = 40 }
  0x18 PF: > { %v9768_v1 = vld [vmem:[%s11425_s28 + $0x4] ss:$16 sps:$4 sm:$0xff]   ;;  %v9770_v2 = vld [vmem:[%s11425_s28 + $0xc] ss:$16 sps:$4 sm:$0xff]   ;;  %v9772_v3 = vld [vmem:[%s11425_s28] ss:$16 sps:$4 sm:$0xff]   ;;  %v319_v39 = vlaneseq }
  0x19   : > { %6659 = vmatprep.subr.bf16.mxu0 %v9768_v1  ;;  %v9773_v4 = vld [vmem:[%s11425_s28 + $0x8] ss:$16 sps:$4 sm:$0xff]   ;;  %7315 = vmatprep.subr.bf16.mxu1 %v9770_v2  ;;  %v9774_v5 = vld [vmem:[%s11425_s28 + $0x24] ss:$16 sps:$4 sm:$0xff]   ;;  %v9776_v6 = vld [vmem:[%s11425_s28 + $0x2c] ss:$16 sps:$4 sm:$0xff]  }
  0x1a   : > { %6660 = vmatpush1.bf16.msra.mxu0 %v9772_v3  ;;  %7316 = vmatpush1.bf16.msra.mxu1 %v9773_v4  ;;  %v9778_v7 = vld [vmem:[%s11425_s28 + $0x20] ss:$16 sps:$4 sm:$0xff]   ;;  %v9779_v8 = vld [vmem:[%s11425_s28 + $0x28] ss:$16 sps:$4 sm:$0xff]   ;;  %v9780_v9 = vld [vmem:[%s11425_s28 + $0x44] ss:$16 sps:$4 sm:$0xff]  }
  0x1b   : > { %6661 = vmatprep.subr.bf16.mxu0 %v9774_v5  ;;  %7317 = vmatprep.subr.bf16.mxu1 %v9776_v6  ;;  %v9782_v10 = vld [vmem:[%s11425_s28 + $0x4c] ss:$16 sps:$4 sm:$0xff]   ;;  %v9784_v11 = vld [vmem:[%s11425_s28 + $0x40] ss:$16 sps:$4 sm:$0xff]   ;;  %v9785_v12 = vld [vmem:[%s11425_s28 + $0x48] ss:$16 sps:$4 sm:$0xff]  }
  0x1c   : > { %v9786_v13 = vld [vmem:[%s11425_s28 + $0x64] ss:$16 sps:$4 sm:$0xff]   ;;  %v9788_v14 = vld [vmem:[%s11425_s28 + $0x6c] ss:$16 sps:$4 sm:$0xff]   ;;  %v9790_v15 = vld [vmem:[%s11425_s28 + $0x60] ss:$16 sps:$4 sm:$0xff]  }
  0x1d   : > { %v9791_v16 = vld [vmem:[%s11425_s28 + $0x68] ss:$16 sps:$4 sm:$0xff]   ;;  %v9792_v17 = vld [vmem:[%s11425_s28 + $0x84] ss:$16 sps:$4 sm:$0xff]   ;;  %v9794_v18 = vld [vmem:[%s11425_s28 + $0x8c] ss:$16 sps:$4 sm:$0xff]  }
  0x1e   : > { %6662 = vmatpush1.bf16.msra.mxu0 %v9778_v7  ;;  %7318 = vmatpush1.bf16.msra.mxu1 %v9779_v8  ;;  %v9796_v19 = vld [vmem:[%s11425_s28 + $0x80] ss:$16 sps:$4 sm:$0xff]   ;;  %v9797_v20 = vld [vmem:[%s11425_s28 + $0x88] ss:$16 sps:$4 sm:$0xff]   ;;  %v9798_v21 = vld [vmem:[%s11425_s28 + $0xa4] ss:$16 sps:$4 sm:$0xff]  }
  0x1f   : > { %6663 = vmatprep.subr.bf16.mxu0 %v9780_v9  ;;  %7319 = vmatprep.subr.bf16.mxu1 %v9782_v10  ;;  %v9800_v22 = vld [vmem:[%s11425_s28 + $0xac] ss:$16 sps:$4 sm:$0xff]   ;;  %v9802_v23 = vld [vmem:[%s11425_s28 + $0xa0] ss:$16 sps:$4 sm:$0xff]   ;;  %v9803_v24 = vld [vmem:[%s11425_s28 + $0xa8] ss:$16 sps:$4 sm:$0xff]  }
  0x20   : > { %v9804_v25 = vld [vmem:[%s11425_s28 + $0xc4] ss:$16 sps:$4 sm:$0xff]   ;;  %v9806_v26 = vld [vmem:[%s11425_s28 + $0xcc] ss:$16 sps:$4 sm:$0xff]   ;;  %v9808_v27 = vld [vmem:[%s11425_s28 + $0xc0] ss:$16 sps:$4 sm:$0xff]  }
  0x21   : > { %v9809_v28 = vld [vmem:[%s11425_s28 + $0xc8] ss:$16 sps:$4 sm:$0xff]   ;;  %v9810_v29 = vld [vmem:[%s11425_s28 + $0xe4] ss:$16 sps:$4 sm:$0xff]   ;;  %v9812_v30 = vld [vmem:[%s11425_s28 + $0xec] ss:$16 sps:$4 sm:$0xff]  }
  0x22   : > { %6664 = vmatpush1.bf16.msra.mxu0 %v9784_v11  ;;  %7320 = vmatpush1.bf16.msra.mxu1 %v9785_v12  ;;  %v9814_v31 = vld [vmem:[%s11425_s28 + $0xe0] ss:$16 sps:$4 sm:$0xff]   ;;  %v9815_v32 = vld [vmem:[%s11425_s28 + $0xe8] ss:$16 sps:$4 sm:$0xff]   ;;  %v9816_v33 = vld [vmem:[%s11425_s28 + $0x104] ss:$16 sps:$4 sm:$0xff]  }
  0x23   : > { %6665 = vmatprep.subr.bf16.mxu0 %v9786_v13  ;;  %7321 = vmatprep.subr.bf16.mxu1 %v9788_v14  ;;  %v9818_v34 = vld [vmem:[%s11425_s28 + $0x10c] ss:$16 sps:$4 sm:$0xff]   ;;  %v9820_v35 = vld [vmem:[%s11425_s28 + $0x100] ss:$16 sps:$4 sm:$0xff]   ;;  %v9821_v36 = vld [vmem:[%s11425_s28 + $0x108] ss:$16 sps:$4 sm:$0xff]  }
  0x24   : > { %v11369_v37 = vmov 1983009808   ;;  %v9822_v40 = vld [vmem:[%s11425_s28 + $0x124] ss:$16 sps:$4 sm:$0xff]   ;;  %v9824_v41 = vld [vmem:[%s11425_s28 + $0x12c] ss:$16 sps:$4 sm:$0xff]  }
  0x25   : > { %v317_v38 = vunpack.c.l.s4 %v11369_v37  ;;  %v9826_v42 = vld [vmem:[%s11425_s28 + $0x120] ss:$16 sps:$4 sm:$0xff]   ;;  %v11467_v44 = vshrl.u32 %v319_v39, 7  ;;  %v9827_v45 = vld [vmem:[%s11425_s28 + $0x128] ss:$16 sps:$4 sm:$0xff]   ;;  %p9541_p7 = scmp.ne.s32.totalorder %s11358_s15, 1 }
  0x26   : > { %6666 = vmatpush1.bf16.msra.mxu0 %v9790_v15  ;;  %7322 = vmatpush1.bf16.msra.mxu1 %v9791_v16  ;;  %v9828_v46 = vld [vmem:[%s11425_s28 + $0x144] ss:$16 sps:$4 sm:$0xff]   ;;  %v9830_v47 = vld [vmem:[%s11425_s28 + $0x14c] ss:$16 sps:$4 sm:$0xff]   ;;  %v9832_v48 = vld [vmem:[%s11425_s28 + $0x140] ss:$16 sps:$4 sm:$0xff]  }
  0x27   : > { %6667 = vmatprep.subr.bf16.mxu0 %v9792_v17  ;;  %7323 = vmatprep.subr.bf16.mxu1 %v9794_v18  ;;  %v318_v43 = vunpack.c.0.s8 %v317_v38  ;;  %v9833_v49 = vld [vmem:[%s11425_s28 + $0x148] ss:$16 sps:$4 sm:$0xff]   ;;  %v9834_v51 = vld [vmem:[%s11425_s28 + $0x164] ss:$16 sps:$4 sm:$0xff]   ;;  %v9836_v52 = vld [vmem:[%s11425_s28 + $0x16c] ss:$16 sps:$4 sm:$0xff]  }
  0x28   : > { %v299_v53 = vld [vmem:[%s11420_s24] sm:$0xff]  ;;  %v9839_v56 = vld [vmem:[%s11425_s28 + $0x168] ss:$16 sps:$4 sm:$0xff]   ;;  %v9842_v58 = vld [vmem:[%s11425_s28 + $0x18c] ss:$16 sps:$4 sm:$0xff]  }
  0x29   : > { %v11475_v50 = vsub.s32 %v318_v43, %v11467_v44  ;;  %v9838_v54 = vld [vmem:[%s11425_s28 + $0x160] ss:$16 sps:$4 sm:$0xff]   ;;  %v9840_v57 = vld [vmem:[%s11425_s28 + $0x184] ss:$16 sps:$4 sm:$0xff]   ;;  %v9845_v62 = vld [vmem:[%s11425_s28 + $0x188] ss:$16 sps:$4 sm:$0xff]   ;;  %v315_v5 = vcombine.high %v299_v53, %v299_v53 }
  0x2a   : > { %6668 = vmatpush1.bf16.msra.mxu0 %v9796_v19  ;;  %7324 = vmatpush1.bf16.msra.mxu1 %v9797_v20  ;;  %v9844_v60 = vld [vmem:[%s11425_s28 + $0x180] ss:$16 sps:$4 sm:$0xff]   ;;  %v9846_v63 = vld [vmem:[%s11425_s28 + $0x1a4] ss:$16 sps:$4 sm:$0xff]   ;;  %v9848_v0 = vld [vmem:[%s11425_s28 + $0x1ac] ss:$16 sps:$4 sm:$0xff]  }
  0x2b   : > { %6669 = vmatprep.subr.bf16.mxu0 %v9798_v21  ;;  %7325 = vmatprep.subr.bf16.mxu1 %v9800_v22  ;;  %v322_v55 = vrot.slane %v299_v53, %v11475_v50  ;;  %v9850_v1 = vld [vmem:[%s11425_s28 + $0x1a0] ss:$16 sps:$4 sm:$0xff]   ;;  %v9851_v2 = vld [vmem:[%s11425_s28 + $0x1a8] ss:$16 sps:$4 sm:$0xff]   ;;  %v9852_v3 = vld [vmem:[%s11425_s28 + $0x1c4] ss:$16 sps:$4 sm:$0xff]   ;;  %v11498_v10 = vrot.slane %v315_v5, %v11475_v50 }
  0x2c   : > { %v9854_v4 = vld [vmem:[%s11425_s28 + $0x1cc] ss:$16 sps:$4 sm:$0xff]   ;;  %v9856_v6 = vld [vmem:[%s11425_s28 + $0x1c0] ss:$16 sps:$4 sm:$0xff]   ;;  %v9857_v7 = vld [vmem:[%s11425_s28 + $0x1c8] ss:$16 sps:$4 sm:$0xff]  }
  0x2d   : > { %v330_v59 = vcombine.high %v322_v55, %v322_v55  ;;  %v9858_v8 = vld [vmem:[%s11425_s28 + $0x1e4] ss:$16 sps:$4 sm:$0xff]   ;;  %v9860_v9 = vld [vmem:[%s11425_s28 + $0x1ec] ss:$16 sps:$4 sm:$0xff]   ;;  %v9862_v11 = vld [vmem:[%s11425_s28 + $0x1e0] ss:$16 sps:$4 sm:$0xff]   ;;  %v331_v15 = vcombine.high %v11498_v10, %v11498_v10  ;;  %v483_v17 = vpack.c.bf16 %v322_v55, %v322_v55 }
  0x2e   : > { %6670 = vmatpush1.bf16.msra.mxu0 %v9802_v23  ;;  %7326 = vmatpush1.bf16.msra.mxu1 %v9803_v24  ;;  %v9863_v12 = vld [vmem:[%s11425_s28 + $0x1e8] ss:$16 sps:$4 sm:$0xff]   ;;  %v9867_v13 = vld [vmem:[%s11425_s28 + $0x204] ss:$16 sps:$4 sm:$0xff]   ;;  %v9870_v14 = vld [vmem:[%s11425_s28 + $0x20c] ss:$16 sps:$4 sm:$0xff]  }
  0x2f   : > { %6671 = vmatprep.subr.bf16.mxu0 %v9804_v25  ;;  %7327 = vmatprep.subr.bf16.mxu1 %v9806_v26  ;;  %v484_v61 = vpack.c.bf16 %v330_v59, %v330_v59  ;;  %v9865_v16 = vld [vmem:[%s11425_s28 + $0x200] ss:$16 sps:$4 sm:$0xff]   ;;  %v9868_v18 = vld [vmem:[%s11425_s28 + $0x208] ss:$16 sps:$4 sm:$0xff]   ;;  %v9873_v19 = vld [vmem:[%s11425_s28 + $0x224] ss:$16 sps:$4 sm:$0xff]   ;;  %v486_v21 = vpack.c.bf16 %v331_v15, %v331_v15 }
  0x30   : > { %v9876_v20 = vld [vmem:[%s11425_s28 + $0x22c] ss:$16 sps:$4 sm:$0xff]   ;;  %v9871_v22 = vld [vmem:[%s11425_s28 + $0x220] ss:$16 sps:$4 sm:$0xff]   ;;  %v9874_v23 = vld [vmem:[%s11425_s28 + $0x228] ss:$16 sps:$4 sm:$0xff]  }
  0x31   : > { %6691 = vmatprep.mubr.bf16.mxu0 %v484_v61  ;;  %7347 = vmatprep.mubr.bf16.mxu1 %v484_v61  ;;  %v9879_v24 = vld [vmem:[%s11425_s28 + $0x244] ss:$16 sps:$4 sm:$0xff]   ;;  %v9882_v25 = vld [vmem:[%s11425_s28 + $0x24c] ss:$16 sps:$4 sm:$0xff]   ;;  %v9877_v26 = vld [vmem:[%s11425_s28 + $0x240] ss:$16 sps:$4 sm:$0xff]  }
  0x32   : > { %6672 = vmatpush1.bf16.msra.mxu0 %v9808_v27  ;;  %7328 = vmatpush1.bf16.msra.mxu1 %v9809_v28  ;;  %v9880_v27 = vld [vmem:[%s11425_s28 + $0x248] ss:$16 sps:$4 sm:$0xff]   ;;  %v9885_v28 = vld [vmem:[%s11425_s28 + $0x264] ss:$16 sps:$4 sm:$0xff]   ;;  %v9900_v37 = vld [vmem:[%s11425_s28 + $0x2ac] ss:$16 sps:$4 sm:$0xff]  }
  0x33   : > { %6673 = vmatprep.subr.bf16.mxu0 %v9810_v29  ;;  %7329 = vmatprep.subr.bf16.mxu1 %v9812_v30  ;;  %v9888_v29 = vld [vmem:[%s11425_s28 + $0x26c] ss:$16 sps:$4 sm:$0xff]   ;;  %v9883_v30 = vld [vmem:[%s11425_s28 + $0x260] ss:$16 sps:$4 sm:$0xff]   ;;  %v9898_v39 = vld [vmem:[%s11425_s28 + $0x2a8] ss:$16 sps:$4 sm:$0xff]  }
  0x34   : > { %v9895_v38 = vld [vmem:[%s11425_s28 + $0x2a0] ss:$16 sps:$4 sm:$0xff]   ;;  %v9904_v43 = vld [vmem:[%s11425_s28 + $0x2c8] ss:$16 sps:$4 sm:$0xff]   ;;  %v9924_v55 = vld [vmem:[%s11425_s28 + $0x32c] ss:$16 sps:$4 sm:$0xff]  }
  0x35   : > { %v9916_v53 = vld [vmem:[%s11425_s28 + $0x308] ss:$16 sps:$4 sm:$0xff]   ;;  %v9930_v59 = vld [vmem:[%s11425_s28 + $0x34c] ss:$16 sps:$4 sm:$0xff]   ;;  %v9957_v15 = vld [vmem:[%s11425_s28 + $0x3e4] ss:$16 sps:$4 sm:$0xff]  }
  0x36   : > { %6674 = vmatpush1.bf16.msra.mxu0 %v9814_v31  ;;  %7330 = vmatpush1.bf16.msra.mxu1 %v9815_v32  ;;  %v9886_v31 = vld [vmem:[%s11425_s28 + $0x268] ss:$16 sps:$4 sm:$0xff]   ;;  %v9891_v32 = vld [vmem:[%s11425_s28 + $0x284] ss:$16 sps:$4 sm:$0xff]  }
  0x37   : > { %6675 = vmatprep.subr.bf16.mxu0 %v9816_v33  ;;  %7331 = vmatprep.subr.bf16.mxu1 %v9818_v34  ;;  %v9894_v33 = vld [vmem:[%s11425_s28 + $0x28c] ss:$16 sps:$4 sm:$0xff]   ;;  %v9889_v34 = vld [vmem:[%s11425_s28 + $0x280] ss:$16 sps:$4 sm:$0xff]   ;;  %v9928_v61 = vld [vmem:[%s11425_s28 + $0x348] ss:$16 sps:$4 sm:$0xff]  }
  0x38   : > { %v9940_v5 = vld [vmem:[%s11425_s28 + $0x388] ss:$16 sps:$4 sm:$0xff]  }
  0x3a   : > { %6676 = vmatpush1.bf16.msra.mxu0 %v9820_v35  ;;  %7332 = vmatpush1.bf16.msra.mxu1 %v9821_v36  ;;  %v9892_v35 = vld [vmem:[%s11425_s28 + $0x288] ss:$16 sps:$4 sm:$0xff]   ;;  %v9897_v36 = vld [vmem:[%s11425_s28 + $0x2a4] ss:$16 sps:$4 sm:$0xff]  }
  0x3b   : > { %6677 = vmatprep.subr.bf16.mxu0 %v9822_v40  ;;  %7333 = vmatprep.subr.bf16.mxu1 %v9824_v41  ;;  %v9903_v40 = vld [vmem:[%s11425_s28 + $0x2c4] ss:$16 sps:$4 sm:$0xff]   ;;  %v9906_v41 = vld [vmem:[%s11425_s28 + $0x2cc] ss:$16 sps:$4 sm:$0xff]  }
  0x3e   : > { %6678 = vmatpush1.bf16.msra.mxu0 %v9826_v42  ;;  %7334 = vmatpush1.bf16.msra.mxu1 %v9827_v45  ;;  %v9901_v42 = vld [vmem:[%s11425_s28 + $0x2c0] ss:$16 sps:$4 sm:$0xff]   ;;  %v9909_v45 = vld [vmem:[%s11425_s28 + $0x2e4] ss:$16 sps:$4 sm:$0xff]  }
  0x3f   : > { %6679 = vmatprep.subr.bf16.mxu0 %v9828_v46  ;;  %7335 = vmatprep.subr.bf16.mxu1 %v9830_v47  ;;  %v9912_v46 = vld [vmem:[%s11425_s28 + $0x2ec] ss:$16 sps:$4 sm:$0xff]   ;;  %v9907_v47 = vld [vmem:[%s11425_s28 + $0x2e0] ss:$16 sps:$4 sm:$0xff]  }
  0x42   : > { %6680 = vmatpush1.bf16.msra.mxu0 %v9832_v48  ;;  %7336 = vmatpush1.bf16.msra.mxu1 %v9833_v49  ;;  %v9910_v48 = vld [vmem:[%s11425_s28 + $0x2e8] ss:$16 sps:$4 sm:$0xff]   ;;  %v9915_v49 = vld [vmem:[%s11425_s28 + $0x304] ss:$16 sps:$4 sm:$0xff]  }
  0x43   : > { %6681 = vmatprep.subr.bf16.mxu0 %v9834_v51  ;;  %7337 = vmatprep.subr.bf16.mxu1 %v9836_v52  ;;  %v9918_v51 = vld [vmem:[%s11425_s28 + $0x30c] ss:$16 sps:$4 sm:$0xff]   ;;  %v9913_v52 = vld [vmem:[%s11425_s28 + $0x300] ss:$16 sps:$4 sm:$0xff]  }
  0x46   : > { %6682 = vmatpush1.bf16.msra.mxu0 %v9838_v54  ;;  %7338 = vmatpush1.bf16.msra.mxu1 %v9839_v56  ;;  %v9921_v54 = vld [vmem:[%s11425_s28 + $0x324] ss:$16 sps:$4 sm:$0xff]   ;;  %v9919_v56 = vld [vmem:[%s11425_s28 + $0x320] ss:$16 sps:$4 sm:$0xff]  }
  0x47   : > { %6683 = vmatprep.subr.bf16.mxu0 %v9840_v57  ;;  %7339 = vmatprep.subr.bf16.mxu1 %v9842_v58  ;;  %v9922_v57 = vld [vmem:[%s11425_s28 + $0x328] ss:$16 sps:$4 sm:$0xff]   ;;  %v9927_v58 = vld [vmem:[%s11425_s28 + $0x344] ss:$16 sps:$4 sm:$0xff]  }
  0x4a   : > { %6684 = vmatpush1.bf16.msra.mxu0 %v9844_v60  ;;  %7340 = vmatpush1.bf16.msra.mxu1 %v9845_v62  ;;  %v9925_v60 = vld [vmem:[%s11425_s28 + $0x340] ss:$16 sps:$4 sm:$0xff]   ;;  %v9933_v62 = vld [vmem:[%s11425_s28 + $0x364] ss:$16 sps:$4 sm:$0xff]  }
  0x4b   : > { %6685 = vmatprep.subr.bf16.mxu0 %v9846_v63  ;;  %7341 = vmatprep.subr.bf16.mxu1 %v9848_v0  ;;  %v9936_v63 = vld [vmem:[%s11425_s28 + $0x36c] ss:$16 sps:$4 sm:$0xff]   ;;  %v9931_v0 = vld [vmem:[%s11425_s28 + $0x360] ss:$16 sps:$4 sm:$0xff]  }
  0x4e   : > { %6686 = vmatpush1.bf16.msra.mxu0 %v9850_v1  ;;  %7342 = vmatpush1.bf16.msra.mxu1 %v9851_v2  ;;  %v9934_v1 = vld [vmem:[%s11425_s28 + $0x368] ss:$16 sps:$4 sm:$0xff]   ;;  %v9939_v2 = vld [vmem:[%s11425_s28 + $0x384] ss:$16 sps:$4 sm:$0xff]  }
  0x4f   : > { %6687 = vmatprep.subr.bf16.mxu0 %v9852_v3  ;;  %7343 = vmatprep.subr.bf16.mxu1 %v9854_v4  ;;  %v9942_v3 = vld [vmem:[%s11425_s28 + $0x38c] ss:$16 sps:$4 sm:$0xff]   ;;  %v9937_v4 = vld [vmem:[%s11425_s28 + $0x380] ss:$16 sps:$4 sm:$0xff]  }
  0x52   : > { %6688 = vmatpush1.bf16.msra.mxu0 %v9856_v6  ;;  %7344 = vmatpush1.bf16.msra.mxu1 %v9857_v7  ;;  %v9945_v6 = vld [vmem:[%s11425_s28 + $0x3a4] ss:$16 sps:$4 sm:$0xff]   ;;  %v9948_v7 = vld [vmem:[%s11425_s28 + $0x3ac] ss:$16 sps:$4 sm:$0xff]  }
  0x53   : > { %6689 = vmatprep.subr.bf16.mxu0 %v9858_v8  ;;  %7345 = vmatprep.subr.bf16.mxu1 %v9860_v9  ;;  %v9943_v8 = vld [vmem:[%s11425_s28 + $0x3a0] ss:$16 sps:$4 sm:$0xff]   ;;  %v9946_v9 = vld [vmem:[%s11425_s28 + $0x3a8] ss:$16 sps:$4 sm:$0xff]  }
  0x56   : > { %6690 = vmatpush1.bf16.msra.mxu0 %v9862_v11  ;;  %7346 = vmatpush1.bf16.msra.mxu1 %v9863_v12  ;;  %v9951_v11 = vld [vmem:[%s11425_s28 + $0x3c4] ss:$16 sps:$4 sm:$0xff]   ;;  %v9954_v12 = vld [vmem:[%s11425_s28 + $0x3cc] ss:$16 sps:$4 sm:$0xff]  }
  0x57   : > { %6700 = vmatprep.subr.bf16.mxu0 %v9867_v13  ;;  %7356 = vmatprep.subr.bf16.mxu1 %v9870_v14  ;;  %v9949_v13 = vld [vmem:[%s11425_s28 + $0x3c0] ss:$16 sps:$4 sm:$0xff]   ;;  %v9952_v14 = vld [vmem:[%s11425_s28 + $0x3c8] ss:$16 sps:$4 sm:$0xff]  }
  0x59   : > { %6692 = vmatmul.mubr.bf16.vlgmr.msra.gmra.mrb[0].mxu0 %v483_v17  ;;  %7348 = vmatmul.mubr.bf16.vlgmr.msra.gmra.mrb[0].mxu1 %v483_v17  ;;  %v9955_v17 = vld [vmem:[%s11425_s28 + $0x3e0] ss:$16 sps:$4 sm:$0xff]  }
  0x5a   : > { %6701 = vmatpush1.bf16.msra.mxu0 %v9865_v16  ;;  %7357 = vmatpush1.bf16.msra.mxu1 %v9868_v18  ;;  %v9960_v16 = vld [vmem:[%s11425_s28 + $0x3ec] ss:$16 sps:$4 sm:$0xff]   ;;  %v9958_v18 = vld [vmem:[%s11425_s28 + $0x3e8] ss:$16 sps:$4 sm:$0xff]  }
  0x5b   : > { %6702 = vmatprep.subr.bf16.mxu0 %v9873_v19  ;;  %7358 = vmatprep.subr.bf16.mxu1 %v9876_v20  ;;  %v9963_v19 = vld [vmem:[%s11425_s28 + $0x404] ss:$16 sps:$4 sm:$0xff]   ;;  %v9966_v20 = vld [vmem:[%s11425_s28 + $0x40c] ss:$16 sps:$4 sm:$0xff]  }
  0x5c   : > { %6732 = vmatprep.mubr.bf16.mxu0 %v486_v21  ;;  %7388 = vmatprep.mubr.bf16.mxu1 %v486_v21  ;;  %v9961_v21 = vld [vmem:[%s11425_s28 + $0x400] ss:$16 sps:$4 sm:$0xff]  }
  0x5e   : > { %6703 = vmatpush1.bf16.msra.mxu0 %v9871_v22  ;;  %7359 = vmatpush1.bf16.msra.mxu1 %v9874_v23  ;;  %v485_v22 = vpack.c.bf16 %v11498_v10, %v11498_v10  ;;  %v9964_v23 = vld [vmem:[%s11425_s28 + $0x408] ss:$16 sps:$4 sm:$0xff]  }
  0x5f   : > { %6704 = vmatprep.subr.bf16.mxu0 %v9879_v24  ;;  %7360 = vmatprep.subr.bf16.mxu1 %v9882_v25  ;;  %v11575_v24 = vld [vmem:[%s11420_s24 + $0x8] sm:$0xff]  ;;  %v9969_v25 = vld [vmem:[%s11425_s28 + $0x424] ss:$16 sps:$4 sm:$0xff]  }
  0x62   : > { %6705 = vmatpush1.bf16.msra.mxu0 %v9877_v26  ;;  %7361 = vmatpush1.bf16.msra.mxu1 %v9880_v27  ;;  %v9972_v26 = vld [vmem:[%s11425_s28 + $0x42c] ss:$16 sps:$4 sm:$0xff]   ;;  %v11581_v27 = vrot.slane %v11575_v24, %v11475_v50 }
  0x63   : > { %6706 = vmatprep.subr.bf16.mxu0 %v9885_v28  ;;  %7362 = vmatprep.subr.bf16.mxu1 %v9888_v29  ;;  %v9967_v28 = vld [vmem:[%s11425_s28 + $0x420] ss:$16 sps:$4 sm:$0xff]   ;;  %v9970_v29 = vld [vmem:[%s11425_s28 + $0x428] ss:$16 sps:$4 sm:$0xff]  }
  0x64   : > { %v347_v10 = vcombine.high %v11581_v27, %v11581_v27 }
  0x66   : > { %6707 = vmatpush1.bf16.msra.mxu0 %v9883_v30  ;;  %7363 = vmatpush1.bf16.msra.mxu1 %v9886_v31  ;;  %v9975_v30 = vld [vmem:[%s11425_s28 + $0x444] ss:$16 sps:$4 sm:$0xff]   ;;  %v9978_v31 = vld [vmem:[%s11425_s28 + $0x44c] ss:$16 sps:$4 sm:$0xff]  }
  0x67   : > { %6708 = vmatprep.subr.bf16.mxu0 %v9891_v32  ;;  %7364 = vmatprep.subr.bf16.mxu1 %v9894_v33  ;;  %v488_v32 = vpack.c.bf16 %v347_v10, %v347_v10  ;;  %v9973_v33 = vld [vmem:[%s11425_s28 + $0x440] ss:$16 sps:$4 sm:$0xff]   ;;  %v10054_v10 = vld [vmem:[%s11425_s28 + $0x5e8] ss:$16 sps:$4 sm:$0xff]  }
  0x6a   : > { %6709 = vmatpush1.bf16.msra.mxu0 %v9889_v34  ;;  %7365 = vmatpush1.bf16.msra.mxu1 %v9892_v35  ;;  %v9976_v34 = vld [vmem:[%s11425_s28 + $0x448] ss:$16 sps:$4 sm:$0xff]   ;;  %v9981_v35 = vld [vmem:[%s11425_s28 + $0x464] ss:$16 sps:$4 sm:$0xff]  }
  0x6b   : > { %6710 = vmatprep.subr.bf16.mxu0 %v9897_v36  ;;  %7366 = vmatprep.subr.bf16.mxu1 %v9900_v37  ;;  %v9984_v36 = vld [vmem:[%s11425_s28 + $0x46c] ss:$16 sps:$4 sm:$0xff]   ;;  %v9979_v37 = vld [vmem:[%s11425_s28 + $0x460] ss:$16 sps:$4 sm:$0xff]  }
  0x6e   : > { %6711 = vmatpush1.bf16.msra.mxu0 %v9895_v38  ;;  %7367 = vmatpush1.bf16.msra.mxu1 %v9898_v39  ;;  %v9982_v38 = vld [vmem:[%s11425_s28 + $0x468] ss:$16 sps:$4 sm:$0xff]   ;;  %v9987_v39 = vld [vmem:[%s11425_s28 + $0x484] ss:$16 sps:$4 sm:$0xff]  }
  0x6f   : > { %6712 = vmatprep.subr.bf16.mxu0 %v9903_v40  ;;  %7368 = vmatprep.subr.bf16.mxu1 %v9906_v41  ;;  %v9990_v40 = vld [vmem:[%s11425_s28 + $0x48c] ss:$16 sps:$4 sm:$0xff]   ;;  %v9985_v41 = vld [vmem:[%s11425_s28 + $0x480] ss:$16 sps:$4 sm:$0xff]  }
  0x72   : > { %6713 = vmatpush1.bf16.msra.mxu0 %v9901_v42  ;;  %7369 = vmatpush1.bf16.msra.mxu1 %v9904_v43  ;;  %v9988_v42 = vld [vmem:[%s11425_s28 + $0x488] ss:$16 sps:$4 sm:$0xff]   ;;  %v9993_v43 = vld [vmem:[%s11425_s28 + $0x4a4] ss:$16 sps:$4 sm:$0xff]  }
  0x73   : > { %6714 = vmatprep.subr.bf16.mxu0 %v9909_v45  ;;  %7370 = vmatprep.subr.bf16.mxu1 %v9912_v46  ;;  %v9996_v45 = vld [vmem:[%s11425_s28 + $0x4ac] ss:$16 sps:$4 sm:$0xff]   ;;  %v9991_v46 = vld [vmem:[%s11425_s28 + $0x4a0] ss:$16 sps:$4 sm:$0xff]  }
  0x76   : > { %6715 = vmatpush1.bf16.msra.mxu0 %v9907_v47  ;;  %7371 = vmatpush1.bf16.msra.mxu1 %v9910_v48  ;;  %v9994_v47 = vld [vmem:[%s11425_s28 + $0x4a8] ss:$16 sps:$4 sm:$0xff]   ;;  %v9999_v48 = vld [vmem:[%s11425_s28 + $0x4c4] ss:$16 sps:$4 sm:$0xff]  }
  0x77   : > { %6716 = vmatprep.subr.bf16.mxu0 %v9915_v49  ;;  %7372 = vmatprep.subr.bf16.mxu1 %v9918_v51  ;;  %v10002_v49 = vld [vmem:[%s11425_s28 + $0x4cc] ss:$16 sps:$4 sm:$0xff]   ;;  %v9997_v51 = vld [vmem:[%s11425_s28 + $0x4c0] ss:$16 sps:$4 sm:$0xff]  }
  0x7a   : > { %6717 = vmatpush1.bf16.msra.mxu0 %v9913_v52  ;;  %7373 = vmatpush1.bf16.msra.mxu1 %v9916_v53  ;;  %v10000_v52 = vld [vmem:[%s11425_s28 + $0x4c8] ss:$16 sps:$4 sm:$0xff]   ;;  %v10005_v53 = vld [vmem:[%s11425_s28 + $0x4e4] ss:$16 sps:$4 sm:$0xff]  }
  0x7b   : > { %6718 = vmatprep.subr.bf16.mxu0 %v9921_v54  ;;  %7374 = vmatprep.subr.bf16.mxu1 %v9924_v55  ;;  %v10008_v54 = vld [vmem:[%s11425_s28 + $0x4ec] ss:$16 sps:$4 sm:$0xff]   ;;  %v10003_v55 = vld [vmem:[%s11425_s28 + $0x4e0] ss:$16 sps:$4 sm:$0xff]  }
  0x7e   : > { %6719 = vmatpush1.bf16.msra.mxu0 %v9919_v56  ;;  %7375 = vmatpush1.bf16.msra.mxu1 %v9922_v57  ;;  %v10006_v56 = vld [vmem:[%s11425_s28 + $0x4e8] ss:$16 sps:$4 sm:$0xff]   ;;  %v10011_v57 = vld [vmem:[%s11425_s28 + $0x504] ss:$16 sps:$4 sm:$0xff]  }
  0x7f   : > { %6720 = vmatprep.subr.bf16.mxu0 %v9927_v58  ;;  %7376 = vmatprep.subr.bf16.mxu1 %v9930_v59  ;;  %v10014_v58 = vld [vmem:[%s11425_s28 + $0x50c] ss:$16 sps:$4 sm:$0xff]   ;;  %v10009_v59 = vld [vmem:[%s11425_s28 + $0x500] ss:$16 sps:$4 sm:$0xff]  }
  0x82   : > { %6721 = vmatpush1.bf16.msra.mxu0 %v9925_v60  ;;  %7377 = vmatpush1.bf16.msra.mxu1 %v9928_v61  ;;  %v10012_v60 = vld [vmem:[%s11425_s28 + $0x508] ss:$16 sps:$4 sm:$0xff]   ;;  %v10017_v61 = vld [vmem:[%s11425_s28 + $0x524] ss:$16 sps:$4 sm:$0xff]  }
  0x83   : > { %6722 = vmatprep.subr.bf16.mxu0 %v9933_v62  ;;  %7378 = vmatprep.subr.bf16.mxu1 %v9936_v63  ;;  %v10020_v62 = vld [vmem:[%s11425_s28 + $0x52c] ss:$16 sps:$4 sm:$0xff]   ;;  %v10015_v63 = vld [vmem:[%s11425_s28 + $0x520] ss:$16 sps:$4 sm:$0xff]  }
  0x86   : > { %6723 = vmatpush1.bf16.msra.mxu0 %v9931_v0  ;;  %7379 = vmatpush1.bf16.msra.mxu1 %v9934_v1  ;;  %v10018_v0 = vld [vmem:[%s11425_s28 + $0x528] ss:$16 sps:$4 sm:$0xff]   ;;  %v10023_v1 = vld [vmem:[%s11425_s28 + $0x544] ss:$16 sps:$4 sm:$0xff]  }
  0x87   : > { %6724 = vmatprep.subr.bf16.mxu0 %v9939_v2  ;;  %7380 = vmatprep.subr.bf16.mxu1 %v9942_v3  ;;  %v10026_v2 = vld [vmem:[%s11425_s28 + $0x54c] ss:$16 sps:$4 sm:$0xff]   ;;  %v10021_v3 = vld [vmem:[%s11425_s28 + $0x540] ss:$16 sps:$4 sm:$0xff]  }
  0x8a   : > { %6725 = vmatpush1.bf16.msra.mxu0 %v9937_v4  ;;  %7381 = vmatpush1.bf16.msra.mxu1 %v9940_v5  ;;  %v10024_v4 = vld [vmem:[%s11425_s28 + $0x548] ss:$16 sps:$4 sm:$0xff]   ;;  %v10029_v5 = vld [vmem:[%s11425_s28 + $0x564] ss:$16 sps:$4 sm:$0xff]  }
  0x8b   : > { %6726 = vmatprep.subr.bf16.mxu0 %v9945_v6  ;;  %7382 = vmatprep.subr.bf16.mxu1 %v9948_v7  ;;  %v10032_v6 = vld [vmem:[%s11425_s28 + $0x56c] ss:$16 sps:$4 sm:$0xff]   ;;  %v10027_v7 = vld [vmem:[%s11425_s28 + $0x560] ss:$16 sps:$4 sm:$0xff]  }
  0x8e   : > { %6727 = vmatpush1.bf16.msra.mxu0 %v9943_v8  ;;  %7383 = vmatpush1.bf16.msra.mxu1 %v9946_v9  ;;  %v10030_v8 = vld [vmem:[%s11425_s28 + $0x568] ss:$16 sps:$4 sm:$0xff]   ;;  %v10035_v9 = vld [vmem:[%s11425_s28 + $0x584] ss:$16 sps:$4 sm:$0xff]  }
  0x8f   : > { %6728 = vmatprep.subr.bf16.mxu0 %v9951_v11  ;;  %7384 = vmatprep.subr.bf16.mxu1 %v9954_v12  ;;  %v10038_v11 = vld [vmem:[%s11425_s28 + $0x58c] ss:$16 sps:$4 sm:$0xff]   ;;  %v10033_v12 = vld [vmem:[%s11425_s28 + $0x580] ss:$16 sps:$4 sm:$0xff]  }
  0x92   : > { %6729 = vmatpush1.bf16.msra.mxu0 %v9949_v13  ;;  %7385 = vmatpush1.bf16.msra.mxu1 %v9952_v14  ;;  %v10036_v13 = vld [vmem:[%s11425_s28 + $0x588] ss:$16 sps:$4 sm:$0xff]   ;;  %v10041_v14 = vld [vmem:[%s11425_s28 + $0x5a4] ss:$16 sps:$4 sm:$0xff]  }
  0x93   : > { %6730 = vmatprep.subr.bf16.mxu0 %v9957_v15  ;;  %7386 = vmatprep.subr.bf16.mxu1 %v9960_v16  ;;  %v10044_v15 = vld [vmem:[%s11425_s28 + $0x5ac] ss:$16 sps:$4 sm:$0xff]   ;;  %v10039_v16 = vld [vmem:[%s11425_s28 + $0x5a0] ss:$16 sps:$4 sm:$0xff]  }
  0x96   : > { %6731 = vmatpush1.bf16.msra.mxu0 %v9955_v17  ;;  %7387 = vmatpush1.bf16.msra.mxu1 %v9958_v18  ;;  %v10042_v17 = vld [vmem:[%s11425_s28 + $0x5a8] ss:$16 sps:$4 sm:$0xff]   ;;  %v10047_v18 = vld [vmem:[%s11425_s28 + $0x5c4] ss:$16 sps:$4 sm:$0xff]  }
  0x97   : > { %6741 = vmatprep.subr.bf16.mxu0 %v9963_v19  ;;  %7397 = vmatprep.subr.bf16.mxu1 %v9966_v20  ;;  %v10050_v19 = vld [vmem:[%s11425_s28 + $0x5cc] ss:$16 sps:$4 sm:$0xff]   ;;  %v332_v20 = vcombine.high %v11575_v24, %v11575_v24  ;;  %v10051_v24 = vld [vmem:[%s11425_s28 + $0x5e0] ss:$16 sps:$4 sm:$0xff]  }
  0x99   : > { %6733 = vmatmul.mubr.bf16.vlgmr.msra.gmra.mrb[0].mxu0 %v485_v22  ;;  %7389 = vmatmul.mubr.bf16.vlgmr.msra.gmra.mrb[0].mxu1 %v485_v22  ;;  %v10048_v22 = vld [vmem:[%s11425_s28 + $0x5c8] ss:$16 sps:$4 sm:$0xff]  }
  0x9a   : > { %6742 = vmatpush1.bf16.msra.mxu0 %v9961_v21  ;;  %7398 = vmatpush1.bf16.msra.mxu1 %v9964_v23  ;;  %v10045_v21 = vld [vmem:[%s11425_s28 + $0x5c0] ss:$16 sps:$4 sm:$0xff]   ;;  %v10053_v23 = vld [vmem:[%s11425_s28 + $0x5e4] ss:$16 sps:$4 sm:$0xff]  }
  0x9b   : > { %6743 = vmatprep.subr.bf16.mxu0 %v9969_v25  ;;  %7399 = vmatprep.subr.bf16.mxu1 %v9972_v26  ;;  %v10056_v25 = vld [vmem:[%s11425_s28 + $0x5ec] ss:$16 sps:$4 sm:$0xff]   ;;  %v11644_v26 = vrot.slane %v332_v20, %v11475_v50  ;;  %v10132_v20 = vld [vmem:[%s11425_s28 + $0x788] ss:$16 sps:$4 sm:$0xff]  }
  0x9c   : > { %6773 = vmatprep.mubr.bf16.mxu0 %v488_v32  ;;  %7429 = vmatprep.mubr.bf16.mxu1 %v488_v32  ;;  %v10057_v32 = vld [vmem:[%s11425_s28 + $0x600] ss:$16 sps:$4 sm:$0xff]  }
  0x9e   : > { %6744 = vmatpush1.bf16.msra.mxu0 %v9967_v28  ;;  %7400 = vmatpush1.bf16.msra.mxu1 %v9970_v29  ;;  %v10059_v28 = vld [vmem:[%s11425_s28 + $0x604] ss:$16 sps:$4 sm:$0xff]   ;;  %v10062_v29 = vld [vmem:[%s11425_s28 + $0x60c] ss:$16 sps:$4 sm:$0xff]  }
  0x9f   : > { %6745 = vmatprep.subr.bf16.mxu0 %v9975_v30  ;;  %7401 = vmatprep.subr.bf16.mxu1 %v9978_v31  ;;  %v348_v30 = vcombine.high %v11644_v26, %v11644_v26  ;;  %v487_v31 = vpack.c.bf16 %v11581_v27, %v11581_v27  ;;  %v10063_v27 = vld [vmem:[%s11425_s28 + $0x620] ss:$16 sps:$4 sm:$0xff]  }
  0xa2   : > { %6746 = vmatpush1.bf16.msra.mxu0 %v9973_v33  ;;  %7402 = vmatpush1.bf16.msra.mxu1 %v9976_v34  ;;  %v10060_v33 = vld [vmem:[%s11425_s28 + $0x608] ss:$16 sps:$4 sm:$0xff]   ;;  %v10065_v34 = vld [vmem:[%s11425_s28 + $0x624] ss:$16 sps:$4 sm:$0xff]  }
  0xa3   : > { %6747 = vmatprep.subr.bf16.mxu0 %v9981_v35  ;;  %7403 = vmatprep.subr.bf16.mxu1 %v9984_v36  ;;  %v10068_v35 = vld [vmem:[%s11425_s28 + $0x62c] ss:$16 sps:$4 sm:$0xff]   ;;  %v490_v36 = vpack.c.bf16 %v348_v30, %v348_v30  ;;  %v10144_v30 = vld [vmem:[%s11425_s28 + $0x7c8] ss:$16 sps:$4 sm:$0xff]  }
  0xa6   : > { %6748 = vmatpush1.bf16.msra.mxu0 %v9979_v37  ;;  %7404 = vmatpush1.bf16.msra.mxu1 %v9982_v38  ;;  %v10066_v37 = vld [vmem:[%s11425_s28 + $0x628] ss:$16 sps:$4 sm:$0xff]   ;;  %v10071_v38 = vld [vmem:[%s11425_s28 + $0x644] ss:$16 sps:$4 sm:$0xff]  }
  0xa7   : > { %6749 = vmatprep.subr.bf16.mxu0 %v9987_v39  ;;  %7405 = vmatprep.subr.bf16.mxu1 %v9990_v40  ;;  %v10074_v39 = vld [vmem:[%s11425_s28 + $0x64c] ss:$16 sps:$4 sm:$0xff]   ;;  %v10069_v40 = vld [vmem:[%s11425_s28 + $0x640] ss:$16 sps:$4 sm:$0xff]  }
  0xaa   : > { %6750 = vmatpush1.bf16.msra.mxu0 %v9985_v41  ;;  %7406 = vmatpush1.bf16.msra.mxu1 %v9988_v42  ;;  %v10072_v41 = vld [vmem:[%s11425_s28 + $0x648] ss:$16 sps:$4 sm:$0xff]   ;;  %v10077_v42 = vld [vmem:[%s11425_s28 + $0x664] ss:$16 sps:$4 sm:$0xff]  }
  0xab   : > { %6751 = vmatprep.subr.bf16.mxu0 %v9993_v43  ;;  %7407 = vmatprep.subr.bf16.mxu1 %v9996_v45  ;;  %v10080_v43 = vld [vmem:[%s11425_s28 + $0x66c] ss:$16 sps:$4 sm:$0xff]   ;;  %v10075_v45 = vld [vmem:[%s11425_s28 + $0x660] ss:$16 sps:$4 sm:$0xff]  }
  0xae   : > { %6752 = vmatpush1.bf16.msra.mxu0 %v9991_v46  ;;  %7408 = vmatpush1.bf16.msra.mxu1 %v9994_v47  ;;  %v10078_v46 = vld [vmem:[%s11425_s28 + $0x668] ss:$16 sps:$4 sm:$0xff]   ;;  %v10083_v47 = vld [vmem:[%s11425_s28 + $0x684] ss:$16 sps:$4 sm:$0xff]  }
  0xaf   : > { %6753 = vmatprep.subr.bf16.mxu0 %v9999_v48  ;;  %7409 = vmatprep.subr.bf16.mxu1 %v10002_v49  ;;  %v10086_v48 = vld [vmem:[%s11425_s28 + $0x68c] ss:$16 sps:$4 sm:$0xff]   ;;  %v10081_v49 = vld [vmem:[%s11425_s28 + $0x680] ss:$16 sps:$4 sm:$0xff]  }
  0xb2   : > { %6754 = vmatpush1.bf16.msra.mxu0 %v9997_v51  ;;  %7410 = vmatpush1.bf16.msra.mxu1 %v10000_v52  ;;  %v10084_v51 = vld [vmem:[%s11425_s28 + $0x688] ss:$16 sps:$4 sm:$0xff]   ;;  %v10089_v52 = vld [vmem:[%s11425_s28 + $0x6a4] ss:$16 sps:$4 sm:$0xff]  }
  0xb3   : > { %6755 = vmatprep.subr.bf16.mxu0 %v10005_v53  ;;  %7411 = vmatprep.subr.bf16.mxu1 %v10008_v54  ;;  %v10092_v53 = vld [vmem:[%s11425_s28 + $0x6ac] ss:$16 sps:$4 sm:$0xff]   ;;  %v10087_v54 = vld [vmem:[%s11425_s28 + $0x6a0] ss:$16 sps:$4 sm:$0xff]  }
  0xb6   : > { %6756 = vmatpush1.bf16.msra.mxu0 %v10003_v55  ;;  %7412 = vmatpush1.bf16.msra.mxu1 %v10006_v56  ;;  %v10090_v55 = vld [vmem:[%s11425_s28 + $0x6a8] ss:$16 sps:$4 sm:$0xff]   ;;  %v10095_v56 = vld [vmem:[%s11425_s28 + $0x6c4] ss:$16 sps:$4 sm:$0xff]  }
  0xb7   : > { %6757 = vmatprep.subr.bf16.mxu0 %v10011_v57  ;;  %7413 = vmatprep.subr.bf16.mxu1 %v10014_v58  ;;  %v10098_v57 = vld [vmem:[%s11425_s28 + $0x6cc] ss:$16 sps:$4 sm:$0xff]   ;;  %v10093_v58 = vld [vmem:[%s11425_s28 + $0x6c0] ss:$16 sps:$4 sm:$0xff]  }
  0xba   : > { %6758 = vmatpush1.bf16.msra.mxu0 %v10009_v59  ;;  %7414 = vmatpush1.bf16.msra.mxu1 %v10012_v60  ;;  %v10096_v59 = vld [vmem:[%s11425_s28 + $0x6c8] ss:$16 sps:$4 sm:$0xff]   ;;  %v10101_v60 = vld [vmem:[%s11425_s28 + $0x6e4] ss:$16 sps:$4 sm:$0xff]  }
  0xbb   : > { %6759 = vmatprep.subr.bf16.mxu0 %v10017_v61  ;;  %7415 = vmatprep.subr.bf16.mxu1 %v10020_v62  ;;  %v10104_v61 = vld [vmem:[%s11425_s28 + $0x6ec] ss:$16 sps:$4 sm:$0xff]   ;;  %v10099_v62 = vld [vmem:[%s11425_s28 + $0x6e0] ss:$16 sps:$4 sm:$0xff]  }
  0xbe   : > { %6760 = vmatpush1.bf16.msra.mxu0 %v10015_v63  ;;  %7416 = vmatpush1.bf16.msra.mxu1 %v10018_v0  ;;  %v10102_v63 = vld [vmem:[%s11425_s28 + $0x6e8] ss:$16 sps:$4 sm:$0xff]   ;;  %v10107_v0 = vld [vmem:[%s11425_s28 + $0x704] ss:$16 sps:$4 sm:$0xff]  }
  0xbf   : > { %6761 = vmatprep.subr.bf16.mxu0 %v10023_v1  ;;  %7417 = vmatprep.subr.bf16.mxu1 %v10026_v2  ;;  %v10110_v1 = vld [vmem:[%s11425_s28 + $0x70c] ss:$16 sps:$4 sm:$0xff]   ;;  %v10105_v2 = vld [vmem:[%s11425_s28 + $0x700] ss:$16 sps:$4 sm:$0xff]  }
  0xc2   : > { %6762 = vmatpush1.bf16.msra.mxu0 %v10021_v3  ;;  %7418 = vmatpush1.bf16.msra.mxu1 %v10024_v4  ;;  %v10108_v3 = vld [vmem:[%s11425_s28 + $0x708] ss:$16 sps:$4 sm:$0xff]   ;;  %v10113_v4 = vld [vmem:[%s11425_s28 + $0x724] ss:$16 sps:$4 sm:$0xff]  }
  0xc3   : > { %6763 = vmatprep.subr.bf16.mxu0 %v10029_v5  ;;  %7419 = vmatprep.subr.bf16.mxu1 %v10032_v6  ;;  %v10116_v5 = vld [vmem:[%s11425_s28 + $0x72c] ss:$16 sps:$4 sm:$0xff]   ;;  %v10111_v6 = vld [vmem:[%s11425_s28 + $0x720] ss:$16 sps:$4 sm:$0xff]  }
  0xc6   : > { %6764 = vmatpush1.bf16.msra.mxu0 %v10027_v7  ;;  %7420 = vmatpush1.bf16.msra.mxu1 %v10030_v8  ;;  %v10114_v7 = vld [vmem:[%s11425_s28 + $0x728] ss:$16 sps:$4 sm:$0xff]   ;;  %v10119_v8 = vld [vmem:[%s11425_s28 + $0x744] ss:$16 sps:$4 sm:$0xff]  }
  0xc7   : > { %6765 = vmatprep.subr.bf16.mxu0 %v10035_v9  ;;  %7421 = vmatprep.subr.bf16.mxu1 %v10038_v11  ;;  %v10122_v9 = vld [vmem:[%s11425_s28 + $0x74c] ss:$16 sps:$4 sm:$0xff]   ;;  %v10117_v11 = vld [vmem:[%s11425_s28 + $0x740] ss:$16 sps:$4 sm:$0xff]  }
  0xca   : > { %6766 = vmatpush1.bf16.msra.mxu0 %v10033_v12  ;;  %7422 = vmatpush1.bf16.msra.mxu1 %v10036_v13  ;;  %v10120_v12 = vld [vmem:[%s11425_s28 + $0x748] ss:$16 sps:$4 sm:$0xff]   ;;  %v10125_v13 = vld [vmem:[%s11425_s28 + $0x764] ss:$16 sps:$4 sm:$0xff]  }
  0xcb   : > { %6767 = vmatprep.subr.bf16.mxu0 %v10041_v14  ;;  %7423 = vmatprep.subr.bf16.mxu1 %v10044_v15  ;;  %v10128_v14 = vld [vmem:[%s11425_s28 + $0x76c] ss:$16 sps:$4 sm:$0xff]   ;;  %v10123_v15 = vld [vmem:[%s11425_s28 + $0x760] ss:$16 sps:$4 sm:$0xff]  }
  0xce   : > { %6768 = vmatpush1.bf16.msra.mxu0 %v10039_v16  ;;  %7424 = vmatpush1.bf16.msra.mxu1 %v10042_v17  ;;  %v10126_v16 = vld [vmem:[%s11425_s28 + $0x768] ss:$16 sps:$4 sm:$0xff]   ;;  %v10131_v17 = vld [vmem:[%s11425_s28 + $0x784] ss:$16 sps:$4 sm:$0xff]  }
  0xcf   : > { %6769 = vmatprep.subr.bf16.mxu0 %v10047_v18  ;;  %7425 = vmatprep.subr.bf16.mxu1 %v10050_v19  ;;  %v10134_v18 = vld [vmem:[%s11425_s28 + $0x78c] ss:$16 sps:$4 sm:$0xff]   ;;  %v10129_v19 = vld [vmem:[%s11425_s28 + $0x780] ss:$16 sps:$4 sm:$0xff]  }
  0xd2   : > { %6770 = vmatpush1.bf16.msra.mxu0 %v10045_v21  ;;  %7426 = vmatpush1.bf16.msra.mxu1 %v10048_v22  ;;  %v10137_v21 = vld [vmem:[%s11425_s28 + $0x7a4] ss:$16 sps:$4 sm:$0xff]   ;;  %v10140_v22 = vld [vmem:[%s11425_s28 + $0x7ac] ss:$16 sps:$4 sm:$0xff]  }
  0xd3   : > { %6771 = vmatprep.subr.bf16.mxu0 %v10053_v23  ;;  %7427 = vmatprep.subr.bf16.mxu1 %v10056_v25  ;;  %v10135_v23 = vld [vmem:[%s11425_s28 + $0x7a0] ss:$16 sps:$4 sm:$0xff]   ;;  %v10138_v25 = vld [vmem:[%s11425_s28 + $0x7a8] ss:$16 sps:$4 sm:$0xff]  }
  0xd6   : > { %6772 = vmatpush1.bf16.msra.mxu0 %v10051_v24  ;;  %7428 = vmatpush1.bf16.msra.mxu1 %v10054_v10  ;;  %v10143_v24 = vld [vmem:[%s11425_s28 + $0x7c4] ss:$16 sps:$4 sm:$0xff]   ;;  %v10146_v10 = vld [vmem:[%s11425_s28 + $0x7cc] ss:$16 sps:$4 sm:$0xff]  }
  0xd7   : > { %6782 = vmatprep.subr.bf16.mxu0 %v10059_v28  ;;  %7438 = vmatprep.subr.bf16.mxu1 %v10062_v29  ;;  %v10141_v28 = vld [vmem:[%s11425_s28 + $0x7c0] ss:$16 sps:$4 sm:$0xff]  }
  0xd8   : > { %v11712_v29 = vld [vmem:[%s11420_s24 + $0x10] sm:$0xff] }
  0xd9   : > { %6774 = vmatmul.mubr.bf16.vlgmr.msra.gmra.mrb[0].mxu0 %v487_v31  ;;  %7430 = vmatmul.mubr.bf16.vlgmr.msra.gmra.mrb[0].mxu1 %v487_v31  ;;  %v10149_v31 = vld [vmem:[%s11425_s28 + $0x7e4] ss:$16 sps:$4 sm:$0xff]  }
  0xda   : > { %6783 = vmatpush1.bf16.msra.mxu0 %v10057_v32  ;;  %7439 = vmatpush1.bf16.msra.mxu1 %v10060_v33  ;;  %v10152_v32 = vld [vmem:[%s11425_s28 + $0x7ec] ss:$16 sps:$4 sm:$0xff]   ;;  %v11719_v33 = vrot.slane %v11712_v29, %v11475_v50 }
  0xdb   : > { %6784 = vmatprep.subr.bf16.mxu0 %v10065_v34  ;;  %7440 = vmatprep.subr.bf16.mxu1 %v10068_v35  ;;  %v10147_v34 = vld [vmem:[%s11425_s28 + $0x7e0] ss:$16 sps:$4 sm:$0xff]   ;;  %v10150_v35 = vld [vmem:[%s11425_s28 + $0x7e8] ss:$16 sps:$4 sm:$0xff]  }
  0xdc   : > { %6814 = vmatprep.mubr.bf16.mxu0 %v490_v36  ;;  %7470 = vmatprep.mubr.bf16.mxu1 %v490_v36  ;;  %v10156_v36 = vld [vmem:[%s11425_s28 + $0x804] ss:$16 sps:$4 sm:$0xff]  }
  0xde   : > { %6785 = vmatpush1.bf16.msra.mxu0 %v10063_v27  ;;  %7441 = vmatpush1.bf16.msra.mxu1 %v10066_v37  ;;  %v10159_v27 = vld [vmem:[%s11425_s28 + $0x80c] ss:$16 sps:$4 sm:$0xff]   ;;  %v364_v37 = vcombine.high %v11719_v33, %v11719_v33 }
  0xdf   : > { %6786 = vmatprep.subr.bf16.mxu0 %v10071_v38  ;;  %7442 = vmatprep.subr.bf16.mxu1 %v10074_v39  ;;  %v10154_v38 = vld [vmem:[%s11425_s28 + $0x800] ss:$16 sps:$4 sm:$0xff]   ;;  %v489_v39 = vpack.c.bf16 %v11644_v26, %v11644_v26  ;;  %v10168_v26 = vld [vmem:[%s11425_s28 + $0x844] ss:$16 sps:$4 sm:$0xff]  }
  0xe2   : > { %6787 = vmatpush1.bf16.msra.mxu0 %v10069_v40  ;;  %7443 = vmatpush1.bf16.msra.mxu1 %v10072_v41  ;;  %v10157_v40 = vld [vmem:[%s11425_s28 + $0x808] ss:$16 sps:$4 sm:$0xff]   ;;  %v10162_v41 = vld [vmem:[%s11425_s28 + $0x824] ss:$16 sps:$4 sm:$0xff]  }
  0xe3   : > { %6788 = vmatprep.subr.bf16.mxu0 %v10077_v42  ;;  %7444 = vmatprep.subr.bf16.mxu1 %v10080_v43  ;;  %v10165_v42 = vld [vmem:[%s11425_s28 + $0x82c] ss:$16 sps:$4 sm:$0xff]   ;;  %v492_v43 = vpack.c.bf16 %v364_v37, %v364_v37  ;;  %v10238_v37 = vld [vmem:[%s11425_s28 + $0x9c0] ss:$16 sps:$4 sm:$0xff]  }
  0xe6   : > { %6789 = vmatpush1.bf16.msra.mxu0 %v10075_v45  ;;  %7445 = vmatpush1.bf16.msra.mxu1 %v10078_v46  ;;  %v10160_v45 = vld [vmem:[%s11425_s28 + $0x820] ss:$16 sps:$4 sm:$0xff]   ;;  %v10163_v46 = vld [vmem:[%s11425_s28 + $0x828] ss:$16 sps:$4 sm:$0xff]  }
  0xe7   : > { %6790 = vmatprep.subr.bf16.mxu0 %v10083_v47  ;;  %7446 = vmatprep.subr.bf16.mxu1 %v10086_v48  ;;  %v10171_v47 = vld [vmem:[%s11425_s28 + $0x84c] ss:$16 sps:$4 sm:$0xff]   ;;  %v10166_v48 = vld [vmem:[%s11425_s28 + $0x840] ss:$16 sps:$4 sm:$0xff]  }
  0xea   : > { %6791 = vmatpush1.bf16.msra.mxu0 %v10081_v49  ;;  %7447 = vmatpush1.bf16.msra.mxu1 %v10084_v51  ;;  %v10169_v49 = vld [vmem:[%s11425_s28 + $0x848] ss:$16 sps:$4 sm:$0xff]   ;;  %v10174_v51 = vld [vmem:[%s11425_s28 + $0x864] ss:$16 sps:$4 sm:$0xff]  }
  0xeb   : > { %6792 = vmatprep.subr.bf16.mxu0 %v10089_v52  ;;  %7448 = vmatprep.subr.bf16.mxu1 %v10092_v53  ;;  %v10177_v52 = vld [vmem:[%s11425_s28 + $0x86c] ss:$16 sps:$4 sm:$0xff]   ;;  %v10172_v53 = vld [vmem:[%s11425_s28 + $0x860] ss:$16 sps:$4 sm:$0xff]  }
  0xee   : > { %6793 = vmatpush1.bf16.msra.mxu0 %v10087_v54  ;;  %7449 = vmatpush1.bf16.msra.mxu1 %v10090_v55  ;;  %v10175_v54 = vld [vmem:[%s11425_s28 + $0x868] ss:$16 sps:$4 sm:$0xff]   ;;  %v10180_v55 = vld [vmem:[%s11425_s28 + $0x884] ss:$16 sps:$4 sm:$0xff]  }
  0xef   : > { %6794 = vmatprep.subr.bf16.mxu0 %v10095_v56  ;;  %7450 = vmatprep.subr.bf16.mxu1 %v10098_v57  ;;  %v10183_v56 = vld [vmem:[%s11425_s28 + $0x88c] ss:$16 sps:$4 sm:$0xff]   ;;  %v10178_v57 = vld [vmem:[%s11425_s28 + $0x880] ss:$16 sps:$4 sm:$0xff]  }
  0xf2   : > { %6795 = vmatpush1.bf16.msra.mxu0 %v10093_v58  ;;  %7451 = vmatpush1.bf16.msra.mxu1 %v10096_v59  ;;  %v10181_v58 = vld [vmem:[%s11425_s28 + $0x888] ss:$16 sps:$4 sm:$0xff]   ;;  %v10186_v59 = vld [vmem:[%s11425_s28 + $0x8a4] ss:$16 sps:$4 sm:$0xff]  }
  0xf3   : > { %6796 = vmatprep.subr.bf16.mxu0 %v10101_v60  ;;  %7452 = vmatprep.subr.bf16.mxu1 %v10104_v61  ;;  %v10189_v60 = vld [vmem:[%s11425_s28 + $0x8ac] ss:$16 sps:$4 sm:$0xff]   ;;  %v10184_v61 = vld [vmem:[%s11425_s28 + $0x8a0] ss:$16 sps:$4 sm:$0xff]  }
  0xf6   : > { %6797 = vmatpush1.bf16.msra.mxu0 %v10099_v62  ;;  %7453 = vmatpush1.bf16.msra.mxu1 %v10102_v63  ;;  %v10187_v62 = vld [vmem:[%s11425_s28 + $0x8a8] ss:$16 sps:$4 sm:$0xff]   ;;  %v10192_v63 = vld [vmem:[%s11425_s28 + $0x8c4] ss:$16 sps:$4 sm:$0xff]  }
  0xf7   : > { %6798 = vmatprep.subr.bf16.mxu0 %v10107_v0  ;;  %7454 = vmatprep.subr.bf16.mxu1 %v10110_v1  ;;  %v10195_v0 = vld [vmem:[%s11425_s28 + $0x8cc] ss:$16 sps:$4 sm:$0xff]   ;;  %v10190_v1 = vld [vmem:[%s11425_s28 + $0x8c0] ss:$16 sps:$4 sm:$0xff]  }
  0xfa   : > { %6799 = vmatpush1.bf16.msra.mxu0 %v10105_v2  ;;  %7455 = vmatpush1.bf16.msra.mxu1 %v10108_v3  ;;  %v10193_v2 = vld [vmem:[%s11425_s28 + $0x8c8] ss:$16 sps:$4 sm:$0xff]   ;;  %v10198_v3 = vld [vmem:[%s11425_s28 + $0x8e4] ss:$16 sps:$4 sm:$0xff]  }
  0xfb   : > { %6800 = vmatprep.subr.bf16.mxu0 %v10113_v4  ;;  %7456 = vmatprep.subr.bf16.mxu1 %v10116_v5  ;;  %v10201_v4 = vld [vmem:[%s11425_s28 + $0x8ec] ss:$16 sps:$4 sm:$0xff]   ;;  %v10196_v5 = vld [vmem:[%s11425_s28 + $0x8e0] ss:$16 sps:$4 sm:$0xff]  }
  0xfe   : > { %6801 = vmatpush1.bf16.msra.mxu0 %v10111_v6  ;;  %7457 = vmatpush1.bf16.msra.mxu1 %v10114_v7  ;;  %v10199_v6 = vld [vmem:[%s11425_s28 + $0x8e8] ss:$16 sps:$4 sm:$0xff]   ;;  %v10204_v7 = vld [vmem:[%s11425_s28 + $0x904] ss:$16 sps:$4 sm:$0xff]  }
  0xff   : > { %6802 = vmatprep.subr.bf16.mxu0 %v10119_v8  ;;  %7458 = vmatprep.subr.bf16.mxu1 %v10122_v9  ;;  %v10207_v8 = vld [vmem:[%s11425_s28 + $0x90c] ss:$16 sps:$4 sm:$0xff]   ;;  %v10202_v9 = vld [vmem:[%s11425_s28 + $0x900] ss:$16 sps:$4 sm:$0xff]  }
 0x102   : > { %6803 = vmatpush1.bf16.msra.mxu0 %v10117_v11  ;;  %7459 = vmatpush1.bf16.msra.mxu1 %v10120_v12  ;;  %v10205_v11 = vld [vmem:[%s11425_s28 + $0x908] ss:$16 sps:$4 sm:$0xff]   ;;  %v10210_v12 = vld [vmem:[%s11425_s28 + $0x924] ss:$16 sps:$4 sm:$0xff]  }
 0x103   : > { %6804 = vmatprep.subr.bf16.mxu0 %v10125_v13  ;;  %7460 = vmatprep.subr.bf16.mxu1 %v10128_v14  ;;  %v10213_v13 = vld [vmem:[%s11425_s28 + $0x92c] ss:$16 sps:$4 sm:$0xff]   ;;  %v10208_v14 = vld [vmem:[%s11425_s28 + $0x920] ss:$16 sps:$4 sm:$0xff]  }
 0x106   : > { %6805 = vmatpush1.bf16.msra.mxu0 %v10123_v15  ;;  %7461 = vmatpush1.bf16.msra.mxu1 %v10126_v16  ;;  %v10211_v15 = vld [vmem:[%s11425_s28 + $0x928] ss:$16 sps:$4 sm:$0xff]   ;;  %v10216_v16 = vld [vmem:[%s11425_s28 + $0x944] ss:$16 sps:$4 sm:$0xff]  }
 0x107   : > { %6806 = vmatprep.subr.bf16.mxu0 %v10131_v17  ;;  %7462 = vmatprep.subr.bf16.mxu1 %v10134_v18  ;;  %v10219_v17 = vld [vmem:[%s11425_s28 + $0x94c] ss:$16 sps:$4 sm:$0xff]   ;;  %v10214_v18 = vld [vmem:[%s11425_s28 + $0x940] ss:$16 sps:$4 sm:$0xff]  }
 0x10a   : > { %6807 = vmatpush1.bf16.msra.mxu0 %v10129_v19  ;;  %7463 = vmatpush1.bf16.msra.mxu1 %v10132_v20  ;;  %v10217_v19 = vld [vmem:[%s11425_s28 + $0x948] ss:$16 sps:$4 sm:$0xff]   ;;  %v10222_v20 = vld [vmem:[%s11425_s28 + $0x964] ss:$16 sps:$4 sm:$0xff]  }
 0x10b   : > { %6808 = vmatprep.subr.bf16.mxu0 %v10137_v21  ;;  %7464 = vmatprep.subr.bf16.mxu1 %v10140_v22  ;;  %v10225_v21 = vld [vmem:[%s11425_s28 + $0x96c] ss:$16 sps:$4 sm:$0xff]   ;;  %v10220_v22 = vld [vmem:[%s11425_s28 + $0x960] ss:$16 sps:$4 sm:$0xff]  }
 0x10e   : > { %6809 = vmatpush1.bf16.msra.mxu0 %v10135_v23  ;;  %7465 = vmatpush1.bf16.msra.mxu1 %v10138_v25  ;;  %v10223_v23 = vld [vmem:[%s11425_s28 + $0x968] ss:$16 sps:$4 sm:$0xff]   ;;  %v10228_v25 = vld [vmem:[%s11425_s28 + $0x984] ss:$16 sps:$4 sm:$0xff]  }
 0x10f   : > { %6810 = vmatprep.subr.bf16.mxu0 %v10143_v24  ;;  %7466 = vmatprep.subr.bf16.mxu1 %v10146_v10  ;;  %v10231_v24 = vld [vmem:[%s11425_s28 + $0x98c] ss:$16 sps:$4 sm:$0xff]   ;;  %v10226_v10 = vld [vmem:[%s11425_s28 + $0x980] ss:$16 sps:$4 sm:$0xff]  }
 0x112   : > { %6811 = vmatpush1.bf16.msra.mxu0 %v10141_v28  ;;  %7467 = vmatpush1.bf16.msra.mxu1 %v10144_v30  ;;  %v10229_v28 = vld [vmem:[%s11425_s28 + $0x988] ss:$16 sps:$4 sm:$0xff]   ;;  %v10234_v30 = vld [vmem:[%s11425_s28 + $0x9a4] ss:$16 sps:$4 sm:$0xff]  }
 0x113   : > { %6812 = vmatprep.subr.bf16.mxu0 %v10149_v31  ;;  %7468 = vmatprep.subr.bf16.mxu1 %v10152_v32  ;;  %v10237_v31 = vld [vmem:[%s11425_s28 + $0x9ac] ss:$16 sps:$4 sm:$0xff]   ;;  %v10232_v32 = vld [vmem:[%s11425_s28 + $0x9a0] ss:$16 sps:$4 sm:$0xff]  }
 0x116   : > { %6813 = vmatpush1.bf16.msra.mxu0 %v10147_v34  ;;  %7469 = vmatpush1.bf16.msra.mxu1 %v10150_v35  ;;  %v10235_v34 = vld [vmem:[%s11425_s28 + $0x9a8] ss:$16 sps:$4 sm:$0xff]   ;;  %v10240_v35 = vld [vmem:[%s11425_s28 + $0x9c4] ss:$16 sps:$4 sm:$0xff]  }
 0x117   : > { %6823 = vmatprep.subr.bf16.mxu0 %v10156_v36  ;;  %7479 = vmatprep.subr.bf16.mxu1 %v10159_v27  ;;  %v10243_v36 = vld [vmem:[%s11425_s28 + $0x9cc] ss:$16 sps:$4 sm:$0xff]   ;;  %v349_v27 = vcombine.high %v11712_v29, %v11712_v29  ;;  %v10244_v29 = vld [vmem:[%s11425_s28 + $0x9e0] ss:$16 sps:$4 sm:$0xff]  }
 0x119   : > { %6815 = vmatmul.mubr.bf16.vlgmr.msra.gmra.mrb[0].mxu0 %v489_v39  ;;  %7471 = vmatmul.mubr.bf16.vlgmr.msra.gmra.mrb[0].mxu1 %v489_v39  ;;  %v10246_v39 = vld [vmem:[%s11425_s28 + $0x9e4] ss:$16 sps:$4 sm:$0xff]  }
 0x11a   : > { %6824 = vmatpush1.bf16.msra.mxu0 %v10154_v38  ;;  %7480 = vmatpush1.bf16.msra.mxu1 %v10157_v40  ;;  %v10241_v38 = vld [vmem:[%s11425_s28 + $0x9c8] ss:$16 sps:$4 sm:$0xff]   ;;  %v10249_v40 = vld [vmem:[%s11425_s28 + $0x9ec] ss:$16 sps:$4 sm:$0xff]  }
 0x11b   : > { %6825 = vmatprep.subr.bf16.mxu0 %v10162_v41  ;;  %7481 = vmatprep.subr.bf16.mxu1 %v10165_v42  ;;  %v11792_v41 = vrot.slane %v349_v27, %v11475_v50  ;;  %v10247_v42 = vld [vmem:[%s11425_s28 + $0x9e8] ss:$16 sps:$4 sm:$0xff]  }
 0x11c   : > { %6855 = vmatprep.mubr.bf16.mxu0 %v492_v43  ;;  %7511 = vmatprep.mubr.bf16.mxu1 %v492_v43  ;;  %v10252_v43 = vld [vmem:[%s11425_s28 + $0xa04] ss:$16 sps:$4 sm:$0xff]   ;;  %v10325_v27 = vld [vmem:[%s11425_s28 + $0xb88] ss:$16 sps:$4 sm:$0xff]  }
 0x11e   : > { %6826 = vmatpush1.bf16.msra.mxu0 %v10160_v45  ;;  %7482 = vmatpush1.bf16.msra.mxu1 %v10163_v46  ;;  %v10255_v45 = vld [vmem:[%s11425_s28 + $0xa0c] ss:$16 sps:$4 sm:$0xff]   ;;  %v365_v46 = vcombine.high %v11792_v41, %v11792_v41 }
 0x11f   : > { %6827 = vmatprep.subr.bf16.mxu0 %v10168_v26  ;;  %7483 = vmatprep.subr.bf16.mxu1 %v10171_v47  ;;  %v491_v26 = vpack.c.bf16 %v11719_v33, %v11719_v33  ;;  %v10250_v47 = vld [vmem:[%s11425_s28 + $0xa00] ss:$16 sps:$4 sm:$0xff]  }
 0x120   : > { %v10256_v33 = vld [vmem:[%s11425_s28 + $0xa20] ss:$16 sps:$4 sm:$0xff]  }
 0x122   : > { %6828 = vmatpush1.bf16.msra.mxu0 %v10166_v48  ;;  %7484 = vmatpush1.bf16.msra.mxu1 %v10169_v49  ;;  %v10253_v48 = vld [vmem:[%s11425_s28 + $0xa08] ss:$16 sps:$4 sm:$0xff]   ;;  %v10258_v49 = vld [vmem:[%s11425_s28 + $0xa24] ss:$16 sps:$4 sm:$0xff]  }
 0x123   : > { %6829 = vmatprep.subr.bf16.mxu0 %v10174_v51  ;;  %7485 = vmatprep.subr.bf16.mxu1 %v10177_v52  ;;  %v10261_v51 = vld [vmem:[%s11425_s28 + $0xa2c] ss:$16 sps:$4 sm:$0xff]   ;;  %v494_v52 = vpack.c.bf16 %v365_v46, %v365_v46  ;;  %v10337_v46 = vld [vmem:[%s11425_s28 + $0xbc8] ss:$16 sps:$4 sm:$0xff]  }
 0x126   : > { %6830 = vmatpush1.bf16.msra.mxu0 %v10172_v53  ;;  %7486 = vmatpush1.bf16.msra.mxu1 %v10175_v54  ;;  %v10259_v53 = vld [vmem:[%s11425_s28 + $0xa28] ss:$16 sps:$4 sm:$0xff]   ;;  %v10264_v54 = vld [vmem:[%s11425_s28 + $0xa44] ss:$16 sps:$4 sm:$0xff]  }
 0x127   : > { %6831 = vmatprep.subr.bf16.mxu0 %v10180_v55  ;;  %7487 = vmatprep.subr.bf16.mxu1 %v10183_v56  ;;  %v10267_v55 = vld [vmem:[%s11425_s28 + $0xa4c] ss:$16 sps:$4 sm:$0xff]   ;;  %v10262_v56 = vld [vmem:[%s11425_s28 + $0xa40] ss:$16 sps:$4 sm:$0xff]  }
 0x12a   : > { %6832 = vmatpush1.bf16.msra.mxu0 %v10178_v57  ;;  %7488 = vmatpush1.bf16.msra.mxu1 %v10181_v58  ;;  %v10265_v57 = vld [vmem:[%s11425_s28 + $0xa48] ss:$16 sps:$4 sm:$0xff]   ;;  %v10270_v58 = vld [vmem:[%s11425_s28 + $0xa64] ss:$16 sps:$4 sm:$0xff]  }
 0x12b   : > { %6833 = vmatprep.subr.bf16.mxu0 %v10186_v59  ;;  %7489 = vmatprep.subr.bf16.mxu1 %v10189_v60  ;;  %v10273_v59 = vld [vmem:[%s11425_s28 + $0xa6c] ss:$16 sps:$4 sm:$0xff]   ;;  %v10268_v60 = vld [vmem:[%s11425_s28 + $0xa60] ss:$16 sps:$4 sm:$0xff]  }
 0x12e   : > { %6834 = vmatpush1.bf16.msra.mxu0 %v10184_v61  ;;  %7490 = vmatpush1.bf16.msra.mxu1 %v10187_v62  ;;  %v10271_v61 = vld [vmem:[%s11425_s28 + $0xa68] ss:$16 sps:$4 sm:$0xff]   ;;  %v10276_v62 = vld [vmem:[%s11425_s28 + $0xa84] ss:$16 sps:$4 sm:$0xff]  }
 0x12f   : > { %6835 = vmatprep.subr.bf16.mxu0 %v10192_v63  ;;  %7491 = vmatprep.subr.bf16.mxu1 %v10195_v0  ;;  %v10279_v63 = vld [vmem:[%s11425_s28 + $0xa8c] ss:$16 sps:$4 sm:$0xff]   ;;  %v10274_v0 = vld [vmem:[%s11425_s28 + $0xa80] ss:$16 sps:$4 sm:$0xff]  }
 0x132   : > { %6836 = vmatpush1.bf16.msra.mxu0 %v10190_v1  ;;  %7492 = vmatpush1.bf16.msra.mxu1 %v10193_v2  ;;  %v10277_v1 = vld [vmem:[%s11425_s28 + $0xa88] ss:$16 sps:$4 sm:$0xff]   ;;  %v10282_v2 = vld [vmem:[%s11425_s28 + $0xaa4] ss:$16 sps:$4 sm:$0xff]  }
 0x133   : > { %6837 = vmatprep.subr.bf16.mxu0 %v10198_v3  ;;  %7493 = vmatprep.subr.bf16.mxu1 %v10201_v4  ;;  %v10285_v3 = vld [vmem:[%s11425_s28 + $0xaac] ss:$16 sps:$4 sm:$0xff]   ;;  %v10280_v4 = vld [vmem:[%s11425_s28 + $0xaa0] ss:$16 sps:$4 sm:$0xff]  }
 0x136   : > { %6838 = vmatpush1.bf16.msra.mxu0 %v10196_v5  ;;  %7494 = vmatpush1.bf16.msra.mxu1 %v10199_v6  ;;  %v10283_v5 = vld [vmem:[%s11425_s28 + $0xaa8] ss:$16 sps:$4 sm:$0xff]   ;;  %v10288_v6 = vld [vmem:[%s11425_s28 + $0xac4] ss:$16 sps:$4 sm:$0xff]  }
 0x137   : > { %6839 = vmatprep.subr.bf16.mxu0 %v10204_v7  ;;  %7495 = vmatprep.subr.bf16.mxu1 %v10207_v8  ;;  %v10291_v7 = vld [vmem:[%s11425_s28 + $0xacc] ss:$16 sps:$4 sm:$0xff]   ;;  %v10286_v8 = vld [vmem:[%s11425_s28 + $0xac0] ss:$16 sps:$4 sm:$0xff]  }
 0x13a   : > { %6840 = vmatpush1.bf16.msra.mxu0 %v10202_v9  ;;  %7496 = vmatpush1.bf16.msra.mxu1 %v10205_v11  ;;  %v10289_v9 = vld [vmem:[%s11425_s28 + $0xac8] ss:$16 sps:$4 sm:$0xff]   ;;  %v10294_v11 = vld [vmem:[%s11425_s28 + $0xae4] ss:$16 sps:$4 sm:$0xff]  }
 0x13b   : > { %6841 = vmatprep.subr.bf16.mxu0 %v10210_v12  ;;  %7497 = vmatprep.subr.bf16.mxu1 %v10213_v13  ;;  %v10297_v12 = vld [vmem:[%s11425_s28 + $0xaec] ss:$16 sps:$4 sm:$0xff]   ;;  %v10292_v13 = vld [vmem:[%s11425_s28 + $0xae0] ss:$16 sps:$4 sm:$0xff]  }
 0x13e   : > { %6842 = vmatpush1.bf16.msra.mxu0 %v10208_v14  ;;  %7498 = vmatpush1.bf16.msra.mxu1 %v10211_v15  ;;  %v10295_v14 = vld [vmem:[%s11425_s28 + $0xae8] ss:$16 sps:$4 sm:$0xff]   ;;  %v10300_v15 = vld [vmem:[%s11425_s28 + $0xb04] ss:$16 sps:$4 sm:$0xff]  }
 0x13f   : > { %6843 = vmatprep.subr.bf16.mxu0 %v10216_v16  ;;  %7499 = vmatprep.subr.bf16.mxu1 %v10219_v17  ;;  %v10303_v16 = vld [vmem:[%s11425_s28 + $0xb0c] ss:$16 sps:$4 sm:$0xff]   ;;  %v10298_v17 = vld [vmem:[%s11425_s28 + $0xb00] ss:$16 sps:$4 sm:$0xff]  }
 0x142   : > { %6844 = vmatpush1.bf16.msra.mxu0 %v10214_v18  ;;  %7500 = vmatpush1.bf16.msra.mxu1 %v10217_v19  ;;  %v10301_v18 = vld [vmem:[%s11425_s28 + $0xb08] ss:$16 sps:$4 sm:$0xff]   ;;  %v10306_v19 = vld [vmem:[%s11425_s28 + $0xb24] ss:$16 sps:$4 sm:$0xff]  }
 0x143   : > { %6845 = vmatprep.subr.bf16.mxu0 %v10222_v20  ;;  %7501 = vmatprep.subr.bf16.mxu1 %v10225_v21  ;;  %v10309_v20 = vld [vmem:[%s11425_s28 + $0xb2c] ss:$16 sps:$4 sm:$0xff]   ;;  %v10304_v21 = vld [vmem:[%s11425_s28 + $0xb20] ss:$16 sps:$4 sm:$0xff]  }
 0x146   : > { %6846 = vmatpush1.bf16.msra.mxu0 %v10220_v22  ;;  %7502 = vmatpush1.bf16.msra.mxu1 %v10223_v23  ;;  %v10307_v22 = vld [vmem:[%s11425_s28 + $0xb28] ss:$16 sps:$4 sm:$0xff]   ;;  %v10312_v23 = vld [vmem:[%s11425_s28 + $0xb44] ss:$16 sps:$4 sm:$0xff]  }
 0x147   : > { %6847 = vmatprep.subr.bf16.mxu0 %v10228_v25  ;;  %7503 = vmatprep.subr.bf16.mxu1 %v10231_v24  ;;  %v10315_v25 = vld [vmem:[%s11425_s28 + $0xb4c] ss:$16 sps:$4 sm:$0xff]   ;;  %v10310_v24 = vld [vmem:[%s11425_s28 + $0xb40] ss:$16 sps:$4 sm:$0xff]  }
 0x14a   : > { %6848 = vmatpush1.bf16.msra.mxu0 %v10226_v10  ;;  %7504 = vmatpush1.bf16.msra.mxu1 %v10229_v28  ;;  %v10313_v10 = vld [vmem:[%s11425_s28 + $0xb48] ss:$16 sps:$4 sm:$0xff]   ;;  %v10318_v28 = vld [vmem:[%s11425_s28 + $0xb64] ss:$16 sps:$4 sm:$0xff]  }
 0x14b   : > { %6849 = vmatprep.subr.bf16.mxu0 %v10234_v30  ;;  %7505 = vmatprep.subr.bf16.mxu1 %v10237_v31  ;;  %v10321_v30 = vld [vmem:[%s11425_s28 + $0xb6c] ss:$16 sps:$4 sm:$0xff]   ;;  %v10316_v31 = vld [vmem:[%s11425_s28 + $0xb60] ss:$16 sps:$4 sm:$0xff]  }
 0x14e   : > { %6850 = vmatpush1.bf16.msra.mxu0 %v10232_v32  ;;  %7506 = vmatpush1.bf16.msra.mxu1 %v10235_v34  ;;  %v10319_v32 = vld [vmem:[%s11425_s28 + $0xb68] ss:$16 sps:$4 sm:$0xff]   ;;  %v10324_v34 = vld [vmem:[%s11425_s28 + $0xb84] ss:$16 sps:$4 sm:$0xff]  }
 0x14f   : > { %6851 = vmatprep.subr.bf16.mxu0 %v10240_v35  ;;  %7507 = vmatprep.subr.bf16.mxu1 %v10243_v36  ;;  %v10327_v35 = vld [vmem:[%s11425_s28 + $0xb8c] ss:$16 sps:$4 sm:$0xff]   ;;  %v10322_v36 = vld [vmem:[%s11425_s28 + $0xb80] ss:$16 sps:$4 sm:$0xff]  }
 0x152   : > { %6852 = vmatpush1.bf16.msra.mxu0 %v10238_v37  ;;  %7508 = vmatpush1.bf16.msra.mxu1 %v10241_v38  ;;  %v10330_v37 = vld [vmem:[%s11425_s28 + $0xba4] ss:$16 sps:$4 sm:$0xff]   ;;  %v10333_v38 = vld [vmem:[%s11425_s28 + $0xbac] ss:$16 sps:$4 sm:$0xff]  }
 0x153   : > { %6853 = vmatprep.subr.bf16.mxu0 %v10246_v39  ;;  %7509 = vmatprep.subr.bf16.mxu1 %v10249_v40  ;;  %v10328_v39 = vld [vmem:[%s11425_s28 + $0xba0] ss:$16 sps:$4 sm:$0xff]   ;;  %v10331_v40 = vld [vmem:[%s11425_s28 + $0xba8] ss:$16 sps:$4 sm:$0xff]  }
 0x156   : > { %6854 = vmatpush1.bf16.msra.mxu0 %v10244_v29  ;;  %7510 = vmatpush1.bf16.msra.mxu1 %v10247_v42  ;;  %v10336_v29 = vld [vmem:[%s11425_s28 + $0xbc4] ss:$16 sps:$4 sm:$0xff]   ;;  %v10339_v42 = vld [vmem:[%s11425_s28 + $0xbcc] ss:$16 sps:$4 sm:$0xff]  }
 0x157   : > { %6864 = vmatprep.subr.bf16.mxu0 %v10252_v43  ;;  %7520 = vmatprep.subr.bf16.mxu1 %v10255_v45  ;;  %v11859_v43 = vld [vmem:[%s11420_s24 + $0x18] sm:$0xff]  ;;  %v10334_v45 = vld [vmem:[%s11425_s28 + $0xbc0] ss:$16 sps:$4 sm:$0xff]  }
 0x159   : > { %6856 = vmatmul.mubr.bf16.vlgmr.msra.gmra.mrb[0].mxu0 %v491_v26  ;;  %7512 = vmatmul.mubr.bf16.vlgmr.msra.gmra.mrb[0].mxu1 %v491_v26  ;;  %v10342_v26 = vld [vmem:[%s11425_s28 + $0xbe4] ss:$16 sps:$4 sm:$0xff]  }
 0x15a   : > { %6865 = vmatpush1.bf16.msra.mxu0 %v10250_v47  ;;  %7521 = vmatpush1.bf16.msra.mxu1 %v10253_v48  ;;  %v10345_v47 = vld [vmem:[%s11425_s28 + $0xbec] ss:$16 sps:$4 sm:$0xff]   ;;  %v11867_v48 = vrot.slane %v11859_v43, %v11475_v50 }
 0x15b   : > { %6866 = vmatprep.subr.bf16.mxu0 %v10258_v49  ;;  %7522 = vmatprep.subr.bf16.mxu1 %v10261_v51  ;;  %v10340_v49 = vld [vmem:[%s11425_s28 + $0xbe0] ss:$16 sps:$4 sm:$0xff]   ;;  %v10343_v51 = vld [vmem:[%s11425_s28 + $0xbe8] ss:$16 sps:$4 sm:$0xff]  }
 0x15c   : > { %6896 = vmatprep.mubr.bf16.mxu0 %v494_v52  ;;  %7552 = vmatprep.mubr.bf16.mxu1 %v494_v52  ;;  %v10349_v52 = vld [vmem:[%s11425_s28 + $0xc04] ss:$16 sps:$4 sm:$0xff]  }
 0x15e   : > { %6867 = vmatpush1.bf16.msra.mxu0 %v10256_v33  ;;  %7523 = vmatpush1.bf16.msra.mxu1 %v10259_v53  ;;  %v10352_v33 = vld [vmem:[%s11425_s28 + $0xc0c] ss:$16 sps:$4 sm:$0xff]   ;;  %v381_v53 = vcombine.high %v11867_v48, %v11867_v48 }
 0x15f   : > { %6868 = vmatprep.subr.bf16.mxu0 %v10264_v54  ;;  %7524 = vmatprep.subr.bf16.mxu1 %v10267_v55  ;;  %v493_v54 = vpack.c.bf16 %v11792_v41, %v11792_v41  ;;  %v10347_v55 = vld [vmem:[%s11425_s28 + $0xc00] ss:$16 sps:$4 sm:$0xff]  }
 0x160   : > { %v10353_v41 = vld [vmem:[%s11425_s28 + $0xc20] ss:$16 sps:$4 sm:$0xff]  }
 0x162   : > { %6869 = vmatpush1.bf16.msra.mxu0 %v10262_v56  ;;  %7525 = vmatpush1.bf16.msra.mxu1 %v10265_v57  ;;  %v10350_v56 = vld [vmem:[%s11425_s28 + $0xc08] ss:$16 sps:$4 sm:$0xff]   ;;  %v10355_v57 = vld [vmem:[%s11425_s28 + $0xc24] ss:$16 sps:$4 sm:$0xff]  }
 0x163   : > { %6870 = vmatprep.subr.bf16.mxu0 %v10270_v58  ;;  %7526 = vmatprep.subr.bf16.mxu1 %v10273_v59  ;;  %v10358_v58 = vld [vmem:[%s11425_s28 + $0xc2c] ss:$16 sps:$4 sm:$0xff]   ;;  %v496_v59 = vpack.c.bf16 %v381_v53, %v381_v53  ;;  %v10431_v53 = vld [vmem:[%s11425_s28 + $0xdc0] ss:$16 sps:$4 sm:$0xff]  }
 0x166   : > { %6871 = vmatpush1.bf16.msra.mxu0 %v10268_v60  ;;  %7527 = vmatpush1.bf16.msra.mxu1 %v10271_v61  ;;  %v10356_v60 = vld [vmem:[%s11425_s28 + $0xc28] ss:$16 sps:$4 sm:$0xff]   ;;  %v10361_v61 = vld [vmem:[%s11425_s28 + $0xc44] ss:$16 sps:$4 sm:$0xff]  }
 0x167   : > { %6872 = vmatprep.subr.bf16.mxu0 %v10276_v62  ;;  %7528 = vmatprep.subr.bf16.mxu1 %v10279_v63  ;;  %v10364_v62 = vld [vmem:[%s11425_s28 + $0xc4c] ss:$16 sps:$4 sm:$0xff]   ;;  %v10359_v63 = vld [vmem:[%s11425_s28 + $0xc40] ss:$16 sps:$4 sm:$0xff]  }
 0x16a   : > { %6873 = vmatpush1.bf16.msra.mxu0 %v10274_v0  ;;  %7529 = vmatpush1.bf16.msra.mxu1 %v10277_v1  ;;  %v10362_v0 = vld [vmem:[%s11425_s28 + $0xc48] ss:$16 sps:$4 sm:$0xff]   ;;  %v10367_v1 = vld [vmem:[%s11425_s28 + $0xc64] ss:$16 sps:$4 sm:$0xff]  }
 0x16b   : > { %6874 = vmatprep.subr.bf16.mxu0 %v10282_v2  ;;  %7530 = vmatprep.subr.bf16.mxu1 %v10285_v3  ;;  %v10370_v2 = vld [vmem:[%s11425_s28 + $0xc6c] ss:$16 sps:$4 sm:$0xff]   ;;  %v10365_v3 = vld [vmem:[%s11425_s28 + $0xc60] ss:$16 sps:$4 sm:$0xff]  }
 0x16e   : > { %6875 = vmatpush1.bf16.msra.mxu0 %v10280_v4  ;;  %7531 = vmatpush1.bf16.msra.mxu1 %v10283_v5  ;;  %v10368_v4 = vld [vmem:[%s11425_s28 + $0xc68] ss:$16 sps:$4 sm:$0xff]   ;;  %v10373_v5 = vld [vmem:[%s11425_s28 + $0xc84] ss:$16 sps:$4 sm:$0xff]  }
 0x16f   : > { %6876 = vmatprep.subr.bf16.mxu0 %v10288_v6  ;;  %7532 = vmatprep.subr.bf16.mxu1 %v10291_v7  ;;  %v10376_v6 = vld [vmem:[%s11425_s28 + $0xc8c] ss:$16 sps:$4 sm:$0xff]   ;;  %v10371_v7 = vld [vmem:[%s11425_s28 + $0xc80] ss:$16 sps:$4 sm:$0xff]  }
 0x172   : > { %6877 = vmatpush1.bf16.msra.mxu0 %v10286_v8  ;;  %7533 = vmatpush1.bf16.msra.mxu1 %v10289_v9  ;;  %v10374_v8 = vld [vmem:[%s11425_s28 + $0xc88] ss:$16 sps:$4 sm:$0xff]   ;;  %v10379_v9 = vld [vmem:[%s11425_s28 + $0xca4] ss:$16 sps:$4 sm:$0xff]  }
 0x173   : > { %6878 = vmatprep.subr.bf16.mxu0 %v10294_v11  ;;  %7534 = vmatprep.subr.bf16.mxu1 %v10297_v12  ;;  %v10382_v11 = vld [vmem:[%s11425_s28 + $0xcac] ss:$16 sps:$4 sm:$0xff]   ;;  %v10377_v12 = vld [vmem:[%s11425_s28 + $0xca0] ss:$16 sps:$4 sm:$0xff]  }
 0x176   : > { %6879 = vmatpush1.bf16.msra.mxu0 %v10292_v13  ;;  %7535 = vmatpush1.bf16.msra.mxu1 %v10295_v14  ;;  %v10380_v13 = vld [vmem:[%s11425_s28 + $0xca8] ss:$16 sps:$4 sm:$0xff]   ;;  %v10385_v14 = vld [vmem:[%s11425_s28 + $0xcc4] ss:$16 sps:$4 sm:$0xff]  }
 0x177   : > { %6880 = vmatprep.subr.bf16.mxu0 %v10300_v15  ;;  %7536 = vmatprep.subr.bf16.mxu1 %v10303_v16  ;;  %v10388_v15 = vld [vmem:[%s11425_s28 + $0xccc] ss:$16 sps:$4 sm:$0xff]   ;;  %v10383_v16 = vld [vmem:[%s11425_s28 + $0xcc0] ss:$16 sps:$4 sm:$0xff]  }
 0x17a   : > { %6881 = vmatpush1.bf16.msra.mxu0 %v10298_v17  ;;  %7537 = vmatpush1.bf16.msra.mxu1 %v10301_v18  ;;  %v10386_v17 = vld [vmem:[%s11425_s28 + $0xcc8] ss:$16 sps:$4 sm:$0xff]   ;;  %v10391_v18 = vld [vmem:[%s11425_s28 + $0xce4] ss:$16 sps:$4 sm:$0xff]  }
 0x17b   : > { %6882 = vmatprep.subr.bf16.mxu0 %v10306_v19  ;;  %7538 = vmatprep.subr.bf16.mxu1 %v10309_v20  ;;  %v10394_v19 = vld [vmem:[%s11425_s28 + $0xcec] ss:$16 sps:$4 sm:$0xff]   ;;  %v10389_v20 = vld [vmem:[%s11425_s28 + $0xce0] ss:$16 sps:$4 sm:$0xff]  }
 0x17e   : > { %6883 = vmatpush1.bf16.msra.mxu0 %v10304_v21  ;;  %7539 = vmatpush1.bf16.msra.mxu1 %v10307_v22  ;;  %v10392_v21 = vld [vmem:[%s11425_s28 + $0xce8] ss:$16 sps:$4 sm:$0xff]   ;;  %v10397_v22 = vld [vmem:[%s11425_s28 + $0xd04] ss:$16 sps:$4 sm:$0xff]  }
 0x17f   : > { %6884 = vmatprep.subr.bf16.mxu0 %v10312_v23  ;;  %7540 = vmatprep.subr.bf16.mxu1 %v10315_v25  ;;  %v10400_v23 = vld [vmem:[%s11425_s28 + $0xd0c] ss:$16 sps:$4 sm:$0xff]   ;;  %v10395_v25 = vld [vmem:[%s11425_s28 + $0xd00] ss:$16 sps:$4 sm:$0xff]  }
 0x182   : > { %6885 = vmatpush1.bf16.msra.mxu0 %v10310_v24  ;;  %7541 = vmatpush1.bf16.msra.mxu1 %v10313_v10  ;;  %v10398_v24 = vld [vmem:[%s11425_s28 + $0xd08] ss:$16 sps:$4 sm:$0xff]   ;;  %v10403_v10 = vld [vmem:[%s11425_s28 + $0xd24] ss:$16 sps:$4 sm:$0xff]  }
 0x183   : > { %6886 = vmatprep.subr.bf16.mxu0 %v10318_v28  ;;  %7542 = vmatprep.subr.bf16.mxu1 %v10321_v30  ;;  %v10406_v28 = vld [vmem:[%s11425_s28 + $0xd2c] ss:$16 sps:$4 sm:$0xff]   ;;  %v10401_v30 = vld [vmem:[%s11425_s28 + $0xd20] ss:$16 sps:$4 sm:$0xff]  }
 0x186   : > { %6887 = vmatpush1.bf16.msra.mxu0 %v10316_v31  ;;  %7543 = vmatpush1.bf16.msra.mxu1 %v10319_v32  ;;  %v10404_v31 = vld [vmem:[%s11425_s28 + $0xd28] ss:$16 sps:$4 sm:$0xff]   ;;  %v10409_v32 = vld [vmem:[%s11425_s28 + $0xd44] ss:$16 sps:$4 sm:$0xff]  }
 0x187   : > { %6888 = vmatprep.subr.bf16.mxu0 %v10324_v34  ;;  %7544 = vmatprep.subr.bf16.mxu1 %v10327_v35  ;;  %v10412_v34 = vld [vmem:[%s11425_s28 + $0xd4c] ss:$16 sps:$4 sm:$0xff]   ;;  %v10407_v35 = vld [vmem:[%s11425_s28 + $0xd40] ss:$16 sps:$4 sm:$0xff]  }
 0x18a   : > { %6889 = vmatpush1.bf16.msra.mxu0 %v10322_v36  ;;  %7545 = vmatpush1.bf16.msra.mxu1 %v10325_v27  ;;  %v10410_v36 = vld [vmem:[%s11425_s28 + $0xd48] ss:$16 sps:$4 sm:$0xff]   ;;  %v10415_v27 = vld [vmem:[%s11425_s28 + $0xd64] ss:$16 sps:$4 sm:$0xff]  }
 0x18b   : > { %6890 = vmatprep.subr.bf16.mxu0 %v10330_v37  ;;  %7546 = vmatprep.subr.bf16.mxu1 %v10333_v38  ;;  %v10418_v37 = vld [vmem:[%s11425_s28 + $0xd6c] ss:$16 sps:$4 sm:$0xff]   ;;  %v10413_v38 = vld [vmem:[%s11425_s28 + $0xd60] ss:$16 sps:$4 sm:$0xff]  }
 0x18e   : > { %6891 = vmatpush1.bf16.msra.mxu0 %v10328_v39  ;;  %7547 = vmatpush1.bf16.msra.mxu1 %v10331_v40  ;;  %v10416_v39 = vld [vmem:[%s11425_s28 + $0xd68] ss:$16 sps:$4 sm:$0xff]   ;;  %v10421_v40 = vld [vmem:[%s11425_s28 + $0xd84] ss:$16 sps:$4 sm:$0xff]  }
 0x18f   : > { %6892 = vmatprep.subr.bf16.mxu0 %v10336_v29  ;;  %7548 = vmatprep.subr.bf16.mxu1 %v10339_v42  ;;  %v10424_v29 = vld [vmem:[%s11425_s28 + $0xd8c] ss:$16 sps:$4 sm:$0xff]   ;;  %v10419_v42 = vld [vmem:[%s11425_s28 + $0xd80] ss:$16 sps:$4 sm:$0xff]  }
 0x192   : > { %6893 = vmatpush1.bf16.msra.mxu0 %v10334_v45  ;;  %7549 = vmatpush1.bf16.msra.mxu1 %v10337_v46  ;;  %v10422_v45 = vld [vmem:[%s11425_s28 + $0xd88] ss:$16 sps:$4 sm:$0xff]   ;;  %v10427_v46 = vld [vmem:[%s11425_s28 + $0xda4] ss:$16 sps:$4 sm:$0xff]  }
 0x193   : > { %6894 = vmatprep.subr.bf16.mxu0 %v10342_v26  ;;  %7550 = vmatprep.subr.bf16.mxu1 %v10345_v47  ;;  %v10430_v26 = vld [vmem:[%s11425_s28 + $0xdac] ss:$16 sps:$4 sm:$0xff]   ;;  %v10425_v47 = vld [vmem:[%s11425_s28 + $0xda0] ss:$16 sps:$4 sm:$0xff]  }
 0x196   : > { %6895 = vmatpush1.bf16.msra.mxu0 %v10340_v49  ;;  %7551 = vmatpush1.bf16.msra.mxu1 %v10343_v51  ;;  %v10428_v49 = vld [vmem:[%s11425_s28 + $0xda8] ss:$16 sps:$4 sm:$0xff]   ;;  %v10433_v51 = vld [vmem:[%s11425_s28 + $0xdc4] ss:$16 sps:$4 sm:$0xff]  }
 0x197   : > { %6905 = vmatprep.subr.bf16.mxu0 %v10349_v52  ;;  %7561 = vmatprep.subr.bf16.mxu1 %v10352_v33  ;;  %v10436_v52 = vld [vmem:[%s11425_s28 + $0xdcc] ss:$16 sps:$4 sm:$0xff]   ;;  %v366_v33 = vcombine.high %v11859_v43, %v11859_v43  ;;  %v10437_v43 = vld [vmem:[%s11425_s28 + $0xde0] ss:$16 sps:$4 sm:$0xff]  }
 0x199   : > { %6897 = vmatmul.mubr.bf16.vlgmr.msra.gmra.mrb[0].mxu0 %v493_v54  ;;  %7553 = vmatmul.mubr.bf16.vlgmr.msra.gmra.mrb[0].mxu1 %v493_v54  ;;  %v10434_v54 = vld [vmem:[%s11425_s28 + $0xdc8] ss:$16 sps:$4 sm:$0xff]  }
 0x19a   : > { %6906 = vmatpush1.bf16.msra.mxu0 %v10347_v55  ;;  %7562 = vmatpush1.bf16.msra.mxu1 %v10350_v56  ;;  %v10439_v55 = vld [vmem:[%s11425_s28 + $0xde4] ss:$16 sps:$4 sm:$0xff]   ;;  %v10442_v56 = vld [vmem:[%s11425_s28 + $0xdec] ss:$16 sps:$4 sm:$0xff]  }
 0x19b   : > { %6907 = vmatprep.subr.bf16.mxu0 %v10355_v57  ;;  %7563 = vmatprep.subr.bf16.mxu1 %v10358_v58  ;;  %v11940_v57 = vrot.slane %v366_v33, %v11475_v50  ;;  %v10440_v58 = vld [vmem:[%s11425_s28 + $0xde8] ss:$16 sps:$4 sm:$0xff]  }
 0x19c   : > { %6937 = vmatprep.mubr.bf16.mxu0 %v496_v59  ;;  %7593 = vmatprep.mubr.bf16.mxu1 %v496_v59  ;;  %v10445_v59 = vld [vmem:[%s11425_s28 + $0xe04] ss:$16 sps:$4 sm:$0xff]   ;;  %v10518_v33 = vld [vmem:[%s11425_s28 + $0xf88] ss:$16 sps:$4 sm:$0xff]  }
 0x19e   : > { %6908 = vmatpush1.bf16.msra.mxu0 %v10353_v41  ;;  %7564 = vmatpush1.bf16.msra.mxu1 %v10356_v60  ;;  %v10448_v41 = vld [vmem:[%s11425_s28 + $0xe0c] ss:$16 sps:$4 sm:$0xff]   ;;  %v382_v60 = vcombine.high %v11940_v57, %v11940_v57 }
 0x19f   : > { %6909 = vmatprep.subr.bf16.mxu0 %v10361_v61  ;;  %7565 = vmatprep.subr.bf16.mxu1 %v10364_v62  ;;  %v495_v61 = vpack.c.bf16 %v11867_v48, %v11867_v48  ;;  %v10443_v62 = vld [vmem:[%s11425_s28 + $0xe00] ss:$16 sps:$4 sm:$0xff]  }
 0x1a0   : > { %v10449_v48 = vld [vmem:[%s11425_s28 + $0xe20] ss:$16 sps:$4 sm:$0xff]  }
 0x1a2   : > { %6910 = vmatpush1.bf16.msra.mxu0 %v10359_v63  ;;  %7566 = vmatpush1.bf16.msra.mxu1 %v10362_v0  ;;  %v10446_v63 = vld [vmem:[%s11425_s28 + $0xe08] ss:$16 sps:$4 sm:$0xff]   ;;  %v10451_v0 = vld [vmem:[%s11425_s28 + $0xe24] ss:$16 sps:$4 sm:$0xff]  }
 0x1a3   : > { %6911 = vmatprep.subr.bf16.mxu0 %v10367_v1  ;;  %7567 = vmatprep.subr.bf16.mxu1 %v10370_v2  ;;  %v10454_v1 = vld [vmem:[%s11425_s28 + $0xe2c] ss:$16 sps:$4 sm:$0xff]   ;;  %v498_v2 = vpack.c.bf16 %v382_v60, %v382_v60  ;;  %v10530_v60 = vld [vmem:[%s11425_s28 + $0xfc8] ss:$16 sps:$4 sm:$0xff]  }
 0x1a6   : > { %6912 = vmatpush1.bf16.msra.mxu0 %v10365_v3  ;;  %7568 = vmatpush1.bf16.msra.mxu1 %v10368_v4  ;;  %v10452_v3 = vld [vmem:[%s11425_s28 + $0xe28] ss:$16 sps:$4 sm:$0xff]   ;;  %v10457_v4 = vld [vmem:[%s11425_s28 + $0xe44] ss:$16 sps:$4 sm:$0xff]  }
 0x1a7   : > { %6913 = vmatprep.subr.bf16.mxu0 %v10373_v5  ;;  %7569 = vmatprep.subr.bf16.mxu1 %v10376_v6  ;;  %v10460_v5 = vld [vmem:[%s11425_s28 + $0xe4c] ss:$16 sps:$4 sm:$0xff]   ;;  %v10455_v6 = vld [vmem:[%s11425_s28 + $0xe40] ss:$16 sps:$4 sm:$0xff]  }
 0x1aa   : > { %6914 = vmatpush1.bf16.msra.mxu0 %v10371_v7  ;;  %7570 = vmatpush1.bf16.msra.mxu1 %v10374_v8  ;;  %v10458_v7 = vld [vmem:[%s11425_s28 + $0xe48] ss:$16 sps:$4 sm:$0xff]   ;;  %v10463_v8 = vld [vmem:[%s11425_s28 + $0xe64] ss:$16 sps:$4 sm:$0xff]  }
 0x1ab   : > { %6915 = vmatprep.subr.bf16.mxu0 %v10379_v9  ;;  %7571 = vmatprep.subr.bf16.mxu1 %v10382_v11  ;;  %v10466_v9 = vld [vmem:[%s11425_s28 + $0xe6c] ss:$16 sps:$4 sm:$0xff]   ;;  %v10461_v11 = vld [vmem:[%s11425_s28 + $0xe60] ss:$16 sps:$4 sm:$0xff]  }
 0x1ae   : > { %6916 = vmatpush1.bf16.msra.mxu0 %v10377_v12  ;;  %7572 = vmatpush1.bf16.msra.mxu1 %v10380_v13  ;;  %v10464_v12 = vld [vmem:[%s11425_s28 + $0xe68] ss:$16 sps:$4 sm:$0xff]   ;;  %v10469_v13 = vld [vmem:[%s11425_s28 + $0xe84] ss:$16 sps:$4 sm:$0xff]  }
 0x1af   : > { %6917 = vmatprep.subr.bf16.mxu0 %v10385_v14  ;;  %7573 = vmatprep.subr.bf16.mxu1 %v10388_v15  ;;  %v10472_v14 = vld [vmem:[%s11425_s28 + $0xe8c] ss:$16 sps:$4 sm:$0xff]   ;;  %v10467_v15 = vld [vmem:[%s11425_s28 + $0xe80] ss:$16 sps:$4 sm:$0xff]  }
 0x1b2   : > { %6918 = vmatpush1.bf16.msra.mxu0 %v10383_v16  ;;  %7574 = vmatpush1.bf16.msra.mxu1 %v10386_v17  ;;  %v10470_v16 = vld [vmem:[%s11425_s28 + $0xe88] ss:$16 sps:$4 sm:$0xff]   ;;  %v10475_v17 = vld [vmem:[%s11425_s28 + $0xea4] ss:$16 sps:$4 sm:$0xff]  }
 0x1b3   : > { %6919 = vmatprep.subr.bf16.mxu0 %v10391_v18  ;;  %7575 = vmatprep.subr.bf16.mxu1 %v10394_v19  ;;  %v10478_v18 = vld [vmem:[%s11425_s28 + $0xeac] ss:$16 sps:$4 sm:$0xff]   ;;  %v10473_v19 = vld [vmem:[%s11425_s28 + $0xea0] ss:$16 sps:$4 sm:$0xff]  }
 0x1b6   : > { %6920 = vmatpush1.bf16.msra.mxu0 %v10389_v20  ;;  %7576 = vmatpush1.bf16.msra.mxu1 %v10392_v21  ;;  %v10476_v20 = vld [vmem:[%s11425_s28 + $0xea8] ss:$16 sps:$4 sm:$0xff]   ;;  %v10481_v21 = vld [vmem:[%s11425_s28 + $0xec4] ss:$16 sps:$4 sm:$0xff]  }
 0x1b7   : > { %6921 = vmatprep.subr.bf16.mxu0 %v10397_v22  ;;  %7577 = vmatprep.subr.bf16.mxu1 %v10400_v23  ;;  %v10484_v22 = vld [vmem:[%s11425_s28 + $0xecc] ss:$16 sps:$4 sm:$0xff]   ;;  %v10479_v23 = vld [vmem:[%s11425_s28 + $0xec0] ss:$16 sps:$4 sm:$0xff]  }
 0x1ba   : > { %6922 = vmatpush1.bf16.msra.mxu0 %v10395_v25  ;;  %7578 = vmatpush1.bf16.msra.mxu1 %v10398_v24  ;;  %v10482_v25 = vld [vmem:[%s11425_s28 + $0xec8] ss:$16 sps:$4 sm:$0xff]   ;;  %v10487_v24 = vld [vmem:[%s11425_s28 + $0xee4] ss:$16 sps:$4 sm:$0xff]  }
 0x1bb   : > { %6923 = vmatprep.subr.bf16.mxu0 %v10403_v10  ;;  %7579 = vmatprep.subr.bf16.mxu1 %v10406_v28  ;;  %v10490_v10 = vld [vmem:[%s11425_s28 + $0xeec] ss:$16 sps:$4 sm:$0xff]   ;;  %v10485_v28 = vld [vmem:[%s11425_s28 + $0xee0] ss:$16 sps:$4 sm:$0xff]  }
 0x1be   : > { %6924 = vmatpush1.bf16.msra.mxu0 %v10401_v30  ;;  %7580 = vmatpush1.bf16.msra.mxu1 %v10404_v31  ;;  %v10488_v30 = vld [vmem:[%s11425_s28 + $0xee8] ss:$16 sps:$4 sm:$0xff]   ;;  %v10493_v31 = vld [vmem:[%s11425_s28 + $0xf04] ss:$16 sps:$4 sm:$0xff]  }
 0x1bf   : > { %6925 = vmatprep.subr.bf16.mxu0 %v10409_v32  ;;  %7581 = vmatprep.subr.bf16.mxu1 %v10412_v34  ;;  %v10496_v32 = vld [vmem:[%s11425_s28 + $0xf0c] ss:$16 sps:$4 sm:$0xff]   ;;  %v10491_v34 = vld [vmem:[%s11425_s28 + $0xf00] ss:$16 sps:$4 sm:$0xff]  }
 0x1c2   : > { %6926 = vmatpush1.bf16.msra.mxu0 %v10407_v35  ;;  %7582 = vmatpush1.bf16.msra.mxu1 %v10410_v36  ;;  %v10494_v35 = vld [vmem:[%s11425_s28 + $0xf08] ss:$16 sps:$4 sm:$0xff]   ;;  %v10499_v36 = vld [vmem:[%s11425_s28 + $0xf24] ss:$16 sps:$4 sm:$0xff]  }
 0x1c3   : > { %6927 = vmatprep.subr.bf16.mxu0 %v10415_v27  ;;  %7583 = vmatprep.subr.bf16.mxu1 %v10418_v37  ;;  %v10502_v27 = vld [vmem:[%s11425_s28 + $0xf2c] ss:$16 sps:$4 sm:$0xff]   ;;  %v10497_v37 = vld [vmem:[%s11425_s28 + $0xf20] ss:$16 sps:$4 sm:$0xff]  }
 0x1c6   : > { %6928 = vmatpush1.bf16.msra.mxu0 %v10413_v38  ;;  %7584 = vmatpush1.bf16.msra.mxu1 %v10416_v39  ;;  %v10500_v38 = vld [vmem:[%s11425_s28 + $0xf28] ss:$16 sps:$4 sm:$0xff]   ;;  %v10505_v39 = vld [vmem:[%s11425_s28 + $0xf44] ss:$16 sps:$4 sm:$0xff]  }
 0x1c7   : > { %6929 = vmatprep.subr.bf16.mxu0 %v10421_v40  ;;  %7585 = vmatprep.subr.bf16.mxu1 %v10424_v29  ;;  %v10508_v40 = vld [vmem:[%s11425_s28 + $0xf4c] ss:$16 sps:$4 sm:$0xff]   ;;  %v10503_v29 = vld [vmem:[%s11425_s28 + $0xf40] ss:$16 sps:$4 sm:$0xff]  }
 0x1ca   : > { %6930 = vmatpush1.bf16.msra.mxu0 %v10419_v42  ;;  %7586 = vmatpush1.bf16.msra.mxu1 %v10422_v45  ;;  %v10506_v42 = vld [vmem:[%s11425_s28 + $0xf48] ss:$16 sps:$4 sm:$0xff]   ;;  %v10511_v45 = vld [vmem:[%s11425_s28 + $0xf64] ss:$16 sps:$4 sm:$0xff]  }
 0x1cb   : > { %6931 = vmatprep.subr.bf16.mxu0 %v10427_v46  ;;  %7587 = vmatprep.subr.bf16.mxu1 %v10430_v26  ;;  %v10514_v46 = vld [vmem:[%s11425_s28 + $0xf6c] ss:$16 sps:$4 sm:$0xff]   ;;  %v10509_v26 = vld [vmem:[%s11425_s28 + $0xf60] ss:$16 sps:$4 sm:$0xff]  }
 0x1ce   : > { %6932 = vmatpush1.bf16.msra.mxu0 %v10425_v47  ;;  %7588 = vmatpush1.bf16.msra.mxu1 %v10428_v49  ;;  %v10512_v47 = vld [vmem:[%s11425_s28 + $0xf68] ss:$16 sps:$4 sm:$0xff]   ;;  %v10517_v49 = vld [vmem:[%s11425_s28 + $0xf84] ss:$16 sps:$4 sm:$0xff]  }
 0x1cf   : > { %6933 = vmatprep.subr.bf16.mxu0 %v10433_v51  ;;  %7589 = vmatprep.subr.bf16.mxu1 %v10436_v52  ;;  %v10520_v51 = vld [vmem:[%s11425_s28 + $0xf8c] ss:$16 sps:$4 sm:$0xff]   ;;  %v10515_v52 = vld [vmem:[%s11425_s28 + $0xf80] ss:$16 sps:$4 sm:$0xff]  }
 0x1d2   : > { %6934 = vmatpush1.bf16.msra.mxu0 %v10431_v53  ;;  %7590 = vmatpush1.bf16.msra.mxu1 %v10434_v54  ;;  %v10523_v53 = vld [vmem:[%s11425_s28 + $0xfa4] ss:$16 sps:$4 sm:$0xff]   ;;  %v10526_v54 = vld [vmem:[%s11425_s28 + $0xfac] ss:$16 sps:$4 sm:$0xff]  }
 0x1d3   : > { %6935 = vmatprep.subr.bf16.mxu0 %v10439_v55  ;;  %7591 = vmatprep.subr.bf16.mxu1 %v10442_v56  ;;  %v10521_v55 = vld [vmem:[%s11425_s28 + $0xfa0] ss:$16 sps:$4 sm:$0xff]   ;;  %v10524_v56 = vld [vmem:[%s11425_s28 + $0xfa8] ss:$16 sps:$4 sm:$0xff]  }
 0x1d6   : > { %6936 = vmatpush1.bf16.msra.mxu0 %v10437_v43  ;;  %7592 = vmatpush1.bf16.msra.mxu1 %v10440_v58  ;;  %v10529_v43 = vld [vmem:[%s11425_s28 + $0xfc4] ss:$16 sps:$4 sm:$0xff]   ;;  %v10532_v58 = vld [vmem:[%s11425_s28 + $0xfcc] ss:$16 sps:$4 sm:$0xff]  }
 0x1d7   : > { %6946 = vmatprep.subr.bf16.mxu0 %v10445_v59  ;;  %7602 = vmatprep.subr.bf16.mxu1 %v10448_v41  ;;  %v12007_v59 = vld [vmem:[%s11420_s24 + $0x20] sm:$0xff] }
 0x1d8   : > { %v10527_v41 = vld [vmem:[%s11425_s28 + $0xfc0] ss:$16 sps:$4 sm:$0xff]  }
 0x1d9   : > { %6938 = vmatmul.mubr.bf16.vlgmr.msra.gmra.mrb[0].mxu0 %v495_v61  ;;  %7594 = vmatmul.mubr.bf16.vlgmr.msra.gmra.mrb[0].mxu1 %v495_v61  ;;  %v10535_v61 = vld [vmem:[%s11425_s28 + $0xfe4] ss:$16 sps:$4 sm:$0xff]  }
 0x1da   : > { %6947 = vmatpush1.bf16.msra.mxu0 %v10443_v62  ;;  %7603 = vmatpush1.bf16.msra.mxu1 %v10446_v63  ;;  %v10538_v62 = vld [vmem:[%s11425_s28 + $0xfec] ss:$16 sps:$4 sm:$0xff]   ;;  %v12015_v63 = vrot.slane %v12007_v59, %v11475_v50 }
 0x1db   : > { %6948 = vmatprep.subr.bf16.mxu0 %v10451_v0  ;;  %7604 = vmatprep.subr.bf16.mxu1 %v10454_v1  ;;  %v10533_v0 = vld [vmem:[%s11425_s28 + $0xfe0] ss:$16 sps:$4 sm:$0xff]   ;;  %v10536_v1 = vld [vmem:[%s11425_s28 + $0xfe8] ss:$16 sps:$4 sm:$0xff]  }
 0x1dc   : > { %6978 = vmatprep.mubr.bf16.mxu0 %v498_v2  ;;  %7634 = vmatprep.mubr.bf16.mxu1 %v498_v2  ;;  %v10542_v2 = vld [vmem:[%s11425_s28 + $0x1004] ss:$16 sps:$4 sm:$0xff]  }
 0x1de   : > { %6949 = vmatpush1.bf16.msra.mxu0 %v10449_v48  ;;  %7605 = vmatpush1.bf16.msra.mxu1 %v10452_v3  ;;  %v10545_v48 = vld [vmem:[%s11425_s28 + $0x100c] ss:$16 sps:$4 sm:$0xff]   ;;  %v398_v3 = vcombine.high %v12015_v63, %v12015_v63 }
 0x1df   : > { %6950 = vmatprep.subr.bf16.mxu0 %v10457_v4  ;;  %7606 = vmatprep.subr.bf16.mxu1 %v10460_v5  ;;  %v497_v4 = vpack.c.bf16 %v11940_v57, %v11940_v57  ;;  %v10540_v5 = vld [vmem:[%s11425_s28 + $0x1000] ss:$16 sps:$4 sm:$0xff]  }
 0x1e0   : > { %v10546_v57 = vld [vmem:[%s11425_s28 + $0x1020] ss:$16 sps:$4 sm:$0xff]  }
 0x1e2   : > { %6951 = vmatpush1.bf16.msra.mxu0 %v10455_v6  ;;  %7607 = vmatpush1.bf16.msra.mxu1 %v10458_v7  ;;  %v10543_v6 = vld [vmem:[%s11425_s28 + $0x1008] ss:$16 sps:$4 sm:$0xff]   ;;  %v10548_v7 = vld [vmem:[%s11425_s28 + $0x1024] ss:$16 sps:$4 sm:$0xff]  }
 0x1e3   : > { %6952 = vmatprep.subr.bf16.mxu0 %v10463_v8  ;;  %7608 = vmatprep.subr.bf16.mxu1 %v10466_v9  ;;  %v10551_v8 = vld [vmem:[%s11425_s28 + $0x102c] ss:$16 sps:$4 sm:$0xff]   ;;  %v500_v9 = vpack.c.bf16 %v398_v3, %v398_v3  ;;  %v10624_v3 = vld [vmem:[%s11425_s28 + $0x11c0] ss:$16 sps:$4 sm:$0xff]  }
 0x1e6   : > { %6953 = vmatpush1.bf16.msra.mxu0 %v10461_v11  ;;  %7609 = vmatpush1.bf16.msra.mxu1 %v10464_v12  ;;  %v10549_v11 = vld [vmem:[%s11425_s28 + $0x1028] ss:$16 sps:$4 sm:$0xff]   ;;  %v10554_v12 = vld [vmem:[%s11425_s28 + $0x1044] ss:$16 sps:$4 sm:$0xff]  }
 0x1e7   : > { %6954 = vmatprep.subr.bf16.mxu0 %v10469_v13  ;;  %7610 = vmatprep.subr.bf16.mxu1 %v10472_v14  ;;  %v10557_v13 = vld [vmem:[%s11425_s28 + $0x104c] ss:$16 sps:$4 sm:$0xff]   ;;  %v10552_v14 = vld [vmem:[%s11425_s28 + $0x1040] ss:$16 sps:$4 sm:$0xff]  }
 0x1ea   : > { %6955 = vmatpush1.bf16.msra.mxu0 %v10467_v15  ;;  %7611 = vmatpush1.bf16.msra.mxu1 %v10470_v16  ;;  %v10555_v15 = vld [vmem:[%s11425_s28 + $0x1048] ss:$16 sps:$4 sm:$0xff]   ;;  %v10560_v16 = vld [vmem:[%s11425_s28 + $0x1064] ss:$16 sps:$4 sm:$0xff]  }
 0x1eb   : > { %6956 = vmatprep.subr.bf16.mxu0 %v10475_v17  ;;  %7612 = vmatprep.subr.bf16.mxu1 %v10478_v18  ;;  %v10563_v17 = vld [vmem:[%s11425_s28 + $0x106c] ss:$16 sps:$4 sm:$0xff]   ;;  %v10558_v18 = vld [vmem:[%s11425_s28 + $0x1060] ss:$16 sps:$4 sm:$0xff]  }
 0x1ee   : > { %6957 = vmatpush1.bf16.msra.mxu0 %v10473_v19  ;;  %7613 = vmatpush1.bf16.msra.mxu1 %v10476_v20  ;;  %v10561_v19 = vld [vmem:[%s11425_s28 + $0x1068] ss:$16 sps:$4 sm:$0xff]   ;;  %v10566_v20 = vld [vmem:[%s11425_s28 + $0x1084] ss:$16 sps:$4 sm:$0xff]  }
 0x1ef   : > { %6958 = vmatprep.subr.bf16.mxu0 %v10481_v21  ;;  %7614 = vmatprep.subr.bf16.mxu1 %v10484_v22  ;;  %v10569_v21 = vld [vmem:[%s11425_s28 + $0x108c] ss:$16 sps:$4 sm:$0xff]   ;;  %v10564_v22 = vld [vmem:[%s11425_s28 + $0x1080] ss:$16 sps:$4 sm:$0xff]  }
 0x1f2   : > { %6959 = vmatpush1.bf16.msra.mxu0 %v10479_v23  ;;  %7615 = vmatpush1.bf16.msra.mxu1 %v10482_v25  ;;  %v10567_v23 = vld [vmem:[%s11425_s28 + $0x1088] ss:$16 sps:$4 sm:$0xff]   ;;  %v10572_v25 = vld [vmem:[%s11425_s28 + $0x10a4] ss:$16 sps:$4 sm:$0xff]  }
 0x1f3   : > { %6960 = vmatprep.subr.bf16.mxu0 %v10487_v24  ;;  %7616 = vmatprep.subr.bf16.mxu1 %v10490_v10  ;;  %v10575_v24 = vld [vmem:[%s11425_s28 + $0x10ac] ss:$16 sps:$4 sm:$0xff]   ;;  %v10570_v10 = vld [vmem:[%s11425_s28 + $0x10a0] ss:$16 sps:$4 sm:$0xff]  }
 0x1f6   : > { %6961 = vmatpush1.bf16.msra.mxu0 %v10485_v28  ;;  %7617 = vmatpush1.bf16.msra.mxu1 %v10488_v30  ;;  %v10573_v28 = vld [vmem:[%s11425_s28 + $0x10a8] ss:$16 sps:$4 sm:$0xff]   ;;  %v10578_v30 = vld [vmem:[%s11425_s28 + $0x10c4] ss:$16 sps:$4 sm:$0xff]  }
 0x1f7   : > { %6962 = vmatprep.subr.bf16.mxu0 %v10493_v31  ;;  %7618 = vmatprep.subr.bf16.mxu1 %v10496_v32  ;;  %v10581_v31 = vld [vmem:[%s11425_s28 + $0x10cc] ss:$16 sps:$4 sm:$0xff]   ;;  %v10576_v32 = vld [vmem:[%s11425_s28 + $0x10c0] ss:$16 sps:$4 sm:$0xff]  }
 0x1fa   : > { %6963 = vmatpush1.bf16.msra.mxu0 %v10491_v34  ;;  %7619 = vmatpush1.bf16.msra.mxu1 %v10494_v35  ;;  %v10579_v34 = vld [vmem:[%s11425_s28 + $0x10c8] ss:$16 sps:$4 sm:$0xff]   ;;  %v10584_v35 = vld [vmem:[%s11425_s28 + $0x10e4] ss:$16 sps:$4 sm:$0xff]  }
 0x1fb   : > { %6964 = vmatprep.subr.bf16.mxu0 %v10499_v36  ;;  %7620 = vmatprep.subr.bf16.mxu1 %v10502_v27  ;;  %v10587_v36 = vld [vmem:[%s11425_s28 + $0x10ec] ss:$16 sps:$4 sm:$0xff]   ;;  %v10582_v27 = vld [vmem:[%s11425_s28 + $0x10e0] ss:$16 sps:$4 sm:$0xff]  }
 0x1fe   : > { %6965 = vmatpush1.bf16.msra.mxu0 %v10497_v37  ;;  %7621 = vmatpush1.bf16.msra.mxu1 %v10500_v38  ;;  %v10585_v37 = vld [vmem:[%s11425_s28 + $0x10e8] ss:$16 sps:$4 sm:$0xff]   ;;  %v10590_v38 = vld [vmem:[%s11425_s28 + $0x1104] ss:$16 sps:$4 sm:$0xff]  }
 0x1ff   : > { %6966 = vmatprep.subr.bf16.mxu0 %v10505_v39  ;;  %7622 = vmatprep.subr.bf16.mxu1 %v10508_v40  ;;  %v10593_v39 = vld [vmem:[%s11425_s28 + $0x110c] ss:$16 sps:$4 sm:$0xff]   ;;  %v10588_v40 = vld [vmem:[%s11425_s28 + $0x1100] ss:$16 sps:$4 sm:$0xff]  }
 0x202   : > { %6967 = vmatpush1.bf16.msra.mxu0 %v10503_v29  ;;  %7623 = vmatpush1.bf16.msra.mxu1 %v10506_v42  ;;  %v10591_v29 = vld [vmem:[%s11425_s28 + $0x1108] ss:$16 sps:$4 sm:$0xff]   ;;  %v10596_v42 = vld [vmem:[%s11425_s28 + $0x1124] ss:$16 sps:$4 sm:$0xff]  }
 0x203   : > { %6968 = vmatprep.subr.bf16.mxu0 %v10511_v45  ;;  %7624 = vmatprep.subr.bf16.mxu1 %v10514_v46  ;;  %v10599_v45 = vld [vmem:[%s11425_s28 + $0x112c] ss:$16 sps:$4 sm:$0xff]   ;;  %v10594_v46 = vld [vmem:[%s11425_s28 + $0x1120] ss:$16 sps:$4 sm:$0xff]  }
 0x206   : > { %6969 = vmatpush1.bf16.msra.mxu0 %v10509_v26  ;;  %7625 = vmatpush1.bf16.msra.mxu1 %v10512_v47  ;;  %v10597_v26 = vld [vmem:[%s11425_s28 + $0x1128] ss:$16 sps:$4 sm:$0xff]   ;;  %v10602_v47 = vld [vmem:[%s11425_s28 + $0x1144] ss:$16 sps:$4 sm:$0xff]  }
 0x207   : > { %6970 = vmatprep.subr.bf16.mxu0 %v10517_v49  ;;  %7626 = vmatprep.subr.bf16.mxu1 %v10520_v51  ;;  %v10605_v49 = vld [vmem:[%s11425_s28 + $0x114c] ss:$16 sps:$4 sm:$0xff]   ;;  %v10600_v51 = vld [vmem:[%s11425_s28 + $0x1140] ss:$16 sps:$4 sm:$0xff]  }
 0x20a   : > { %6971 = vmatpush1.bf16.msra.mxu0 %v10515_v52  ;;  %7627 = vmatpush1.bf16.msra.mxu1 %v10518_v33  ;;  %v10603_v52 = vld [vmem:[%s11425_s28 + $0x1148] ss:$16 sps:$4 sm:$0xff]   ;;  %v10608_v33 = vld [vmem:[%s11425_s28 + $0x1164] ss:$16 sps:$4 sm:$0xff]  }
 0x20b   : > { %6972 = vmatprep.subr.bf16.mxu0 %v10523_v53  ;;  %7628 = vmatprep.subr.bf16.mxu1 %v10526_v54  ;;  %v10611_v53 = vld [vmem:[%s11425_s28 + $0x116c] ss:$16 sps:$4 sm:$0xff]   ;;  %v10606_v54 = vld [vmem:[%s11425_s28 + $0x1160] ss:$16 sps:$4 sm:$0xff]  }
 0x20e   : > { %6973 = vmatpush1.bf16.msra.mxu0 %v10521_v55  ;;  %7629 = vmatpush1.bf16.msra.mxu1 %v10524_v56  ;;  %v10609_v55 = vld [vmem:[%s11425_s28 + $0x1168] ss:$16 sps:$4 sm:$0xff]   ;;  %v10614_v56 = vld [vmem:[%s11425_s28 + $0x1184] ss:$16 sps:$4 sm:$0xff]  }
 0x20f   : > { %6974 = vmatprep.subr.bf16.mxu0 %v10529_v43  ;;  %7630 = vmatprep.subr.bf16.mxu1 %v10532_v58  ;;  %v10617_v43 = vld [vmem:[%s11425_s28 + $0x118c] ss:$16 sps:$4 sm:$0xff]   ;;  %v10612_v58 = vld [vmem:[%s11425_s28 + $0x1180] ss:$16 sps:$4 sm:$0xff]  }
 0x212   : > { %6975 = vmatpush1.bf16.msra.mxu0 %v10527_v41  ;;  %7631 = vmatpush1.bf16.msra.mxu1 %v10530_v60  ;;  %v10615_v41 = vld [vmem:[%s11425_s28 + $0x1188] ss:$16 sps:$4 sm:$0xff]   ;;  %v10620_v60 = vld [vmem:[%s11425_s28 + $0x11a4] ss:$16 sps:$4 sm:$0xff]  }
 0x213   : > { %6976 = vmatprep.subr.bf16.mxu0 %v10535_v61  ;;  %7632 = vmatprep.subr.bf16.mxu1 %v10538_v62  ;;  %v10623_v61 = vld [vmem:[%s11425_s28 + $0x11ac] ss:$16 sps:$4 sm:$0xff]   ;;  %v10618_v62 = vld [vmem:[%s11425_s28 + $0x11a0] ss:$16 sps:$4 sm:$0xff]  }
 0x216   : > { %6977 = vmatpush1.bf16.msra.mxu0 %v10533_v0  ;;  %7633 = vmatpush1.bf16.msra.mxu1 %v10536_v1  ;;  %v10621_v0 = vld [vmem:[%s11425_s28 + $0x11a8] ss:$16 sps:$4 sm:$0xff]   ;;  %v10626_v1 = vld [vmem:[%s11425_s28 + $0x11c4] ss:$16 sps:$4 sm:$0xff]  }
 0x217   : > { %6987 = vmatprep.subr.bf16.mxu0 %v10542_v2  ;;  %7643 = vmatprep.subr.bf16.mxu1 %v10545_v48  ;;  %v10629_v2 = vld [vmem:[%s11425_s28 + $0x11cc] ss:$16 sps:$4 sm:$0xff]   ;;  %v383_v48 = vcombine.high %v12007_v59, %v12007_v59  ;;  %v10630_v59 = vld [vmem:[%s11425_s28 + $0x11e0] ss:$16 sps:$4 sm:$0xff]  }
 0x219   : > { %6979 = vmatmul.mubr.bf16.vlgmr.msra.gmra.mrb[0].mxu0 %v497_v4  ;;  %7635 = vmatmul.mubr.bf16.vlgmr.msra.gmra.mrb[0].mxu1 %v497_v4  ;;  %v10627_v4 = vld [vmem:[%s11425_s28 + $0x11c8] ss:$16 sps:$4 sm:$0xff]  }
 0x21a   : > { %6988 = vmatpush1.bf16.msra.mxu0 %v10540_v5  ;;  %7644 = vmatpush1.bf16.msra.mxu1 %v10543_v6  ;;  %v10632_v5 = vld [vmem:[%s11425_s28 + $0x11e4] ss:$16 sps:$4 sm:$0xff]   ;;  %v10635_v6 = vld [vmem:[%s11425_s28 + $0x11ec] ss:$16 sps:$4 sm:$0xff]  }
 0x21b   : > { %6989 = vmatprep.subr.bf16.mxu0 %v10548_v7  ;;  %7645 = vmatprep.subr.bf16.mxu1 %v10551_v8  ;;  %v12088_v7 = vrot.slane %v383_v48, %v11475_v50  ;;  %v10633_v8 = vld [vmem:[%s11425_s28 + $0x11e8] ss:$16 sps:$4 sm:$0xff]  }
 0x21c   : > { %7019 = vmatprep.mubr.bf16.mxu0 %v500_v9  ;;  %7675 = vmatprep.mubr.bf16.mxu1 %v500_v9  ;;  %v10638_v9 = vld [vmem:[%s11425_s28 + $0x1204] ss:$16 sps:$4 sm:$0xff]   ;;  %v10711_v48 = vld [vmem:[%s11425_s28 + $0x1388] ss:$16 sps:$4 sm:$0xff]  }
 0x21e   : > { %6990 = vmatpush1.bf16.msra.mxu0 %v10546_v57  ;;  %7646 = vmatpush1.bf16.msra.mxu1 %v10549_v11  ;;  %v10641_v57 = vld [vmem:[%s11425_s28 + $0x120c] ss:$16 sps:$4 sm:$0xff]   ;;  %v399_v11 = vcombine.high %v12088_v7, %v12088_v7 }
 0x21f   : > { %6991 = vmatprep.subr.bf16.mxu0 %v10554_v12  ;;  %7647 = vmatprep.subr.bf16.mxu1 %v10557_v13  ;;  %v499_v12 = vpack.c.bf16 %v12015_v63, %v12015_v63  ;;  %v10636_v13 = vld [vmem:[%s11425_s28 + $0x1200] ss:$16 sps:$4 sm:$0xff]  }
 0x220   : > { %v10642_v63 = vld [vmem:[%s11425_s28 + $0x1220] ss:$16 sps:$4 sm:$0xff]  }
 0x222   : > { %6992 = vmatpush1.bf16.msra.mxu0 %v10552_v14  ;;  %7648 = vmatpush1.bf16.msra.mxu1 %v10555_v15  ;;  %v10639_v14 = vld [vmem:[%s11425_s28 + $0x1208] ss:$16 sps:$4 sm:$0xff]   ;;  %v10644_v15 = vld [vmem:[%s11425_s28 + $0x1224] ss:$16 sps:$4 sm:$0xff]  }
 0x223   : > { %6993 = vmatprep.subr.bf16.mxu0 %v10560_v16  ;;  %7649 = vmatprep.subr.bf16.mxu1 %v10563_v17  ;;  %v10647_v16 = vld [vmem:[%s11425_s28 + $0x122c] ss:$16 sps:$4 sm:$0xff]   ;;  %v502_v17 = vpack.c.bf16 %v399_v11, %v399_v11  ;;  %v10723_v11 = vld [vmem:[%s11425_s28 + $0x13c8] ss:$16 sps:$4 sm:$0xff]  }
 0x226   : > { %6994 = vmatpush1.bf16.msra.mxu0 %v10558_v18  ;;  %7650 = vmatpush1.bf16.msra.mxu1 %v10561_v19  ;;  %v10645_v18 = vld [vmem:[%s11425_s28 + $0x1228] ss:$16 sps:$4 sm:$0xff]   ;;  %v10650_v19 = vld [vmem:[%s11425_s28 + $0x1244] ss:$16 sps:$4 sm:$0xff]  }
 0x227   : > { %6995 = vmatprep.subr.bf16.mxu0 %v10566_v20  ;;  %7651 = vmatprep.subr.bf16.mxu1 %v10569_v21  ;;  %v10653_v20 = vld [vmem:[%s11425_s28 + $0x124c] ss:$16 sps:$4 sm:$0xff]   ;;  %v10648_v21 = vld [vmem:[%s11425_s28 + $0x1240] ss:$16 sps:$4 sm:$0xff]  }
 0x22a   : > { %6996 = vmatpush1.bf16.msra.mxu0 %v10564_v22  ;;  %7652 = vmatpush1.bf16.msra.mxu1 %v10567_v23  ;;  %v10651_v22 = vld [vmem:[%s11425_s28 + $0x1248] ss:$16 sps:$4 sm:$0xff]   ;;  %v10656_v23 = vld [vmem:[%s11425_s28 + $0x1264] ss:$16 sps:$4 sm:$0xff]  }
 0x22b   : > { %6997 = vmatprep.subr.bf16.mxu0 %v10572_v25  ;;  %7653 = vmatprep.subr.bf16.mxu1 %v10575_v24  ;;  %v10659_v25 = vld [vmem:[%s11425_s28 + $0x126c] ss:$16 sps:$4 sm:$0xff]   ;;  %v10654_v24 = vld [vmem:[%s11425_s28 + $0x1260] ss:$16 sps:$4 sm:$0xff]  }
 0x22e   : > { %6998 = vmatpush1.bf16.msra.mxu0 %v10570_v10  ;;  %7654 = vmatpush1.bf16.msra.mxu1 %v10573_v28  ;;  %v10657_v10 = vld [vmem:[%s11425_s28 + $0x1268] ss:$16 sps:$4 sm:$0xff]   ;;  %v10662_v28 = vld [vmem:[%s11425_s28 + $0x1284] ss:$16 sps:$4 sm:$0xff]  }
 0x22f   : > { %6999 = vmatprep.subr.bf16.mxu0 %v10578_v30  ;;  %7655 = vmatprep.subr.bf16.mxu1 %v10581_v31  ;;  %v10665_v30 = vld [vmem:[%s11425_s28 + $0x128c] ss:$16 sps:$4 sm:$0xff]   ;;  %v10660_v31 = vld [vmem:[%s11425_s28 + $0x1280] ss:$16 sps:$4 sm:$0xff]  }
 0x232   : > { %7000 = vmatpush1.bf16.msra.mxu0 %v10576_v32  ;;  %7656 = vmatpush1.bf16.msra.mxu1 %v10579_v34  ;;  %v10663_v32 = vld [vmem:[%s11425_s28 + $0x1288] ss:$16 sps:$4 sm:$0xff]   ;;  %v10668_v34 = vld [vmem:[%s11425_s28 + $0x12a4] ss:$16 sps:$4 sm:$0xff]  }
 0x233   : > { %7001 = vmatprep.subr.bf16.mxu0 %v10584_v35  ;;  %7657 = vmatprep.subr.bf16.mxu1 %v10587_v36  ;;  %v10671_v35 = vld [vmem:[%s11425_s28 + $0x12ac] ss:$16 sps:$4 sm:$0xff]   ;;  %v10666_v36 = vld [vmem:[%s11425_s28 + $0x12a0] ss:$16 sps:$4 sm:$0xff]  }
 0x236   : > { %7002 = vmatpush1.bf16.msra.mxu0 %v10582_v27  ;;  %7658 = vmatpush1.bf16.msra.mxu1 %v10585_v37  ;;  %v10669_v27 = vld [vmem:[%s11425_s28 + $0x12a8] ss:$16 sps:$4 sm:$0xff]   ;;  %v10674_v37 = vld [vmem:[%s11425_s28 + $0x12c4] ss:$16 sps:$4 sm:$0xff]  }
 0x237   : > { %7003 = vmatprep.subr.bf16.mxu0 %v10590_v38  ;;  %7659 = vmatprep.subr.bf16.mxu1 %v10593_v39  ;;  %v10677_v38 = vld [vmem:[%s11425_s28 + $0x12cc] ss:$16 sps:$4 sm:$0xff]   ;;  %v10672_v39 = vld [vmem:[%s11425_s28 + $0x12c0] ss:$16 sps:$4 sm:$0xff]  }
 0x23a   : > { %7004 = vmatpush1.bf16.msra.mxu0 %v10588_v40  ;;  %7660 = vmatpush1.bf16.msra.mxu1 %v10591_v29  ;;  %v10675_v40 = vld [vmem:[%s11425_s28 + $0x12c8] ss:$16 sps:$4 sm:$0xff]   ;;  %v10680_v29 = vld [vmem:[%s11425_s28 + $0x12e4] ss:$16 sps:$4 sm:$0xff]  }
 0x23b   : > { %7005 = vmatprep.subr.bf16.mxu0 %v10596_v42  ;;  %7661 = vmatprep.subr.bf16.mxu1 %v10599_v45  ;;  %v10683_v42 = vld [vmem:[%s11425_s28 + $0x12ec] ss:$16 sps:$4 sm:$0xff]   ;;  %v10678_v45 = vld [vmem:[%s11425_s28 + $0x12e0] ss:$16 sps:$4 sm:$0xff]  }
 0x23e   : > { %7006 = vmatpush1.bf16.msra.mxu0 %v10594_v46  ;;  %7662 = vmatpush1.bf16.msra.mxu1 %v10597_v26  ;;  %v10681_v46 = vld [vmem:[%s11425_s28 + $0x12e8] ss:$16 sps:$4 sm:$0xff]   ;;  %v10686_v26 = vld [vmem:[%s11425_s28 + $0x1304] ss:$16 sps:$4 sm:$0xff]  }
 0x23f   : > { %7007 = vmatprep.subr.bf16.mxu0 %v10602_v47  ;;  %7663 = vmatprep.subr.bf16.mxu1 %v10605_v49  ;;  %v10689_v47 = vld [vmem:[%s11425_s28 + $0x130c] ss:$16 sps:$4 sm:$0xff]   ;;  %v10684_v49 = vld [vmem:[%s11425_s28 + $0x1300] ss:$16 sps:$4 sm:$0xff]  }
 0x242   : > { %7008 = vmatpush1.bf16.msra.mxu0 %v10600_v51  ;;  %7664 = vmatpush1.bf16.msra.mxu1 %v10603_v52  ;;  %v10687_v51 = vld [vmem:[%s11425_s28 + $0x1308] ss:$16 sps:$4 sm:$0xff]   ;;  %v10692_v52 = vld [vmem:[%s11425_s28 + $0x1324] ss:$16 sps:$4 sm:$0xff]  }
 0x243   : > { %7009 = vmatprep.subr.bf16.mxu0 %v10608_v33  ;;  %7665 = vmatprep.subr.bf16.mxu1 %v10611_v53  ;;  %v10695_v33 = vld [vmem:[%s11425_s28 + $0x132c] ss:$16 sps:$4 sm:$0xff]   ;;  %v10690_v53 = vld [vmem:[%s11425_s28 + $0x1320] ss:$16 sps:$4 sm:$0xff]  }
 0x246   : > { %7010 = vmatpush1.bf16.msra.mxu0 %v10606_v54  ;;  %7666 = vmatpush1.bf16.msra.mxu1 %v10609_v55  ;;  %v10693_v54 = vld [vmem:[%s11425_s28 + $0x1328] ss:$16 sps:$4 sm:$0xff]   ;;  %v10698_v55 = vld [vmem:[%s11425_s28 + $0x1344] ss:$16 sps:$4 sm:$0xff]  }
 0x247   : > { %7011 = vmatprep.subr.bf16.mxu0 %v10614_v56  ;;  %7667 = vmatprep.subr.bf16.mxu1 %v10617_v43  ;;  %v10701_v56 = vld [vmem:[%s11425_s28 + $0x134c] ss:$16 sps:$4 sm:$0xff]   ;;  %v10696_v43 = vld [vmem:[%s11425_s28 + $0x1340] ss:$16 sps:$4 sm:$0xff]  }
 0x24a   : > { %7012 = vmatpush1.bf16.msra.mxu0 %v10612_v58  ;;  %7668 = vmatpush1.bf16.msra.mxu1 %v10615_v41  ;;  %v10699_v58 = vld [vmem:[%s11425_s28 + $0x1348] ss:$16 sps:$4 sm:$0xff]   ;;  %v10704_v41 = vld [vmem:[%s11425_s28 + $0x1364] ss:$16 sps:$4 sm:$0xff]  }
 0x24b   : > { %7013 = vmatprep.subr.bf16.mxu0 %v10620_v60  ;;  %7669 = vmatprep.subr.bf16.mxu1 %v10623_v61  ;;  %v10707_v60 = vld [vmem:[%s11425_s28 + $0x136c] ss:$16 sps:$4 sm:$0xff]   ;;  %v10702_v61 = vld [vmem:[%s11425_s28 + $0x1360] ss:$16 sps:$4 sm:$0xff]  }
 0x24e   : > { %7014 = vmatpush1.bf16.msra.mxu0 %v10618_v62  ;;  %7670 = vmatpush1.bf16.msra.mxu1 %v10621_v0  ;;  %v10705_v62 = vld [vmem:[%s11425_s28 + $0x1368] ss:$16 sps:$4 sm:$0xff]   ;;  %v10710_v0 = vld [vmem:[%s11425_s28 + $0x1384] ss:$16 sps:$4 sm:$0xff]  }
 0x24f   : > { %7015 = vmatprep.subr.bf16.mxu0 %v10626_v1  ;;  %7671 = vmatprep.subr.bf16.mxu1 %v10629_v2  ;;  %v10713_v1 = vld [vmem:[%s11425_s28 + $0x138c] ss:$16 sps:$4 sm:$0xff]   ;;  %v10708_v2 = vld [vmem:[%s11425_s28 + $0x1380] ss:$16 sps:$4 sm:$0xff]  }
 0x252   : > { %7016 = vmatpush1.bf16.msra.mxu0 %v10624_v3  ;;  %7672 = vmatpush1.bf16.msra.mxu1 %v10627_v4  ;;  %v10716_v3 = vld [vmem:[%s11425_s28 + $0x13a4] ss:$16 sps:$4 sm:$0xff]   ;;  %v10719_v4 = vld [vmem:[%s11425_s28 + $0x13ac] ss:$16 sps:$4 sm:$0xff]  }
 0x253   : > { %7017 = vmatprep.subr.bf16.mxu0 %v10632_v5  ;;  %7673 = vmatprep.subr.bf16.mxu1 %v10635_v6  ;;  %v10714_v5 = vld [vmem:[%s11425_s28 + $0x13a0] ss:$16 sps:$4 sm:$0xff]   ;;  %v10717_v6 = vld [vmem:[%s11425_s28 + $0x13a8] ss:$16 sps:$4 sm:$0xff]  }
 0x256   : > { %7018 = vmatpush1.bf16.msra.mxu0 %v10630_v59  ;;  %7674 = vmatpush1.bf16.msra.mxu1 %v10633_v8  ;;  %v10722_v59 = vld [vmem:[%s11425_s28 + $0x13c4] ss:$16 sps:$4 sm:$0xff]   ;;  %v10725_v8 = vld [vmem:[%s11425_s28 + $0x13cc] ss:$16 sps:$4 sm:$0xff]  }
 0x257   : > { %7028 = vmatprep.subr.bf16.mxu0 %v10638_v9  ;;  %7684 = vmatprep.subr.bf16.mxu1 %v10641_v57  ;;  %v12155_v9 = vld [vmem:[%s11420_s24 + $0x28] sm:$0xff]  ;;  %v10720_v57 = vld [vmem:[%s11425_s28 + $0x13c0] ss:$16 sps:$4 sm:$0xff]  }
 0x259   : > { %7020 = vmatmul.mubr.bf16.vlgmr.msra.gmra.mrb[0].mxu0 %v499_v12  ;;  %7676 = vmatmul.mubr.bf16.vlgmr.msra.gmra.mrb[0].mxu1 %v499_v12  ;;  %v10728_v12 = vld [vmem:[%s11425_s28 + $0x13e4] ss:$16 sps:$4 sm:$0xff]  }
 0x25a   : > { %7029 = vmatpush1.bf16.msra.mxu0 %v10636_v13  ;;  %7685 = vmatpush1.bf16.msra.mxu1 %v10639_v14  ;;  %v10731_v13 = vld [vmem:[%s11425_s28 + $0x13ec] ss:$16 sps:$4 sm:$0xff]   ;;  %v12163_v14 = vrot.slane %v12155_v9, %v11475_v50 }
 0x25b   : > { %7030 = vmatprep.subr.bf16.mxu0 %v10644_v15  ;;  %7686 = vmatprep.subr.bf16.mxu1 %v10647_v16  ;;  %v10726_v15 = vld [vmem:[%s11425_s28 + $0x13e0] ss:$16 sps:$4 sm:$0xff]   ;;  %v10729_v16 = vld [vmem:[%s11425_s28 + $0x13e8] ss:$16 sps:$4 sm:$0xff]  }
 0x25c   : > { %7060 = vmatprep.mubr.bf16.mxu0 %v502_v17  ;;  %7716 = vmatprep.mubr.bf16.mxu1 %v502_v17  ;;  %v10735_v17 = vld [vmem:[%s11425_s28 + $0x1404] ss:$16 sps:$4 sm:$0xff]  }
 0x25e   : > { %7031 = vmatpush1.bf16.msra.mxu0 %v10642_v63  ;;  %7687 = vmatpush1.bf16.msra.mxu1 %v10645_v18  ;;  %v10738_v63 = vld [vmem:[%s11425_s28 + $0x140c] ss:$16 sps:$4 sm:$0xff]   ;;  %v415_v18 = vcombine.high %v12163_v14, %v12163_v14 }
 0x25f   : > { %7032 = vmatprep.subr.bf16.mxu0 %v10650_v19  ;;  %7688 = vmatprep.subr.bf16.mxu1 %v10653_v20  ;;  %v501_v19 = vpack.c.bf16 %v12088_v7, %v12088_v7  ;;  %v10733_v20 = vld [vmem:[%s11425_s28 + $0x1400] ss:$16 sps:$4 sm:$0xff]  }
 0x260   : > { %v10739_v7 = vld [vmem:[%s11425_s28 + $0x1420] ss:$16 sps:$4 sm:$0xff]  }
 0x262   : > { %7033 = vmatpush1.bf16.msra.mxu0 %v10648_v21  ;;  %7689 = vmatpush1.bf16.msra.mxu1 %v10651_v22  ;;  %v10736_v21 = vld [vmem:[%s11425_s28 + $0x1408] ss:$16 sps:$4 sm:$0xff]   ;;  %v10741_v22 = vld [vmem:[%s11425_s28 + $0x1424] ss:$16 sps:$4 sm:$0xff]  }
 0x263   : > { %7034 = vmatprep.subr.bf16.mxu0 %v10656_v23  ;;  %7690 = vmatprep.subr.bf16.mxu1 %v10659_v25  ;;  %v10744_v23 = vld [vmem:[%s11425_s28 + $0x142c] ss:$16 sps:$4 sm:$0xff]   ;;  %v504_v25 = vpack.c.bf16 %v415_v18, %v415_v18  ;;  %v10817_v18 = vld [vmem:[%s11425_s28 + $0x15c0] ss:$16 sps:$4 sm:$0xff]  }
 0x266   : > { %7035 = vmatpush1.bf16.msra.mxu0 %v10654_v24  ;;  %7691 = vmatpush1.bf16.msra.mxu1 %v10657_v10  ;;  %v10742_v24 = vld [vmem:[%s11425_s28 + $0x1428] ss:$16 sps:$4 sm:$0xff]   ;;  %v10747_v10 = vld [vmem:[%s11425_s28 + $0x1444] ss:$16 sps:$4 sm:$0xff]  }
 0x267   : > { %7036 = vmatprep.subr.bf16.mxu0 %v10662_v28  ;;  %7692 = vmatprep.subr.bf16.mxu1 %v10665_v30  ;;  %v10750_v28 = vld [vmem:[%s11425_s28 + $0x144c] ss:$16 sps:$4 sm:$0xff]   ;;  %v10745_v30 = vld [vmem:[%s11425_s28 + $0x1440] ss:$16 sps:$4 sm:$0xff]  }
 0x26a   : > { %7037 = vmatpush1.bf16.msra.mxu0 %v10660_v31  ;;  %7693 = vmatpush1.bf16.msra.mxu1 %v10663_v32  ;;  %v10748_v31 = vld [vmem:[%s11425_s28 + $0x1448] ss:$16 sps:$4 sm:$0xff]   ;;  %v10753_v32 = vld [vmem:[%s11425_s28 + $0x1464] ss:$16 sps:$4 sm:$0xff]  }
 0x26b   : > { %7038 = vmatprep.subr.bf16.mxu0 %v10668_v34  ;;  %7694 = vmatprep.subr.bf16.mxu1 %v10671_v35  ;;  %v10756_v34 = vld [vmem:[%s11425_s28 + $0x146c] ss:$16 sps:$4 sm:$0xff]   ;;  %v10751_v35 = vld [vmem:[%s11425_s28 + $0x1460] ss:$16 sps:$4 sm:$0xff]  }
 0x26e   : > { %7039 = vmatpush1.bf16.msra.mxu0 %v10666_v36  ;;  %7695 = vmatpush1.bf16.msra.mxu1 %v10669_v27  ;;  %v10754_v36 = vld [vmem:[%s11425_s28 + $0x1468] ss:$16 sps:$4 sm:$0xff]   ;;  %v10759_v27 = vld [vmem:[%s11425_s28 + $0x1484] ss:$16 sps:$4 sm:$0xff]  }
 0x26f   : > { %7040 = vmatprep.subr.bf16.mxu0 %v10674_v37  ;;  %7696 = vmatprep.subr.bf16.mxu1 %v10677_v38  ;;  %v10762_v37 = vld [vmem:[%s11425_s28 + $0x148c] ss:$16 sps:$4 sm:$0xff]   ;;  %v10757_v38 = vld [vmem:[%s11425_s28 + $0x1480] ss:$16 sps:$4 sm:$0xff]  }
 0x272   : > { %7041 = vmatpush1.bf16.msra.mxu0 %v10672_v39  ;;  %7697 = vmatpush1.bf16.msra.mxu1 %v10675_v40  ;;  %v10760_v39 = vld [vmem:[%s11425_s28 + $0x1488] ss:$16 sps:$4 sm:$0xff]   ;;  %v10765_v40 = vld [vmem:[%s11425_s28 + $0x14a4] ss:$16 sps:$4 sm:$0xff]  }
 0x273   : > { %7042 = vmatprep.subr.bf16.mxu0 %v10680_v29  ;;  %7698 = vmatprep.subr.bf16.mxu1 %v10683_v42  ;;  %v10768_v29 = vld [vmem:[%s11425_s28 + $0x14ac] ss:$16 sps:$4 sm:$0xff]   ;;  %v10763_v42 = vld [vmem:[%s11425_s28 + $0x14a0] ss:$16 sps:$4 sm:$0xff]  }
 0x276   : > { %7043 = vmatpush1.bf16.msra.mxu0 %v10678_v45  ;;  %7699 = vmatpush1.bf16.msra.mxu1 %v10681_v46  ;;  %v10766_v45 = vld [vmem:[%s11425_s28 + $0x14a8] ss:$16 sps:$4 sm:$0xff]   ;;  %v10771_v46 = vld [vmem:[%s11425_s28 + $0x14c4] ss:$16 sps:$4 sm:$0xff]  }
 0x277   : > { %7044 = vmatprep.subr.bf16.mxu0 %v10686_v26  ;;  %7700 = vmatprep.subr.bf16.mxu1 %v10689_v47  ;;  %v10774_v26 = vld [vmem:[%s11425_s28 + $0x14cc] ss:$16 sps:$4 sm:$0xff]   ;;  %v10769_v47 = vld [vmem:[%s11425_s28 + $0x14c0] ss:$16 sps:$4 sm:$0xff]  }
 0x27a   : > { %7045 = vmatpush1.bf16.msra.mxu0 %v10684_v49  ;;  %7701 = vmatpush1.bf16.msra.mxu1 %v10687_v51  ;;  %v10772_v49 = vld [vmem:[%s11425_s28 + $0x14c8] ss:$16 sps:$4 sm:$0xff]   ;;  %v10777_v51 = vld [vmem:[%s11425_s28 + $0x14e4] ss:$16 sps:$4 sm:$0xff]  }
 0x27b   : > { %7046 = vmatprep.subr.bf16.mxu0 %v10692_v52  ;;  %7702 = vmatprep.subr.bf16.mxu1 %v10695_v33  ;;  %v10780_v52 = vld [vmem:[%s11425_s28 + $0x14ec] ss:$16 sps:$4 sm:$0xff]   ;;  %v10775_v33 = vld [vmem:[%s11425_s28 + $0x14e0] ss:$16 sps:$4 sm:$0xff]  }
 0x27e   : > { %7047 = vmatpush1.bf16.msra.mxu0 %v10690_v53  ;;  %7703 = vmatpush1.bf16.msra.mxu1 %v10693_v54  ;;  %v10778_v53 = vld [vmem:[%s11425_s28 + $0x14e8] ss:$16 sps:$4 sm:$0xff]   ;;  %v10783_v54 = vld [vmem:[%s11425_s28 + $0x1504] ss:$16 sps:$4 sm:$0xff]  }
 0x27f   : > { %7048 = vmatprep.subr.bf16.mxu0 %v10698_v55  ;;  %7704 = vmatprep.subr.bf16.mxu1 %v10701_v56  ;;  %v10786_v55 = vld [vmem:[%s11425_s28 + $0x150c] ss:$16 sps:$4 sm:$0xff]   ;;  %v10781_v56 = vld [vmem:[%s11425_s28 + $0x1500] ss:$16 sps:$4 sm:$0xff]  }
 0x282   : > { %7049 = vmatpush1.bf16.msra.mxu0 %v10696_v43  ;;  %7705 = vmatpush1.bf16.msra.mxu1 %v10699_v58  ;;  %v10784_v43 = vld [vmem:[%s11425_s28 + $0x1508] ss:$16 sps:$4 sm:$0xff]   ;;  %v10789_v58 = vld [vmem:[%s11425_s28 + $0x1524] ss:$16 sps:$4 sm:$0xff]  }
 0x283   : > { %7050 = vmatprep.subr.bf16.mxu0 %v10704_v41  ;;  %7706 = vmatprep.subr.bf16.mxu1 %v10707_v60  ;;  %v10792_v41 = vld [vmem:[%s11425_s28 + $0x152c] ss:$16 sps:$4 sm:$0xff]   ;;  %v10787_v60 = vld [vmem:[%s11425_s28 + $0x1520] ss:$16 sps:$4 sm:$0xff]  }
 0x286   : > { %7051 = vmatpush1.bf16.msra.mxu0 %v10702_v61  ;;  %7707 = vmatpush1.bf16.msra.mxu1 %v10705_v62  ;;  %v10790_v61 = vld [vmem:[%s11425_s28 + $0x1528] ss:$16 sps:$4 sm:$0xff]   ;;  %v10795_v62 = vld [vmem:[%s11425_s28 + $0x1544] ss:$16 sps:$4 sm:$0xff]  }
 0x287   : > { %7052 = vmatprep.subr.bf16.mxu0 %v10710_v0  ;;  %7708 = vmatprep.subr.bf16.mxu1 %v10713_v1  ;;  %v10798_v0 = vld [vmem:[%s11425_s28 + $0x154c] ss:$16 sps:$4 sm:$0xff]   ;;  %v10793_v1 = vld [vmem:[%s11425_s28 + $0x1540] ss:$16 sps:$4 sm:$0xff]  }
 0x28a   : > { %7053 = vmatpush1.bf16.msra.mxu0 %v10708_v2  ;;  %7709 = vmatpush1.bf16.msra.mxu1 %v10711_v48  ;;  %v10796_v2 = vld [vmem:[%s11425_s28 + $0x1548] ss:$16 sps:$4 sm:$0xff]   ;;  %v10801_v48 = vld [vmem:[%s11425_s28 + $0x1564] ss:$16 sps:$4 sm:$0xff]  }
 0x28b   : > { %7054 = vmatprep.subr.bf16.mxu0 %v10716_v3  ;;  %7710 = vmatprep.subr.bf16.mxu1 %v10719_v4  ;;  %v10804_v3 = vld [vmem:[%s11425_s28 + $0x156c] ss:$16 sps:$4 sm:$0xff]   ;;  %v10799_v4 = vld [vmem:[%s11425_s28 + $0x1560] ss:$16 sps:$4 sm:$0xff]  }
 0x28e   : > { %7055 = vmatpush1.bf16.msra.mxu0 %v10714_v5  ;;  %7711 = vmatpush1.bf16.msra.mxu1 %v10717_v6  ;;  %v10802_v5 = vld [vmem:[%s11425_s28 + $0x1568] ss:$16 sps:$4 sm:$0xff]   ;;  %v10807_v6 = vld [vmem:[%s11425_s28 + $0x1584] ss:$16 sps:$4 sm:$0xff]  }
 0x28f   : > { %7056 = vmatprep.subr.bf16.mxu0 %v10722_v59  ;;  %7712 = vmatprep.subr.bf16.mxu1 %v10725_v8  ;;  %v10810_v59 = vld [vmem:[%s11425_s28 + $0x158c] ss:$16 sps:$4 sm:$0xff]   ;;  %v10805_v8 = vld [vmem:[%s11425_s28 + $0x1580] ss:$16 sps:$4 sm:$0xff]  }
 0x292   : > { %7057 = vmatpush1.bf16.msra.mxu0 %v10720_v57  ;;  %7713 = vmatpush1.bf16.msra.mxu1 %v10723_v11  ;;  %v10808_v57 = vld [vmem:[%s11425_s28 + $0x1588] ss:$16 sps:$4 sm:$0xff]   ;;  %v10813_v11 = vld [vmem:[%s11425_s28 + $0x15a4] ss:$16 sps:$4 sm:$0xff]  }
 0x293   : > { %7058 = vmatprep.subr.bf16.mxu0 %v10728_v12  ;;  %7714 = vmatprep.subr.bf16.mxu1 %v10731_v13  ;;  %v10816_v12 = vld [vmem:[%s11425_s28 + $0x15ac] ss:$16 sps:$4 sm:$0xff]   ;;  %v10811_v13 = vld [vmem:[%s11425_s28 + $0x15a0] ss:$16 sps:$4 sm:$0xff]  }
 0x296   : > { %7059 = vmatpush1.bf16.msra.mxu0 %v10726_v15  ;;  %7715 = vmatpush1.bf16.msra.mxu1 %v10729_v16  ;;  %v10814_v15 = vld [vmem:[%s11425_s28 + $0x15a8] ss:$16 sps:$4 sm:$0xff]   ;;  %v10819_v16 = vld [vmem:[%s11425_s28 + $0x15c4] ss:$16 sps:$4 sm:$0xff]  }
 0x297   : > { %7069 = vmatprep.subr.bf16.mxu0 %v10735_v17  ;;  %7725 = vmatprep.subr.bf16.mxu1 %v10738_v63  ;;  %v10822_v17 = vld [vmem:[%s11425_s28 + $0x15cc] ss:$16 sps:$4 sm:$0xff]   ;;  %v400_v63 = vcombine.high %v12155_v9, %v12155_v9  ;;  %v10823_v9 = vld [vmem:[%s11425_s28 + $0x15e0] ss:$16 sps:$4 sm:$0xff]  }
 0x299   : > { %7061 = vmatmul.mubr.bf16.vlgmr.msra.gmra.mrb[0].mxu0 %v501_v19  ;;  %7717 = vmatmul.mubr.bf16.vlgmr.msra.gmra.mrb[0].mxu1 %v501_v19  ;;  %v10820_v19 = vld [vmem:[%s11425_s28 + $0x15c8] ss:$16 sps:$4 sm:$0xff]  }
 0x29a   : > { %7070 = vmatpush1.bf16.msra.mxu0 %v10733_v20  ;;  %7726 = vmatpush1.bf16.msra.mxu1 %v10736_v21  ;;  %v10825_v20 = vld [vmem:[%s11425_s28 + $0x15e4] ss:$16 sps:$4 sm:$0xff]   ;;  %v10828_v21 = vld [vmem:[%s11425_s28 + $0x15ec] ss:$16 sps:$4 sm:$0xff]  }
 0x29b   : > { %7071 = vmatprep.subr.bf16.mxu0 %v10741_v22  ;;  %7727 = vmatprep.subr.bf16.mxu1 %v10744_v23  ;;  %v12236_v22 = vrot.slane %v400_v63, %v11475_v50  ;;  %v10826_v23 = vld [vmem:[%s11425_s28 + $0x15e8] ss:$16 sps:$4 sm:$0xff]  }
 0x29c   : > { %7101 = vmatprep.mubr.bf16.mxu0 %v504_v25  ;;  %7757 = vmatprep.mubr.bf16.mxu1 %v504_v25  ;;  %v10831_v25 = vld [vmem:[%s11425_s28 + $0x1604] ss:$16 sps:$4 sm:$0xff]   ;;  %v10904_v63 = vld [vmem:[%s11425_s28 + $0x1788] ss:$16 sps:$4 sm:$0xff]  }
 0x29e   : > { %7072 = vmatpush1.bf16.msra.mxu0 %v10739_v7  ;;  %7728 = vmatpush1.bf16.msra.mxu1 %v10742_v24  ;;  %v10834_v7 = vld [vmem:[%s11425_s28 + $0x160c] ss:$16 sps:$4 sm:$0xff]   ;;  %v416_v24 = vcombine.high %v12236_v22, %v12236_v22 }
 0x29f   : > { %7073 = vmatprep.subr.bf16.mxu0 %v10747_v10  ;;  %7729 = vmatprep.subr.bf16.mxu1 %v10750_v28  ;;  %v503_v10 = vpack.c.bf16 %v12163_v14, %v12163_v14  ;;  %v10829_v28 = vld [vmem:[%s11425_s28 + $0x1600] ss:$16 sps:$4 sm:$0xff]  }
 0x2a0   : > { %v10835_v14 = vld [vmem:[%s11425_s28 + $0x1620] ss:$16 sps:$4 sm:$0xff]  }
 0x2a2   : > { %7074 = vmatpush1.bf16.msra.mxu0 %v10745_v30  ;;  %7730 = vmatpush1.bf16.msra.mxu1 %v10748_v31  ;;  %v10832_v30 = vld [vmem:[%s11425_s28 + $0x1608] ss:$16 sps:$4 sm:$0xff]   ;;  %v10837_v31 = vld [vmem:[%s11425_s28 + $0x1624] ss:$16 sps:$4 sm:$0xff]  }
 0x2a3   : > { %7075 = vmatprep.subr.bf16.mxu0 %v10753_v32  ;;  %7731 = vmatprep.subr.bf16.mxu1 %v10756_v34  ;;  %v10840_v32 = vld [vmem:[%s11425_s28 + $0x162c] ss:$16 sps:$4 sm:$0xff]   ;;  %v506_v34 = vpack.c.bf16 %v416_v24, %v416_v24  ;;  %v10916_v24 = vld [vmem:[%s11425_s28 + $0x17c8] ss:$16 sps:$4 sm:$0xff]  }
 0x2a6   : > { %7076 = vmatpush1.bf16.msra.mxu0 %v10751_v35  ;;  %7732 = vmatpush1.bf16.msra.mxu1 %v10754_v36  ;;  %v10838_v35 = vld [vmem:[%s11425_s28 + $0x1628] ss:$16 sps:$4 sm:$0xff]   ;;  %v10843_v36 = vld [vmem:[%s11425_s28 + $0x1644] ss:$16 sps:$4 sm:$0xff]  }
 0x2a7   : > { %7077 = vmatprep.subr.bf16.mxu0 %v10759_v27  ;;  %7733 = vmatprep.subr.bf16.mxu1 %v10762_v37  ;;  %v10846_v27 = vld [vmem:[%s11425_s28 + $0x164c] ss:$16 sps:$4 sm:$0xff]   ;;  %v10841_v37 = vld [vmem:[%s11425_s28 + $0x1640] ss:$16 sps:$4 sm:$0xff]  }
 0x2aa   : > { %7078 = vmatpush1.bf16.msra.mxu0 %v10757_v38  ;;  %7734 = vmatpush1.bf16.msra.mxu1 %v10760_v39  ;;  %v10844_v38 = vld [vmem:[%s11425_s28 + $0x1648] ss:$16 sps:$4 sm:$0xff]   ;;  %v10849_v39 = vld [vmem:[%s11425_s28 + $0x1664] ss:$16 sps:$4 sm:$0xff]  }
 0x2ab   : > { %7079 = vmatprep.subr.bf16.mxu0 %v10765_v40  ;;  %7735 = vmatprep.subr.bf16.mxu1 %v10768_v29  ;;  %v10852_v40 = vld [vmem:[%s11425_s28 + $0x166c] ss:$16 sps:$4 sm:$0xff]   ;;  %v10847_v29 = vld [vmem:[%s11425_s28 + $0x1660] ss:$16 sps:$4 sm:$0xff]  }
 0x2ae   : > { %7080 = vmatpush1.bf16.msra.mxu0 %v10763_v42  ;;  %7736 = vmatpush1.bf16.msra.mxu1 %v10766_v45  ;;  %v10850_v42 = vld [vmem:[%s11425_s28 + $0x1668] ss:$16 sps:$4 sm:$0xff]   ;;  %v10855_v45 = vld [vmem:[%s11425_s28 + $0x1684] ss:$16 sps:$4 sm:$0xff]  }
 0x2af   : > { %7081 = vmatprep.subr.bf16.mxu0 %v10771_v46  ;;  %7737 = vmatprep.subr.bf16.mxu1 %v10774_v26  ;;  %v10858_v46 = vld [vmem:[%s11425_s28 + $0x168c] ss:$16 sps:$4 sm:$0xff]   ;;  %v10853_v26 = vld [vmem:[%s11425_s28 + $0x1680] ss:$16 sps:$4 sm:$0xff]  }
 0x2b2   : > { %7082 = vmatpush1.bf16.msra.mxu0 %v10769_v47  ;;  %7738 = vmatpush1.bf16.msra.mxu1 %v10772_v49  ;;  %v10856_v47 = vld [vmem:[%s11425_s28 + $0x1688] ss:$16 sps:$4 sm:$0xff]   ;;  %v10861_v49 = vld [vmem:[%s11425_s28 + $0x16a4] ss:$16 sps:$4 sm:$0xff]  }
 0x2b3   : > { %7083 = vmatprep.subr.bf16.mxu0 %v10777_v51  ;;  %7739 = vmatprep.subr.bf16.mxu1 %v10780_v52  ;;  %v10864_v51 = vld [vmem:[%s11425_s28 + $0x16ac] ss:$16 sps:$4 sm:$0xff]   ;;  %v10859_v52 = vld [vmem:[%s11425_s28 + $0x16a0] ss:$16 sps:$4 sm:$0xff]  }
 0x2b6   : > { %7084 = vmatpush1.bf16.msra.mxu0 %v10775_v33  ;;  %7740 = vmatpush1.bf16.msra.mxu1 %v10778_v53  ;;  %v10862_v33 = vld [vmem:[%s11425_s28 + $0x16a8] ss:$16 sps:$4 sm:$0xff]   ;;  %v10867_v53 = vld [vmem:[%s11425_s28 + $0x16c4] ss:$16 sps:$4 sm:$0xff]  }
 0x2b7   : > { %7085 = vmatprep.subr.bf16.mxu0 %v10783_v54  ;;  %7741 = vmatprep.subr.bf16.mxu1 %v10786_v55  ;;  %v10870_v54 = vld [vmem:[%s11425_s28 + $0x16cc] ss:$16 sps:$4 sm:$0xff]   ;;  %v10865_v55 = vld [vmem:[%s11425_s28 + $0x16c0] ss:$16 sps:$4 sm:$0xff]  }
 0x2ba   : > { %7086 = vmatpush1.bf16.msra.mxu0 %v10781_v56  ;;  %7742 = vmatpush1.bf16.msra.mxu1 %v10784_v43  ;;  %v10868_v56 = vld [vmem:[%s11425_s28 + $0x16c8] ss:$16 sps:$4 sm:$0xff]   ;;  %v10873_v43 = vld [vmem:[%s11425_s28 + $0x16e4] ss:$16 sps:$4 sm:$0xff]  }
 0x2bb   : > { %7087 = vmatprep.subr.bf16.mxu0 %v10789_v58  ;;  %7743 = vmatprep.subr.bf16.mxu1 %v10792_v41  ;;  %v10876_v58 = vld [vmem:[%s11425_s28 + $0x16ec] ss:$16 sps:$4 sm:$0xff]   ;;  %v10871_v41 = vld [vmem:[%s11425_s28 + $0x16e0] ss:$16 sps:$4 sm:$0xff]  }
 0x2be   : > { %7088 = vmatpush1.bf16.msra.mxu0 %v10787_v60  ;;  %7744 = vmatpush1.bf16.msra.mxu1 %v10790_v61  ;;  %v10874_v60 = vld [vmem:[%s11425_s28 + $0x16e8] ss:$16 sps:$4 sm:$0xff]   ;;  %v10879_v61 = vld [vmem:[%s11425_s28 + $0x1704] ss:$16 sps:$4 sm:$0xff]  }
 0x2bf   : > { %7089 = vmatprep.subr.bf16.mxu0 %v10795_v62  ;;  %7745 = vmatprep.subr.bf16.mxu1 %v10798_v0  ;;  %v10882_v62 = vld [vmem:[%s11425_s28 + $0x170c] ss:$16 sps:$4 sm:$0xff]   ;;  %v10877_v0 = vld [vmem:[%s11425_s28 + $0x1700] ss:$16 sps:$4 sm:$0xff]  }
 0x2c2   : > { %7090 = vmatpush1.bf16.msra.mxu0 %v10793_v1  ;;  %7746 = vmatpush1.bf16.msra.mxu1 %v10796_v2  ;;  %v10880_v1 = vld [vmem:[%s11425_s28 + $0x1708] ss:$16 sps:$4 sm:$0xff]   ;;  %v10885_v2 = vld [vmem:[%s11425_s28 + $0x1724] ss:$16 sps:$4 sm:$0xff]  }
 0x2c3   : > { %7091 = vmatprep.subr.bf16.mxu0 %v10801_v48  ;;  %7747 = vmatprep.subr.bf16.mxu1 %v10804_v3  ;;  %v10888_v48 = vld [vmem:[%s11425_s28 + $0x172c] ss:$16 sps:$4 sm:$0xff]   ;;  %v10883_v3 = vld [vmem:[%s11425_s28 + $0x1720] ss:$16 sps:$4 sm:$0xff]  }
 0x2c6   : > { %7092 = vmatpush1.bf16.msra.mxu0 %v10799_v4  ;;  %7748 = vmatpush1.bf16.msra.mxu1 %v10802_v5  ;;  %v10886_v4 = vld [vmem:[%s11425_s28 + $0x1728] ss:$16 sps:$4 sm:$0xff]   ;;  %v10891_v5 = vld [vmem:[%s11425_s28 + $0x1744] ss:$16 sps:$4 sm:$0xff]  }
 0x2c7   : > { %7093 = vmatprep.subr.bf16.mxu0 %v10807_v6  ;;  %7749 = vmatprep.subr.bf16.mxu1 %v10810_v59  ;;  %v10894_v6 = vld [vmem:[%s11425_s28 + $0x174c] ss:$16 sps:$4 sm:$0xff]   ;;  %v10889_v59 = vld [vmem:[%s11425_s28 + $0x1740] ss:$16 sps:$4 sm:$0xff]  }
 0x2ca   : > { %7094 = vmatpush1.bf16.msra.mxu0 %v10805_v8  ;;  %7750 = vmatpush1.bf16.msra.mxu1 %v10808_v57  ;;  %v10892_v8 = vld [vmem:[%s11425_s28 + $0x1748] ss:$16 sps:$4 sm:$0xff]   ;;  %v10897_v57 = vld [vmem:[%s11425_s28 + $0x1764] ss:$16 sps:$4 sm:$0xff]  }
 0x2cb   : > { %7095 = vmatprep.subr.bf16.mxu0 %v10813_v11  ;;  %7751 = vmatprep.subr.bf16.mxu1 %v10816_v12  ;;  %v10900_v11 = vld [vmem:[%s11425_s28 + $0x176c] ss:$16 sps:$4 sm:$0xff]   ;;  %v10895_v12 = vld [vmem:[%s11425_s28 + $0x1760] ss:$16 sps:$4 sm:$0xff]  }
 0x2ce   : > { %7096 = vmatpush1.bf16.msra.mxu0 %v10811_v13  ;;  %7752 = vmatpush1.bf16.msra.mxu1 %v10814_v15  ;;  %v10898_v13 = vld [vmem:[%s11425_s28 + $0x1768] ss:$16 sps:$4 sm:$0xff]   ;;  %v10903_v15 = vld [vmem:[%s11425_s28 + $0x1784] ss:$16 sps:$4 sm:$0xff]  }
 0x2cf   : > { %7097 = vmatprep.subr.bf16.mxu0 %v10819_v16  ;;  %7753 = vmatprep.subr.bf16.mxu1 %v10822_v17  ;;  %v10906_v16 = vld [vmem:[%s11425_s28 + $0x178c] ss:$16 sps:$4 sm:$0xff]   ;;  %v10901_v17 = vld [vmem:[%s11425_s28 + $0x1780] ss:$16 sps:$4 sm:$0xff]  }
 0x2d2   : > { %7098 = vmatpush1.bf16.msra.mxu0 %v10817_v18  ;;  %7754 = vmatpush1.bf16.msra.mxu1 %v10820_v19  ;;  %v10909_v18 = vld [vmem:[%s11425_s28 + $0x17a4] ss:$16 sps:$4 sm:$0xff]   ;;  %v10912_v19 = vld [vmem:[%s11425_s28 + $0x17ac] ss:$16 sps:$4 sm:$0xff]  }
 0x2d3   : > { %7099 = vmatprep.subr.bf16.mxu0 %v10825_v20  ;;  %7755 = vmatprep.subr.bf16.mxu1 %v10828_v21  ;;  %v10907_v20 = vld [vmem:[%s11425_s28 + $0x17a0] ss:$16 sps:$4 sm:$0xff]   ;;  %v10910_v21 = vld [vmem:[%s11425_s28 + $0x17a8] ss:$16 sps:$4 sm:$0xff]  }
 0x2d6   : > { %7100 = vmatpush1.bf16.msra.mxu0 %v10823_v9  ;;  %7756 = vmatpush1.bf16.msra.mxu1 %v10826_v23  ;;  %v10915_v9 = vld [vmem:[%s11425_s28 + $0x17c4] ss:$16 sps:$4 sm:$0xff]   ;;  %v10918_v23 = vld [vmem:[%s11425_s28 + $0x17cc] ss:$16 sps:$4 sm:$0xff]  }
 0x2d7   : > { %7110 = vmatprep.subr.bf16.mxu0 %v10831_v25  ;;  %7766 = vmatprep.subr.bf16.mxu1 %v10834_v7  ;;  %v12303_v25 = vld [vmem:[%s11420_s24 + $0x30] sm:$0xff] }
 0x2d8   : > { %v10913_v7 = vld [vmem:[%s11425_s28 + $0x17c0] ss:$16 sps:$4 sm:$0xff]  }
 0x2d9   : > { %7102 = vmatmul.mubr.bf16.vlgmr.msra.gmra.mrb[0].mxu0 %v503_v10  ;;  %7758 = vmatmul.mubr.bf16.vlgmr.msra.gmra.mrb[0].mxu1 %v503_v10  ;;  %v10921_v10 = vld [vmem:[%s11425_s28 + $0x17e4] ss:$16 sps:$4 sm:$0xff]  }
 0x2da   : > { %7111 = vmatpush1.bf16.msra.mxu0 %v10829_v28  ;;  %7767 = vmatpush1.bf16.msra.mxu1 %v10832_v30  ;;  %v10924_v28 = vld [vmem:[%s11425_s28 + $0x17ec] ss:$16 sps:$4 sm:$0xff]   ;;  %v12311_v30 = vrot.slane %v12303_v25, %v11475_v50 }
 0x2db   : > { %7112 = vmatprep.subr.bf16.mxu0 %v10837_v31  ;;  %7768 = vmatprep.subr.bf16.mxu1 %v10840_v32  ;;  %v10919_v31 = vld [vmem:[%s11425_s28 + $0x17e0] ss:$16 sps:$4 sm:$0xff]   ;;  %v10922_v32 = vld [vmem:[%s11425_s28 + $0x17e8] ss:$16 sps:$4 sm:$0xff]  }
 0x2dc   : > { %7142 = vmatprep.mubr.bf16.mxu0 %v506_v34  ;;  %7798 = vmatprep.mubr.bf16.mxu1 %v506_v34  ;;  %v10928_v34 = vld [vmem:[%s11425_s28 + $0x1804] ss:$16 sps:$4 sm:$0xff]  }
 0x2de   : > { %7113 = vmatpush1.bf16.msra.mxu0 %v10835_v14  ;;  %7769 = vmatpush1.bf16.msra.mxu1 %v10838_v35  ;;  %v10931_v14 = vld [vmem:[%s11425_s28 + $0x180c] ss:$16 sps:$4 sm:$0xff]   ;;  %v432_v35 = vcombine.high %v12311_v30, %v12311_v30 }
 0x2df   : > { %7114 = vmatprep.subr.bf16.mxu0 %v10843_v36  ;;  %7770 = vmatprep.subr.bf16.mxu1 %v10846_v27  ;;  %v505_v36 = vpack.c.bf16 %v12236_v22, %v12236_v22  ;;  %v10926_v27 = vld [vmem:[%s11425_s28 + $0x1800] ss:$16 sps:$4 sm:$0xff]  }
 0x2e0   : > { %v10932_v22 = vld [vmem:[%s11425_s28 + $0x1820] ss:$16 sps:$4 sm:$0xff]  }
 0x2e2   : > { %7115 = vmatpush1.bf16.msra.mxu0 %v10841_v37  ;;  %7771 = vmatpush1.bf16.msra.mxu1 %v10844_v38  ;;  %v10929_v37 = vld [vmem:[%s11425_s28 + $0x1808] ss:$16 sps:$4 sm:$0xff]   ;;  %v10934_v38 = vld [vmem:[%s11425_s28 + $0x1824] ss:$16 sps:$4 sm:$0xff]  }
 0x2e3   : > { %7116 = vmatprep.subr.bf16.mxu0 %v10849_v39  ;;  %7772 = vmatprep.subr.bf16.mxu1 %v10852_v40  ;;  %v10937_v39 = vld [vmem:[%s11425_s28 + $0x182c] ss:$16 sps:$4 sm:$0xff]   ;;  %v508_v40 = vpack.c.bf16 %v432_v35, %v432_v35  ;;  %v11010_v35 = vld [vmem:[%s11425_s28 + $0x19c0] ss:$16 sps:$4 sm:$0xff]  }
 0x2e6   : > { %7117 = vmatpush1.bf16.msra.mxu0 %v10847_v29  ;;  %7773 = vmatpush1.bf16.msra.mxu1 %v10850_v42  ;;  %v10935_v29 = vld [vmem:[%s11425_s28 + $0x1828] ss:$16 sps:$4 sm:$0xff]   ;;  %v10940_v42 = vld [vmem:[%s11425_s28 + $0x1844] ss:$16 sps:$4 sm:$0xff]  }
 0x2e7   : > { %7118 = vmatprep.subr.bf16.mxu0 %v10855_v45  ;;  %7774 = vmatprep.subr.bf16.mxu1 %v10858_v46  ;;  %v10943_v45 = vld [vmem:[%s11425_s28 + $0x184c] ss:$16 sps:$4 sm:$0xff]   ;;  %v10938_v46 = vld [vmem:[%s11425_s28 + $0x1840] ss:$16 sps:$4 sm:$0xff]  }
 0x2ea   : > { %7119 = vmatpush1.bf16.msra.mxu0 %v10853_v26  ;;  %7775 = vmatpush1.bf16.msra.mxu1 %v10856_v47  ;;  %v10941_v26 = vld [vmem:[%s11425_s28 + $0x1848] ss:$16 sps:$4 sm:$0xff]   ;;  %v10946_v47 = vld [vmem:[%s11425_s28 + $0x1864] ss:$16 sps:$4 sm:$0xff]  }
 0x2eb   : > { %7120 = vmatprep.subr.bf16.mxu0 %v10861_v49  ;;  %7776 = vmatprep.subr.bf16.mxu1 %v10864_v51  ;;  %v10949_v49 = vld [vmem:[%s11425_s28 + $0x186c] ss:$16 sps:$4 sm:$0xff]   ;;  %v10944_v51 = vld [vmem:[%s11425_s28 + $0x1860] ss:$16 sps:$4 sm:$0xff]  }
 0x2ee   : > { %7121 = vmatpush1.bf16.msra.mxu0 %v10859_v52  ;;  %7777 = vmatpush1.bf16.msra.mxu1 %v10862_v33  ;;  %v10947_v52 = vld [vmem:[%s11425_s28 + $0x1868] ss:$16 sps:$4 sm:$0xff]   ;;  %v10952_v33 = vld [vmem:[%s11425_s28 + $0x1884] ss:$16 sps:$4 sm:$0xff]  }
 0x2ef   : > { %7122 = vmatprep.subr.bf16.mxu0 %v10867_v53  ;;  %7778 = vmatprep.subr.bf16.mxu1 %v10870_v54  ;;  %v10955_v53 = vld [vmem:[%s11425_s28 + $0x188c] ss:$16 sps:$4 sm:$0xff]   ;;  %v10950_v54 = vld [vmem:[%s11425_s28 + $0x1880] ss:$16 sps:$4 sm:$0xff]  }
 0x2f2   : > { %7123 = vmatpush1.bf16.msra.mxu0 %v10865_v55  ;;  %7779 = vmatpush1.bf16.msra.mxu1 %v10868_v56  ;;  %v10953_v55 = vld [vmem:[%s11425_s28 + $0x1888] ss:$16 sps:$4 sm:$0xff]   ;;  %v10958_v56 = vld [vmem:[%s11425_s28 + $0x18a4] ss:$16 sps:$4 sm:$0xff]  }
 0x2f3   : > { %7124 = vmatprep.subr.bf16.mxu0 %v10873_v43  ;;  %7780 = vmatprep.subr.bf16.mxu1 %v10876_v58  ;;  %v10961_v43 = vld [vmem:[%s11425_s28 + $0x18ac] ss:$16 sps:$4 sm:$0xff]   ;;  %v10956_v58 = vld [vmem:[%s11425_s28 + $0x18a0] ss:$16 sps:$4 sm:$0xff]  }
 0x2f6   : > { %7125 = vmatpush1.bf16.msra.mxu0 %v10871_v41  ;;  %7781 = vmatpush1.bf16.msra.mxu1 %v10874_v60  ;;  %v10959_v41 = vld [vmem:[%s11425_s28 + $0x18a8] ss:$16 sps:$4 sm:$0xff]   ;;  %v10964_v60 = vld [vmem:[%s11425_s28 + $0x18c4] ss:$16 sps:$4 sm:$0xff]  }
 0x2f7   : > { %7126 = vmatprep.subr.bf16.mxu0 %v10879_v61  ;;  %7782 = vmatprep.subr.bf16.mxu1 %v10882_v62  ;;  %v10967_v61 = vld [vmem:[%s11425_s28 + $0x18cc] ss:$16 sps:$4 sm:$0xff]   ;;  %v10962_v62 = vld [vmem:[%s11425_s28 + $0x18c0] ss:$16 sps:$4 sm:$0xff]  }
 0x2fa   : > { %7127 = vmatpush1.bf16.msra.mxu0 %v10877_v0  ;;  %7783 = vmatpush1.bf16.msra.mxu1 %v10880_v1  ;;  %v10965_v0 = vld [vmem:[%s11425_s28 + $0x18c8] ss:$16 sps:$4 sm:$0xff]   ;;  %v10970_v1 = vld [vmem:[%s11425_s28 + $0x18e4] ss:$16 sps:$4 sm:$0xff]  }
 0x2fb   : > { %7128 = vmatprep.subr.bf16.mxu0 %v10885_v2  ;;  %7784 = vmatprep.subr.bf16.mxu1 %v10888_v48  ;;  %v10973_v2 = vld [vmem:[%s11425_s28 + $0x18ec] ss:$16 sps:$4 sm:$0xff]   ;;  %v10968_v48 = vld [vmem:[%s11425_s28 + $0x18e0] ss:$16 sps:$4 sm:$0xff]  }
 0x2fe   : > { %7129 = vmatpush1.bf16.msra.mxu0 %v10883_v3  ;;  %7785 = vmatpush1.bf16.msra.mxu1 %v10886_v4  ;;  %v10971_v3 = vld [vmem:[%s11425_s28 + $0x18e8] ss:$16 sps:$4 sm:$0xff]   ;;  %v10976_v4 = vld [vmem:[%s11425_s28 + $0x1904] ss:$16 sps:$4 sm:$0xff]  }
 0x2ff   : > { %7130 = vmatprep.subr.bf16.mxu0 %v10891_v5  ;;  %7786 = vmatprep.subr.bf16.mxu1 %v10894_v6  ;;  %v10979_v5 = vld [vmem:[%s11425_s28 + $0x190c] ss:$16 sps:$4 sm:$0xff]   ;;  %v10974_v6 = vld [vmem:[%s11425_s28 + $0x1900] ss:$16 sps:$4 sm:$0xff]  }
 0x302   : > { %7131 = vmatpush1.bf16.msra.mxu0 %v10889_v59  ;;  %7787 = vmatpush1.bf16.msra.mxu1 %v10892_v8  ;;  %v10977_v59 = vld [vmem:[%s11425_s28 + $0x1908] ss:$16 sps:$4 sm:$0xff]   ;;  %v10982_v8 = vld [vmem:[%s11425_s28 + $0x1924] ss:$16 sps:$4 sm:$0xff]  }
 0x303   : > { %7132 = vmatprep.subr.bf16.mxu0 %v10897_v57  ;;  %7788 = vmatprep.subr.bf16.mxu1 %v10900_v11  ;;  %v10985_v57 = vld [vmem:[%s11425_s28 + $0x192c] ss:$16 sps:$4 sm:$0xff]   ;;  %v10980_v11 = vld [vmem:[%s11425_s28 + $0x1920] ss:$16 sps:$4 sm:$0xff]  }
 0x306   : > { %7133 = vmatpush1.bf16.msra.mxu0 %v10895_v12  ;;  %7789 = vmatpush1.bf16.msra.mxu1 %v10898_v13  ;;  %v10983_v12 = vld [vmem:[%s11425_s28 + $0x1928] ss:$16 sps:$4 sm:$0xff]   ;;  %v10988_v13 = vld [vmem:[%s11425_s28 + $0x1944] ss:$16 sps:$4 sm:$0xff]  }
 0x307   : > { %7134 = vmatprep.subr.bf16.mxu0 %v10903_v15  ;;  %7790 = vmatprep.subr.bf16.mxu1 %v10906_v16  ;;  %v10991_v15 = vld [vmem:[%s11425_s28 + $0x194c] ss:$16 sps:$4 sm:$0xff]   ;;  %v10986_v16 = vld [vmem:[%s11425_s28 + $0x1940] ss:$16 sps:$4 sm:$0xff]  }
 0x30a   : > { %7135 = vmatpush1.bf16.msra.mxu0 %v10901_v17  ;;  %7791 = vmatpush1.bf16.msra.mxu1 %v10904_v63  ;;  %v10989_v17 = vld [vmem:[%s11425_s28 + $0x1948] ss:$16 sps:$4 sm:$0xff]   ;;  %v10994_v63 = vld [vmem:[%s11425_s28 + $0x1964] ss:$16 sps:$4 sm:$0xff]  }
 0x30b   : > { %7136 = vmatprep.subr.bf16.mxu0 %v10909_v18  ;;  %7792 = vmatprep.subr.bf16.mxu1 %v10912_v19  ;;  %v10997_v18 = vld [vmem:[%s11425_s28 + $0x196c] ss:$16 sps:$4 sm:$0xff]   ;;  %v10992_v19 = vld [vmem:[%s11425_s28 + $0x1960] ss:$16 sps:$4 sm:$0xff]  }
 0x30e   : > { %7137 = vmatpush1.bf16.msra.mxu0 %v10907_v20  ;;  %7793 = vmatpush1.bf16.msra.mxu1 %v10910_v21  ;;  %v10995_v20 = vld [vmem:[%s11425_s28 + $0x1968] ss:$16 sps:$4 sm:$0xff]   ;;  %v11000_v21 = vld [vmem:[%s11425_s28 + $0x1984] ss:$16 sps:$4 sm:$0xff]  }
 0x30f   : > { %7138 = vmatprep.subr.bf16.mxu0 %v10915_v9  ;;  %7794 = vmatprep.subr.bf16.mxu1 %v10918_v23  ;;  %v11003_v9 = vld [vmem:[%s11425_s28 + $0x198c] ss:$16 sps:$4 sm:$0xff]   ;;  %v10998_v23 = vld [vmem:[%s11425_s28 + $0x1980] ss:$16 sps:$4 sm:$0xff]  }
 0x312   : > { %7139 = vmatpush1.bf16.msra.mxu0 %v10913_v7  ;;  %7795 = vmatpush1.bf16.msra.mxu1 %v10916_v24  ;;  %v11001_v7 = vld [vmem:[%s11425_s28 + $0x1988] ss:$16 sps:$4 sm:$0xff]   ;;  %v11006_v24 = vld [vmem:[%s11425_s28 + $0x19a4] ss:$16 sps:$4 sm:$0xff]  }
 0x313   : > { %7140 = vmatprep.subr.bf16.mxu0 %v10921_v10  ;;  %7796 = vmatprep.subr.bf16.mxu1 %v10924_v28  ;;  %v11009_v10 = vld [vmem:[%s11425_s28 + $0x19ac] ss:$16 sps:$4 sm:$0xff]   ;;  %v11004_v28 = vld [vmem:[%s11425_s28 + $0x19a0] ss:$16 sps:$4 sm:$0xff]  }
 0x316   : > { %7141 = vmatpush1.bf16.msra.mxu0 %v10919_v31  ;;  %7797 = vmatpush1.bf16.msra.mxu1 %v10922_v32  ;;  %v11007_v31 = vld [vmem:[%s11425_s28 + $0x19a8] ss:$16 sps:$4 sm:$0xff]   ;;  %v11012_v32 = vld [vmem:[%s11425_s28 + $0x19c4] ss:$16 sps:$4 sm:$0xff]  }
 0x317   : > { %7151 = vmatprep.subr.bf16.mxu0 %v10928_v34  ;;  %7807 = vmatprep.subr.bf16.mxu1 %v10931_v14  ;;  %v11015_v34 = vld [vmem:[%s11425_s28 + $0x19cc] ss:$16 sps:$4 sm:$0xff]   ;;  %v417_v14 = vcombine.high %v12303_v25, %v12303_v25  ;;  %v11016_v25 = vld [vmem:[%s11425_s28 + $0x19e0] ss:$16 sps:$4 sm:$0xff]  }
 0x319   : > { %7143 = vmatmul.mubr.bf16.vlgmr.msra.gmra.mrb[0].mxu0 %v505_v36  ;;  %7799 = vmatmul.mubr.bf16.vlgmr.msra.gmra.mrb[0].mxu1 %v505_v36  ;;  %v11013_v36 = vld [vmem:[%s11425_s28 + $0x19c8] ss:$16 sps:$4 sm:$0xff]  }
 0x31a   : > { %7152 = vmatpush1.bf16.msra.mxu0 %v10926_v27  ;;  %7808 = vmatpush1.bf16.msra.mxu1 %v10929_v37  ;;  %v11018_v27 = vld [vmem:[%s11425_s28 + $0x19e4] ss:$16 sps:$4 sm:$0xff]   ;;  %v11021_v37 = vld [vmem:[%s11425_s28 + $0x19ec] ss:$16 sps:$4 sm:$0xff]  }
 0x31b   : > { %7153 = vmatprep.subr.bf16.mxu0 %v10934_v38  ;;  %7809 = vmatprep.subr.bf16.mxu1 %v10937_v39  ;;  %v12384_v38 = vrot.slane %v417_v14, %v11475_v50  ;;  %v11019_v39 = vld [vmem:[%s11425_s28 + $0x19e8] ss:$16 sps:$4 sm:$0xff]  }
 0x31c   : > { %7183 = vmatprep.mubr.bf16.mxu0 %v508_v40  ;;  %7839 = vmatprep.mubr.bf16.mxu1 %v508_v40  ;;  %v11024_v40 = vld [vmem:[%s11425_s28 + $0x1a04] ss:$16 sps:$4 sm:$0xff]   ;;  %v11097_v14 = vld [vmem:[%s11425_s28 + $0x1b88] ss:$16 sps:$4 sm:$0xff]  }
 0x31e   : > { %7154 = vmatpush1.bf16.msra.mxu0 %v10932_v22  ;;  %7810 = vmatpush1.bf16.msra.mxu1 %v10935_v29  ;;  %v11027_v22 = vld [vmem:[%s11425_s28 + $0x1a0c] ss:$16 sps:$4 sm:$0xff]   ;;  %v433_v29 = vcombine.high %v12384_v38, %v12384_v38 }
 0x31f   : > { %7155 = vmatprep.subr.bf16.mxu0 %v10940_v42  ;;  %7811 = vmatprep.subr.bf16.mxu1 %v10943_v45  ;;  %v507_v42 = vpack.c.bf16 %v12311_v30, %v12311_v30  ;;  %v11022_v45 = vld [vmem:[%s11425_s28 + $0x1a00] ss:$16 sps:$4 sm:$0xff]  }
 0x320   : > { %v11028_v30 = vld [vmem:[%s11425_s28 + $0x1a20] ss:$16 sps:$4 sm:$0xff]  }
 0x322   : > { %7156 = vmatpush1.bf16.msra.mxu0 %v10938_v46  ;;  %7812 = vmatpush1.bf16.msra.mxu1 %v10941_v26  ;;  %v11025_v46 = vld [vmem:[%s11425_s28 + $0x1a08] ss:$16 sps:$4 sm:$0xff]   ;;  %v11030_v26 = vld [vmem:[%s11425_s28 + $0x1a24] ss:$16 sps:$4 sm:$0xff]  }
 0x323   : > { %7157 = vmatprep.subr.bf16.mxu0 %v10946_v47  ;;  %7813 = vmatprep.subr.bf16.mxu1 %v10949_v49  ;;  %v11033_v47 = vld [vmem:[%s11425_s28 + $0x1a2c] ss:$16 sps:$4 sm:$0xff]   ;;  %v510_v49 = vpack.c.bf16 %v433_v29, %v433_v29  ;;  %v11109_v29 = vld [vmem:[%s11425_s28 + $0x1bc8] ss:$16 sps:$4 sm:$0xff]  }
 0x326   : > { %7158 = vmatpush1.bf16.msra.mxu0 %v10944_v51  ;;  %7814 = vmatpush1.bf16.msra.mxu1 %v10947_v52  ;;  %v11031_v51 = vld [vmem:[%s11425_s28 + $0x1a28] ss:$16 sps:$4 sm:$0xff]   ;;  %v11036_v52 = vld [vmem:[%s11425_s28 + $0x1a44] ss:$16 sps:$4 sm:$0xff]  }
 0x327   : > { %7159 = vmatprep.subr.bf16.mxu0 %v10952_v33  ;;  %7815 = vmatprep.subr.bf16.mxu1 %v10955_v53  ;;  %v11039_v33 = vld [vmem:[%s11425_s28 + $0x1a4c] ss:$16 sps:$4 sm:$0xff]   ;;  %v11034_v53 = vld [vmem:[%s11425_s28 + $0x1a40] ss:$16 sps:$4 sm:$0xff]  }
 0x32a   : > { %7160 = vmatpush1.bf16.msra.mxu0 %v10950_v54  ;;  %7816 = vmatpush1.bf16.msra.mxu1 %v10953_v55  ;;  %v11037_v54 = vld [vmem:[%s11425_s28 + $0x1a48] ss:$16 sps:$4 sm:$0xff]   ;;  %v11042_v55 = vld [vmem:[%s11425_s28 + $0x1a64] ss:$16 sps:$4 sm:$0xff]  }
 0x32b   : > { %7161 = vmatprep.subr.bf16.mxu0 %v10958_v56  ;;  %7817 = vmatprep.subr.bf16.mxu1 %v10961_v43  ;;  %v11045_v56 = vld [vmem:[%s11425_s28 + $0x1a6c] ss:$16 sps:$4 sm:$0xff]   ;;  %v11040_v43 = vld [vmem:[%s11425_s28 + $0x1a60] ss:$16 sps:$4 sm:$0xff]  }
 0x32e   : > { %7162 = vmatpush1.bf16.msra.mxu0 %v10956_v58  ;;  %7818 = vmatpush1.bf16.msra.mxu1 %v10959_v41  ;;  %v11043_v58 = vld [vmem:[%s11425_s28 + $0x1a68] ss:$16 sps:$4 sm:$0xff]   ;;  %v11048_v41 = vld [vmem:[%s11425_s28 + $0x1a84] ss:$16 sps:$4 sm:$0xff]  }
 0x32f   : > { %7163 = vmatprep.subr.bf16.mxu0 %v10964_v60  ;;  %7819 = vmatprep.subr.bf16.mxu1 %v10967_v61  ;;  %v11051_v60 = vld [vmem:[%s11425_s28 + $0x1a8c] ss:$16 sps:$4 sm:$0xff]   ;;  %v11046_v61 = vld [vmem:[%s11425_s28 + $0x1a80] ss:$16 sps:$4 sm:$0xff]  }
 0x332   : > { %7164 = vmatpush1.bf16.msra.mxu0 %v10962_v62  ;;  %7820 = vmatpush1.bf16.msra.mxu1 %v10965_v0  ;;  %v11049_v62 = vld [vmem:[%s11425_s28 + $0x1a88] ss:$16 sps:$4 sm:$0xff]   ;;  %v11054_v0 = vld [vmem:[%s11425_s28 + $0x1aa4] ss:$16 sps:$4 sm:$0xff]  }
 0x333   : > { %7165 = vmatprep.subr.bf16.mxu0 %v10970_v1  ;;  %7821 = vmatprep.subr.bf16.mxu1 %v10973_v2  ;;  %v11057_v1 = vld [vmem:[%s11425_s28 + $0x1aac] ss:$16 sps:$4 sm:$0xff]   ;;  %v11052_v2 = vld [vmem:[%s11425_s28 + $0x1aa0] ss:$16 sps:$4 sm:$0xff]  }
 0x336   : > { %7166 = vmatpush1.bf16.msra.mxu0 %v10968_v48  ;;  %7822 = vmatpush1.bf16.msra.mxu1 %v10971_v3  ;;  %v11055_v48 = vld [vmem:[%s11425_s28 + $0x1aa8] ss:$16 sps:$4 sm:$0xff]   ;;  %v11060_v3 = vld [vmem:[%s11425_s28 + $0x1ac4] ss:$16 sps:$4 sm:$0xff]  }
 0x337   : > { %7167 = vmatprep.subr.bf16.mxu0 %v10976_v4  ;;  %7823 = vmatprep.subr.bf16.mxu1 %v10979_v5  ;;  %v11063_v4 = vld [vmem:[%s11425_s28 + $0x1acc] ss:$16 sps:$4 sm:$0xff]   ;;  %v11058_v5 = vld [vmem:[%s11425_s28 + $0x1ac0] ss:$16 sps:$4 sm:$0xff]  }
 0x33a   : > { %7168 = vmatpush1.bf16.msra.mxu0 %v10974_v6  ;;  %7824 = vmatpush1.bf16.msra.mxu1 %v10977_v59  ;;  %v11061_v6 = vld [vmem:[%s11425_s28 + $0x1ac8] ss:$16 sps:$4 sm:$0xff]   ;;  %v11066_v59 = vld [vmem:[%s11425_s28 + $0x1ae4] ss:$16 sps:$4 sm:$0xff]  }
 0x33b   : > { %7169 = vmatprep.subr.bf16.mxu0 %v10982_v8  ;;  %7825 = vmatprep.subr.bf16.mxu1 %v10985_v57  ;;  %v11069_v8 = vld [vmem:[%s11425_s28 + $0x1aec] ss:$16 sps:$4 sm:$0xff]   ;;  %v11064_v57 = vld [vmem:[%s11425_s28 + $0x1ae0] ss:$16 sps:$4 sm:$0xff]  }
 0x33e   : > { %7170 = vmatpush1.bf16.msra.mxu0 %v10980_v11  ;;  %7826 = vmatpush1.bf16.msra.mxu1 %v10983_v12  ;;  %v11067_v11 = vld [vmem:[%s11425_s28 + $0x1ae8] ss:$16 sps:$4 sm:$0xff]   ;;  %v11072_v12 = vld [vmem:[%s11425_s28 + $0x1b04] ss:$16 sps:$4 sm:$0xff]  }
 0x33f   : > { %7171 = vmatprep.subr.bf16.mxu0 %v10988_v13  ;;  %7827 = vmatprep.subr.bf16.mxu1 %v10991_v15  ;;  %v11075_v13 = vld [vmem:[%s11425_s28 + $0x1b0c] ss:$16 sps:$4 sm:$0xff]   ;;  %v11070_v15 = vld [vmem:[%s11425_s28 + $0x1b00] ss:$16 sps:$4 sm:$0xff]  }
 0x342   : > { %7172 = vmatpush1.bf16.msra.mxu0 %v10986_v16  ;;  %7828 = vmatpush1.bf16.msra.mxu1 %v10989_v17  ;;  %v11073_v16 = vld [vmem:[%s11425_s28 + $0x1b08] ss:$16 sps:$4 sm:$0xff]   ;;  %v11078_v17 = vld [vmem:[%s11425_s28 + $0x1b24] ss:$16 sps:$4 sm:$0xff]  }
 0x343   : > { %7173 = vmatprep.subr.bf16.mxu0 %v10994_v63  ;;  %7829 = vmatprep.subr.bf16.mxu1 %v10997_v18  ;;  %v11081_v63 = vld [vmem:[%s11425_s28 + $0x1b2c] ss:$16 sps:$4 sm:$0xff]   ;;  %v11076_v18 = vld [vmem:[%s11425_s28 + $0x1b20] ss:$16 sps:$4 sm:$0xff]  }
 0x346   : > { %7174 = vmatpush1.bf16.msra.mxu0 %v10992_v19  ;;  %7830 = vmatpush1.bf16.msra.mxu1 %v10995_v20  ;;  %v11079_v19 = vld [vmem:[%s11425_s28 + $0x1b28] ss:$16 sps:$4 sm:$0xff]   ;;  %v11084_v20 = vld [vmem:[%s11425_s28 + $0x1b44] ss:$16 sps:$4 sm:$0xff]  }
 0x347   : > { %7175 = vmatprep.subr.bf16.mxu0 %v11000_v21  ;;  %7831 = vmatprep.subr.bf16.mxu1 %v11003_v9  ;;  %v11087_v21 = vld [vmem:[%s11425_s28 + $0x1b4c] ss:$16 sps:$4 sm:$0xff]   ;;  %v11082_v9 = vld [vmem:[%s11425_s28 + $0x1b40] ss:$16 sps:$4 sm:$0xff]  }
 0x34a   : > { %7176 = vmatpush1.bf16.msra.mxu0 %v10998_v23  ;;  %7832 = vmatpush1.bf16.msra.mxu1 %v11001_v7  ;;  %v11085_v23 = vld [vmem:[%s11425_s28 + $0x1b48] ss:$16 sps:$4 sm:$0xff]   ;;  %v11090_v7 = vld [vmem:[%s11425_s28 + $0x1b64] ss:$16 sps:$4 sm:$0xff]  }
 0x34b   : > { %7177 = vmatprep.subr.bf16.mxu0 %v11006_v24  ;;  %7833 = vmatprep.subr.bf16.mxu1 %v11009_v10  ;;  %v11093_v24 = vld [vmem:[%s11425_s28 + $0x1b6c] ss:$16 sps:$4 sm:$0xff]   ;;  %v11088_v10 = vld [vmem:[%s11425_s28 + $0x1b60] ss:$16 sps:$4 sm:$0xff]  }
 0x34e   : > { %7178 = vmatpush1.bf16.msra.mxu0 %v11004_v28  ;;  %7834 = vmatpush1.bf16.msra.mxu1 %v11007_v31  ;;  %v11091_v28 = vld [vmem:[%s11425_s28 + $0x1b68] ss:$16 sps:$4 sm:$0xff]   ;;  %v11096_v31 = vld [vmem:[%s11425_s28 + $0x1b84] ss:$16 sps:$4 sm:$0xff]  }
 0x34f   : > { %7179 = vmatprep.subr.bf16.mxu0 %v11012_v32  ;;  %7835 = vmatprep.subr.bf16.mxu1 %v11015_v34  ;;  %v11099_v32 = vld [vmem:[%s11425_s28 + $0x1b8c] ss:$16 sps:$4 sm:$0xff]   ;;  %v11094_v34 = vld [vmem:[%s11425_s28 + $0x1b80] ss:$16 sps:$4 sm:$0xff]  }
 0x352   : > { %7180 = vmatpush1.bf16.msra.mxu0 %v11010_v35  ;;  %7836 = vmatpush1.bf16.msra.mxu1 %v11013_v36  ;;  %v11102_v35 = vld [vmem:[%s11425_s28 + $0x1ba4] ss:$16 sps:$4 sm:$0xff]   ;;  %v11105_v36 = vld [vmem:[%s11425_s28 + $0x1bac] ss:$16 sps:$4 sm:$0xff]  }
 0x353   : > { %7181 = vmatprep.subr.bf16.mxu0 %v11018_v27  ;;  %7837 = vmatprep.subr.bf16.mxu1 %v11021_v37  ;;  %v11100_v27 = vld [vmem:[%s11425_s28 + $0x1ba0] ss:$16 sps:$4 sm:$0xff]   ;;  %v11103_v37 = vld [vmem:[%s11425_s28 + $0x1ba8] ss:$16 sps:$4 sm:$0xff]  }
 0x356   : > { %7182 = vmatpush1.bf16.msra.mxu0 %v11016_v25  ;;  %7838 = vmatpush1.bf16.msra.mxu1 %v11019_v39  ;;  %v11108_v25 = vld [vmem:[%s11425_s28 + $0x1bc4] ss:$16 sps:$4 sm:$0xff]   ;;  %v11111_v39 = vld [vmem:[%s11425_s28 + $0x1bcc] ss:$16 sps:$4 sm:$0xff]  }
 0x357   : > { %7192 = vmatprep.subr.bf16.mxu0 %v11024_v40  ;;  %7848 = vmatprep.subr.bf16.mxu1 %v11027_v22  ;;  %v12451_v40 = vld [vmem:[%s11420_s24 + $0x38] sm:$0xff]  ;;  %v11106_v22 = vld [vmem:[%s11425_s28 + $0x1bc0] ss:$16 sps:$4 sm:$0xff]  }
 0x359   : > { %7184 = vmatmul.mubr.bf16.vlgmr.msra.gmra.mrb[0].mxu0 %v507_v42  ;;  %7840 = vmatmul.mubr.bf16.vlgmr.msra.gmra.mrb[0].mxu1 %v507_v42  ;;  %v11114_v42 = vld [vmem:[%s11425_s28 + $0x1be4] ss:$16 sps:$4 sm:$0xff]  }
 0x35a   : > { %7193 = vmatpush1.bf16.msra.mxu0 %v11022_v45  ;;  %7849 = vmatpush1.bf16.msra.mxu1 %v11025_v46  ;;  %v11117_v45 = vld [vmem:[%s11425_s28 + $0x1bec] ss:$16 sps:$4 sm:$0xff]   ;;  %v12459_v46 = vrot.slane %v12451_v40, %v11475_v50 }
 0x35b   : > { %7194 = vmatprep.subr.bf16.mxu0 %v11030_v26  ;;  %7850 = vmatprep.subr.bf16.mxu1 %v11033_v47  ;;  %v11112_v26 = vld [vmem:[%s11425_s28 + $0x1be0] ss:$16 sps:$4 sm:$0xff]   ;;  %v11115_v47 = vld [vmem:[%s11425_s28 + $0x1be8] ss:$16 sps:$4 sm:$0xff]  }
 0x35c   : > { %7224 = vmatprep.mubr.bf16.mxu0 %v510_v49  ;;  %7880 = vmatprep.mubr.bf16.mxu1 %v510_v49  ;;  %v11121_v49 = vld [vmem:[%s11425_s28 + $0x1c04] ss:$16 sps:$4 sm:$0xff]  }
 0x35e   : > { %7195 = vmatpush1.bf16.msra.mxu0 %v11028_v30  ;;  %7851 = vmatpush1.bf16.msra.mxu1 %v11031_v51  ;;  %v11124_v30 = vld [vmem:[%s11425_s28 + $0x1c0c] ss:$16 sps:$4 sm:$0xff]   ;;  %v449_v51 = vcombine.high %v12459_v46, %v12459_v46 }
 0x35f   : > { %7196 = vmatprep.subr.bf16.mxu0 %v11036_v52  ;;  %7852 = vmatprep.subr.bf16.mxu1 %v11039_v33  ;;  %v509_v52 = vpack.c.bf16 %v12384_v38, %v12384_v38  ;;  %v11119_v33 = vld [vmem:[%s11425_s28 + $0x1c00] ss:$16 sps:$4 sm:$0xff]  }
 0x360   : > { %v11125_v38 = vld [vmem:[%s11425_s28 + $0x1c20] ss:$16 sps:$4 sm:$0xff]  }
 0x362   : > { %7197 = vmatpush1.bf16.msra.mxu0 %v11034_v53  ;;  %7853 = vmatpush1.bf16.msra.mxu1 %v11037_v54  ;;  %v11122_v53 = vld [vmem:[%s11425_s28 + $0x1c08] ss:$16 sps:$4 sm:$0xff]   ;;  %v11127_v54 = vld [vmem:[%s11425_s28 + $0x1c24] ss:$16 sps:$4 sm:$0xff]  }
 0x363   : > { %7198 = vmatprep.subr.bf16.mxu0 %v11042_v55  ;;  %7854 = vmatprep.subr.bf16.mxu1 %v11045_v56  ;;  %v11130_v55 = vld [vmem:[%s11425_s28 + $0x1c2c] ss:$16 sps:$4 sm:$0xff]   ;;  %v512_v56 = vpack.c.bf16 %v449_v51, %v449_v51  ;;  %v11203_v51 = vld [vmem:[%s11425_s28 + $0x1dc0] ss:$16 sps:$4 sm:$0xff]  }
 0x366   : > { %7199 = vmatpush1.bf16.msra.mxu0 %v11040_v43  ;;  %7855 = vmatpush1.bf16.msra.mxu1 %v11043_v58  ;;  %v11128_v43 = vld [vmem:[%s11425_s28 + $0x1c28] ss:$16 sps:$4 sm:$0xff]   ;;  %v11133_v58 = vld [vmem:[%s11425_s28 + $0x1c44] ss:$16 sps:$4 sm:$0xff]  }
 0x367   : > { %7200 = vmatprep.subr.bf16.mxu0 %v11048_v41  ;;  %7856 = vmatprep.subr.bf16.mxu1 %v11051_v60  ;;  %v11136_v41 = vld [vmem:[%s11425_s28 + $0x1c4c] ss:$16 sps:$4 sm:$0xff]   ;;  %v11131_v60 = vld [vmem:[%s11425_s28 + $0x1c40] ss:$16 sps:$4 sm:$0xff]  }
 0x36a   : > { %7201 = vmatpush1.bf16.msra.mxu0 %v11046_v61  ;;  %7857 = vmatpush1.bf16.msra.mxu1 %v11049_v62  ;;  %v11134_v61 = vld [vmem:[%s11425_s28 + $0x1c48] ss:$16 sps:$4 sm:$0xff]   ;;  %v11139_v62 = vld [vmem:[%s11425_s28 + $0x1c64] ss:$16 sps:$4 sm:$0xff]  }
 0x36b   : > { %7202 = vmatprep.subr.bf16.mxu0 %v11054_v0  ;;  %7858 = vmatprep.subr.bf16.mxu1 %v11057_v1  ;;  %v11142_v0 = vld [vmem:[%s11425_s28 + $0x1c6c] ss:$16 sps:$4 sm:$0xff]   ;;  %v11137_v1 = vld [vmem:[%s11425_s28 + $0x1c60] ss:$16 sps:$4 sm:$0xff]  }
 0x36e   : > { %7203 = vmatpush1.bf16.msra.mxu0 %v11052_v2  ;;  %7859 = vmatpush1.bf16.msra.mxu1 %v11055_v48  ;;  %v11140_v2 = vld [vmem:[%s11425_s28 + $0x1c68] ss:$16 sps:$4 sm:$0xff]   ;;  %v11145_v48 = vld [vmem:[%s11425_s28 + $0x1c84] ss:$16 sps:$4 sm:$0xff]  }
 0x36f   : > { %7204 = vmatprep.subr.bf16.mxu0 %v11060_v3  ;;  %7860 = vmatprep.subr.bf16.mxu1 %v11063_v4  ;;  %v11148_v3 = vld [vmem:[%s11425_s28 + $0x1c8c] ss:$16 sps:$4 sm:$0xff]   ;;  %v11143_v4 = vld [vmem:[%s11425_s28 + $0x1c80] ss:$16 sps:$4 sm:$0xff]  }
 0x372   : > { %7205 = vmatpush1.bf16.msra.mxu0 %v11058_v5  ;;  %7861 = vmatpush1.bf16.msra.mxu1 %v11061_v6  ;;  %v11146_v5 = vld [vmem:[%s11425_s28 + $0x1c88] ss:$16 sps:$4 sm:$0xff]   ;;  %v11151_v6 = vld [vmem:[%s11425_s28 + $0x1ca4] ss:$16 sps:$4 sm:$0xff]  }
 0x373   : > { %7206 = vmatprep.subr.bf16.mxu0 %v11066_v59  ;;  %7862 = vmatprep.subr.bf16.mxu1 %v11069_v8  ;;  %v11154_v59 = vld [vmem:[%s11425_s28 + $0x1cac] ss:$16 sps:$4 sm:$0xff]   ;;  %v11149_v8 = vld [vmem:[%s11425_s28 + $0x1ca0] ss:$16 sps:$4 sm:$0xff]  }
 0x376   : > { %7207 = vmatpush1.bf16.msra.mxu0 %v11064_v57  ;;  %7863 = vmatpush1.bf16.msra.mxu1 %v11067_v11  ;;  %v11152_v57 = vld [vmem:[%s11425_s28 + $0x1ca8] ss:$16 sps:$4 sm:$0xff]   ;;  %v11157_v11 = vld [vmem:[%s11425_s28 + $0x1cc4] ss:$16 sps:$4 sm:$0xff]  }
 0x377   : > { %7208 = vmatprep.subr.bf16.mxu0 %v11072_v12  ;;  %7864 = vmatprep.subr.bf16.mxu1 %v11075_v13  ;;  %v11160_v12 = vld [vmem:[%s11425_s28 + $0x1ccc] ss:$16 sps:$4 sm:$0xff]   ;;  %v11155_v13 = vld [vmem:[%s11425_s28 + $0x1cc0] ss:$16 sps:$4 sm:$0xff]  }
 0x37a   : > { %7209 = vmatpush1.bf16.msra.mxu0 %v11070_v15  ;;  %7865 = vmatpush1.bf16.msra.mxu1 %v11073_v16  ;;  %v11158_v15 = vld [vmem:[%s11425_s28 + $0x1cc8] ss:$16 sps:$4 sm:$0xff]   ;;  %v11163_v16 = vld [vmem:[%s11425_s28 + $0x1ce4] ss:$16 sps:$4 sm:$0xff]  }
 0x37b   : > { %7210 = vmatprep.subr.bf16.mxu0 %v11078_v17  ;;  %7866 = vmatprep.subr.bf16.mxu1 %v11081_v63  ;;  %v11166_v17 = vld [vmem:[%s11425_s28 + $0x1cec] ss:$16 sps:$4 sm:$0xff]   ;;  %v11161_v63 = vld [vmem:[%s11425_s28 + $0x1ce0] ss:$16 sps:$4 sm:$0xff]  }
 0x37e   : > { %7211 = vmatpush1.bf16.msra.mxu0 %v11076_v18  ;;  %7867 = vmatpush1.bf16.msra.mxu1 %v11079_v19  ;;  %v11164_v18 = vld [vmem:[%s11425_s28 + $0x1ce8] ss:$16 sps:$4 sm:$0xff]   ;;  %v11169_v19 = vld [vmem:[%s11425_s28 + $0x1d04] ss:$16 sps:$4 sm:$0xff]  }
 0x37f   : > { %7212 = vmatprep.subr.bf16.mxu0 %v11084_v20  ;;  %7868 = vmatprep.subr.bf16.mxu1 %v11087_v21  ;;  %v11172_v20 = vld [vmem:[%s11425_s28 + $0x1d0c] ss:$16 sps:$4 sm:$0xff]   ;;  %v11167_v21 = vld [vmem:[%s11425_s28 + $0x1d00] ss:$16 sps:$4 sm:$0xff]  }
 0x382   : > { %7213 = vmatpush1.bf16.msra.mxu0 %v11082_v9  ;;  %7869 = vmatpush1.bf16.msra.mxu1 %v11085_v23  ;;  %v11170_v9 = vld [vmem:[%s11425_s28 + $0x1d08] ss:$16 sps:$4 sm:$0xff]   ;;  %v11175_v23 = vld [vmem:[%s11425_s28 + $0x1d24] ss:$16 sps:$4 sm:$0xff]  }
 0x383   : > { %7214 = vmatprep.subr.bf16.mxu0 %v11090_v7  ;;  %7870 = vmatprep.subr.bf16.mxu1 %v11093_v24  ;;  %v11178_v7 = vld [vmem:[%s11425_s28 + $0x1d2c] ss:$16 sps:$4 sm:$0xff]   ;;  %v11173_v24 = vld [vmem:[%s11425_s28 + $0x1d20] ss:$16 sps:$4 sm:$0xff]  }
 0x386   : > { %7215 = vmatpush1.bf16.msra.mxu0 %v11088_v10  ;;  %7871 = vmatpush1.bf16.msra.mxu1 %v11091_v28  ;;  %v11176_v10 = vld [vmem:[%s11425_s28 + $0x1d28] ss:$16 sps:$4 sm:$0xff]   ;;  %v11181_v28 = vld [vmem:[%s11425_s28 + $0x1d44] ss:$16 sps:$4 sm:$0xff]  }
 0x387   : > { %7216 = vmatprep.subr.bf16.mxu0 %v11096_v31  ;;  %7872 = vmatprep.subr.bf16.mxu1 %v11099_v32  ;;  %v11184_v31 = vld [vmem:[%s11425_s28 + $0x1d4c] ss:$16 sps:$4 sm:$0xff]   ;;  %v11179_v32 = vld [vmem:[%s11425_s28 + $0x1d40] ss:$16 sps:$4 sm:$0xff]  }
 0x38a   : > { %7217 = vmatpush1.bf16.msra.mxu0 %v11094_v34  ;;  %7873 = vmatpush1.bf16.msra.mxu1 %v11097_v14  ;;  %v11182_v34 = vld [vmem:[%s11425_s28 + $0x1d48] ss:$16 sps:$4 sm:$0xff]   ;;  %v11187_v14 = vld [vmem:[%s11425_s28 + $0x1d64] ss:$16 sps:$4 sm:$0xff]  }
 0x38b   : > { %7218 = vmatprep.subr.bf16.mxu0 %v11102_v35  ;;  %7874 = vmatprep.subr.bf16.mxu1 %v11105_v36  ;;  %v11190_v35 = vld [vmem:[%s11425_s28 + $0x1d6c] ss:$16 sps:$4 sm:$0xff]   ;;  %v11185_v36 = vld [vmem:[%s11425_s28 + $0x1d60] ss:$16 sps:$4 sm:$0xff]  }
 0x38e   : > { %7219 = vmatpush1.bf16.msra.mxu0 %v11100_v27  ;;  %7875 = vmatpush1.bf16.msra.mxu1 %v11103_v37  ;;  %v11188_v27 = vld [vmem:[%s11425_s28 + $0x1d68] ss:$16 sps:$4 sm:$0xff]   ;;  %v11193_v37 = vld [vmem:[%s11425_s28 + $0x1d84] ss:$16 sps:$4 sm:$0xff]  }
 0x38f   : > { %7220 = vmatprep.subr.bf16.mxu0 %v11108_v25  ;;  %7876 = vmatprep.subr.bf16.mxu1 %v11111_v39  ;;  %v11196_v25 = vld [vmem:[%s11425_s28 + $0x1d8c] ss:$16 sps:$4 sm:$0xff]   ;;  %v11191_v39 = vld [vmem:[%s11425_s28 + $0x1d80] ss:$16 sps:$4 sm:$0xff]  }
 0x392   : > { %7221 = vmatpush1.bf16.msra.mxu0 %v11106_v22  ;;  %7877 = vmatpush1.bf16.msra.mxu1 %v11109_v29  ;;  %v11194_v22 = vld [vmem:[%s11425_s28 + $0x1d88] ss:$16 sps:$4 sm:$0xff]   ;;  %v11199_v29 = vld [vmem:[%s11425_s28 + $0x1da4] ss:$16 sps:$4 sm:$0xff]  }
 0x393   : > { %7222 = vmatprep.subr.bf16.mxu0 %v11114_v42  ;;  %7878 = vmatprep.subr.bf16.mxu1 %v11117_v45  ;;  %v11202_v42 = vld [vmem:[%s11425_s28 + $0x1dac] ss:$16 sps:$4 sm:$0xff]   ;;  %v11197_v45 = vld [vmem:[%s11425_s28 + $0x1da0] ss:$16 sps:$4 sm:$0xff]  }
 0x396   : > { %7223 = vmatpush1.bf16.msra.mxu0 %v11112_v26  ;;  %7879 = vmatpush1.bf16.msra.mxu1 %v11115_v47  ;;  %v11200_v26 = vld [vmem:[%s11425_s28 + $0x1da8] ss:$16 sps:$4 sm:$0xff]   ;;  %v11205_v47 = vld [vmem:[%s11425_s28 + $0x1dc4] ss:$16 sps:$4 sm:$0xff]  }
 0x397   : > { %7233 = vmatprep.subr.bf16.mxu0 %v11121_v49  ;;  %7889 = vmatprep.subr.bf16.mxu1 %v11124_v30  ;;  %v11208_v49 = vld [vmem:[%s11425_s28 + $0x1dcc] ss:$16 sps:$4 sm:$0xff]   ;;  %v434_v30 = vcombine.high %v12451_v40, %v12451_v40  ;;  %v11209_v40 = vld [vmem:[%s11425_s28 + $0x1de0] ss:$16 sps:$4 sm:$0xff]  }
 0x399   : > { %7225 = vmatmul.mubr.bf16.vlgmr.msra.gmra.mrb[0].mxu0 %v509_v52  ;;  %7881 = vmatmul.mubr.bf16.vlgmr.msra.gmra.mrb[0].mxu1 %v509_v52  ;;  %v11206_v52 = vld [vmem:[%s11425_s28 + $0x1dc8] ss:$16 sps:$4 sm:$0xff]  }
 0x39a   : > { %7234 = vmatpush1.bf16.msra.mxu0 %v11119_v33  ;;  %7890 = vmatpush1.bf16.msra.mxu1 %v11122_v53  ;;  %v11211_v33 = vld [vmem:[%s11425_s28 + $0x1de4] ss:$16 sps:$4 sm:$0xff]   ;;  %v11214_v53 = vld [vmem:[%s11425_s28 + $0x1dec] ss:$16 sps:$4 sm:$0xff]  }
 0x39b   : > { %7235 = vmatprep.subr.bf16.mxu0 %v11127_v54  ;;  %7891 = vmatprep.subr.bf16.mxu1 %v11130_v55  ;;  %v12532_v54 = vrot.slane %v434_v30, %v11475_v50  ;;  %v11212_v55 = vld [vmem:[%s11425_s28 + $0x1de8] ss:$16 sps:$4 sm:$0xff]  }
 0x39c   : > { %7265 = vmatprep.mubr.bf16.mxu0 %v512_v56  ;;  %7921 = vmatprep.mubr.bf16.mxu1 %v512_v56  ;;  %v11217_v56 = vld [vmem:[%s11425_s28 + $0x1e04] ss:$16 sps:$4 sm:$0xff]   ;;  %v11290_v30 = vld [vmem:[%s11425_s28 + $0x1f88] ss:$16 sps:$4 sm:$0xff]  }
 0x39e   : > { %7236 = vmatpush1.bf16.msra.mxu0 %v11125_v38  ;;  %7892 = vmatpush1.bf16.msra.mxu1 %v11128_v43  ;;  %v11220_v38 = vld [vmem:[%s11425_s28 + $0x1e0c] ss:$16 sps:$4 sm:$0xff]   ;;  %v450_v43 = vcombine.high %v12532_v54, %v12532_v54 }
 0x39f   : > { %7237 = vmatprep.subr.bf16.mxu0 %v11133_v58  ;;  %7893 = vmatprep.subr.bf16.mxu1 %v11136_v41  ;;  %v511_v58 = vpack.c.bf16 %v12459_v46, %v12459_v46  ;;  %v11215_v41 = vld [vmem:[%s11425_s28 + $0x1e00] ss:$16 sps:$4 sm:$0xff]  }
 0x3a0   : > { %v11221_v46 = vld [vmem:[%s11425_s28 + $0x1e20] ss:$16 sps:$4 sm:$0xff]  }
 0x3a2   : > { %7238 = vmatpush1.bf16.msra.mxu0 %v11131_v60  ;;  %7894 = vmatpush1.bf16.msra.mxu1 %v11134_v61  ;;  %v11218_v60 = vld [vmem:[%s11425_s28 + $0x1e08] ss:$16 sps:$4 sm:$0xff]   ;;  %v11223_v61 = vld [vmem:[%s11425_s28 + $0x1e24] ss:$16 sps:$4 sm:$0xff]  }
 0x3a3   : > { %7239 = vmatprep.subr.bf16.mxu0 %v11139_v62  ;;  %7895 = vmatprep.subr.bf16.mxu1 %v11142_v0  ;;  %v11226_v62 = vld [vmem:[%s11425_s28 + $0x1e2c] ss:$16 sps:$4 sm:$0xff]   ;;  %v514_v0 = vpack.c.bf16 %v450_v43, %v450_v43  ;;  %v11307_v43 = vld [vmem:[%s11425_s28 + $0x1fe4] ss:$16 sps:$4 sm:$0xff]  }
 0x3a6   : > { %7240 = vmatpush1.bf16.msra.mxu0 %v11137_v1  ;;  %7896 = vmatpush1.bf16.msra.mxu1 %v11140_v2  ;;  %v11224_v1 = vld [vmem:[%s11425_s28 + $0x1e28] ss:$16 sps:$4 sm:$0xff]   ;;  %v11229_v2 = vld [vmem:[%s11425_s28 + $0x1e44] ss:$16 sps:$4 sm:$0xff]  }
 0x3a7   : > { %7241 = vmatprep.subr.bf16.mxu0 %v11145_v48  ;;  %7897 = vmatprep.subr.bf16.mxu1 %v11148_v3  ;;  %v11232_v48 = vld [vmem:[%s11425_s28 + $0x1e4c] ss:$16 sps:$4 sm:$0xff]   ;;  %v11227_v3 = vld [vmem:[%s11425_s28 + $0x1e40] ss:$16 sps:$4 sm:$0xff]  }
 0x3aa   : > { %7242 = vmatpush1.bf16.msra.mxu0 %v11143_v4  ;;  %7898 = vmatpush1.bf16.msra.mxu1 %v11146_v5  ;;  %v11230_v4 = vld [vmem:[%s11425_s28 + $0x1e48] ss:$16 sps:$4 sm:$0xff]   ;;  %v11235_v5 = vld [vmem:[%s11425_s28 + $0x1e64] ss:$16 sps:$4 sm:$0xff]  }
 0x3ab   : > { %7243 = vmatprep.subr.bf16.mxu0 %v11151_v6  ;;  %7899 = vmatprep.subr.bf16.mxu1 %v11154_v59  ;;  %v11238_v6 = vld [vmem:[%s11425_s28 + $0x1e6c] ss:$16 sps:$4 sm:$0xff]   ;;  %v11233_v59 = vld [vmem:[%s11425_s28 + $0x1e60] ss:$16 sps:$4 sm:$0xff]  }
 0x3ae   : > { %7244 = vmatpush1.bf16.msra.mxu0 %v11149_v8  ;;  %7900 = vmatpush1.bf16.msra.mxu1 %v11152_v57  ;;  %v11236_v8 = vld [vmem:[%s11425_s28 + $0x1e68] ss:$16 sps:$4 sm:$0xff]   ;;  %v11241_v57 = vld [vmem:[%s11425_s28 + $0x1e84] ss:$16 sps:$4 sm:$0xff]  }
 0x3af   : > { %7245 = vmatprep.subr.bf16.mxu0 %v11157_v11  ;;  %7901 = vmatprep.subr.bf16.mxu1 %v11160_v12  ;;  %v11244_v11 = vld [vmem:[%s11425_s28 + $0x1e8c] ss:$16 sps:$4 sm:$0xff]   ;;  %v11239_v12 = vld [vmem:[%s11425_s28 + $0x1e80] ss:$16 sps:$4 sm:$0xff]  }
 0x3b2   : > { %7246 = vmatpush1.bf16.msra.mxu0 %v11155_v13  ;;  %7902 = vmatpush1.bf16.msra.mxu1 %v11158_v15  ;;  %v11242_v13 = vld [vmem:[%s11425_s28 + $0x1e88] ss:$16 sps:$4 sm:$0xff]   ;;  %v11247_v15 = vld [vmem:[%s11425_s28 + $0x1ea4] ss:$16 sps:$4 sm:$0xff]  }
 0x3b3   : > { %7247 = vmatprep.subr.bf16.mxu0 %v11163_v16  ;;  %7903 = vmatprep.subr.bf16.mxu1 %v11166_v17  ;;  %v11250_v16 = vld [vmem:[%s11425_s28 + $0x1eac] ss:$16 sps:$4 sm:$0xff]   ;;  %v11245_v17 = vld [vmem:[%s11425_s28 + $0x1ea0] ss:$16 sps:$4 sm:$0xff]  }
 0x3b6   : > { %7248 = vmatpush1.bf16.msra.mxu0 %v11161_v63  ;;  %7904 = vmatpush1.bf16.msra.mxu1 %v11164_v18  ;;  %v11248_v63 = vld [vmem:[%s11425_s28 + $0x1ea8] ss:$16 sps:$4 sm:$0xff]   ;;  %v11253_v18 = vld [vmem:[%s11425_s28 + $0x1ec4] ss:$16 sps:$4 sm:$0xff]  }
 0x3b7   : > { %7249 = vmatprep.subr.bf16.mxu0 %v11169_v19  ;;  %7905 = vmatprep.subr.bf16.mxu1 %v11172_v20  ;;  %v11256_v19 = vld [vmem:[%s11425_s28 + $0x1ecc] ss:$16 sps:$4 sm:$0xff]   ;;  %v11251_v20 = vld [vmem:[%s11425_s28 + $0x1ec0] ss:$16 sps:$4 sm:$0xff]  }
 0x3ba   : > { %7250 = vmatpush1.bf16.msra.mxu0 %v11167_v21  ;;  %7906 = vmatpush1.bf16.msra.mxu1 %v11170_v9  ;;  %v11254_v21 = vld [vmem:[%s11425_s28 + $0x1ec8] ss:$16 sps:$4 sm:$0xff]   ;;  %v11259_v9 = vld [vmem:[%s11425_s28 + $0x1ee4] ss:$16 sps:$4 sm:$0xff]  }
 0x3bb   : > { %7251 = vmatprep.subr.bf16.mxu0 %v11175_v23  ;;  %7907 = vmatprep.subr.bf16.mxu1 %v11178_v7  ;;  %v11262_v23 = vld [vmem:[%s11425_s28 + $0x1eec] ss:$16 sps:$4 sm:$0xff]   ;;  %v11257_v7 = vld [vmem:[%s11425_s28 + $0x1ee0] ss:$16 sps:$4 sm:$0xff]  }
 0x3be   : > { %7252 = vmatpush1.bf16.msra.mxu0 %v11173_v24  ;;  %7908 = vmatpush1.bf16.msra.mxu1 %v11176_v10  ;;  %v11260_v24 = vld [vmem:[%s11425_s28 + $0x1ee8] ss:$16 sps:$4 sm:$0xff]   ;;  %v11265_v10 = vld [vmem:[%s11425_s28 + $0x1f04] ss:$16 sps:$4 sm:$0xff]  }
 0x3bf   : > { %7253 = vmatprep.subr.bf16.mxu0 %v11181_v28  ;;  %7909 = vmatprep.subr.bf16.mxu1 %v11184_v31  ;;  %v11268_v28 = vld [vmem:[%s11425_s28 + $0x1f0c] ss:$16 sps:$4 sm:$0xff]   ;;  %v11263_v31 = vld [vmem:[%s11425_s28 + $0x1f00] ss:$16 sps:$4 sm:$0xff]  }
 0x3c2   : > { %7254 = vmatpush1.bf16.msra.mxu0 %v11179_v32  ;;  %7910 = vmatpush1.bf16.msra.mxu1 %v11182_v34  ;;  %v11266_v32 = vld [vmem:[%s11425_s28 + $0x1f08] ss:$16 sps:$4 sm:$0xff]   ;;  %v11271_v34 = vld [vmem:[%s11425_s28 + $0x1f24] ss:$16 sps:$4 sm:$0xff]  }
 0x3c3   : > { %7255 = vmatprep.subr.bf16.mxu0 %v11187_v14  ;;  %7911 = vmatprep.subr.bf16.mxu1 %v11190_v35  ;;  %v11274_v14 = vld [vmem:[%s11425_s28 + $0x1f2c] ss:$16 sps:$4 sm:$0xff]   ;;  %v11269_v35 = vld [vmem:[%s11425_s28 + $0x1f20] ss:$16 sps:$4 sm:$0xff]  }
 0x3c6   : > { %7256 = vmatpush1.bf16.msra.mxu0 %v11185_v36  ;;  %7912 = vmatpush1.bf16.msra.mxu1 %v11188_v27  ;;  %v11272_v36 = vld [vmem:[%s11425_s28 + $0x1f28] ss:$16 sps:$4 sm:$0xff]   ;;  %v11277_v27 = vld [vmem:[%s11425_s28 + $0x1f44] ss:$16 sps:$4 sm:$0xff]  }
 0x3c7   : > { %7257 = vmatprep.subr.bf16.mxu0 %v11193_v37  ;;  %7913 = vmatprep.subr.bf16.mxu1 %v11196_v25  ;;  %v11280_v37 = vld [vmem:[%s11425_s28 + $0x1f4c] ss:$16 sps:$4 sm:$0xff]   ;;  %v11275_v25 = vld [vmem:[%s11425_s28 + $0x1f40] ss:$16 sps:$4 sm:$0xff]  }
 0x3ca   : > { %7258 = vmatpush1.bf16.msra.mxu0 %v11191_v39  ;;  %7914 = vmatpush1.bf16.msra.mxu1 %v11194_v22  ;;  %v11278_v39 = vld [vmem:[%s11425_s28 + $0x1f48] ss:$16 sps:$4 sm:$0xff]   ;;  %v11283_v22 = vld [vmem:[%s11425_s28 + $0x1f64] ss:$16 sps:$4 sm:$0xff]  }
 0x3cb   : > { %7259 = vmatprep.subr.bf16.mxu0 %v11199_v29  ;;  %7915 = vmatprep.subr.bf16.mxu1 %v11202_v42  ;;  %v11286_v29 = vld [vmem:[%s11425_s28 + $0x1f6c] ss:$16 sps:$4 sm:$0xff]   ;;  %v11281_v42 = vld [vmem:[%s11425_s28 + $0x1f60] ss:$16 sps:$4 sm:$0xff]  }
 0x3ce   : > { %7260 = vmatpush1.bf16.msra.mxu0 %v11197_v45  ;;  %7916 = vmatpush1.bf16.msra.mxu1 %v11200_v26  ;;  %v11284_v45 = vld [vmem:[%s11425_s28 + $0x1f68] ss:$16 sps:$4 sm:$0xff]   ;;  %v11289_v26 = vld [vmem:[%s11425_s28 + $0x1f84] ss:$16 sps:$4 sm:$0xff]  }
 0x3cf   : > { %7261 = vmatprep.subr.bf16.mxu0 %v11205_v47  ;;  %7917 = vmatprep.subr.bf16.mxu1 %v11208_v49  ;;  %v11292_v47 = vld [vmem:[%s11425_s28 + $0x1f8c] ss:$16 sps:$4 sm:$0xff]   ;;  %v11287_v49 = vld [vmem:[%s11425_s28 + $0x1f80] ss:$16 sps:$4 sm:$0xff]  }
 0x3d2   : > { %7262 = vmatpush1.bf16.msra.mxu0 %v11203_v51  ;;  %7918 = vmatpush1.bf16.msra.mxu1 %v11206_v52  ;;  %v11295_v51 = vld [vmem:[%s11425_s28 + $0x1fa4] ss:$16 sps:$4 sm:$0xff]   ;;  %v11298_v52 = vld [vmem:[%s11425_s28 + $0x1fac] ss:$16 sps:$4 sm:$0xff]  }
 0x3d3   : > { %7263 = vmatprep.subr.bf16.mxu0 %v11211_v33  ;;  %7919 = vmatprep.subr.bf16.mxu1 %v11214_v53  ;;  %v11293_v33 = vld [vmem:[%s11425_s28 + $0x1fa0] ss:$16 sps:$4 sm:$0xff]   ;;  %v11296_v53 = vld [vmem:[%s11425_s28 + $0x1fa8] ss:$16 sps:$4 sm:$0xff]  }
 0x3d6   : > { %7264 = vmatpush1.bf16.msra.mxu0 %v11209_v40  ;;  %7920 = vmatpush1.bf16.msra.mxu1 %v11212_v55  ;;  %v11301_v40 = vld [vmem:[%s11425_s28 + $0x1fc4] ss:$16 sps:$4 sm:$0xff]   ;;  %v11304_v55 = vld [vmem:[%s11425_s28 + $0x1fcc] ss:$16 sps:$4 sm:$0xff]  }
 0x3d7   : > { %7274 = vmatprep.subr.bf16.mxu0 %v11217_v56  ;;  %7930 = vmatprep.subr.bf16.mxu1 %v11220_v38  ;;  %v11299_v56 = vld [vmem:[%s11425_s28 + $0x1fc0] ss:$16 sps:$4 sm:$0xff]   ;;  %v11302_v38 = vld [vmem:[%s11425_s28 + $0x1fc8] ss:$16 sps:$4 sm:$0xff]  }
 0x3d9   : > { %7266 = vmatmul.mubr.bf16.vlgmr.msra.gmra.mrb[0].mxu0 %v511_v58  ;;  %7922 = vmatmul.mubr.bf16.vlgmr.msra.gmra.mrb[0].mxu1 %v511_v58  ;;  %v11310_v58 = vld [vmem:[%s11425_s28 + $0x1fec] ss:$16 sps:$4 sm:$0xff]  }
 0x3da   : > { %7275 = vmatpush1.bf16.msra.mxu0 %v11215_v41  ;;  %7931 = vmatpush1.bf16.msra.mxu1 %v11218_v60  ;;  %v11305_v41 = vld [vmem:[%s11425_s28 + $0x1fe0] ss:$16 sps:$4 sm:$0xff]   ;;  %v11308_v60 = vld [vmem:[%s11425_s28 + $0x1fe8] ss:$16 sps:$4 sm:$0xff]  }
 0x3db   : > { %7276 = vmatprep.subr.bf16.mxu0 %v11223_v61  ;;  %7932 = vmatprep.subr.bf16.mxu1 %v11226_v62  ;;  %v513_v61 = vpack.c.bf16 %v12532_v54, %v12532_v54 }
 0x3dc   : > { %7306 = vmatprep.mubr.bf16.mxu0 %v514_v0  ;;  %7962 = vmatprep.mubr.bf16.mxu1 %v514_v0 }
 0x3de   : > { %7277 = vmatpush1.bf16.msra.mxu0 %v11221_v46  ;;  %7933 = vmatpush1.bf16.msra.mxu1 %v11224_v1 }
 0x3df   : > { %7278 = vmatprep.subr.bf16.mxu0 %v11229_v2  ;;  %7934 = vmatprep.subr.bf16.mxu1 %v11232_v48 }
 0x3e2   : > { %7279 = vmatpush1.bf16.msra.mxu0 %v11227_v3  ;;  %7935 = vmatpush1.bf16.msra.mxu1 %v11230_v4 }
 0x3e3   : > { %7280 = vmatprep.subr.bf16.mxu0 %v11235_v5  ;;  %7936 = vmatprep.subr.bf16.mxu1 %v11238_v6 }
 0x3e6   : > { %7281 = vmatpush1.bf16.msra.mxu0 %v11233_v59  ;;  %7937 = vmatpush1.bf16.msra.mxu1 %v11236_v8 }
 0x3e7   : > { %7282 = vmatprep.subr.bf16.mxu0 %v11241_v57  ;;  %7938 = vmatprep.subr.bf16.mxu1 %v11244_v11  ;;  %v298_v57 = vld [vmem:[#allocation2] sm:$0xff] }
 0x3ea   : > { %7283 = vmatpush1.bf16.msra.mxu0 %v11239_v12  ;;  %7939 = vmatpush1.bf16.msra.mxu1 %v11242_v13  ;;  %v11312_v12 = vld [vmem:[%s12731_s3 + $0x40] sm:$0xff] (!%p9541_p7)  }
 0x3eb   : > { %7284 = vmatprep.subr.bf16.mxu0 %v11247_v15  ;;  %7940 = vmatprep.subr.bf16.mxu1 %v11250_v16  ;;  %v11313_v13 = vld [vmem:[%s12731_s3 + $0xc0] sm:$0xff] (!%p9541_p7)  }
 0x3ec   : > { %v11314_v15 = vld [vmem:[%s12731_s3] sm:$0xff] (!%p9541_p7)  }
 0x3ed   : > { %v11315_v16 = vld [vmem:[%s12731_s3 + $0x80] sm:$0xff] (!%p9541_p7)  }
 0x3ee   : > { %7285 = vmatpush1.bf16.msra.mxu0 %v11245_v17  ;;  %7941 = vmatpush1.bf16.msra.mxu1 %v11248_v63  ;;  %v11316_v17 = vld [vmem:[%s12731_s3 + $0x48] sm:$0xff] (!%p9541_p7)  }
 0x3ef   : > { %7286 = vmatprep.subr.bf16.mxu0 %v11253_v18  ;;  %7942 = vmatprep.subr.bf16.mxu1 %v11256_v19  ;;  %v11317_v63 = vld [vmem:[%s12731_s3 + $0xc8] sm:$0xff] (!%p9541_p7)  }
 0x3f0   : > { %v11318_v18 = vld [vmem:[%s12731_s3 + $0x8] sm:$0xff] (!%p9541_p7)  }
 0x3f1   : > { %v11319_v19 = vld [vmem:[%s12731_s3 + $0x88] sm:$0xff] (!%p9541_p7)  }
 0x3f2   : > { %7287 = vmatpush1.bf16.msra.mxu0 %v11251_v20  ;;  %7943 = vmatpush1.bf16.msra.mxu1 %v11254_v21  ;;  %v11320_v20 = vld [vmem:[%s12731_s3 + $0x50] sm:$0xff] (!%p9541_p7)  }
 0x3f3   : > { %7288 = vmatprep.subr.bf16.mxu0 %v11259_v9  ;;  %7944 = vmatprep.subr.bf16.mxu1 %v11262_v23  ;;  %v11321_v21 = vld [vmem:[%s12731_s3 + $0xd0] sm:$0xff] (!%p9541_p7)  }
 0x3f4   : > { %v11322_v9 = vld [vmem:[%s12731_s3 + $0x10] sm:$0xff] (!%p9541_p7)  }
 0x3f5   : > { %v11323_v23 = vld [vmem:[%s12731_s3 + $0x90] sm:$0xff] (!%p9541_p7)  }
 0x3f6   : > { %7289 = vmatpush1.bf16.msra.mxu0 %v11257_v7  ;;  %7945 = vmatpush1.bf16.msra.mxu1 %v11260_v24  ;;  %v11324_v7 = vld [vmem:[%s12731_s3 + $0x58] sm:$0xff] (!%p9541_p7)  }
 0x3f7   : > { %7290 = vmatprep.subr.bf16.mxu0 %v11265_v10  ;;  %7946 = vmatprep.subr.bf16.mxu1 %v11268_v28  ;;  %v11325_v24 = vld [vmem:[%s12731_s3 + $0xd8] sm:$0xff] (!%p9541_p7)  }
 0x3f8   : > { %v11326_v10 = vld [vmem:[%s12731_s3 + $0x18] sm:$0xff] (!%p9541_p7)  }
 0x3f9   : > { %v11327_v28 = vld [vmem:[%s12731_s3 + $0x98] sm:$0xff] (!%p9541_p7)  }
 0x3fa   : > { %7291 = vmatpush1.bf16.msra.mxu0 %v11263_v31  ;;  %7947 = vmatpush1.bf16.msra.mxu1 %v11266_v32  ;;  %v11328_v31 = vld [vmem:[%s12731_s3 + $0x60] sm:$0xff] (!%p9541_p7)  }
 0x3fb   : > { %7292 = vmatprep.subr.bf16.mxu0 %v11271_v34  ;;  %7948 = vmatprep.subr.bf16.mxu1 %v11274_v14  ;;  %v11329_v32 = vld [vmem:[%s12731_s3 + $0xe0] sm:$0xff] (!%p9541_p7)  }
 0x3fc   : > { %v11330_v34 = vld [vmem:[%s12731_s3 + $0x20] sm:$0xff] (!%p9541_p7)  }
 0x3fd   : > { %v11331_v14 = vld [vmem:[%s12731_s3 + $0xa0] sm:$0xff] (!%p9541_p7)  }
 0x3fe   : > { %7293 = vmatpush1.bf16.msra.mxu0 %v11269_v35  ;;  %7949 = vmatpush1.bf16.msra.mxu1 %v11272_v36  ;;  %v11332_v35 = vld [vmem:[%s12731_s3 + $0x68] sm:$0xff] (!%p9541_p7)  }
 0x3ff   : > { %7294 = vmatprep.subr.bf16.mxu0 %v11277_v27  ;;  %7950 = vmatprep.subr.bf16.mxu1 %v11280_v37  ;;  %v11333_v36 = vld [vmem:[%s12731_s3 + $0xe8] sm:$0xff] (!%p9541_p7)  }
 0x400   : > { %v11334_v27 = vld [vmem:[%s12731_s3 + $0x28] sm:$0xff] (!%p9541_p7)  }
 0x401   : > { %v11335_v37 = vld [vmem:[%s12731_s3 + $0xa8] sm:$0xff] (!%p9541_p7)  }
 0x402   : > { %7295 = vmatpush1.bf16.msra.mxu0 %v11275_v25  ;;  %7951 = vmatpush1.bf16.msra.mxu1 %v11278_v39  ;;  %v11336_v25 = vld [vmem:[%s12731_s3 + $0x70] sm:$0xff] (!%p9541_p7)  }
 0x403   : > { %7296 = vmatprep.subr.bf16.mxu0 %v11283_v22  ;;  %7952 = vmatprep.subr.bf16.mxu1 %v11286_v29  ;;  %v11337_v39 = vld [vmem:[%s12731_s3 + $0xf0] sm:$0xff] (!%p9541_p7)   ;;  %v8004_v29 = vsub.s32 (!%p9541_p7), 0, %v11467_v44 }
 0x404   : > { %v11338_v22 = vld [vmem:[%s12731_s3 + $0x30] sm:$0xff] (!%p9541_p7)  }
 0x406   : > { %7297 = vmatpush1.bf16.msra.mxu0 %v11281_v42  ;;  %7953 = vmatpush1.bf16.msra.mxu1 %v11284_v45  ;;  %v11339_v42 = vld [vmem:[%s12731_s3 + $0xb0] sm:$0xff] (!%p9541_p7)   ;;  %v8008_v45 = vsub.s32 (!%p9541_p7), 1, %v11467_v44 }
 0x407   : > { %7298 = vmatprep.subr.bf16.mxu0 %v11289_v26  ;;  %7954 = vmatprep.subr.bf16.mxu1 %v11292_v47  ;;  %v11340_v26 = vld [vmem:[%s12731_s3 + $0x78] sm:$0xff] (!%p9541_p7)   ;;  %v8012_v47 = vsub.s32 (!%p9541_p7), 2, %v11467_v44 }
 0x40a   : > { %7299 = vmatpush1.bf16.msra.mxu0 %v11287_v49  ;;  %7955 = vmatpush1.bf16.msra.mxu1 %v11290_v30  ;;  %v11341_v49 = vld [vmem:[%s12731_s3 + $0xf8] sm:$0xff] (!%p9541_p7)   ;;  %v8016_v30 = vsub.s32 (!%p9541_p7), 3, %v11467_v44 }
 0x40b   : > { %7300 = vmatprep.subr.bf16.mxu0 %v11295_v51  ;;  %7956 = vmatprep.subr.bf16.mxu1 %v11298_v52  ;;  %v11342_v51 = vld [vmem:[%s12731_s3 + $0x38] sm:$0xff] (!%p9541_p7)  }
 0x40c   : > { %v11343_v52 = vld [vmem:[%s12731_s3 + $0xb8] sm:$0xff] (!%p9541_p7)  }
 0x40e   : > { %7301 = vmatpush1.bf16.msra.mxu0 %v11293_v33  ;;  %7957 = vmatpush1.bf16.msra.mxu1 %v11296_v53  ;;  %v8000_v33 = vld [vmem:[%s12730_s2] sm:$0xf] (!%p9541_p7) }
 0x40f   : > { %7302 = vmatprep.subr.bf16.mxu0 %v11301_v40  ;;  %7958 = vmatprep.subr.bf16.mxu1 %v11304_v55  ;;  %v8005_v53 = vrot.slane (!%p9541_p7), %v8000_v33, %v8004_v29  ;;  %v8009_v40 = vrot.slane (!%p9541_p7), %v8000_v33, %v8008_v45  ;;  %v8013_v55 = vrot.slane (!%p9541_p7), %v8000_v33, %v8012_v47 }
 0x410   : > { %v8017_v44 = vrot.slane (!%p9541_p7), %v8000_v33, %v8016_v30 }
 0x412   : > { %7303 = vmatpush1.bf16.msra.mxu0 %v11299_v56  ;;  %7959 = vmatpush1.bf16.msra.mxu1 %v11302_v38  ;;  %v8018_v56 = vcombine.low (!%p9541_p7), %v8005_v53, %v8009_v40  ;;  %v8019_v38 = vcombine.low (!%p9541_p7), %v8013_v55, %v8017_v44 }
 0x413   : > { %7304 = vmatprep.subr.bf16.mxu0 %v11307_v43  ;;  %7960 = vmatprep.subr.bf16.mxu1 %v11310_v58 }
 0x414   : > { %v8026_v43 = vrot.slane (!%p9541_p7), %v8018_v56, %v11475_v50  ;;  %v8033_v58 = vrot.slane (!%p9541_p7), %v8019_v38, %v11475_v50 }
 0x416   : > { %7305 = vmatpush1.bf16.msra.mxu0 %v11305_v41  ;;  %7961 = vmatpush1.bf16.msra.mxu1 %v11308_v60  ;;  %v8034_v60 = vcombine.low (!%p9541_p7), %v8026_v43, %v8033_v58 }
 0x417   : > { %9578 = vmatprep.subr.bf16.mxu0 (!%p9541_p7), %v11312_v12  ;;  %9600 = vmatprep.subr.bf16.mxu1 (!%p9541_p7), %v11313_v13 }
 0x419   : > { %7307 = vmatmul.mubr.bf16.vlgmr.msra.gmra.mrb[0].mxu0 %v513_v61  ;;  %7963 = vmatmul.mubr.bf16.vlgmr.msra.gmra.mrb[0].mxu1 %v513_v61 }
 0x41a   : > { %9579 = vmatpush3.bf16.msra.mxu0 (!%p9541_p7), %v11314_v15  ;;  %9601 = vmatpush3.bf16.msra.mxu1 (!%p9541_p7), %v11315_v16 }
 0x41b   : > { %9580 = vmatprep.subr.bf16.mxu0 (!%p9541_p7), %v11316_v17  ;;  %9602 = vmatprep.subr.bf16.mxu1 (!%p9541_p7), %v11317_v63 }
 0x41e   : > { %9581 = vmatpush3.bf16.msra.mxu0 (!%p9541_p7), %v11318_v18  ;;  %9603 = vmatpush3.bf16.msra.mxu1 (!%p9541_p7), %v11319_v19 }
 0x41f   : > { %9582 = vmatprep.subr.bf16.mxu0 (!%p9541_p7), %v11320_v20  ;;  %9604 = vmatprep.subr.bf16.mxu1 (!%p9541_p7), %v11321_v21 }
 0x422   : > { %9583 = vmatpush3.bf16.msra.mxu0 (!%p9541_p7), %v11322_v9  ;;  %9605 = vmatpush3.bf16.msra.mxu1 (!%p9541_p7), %v11323_v23 }
 0x423   : > { %9584 = vmatprep.subr.bf16.mxu0 (!%p9541_p7), %v11324_v7  ;;  %9606 = vmatprep.subr.bf16.mxu1 (!%p9541_p7), %v11325_v24 }
 0x426   : > { %9585 = vmatpush3.bf16.msra.mxu0 (!%p9541_p7), %v11326_v10  ;;  %9607 = vmatpush3.bf16.msra.mxu1 (!%p9541_p7), %v11327_v28 }
 0x427   : > { %9586 = vmatprep.subr.bf16.mxu0 (!%p9541_p7), %v11328_v31  ;;  %9608 = vmatprep.subr.bf16.mxu1 (!%p9541_p7), %v11329_v32 }
 0x42a   : > { %9587 = vmatpush3.bf16.msra.mxu0 (!%p9541_p7), %v11330_v34  ;;  %9609 = vmatpush3.bf16.msra.mxu1 (!%p9541_p7), %v11331_v14 }
 0x42b   : > { %9588 = vmatprep.subr.bf16.mxu0 (!%p9541_p7), %v11332_v35  ;;  %9610 = vmatprep.subr.bf16.mxu1 (!%p9541_p7), %v11333_v36 }
 0x42e   : > { %9589 = vmatpush3.bf16.msra.mxu0 (!%p9541_p7), %v11334_v27  ;;  %9611 = vmatpush3.bf16.msra.mxu1 (!%p9541_p7), %v11335_v37 }
 0x42f   : > { %9590 = vmatprep.subr.bf16.mxu0 (!%p9541_p7), %v11336_v25  ;;  %9612 = vmatprep.subr.bf16.mxu1 (!%p9541_p7), %v11337_v39 }
 0x432   : > { %9591 = vmatpush3.bf16.msra.mxu0 (!%p9541_p7), %v11338_v22  ;;  %9613 = vmatpush3.bf16.msra.mxu1 (!%p9541_p7), %v11339_v42 }
 0x433   : > { %9592 = vmatprep.subr.bf16.mxu0 (!%p9541_p7), %v11340_v26  ;;  %9614 = vmatprep.subr.bf16.mxu1 (!%p9541_p7), %v11341_v49 }
 0x436   : > { %9593 = vmatpush3.bf16.msra.mxu0 (!%p9541_p7), %v11342_v51  ;;  %9615 = vmatpush3.bf16.msra.mxu1 (!%p9541_p7), %v11343_v52 }
 0x4ec   : > { %v7308_v62 = vpop.f32.mrb[0].mxu0  ;;  %v7964_v0 = vpop.f32.mrb[0].mxu1 }
 0x4ed   : > { %v7310_v46 = vpop.f32.mrb[1].mxu0  ;;  %v7966_v1 = vpop.f32.mrb[1].mxu1 }
 0x4ee   : > { %v7975_v2 = vcombine.low %v7308_v62, %v7310_v46  ;;  %v7976_v48 = vcombine.low %v7964_v0, %v7966_v1  ;;  %v7312_v3 = vpop.f32.mrb[2].mxu0  ;;  %v7968_v4 = vpop.f32.mrb[2].mxu1 }
 0x4ef   : > { %v7313_v5 = vpop.f32.mrb[3].mxu0  ;;  %v7969_v6 = vpop.f32.mrb[3].mxu1 }
 0x4f0   : > { %v7983_v59 = vrot.slane %v7975_v2, %v11475_v50  ;;  %v7990_v8 = vrot.slane %v7976_v48, %v11475_v50  ;;  %7998 = sbr.rel (%p9541_p7) target bundleno = 1509 (0x5e5), region = 44 }
 0x4f2   : > { %v7991_v54 = vcombine.low %v7983_v59, %v7990_v8 }
 0x4f4   : > { %v7993_v11 = vadd.f32 %v7991_v54, %v298_v57 }
 0x4f6   : > { %7994 = vst [vmem:[#allocation2] sm:$0xff] %v7993_v11 }
 0x4fd   : > { %v7999_v41 = vld [vmem:[#allocation2] sm:$0xff] }
 0x4fe   : > { %v8036_v61 = vadd.f32 %v8034_v60, %v7999_v41 }
 0x500   : > { %v8037_v62 = vmax.f32 %v8036_v61, 0.0 }
 0x502   : > { %v8046_v0 = vrot.slane %v8037_v62, %v11475_v50  ;;  %v8039_v46 = vcombine.high %v8037_v62, %v8037_v62 }
 0x504   : > { %v8054_v1 = vcombine.high %v8046_v0, %v8046_v0  ;;  %v8053_v2 = vrot.slane %v8039_v46, %v11475_v50  ;;  %v8060_v48 = vpack.c.bf16 %v8046_v0, %v8046_v0 }
 0x506   : > { %v8061_v3 = vpack.c.bf16 %v8054_v1, %v8054_v1  ;;  %v8055_v4 = vcombine.high %v8053_v2, %v8053_v2  ;;  %v8062_v5 = vpack.c.bf16 %v8053_v2, %v8053_v2 }
 0x508   : > { %8352 = vmatprep.mubr.bf16.mxu0 %v8061_v3  ;;  %v8063_v6 = vpack.c.bf16 %v8055_v4, %v8055_v4 }
 0x509   : > { %8353 = vmatmul.mubr.bf16.vlgmr.msra.gmra.mrb[0].mxu0 %v8060_v48 }
 0x50a   : > { %8392 = vmatprep.mubr.bf16.mxu1 %v8063_v6 }
 0x50b   : > { %8393 = vmatmul.mubr.bf16.vlgmr.msra.gmra.mrb[0].mxu1 %v8062_v5 }
 0x5dc   : > { %v9594_v59 = vpop.f32.mrb[0].mxu0 }
 0x5dd   : > { %v9595_v8 = vpop.f32.mrb[1].mxu0 }
 0x5de   : > { %v9616_v57 = vpop.f32.mrb[0].mxu1  ;;  %v9596_v54 = vadd.f32 %v9595_v8, %v9594_v59  ;;  %v9597_v11 = vpop.f32.mrb[2].mxu0 }
 0x5df   : > { %v9617_v12 = vpop.f32.mrb[1].mxu1  ;;  %v9598_v13 = vpop.f32.mrb[3].mxu0 }
 0x5e0   : > { %v9618_v15 = vadd.f32 %v9617_v12, %v9616_v57  ;;  %v9619_v16 = vpop.f32.mrb[2].mxu1 }
 0x5e1   : > { %v9620_v17 = vpop.f32.mrb[3].mxu1 }
 0x5e2   : > { %v8395_v50 = vadd.f32 %v9618_v15, %v9596_v54 }
 0x5e4   : > { %8400 = vst [vmem:[%s12732_s4] sm:$0x3] %v8395_v50 }
 0x5e5 PF: > { %s14_s17 = sadd.s32 1, %s11366_s17   ;;  %s12733_s15 = smov %s11362_s16 }
 0x5e6   : > { %p11_p8 = scmp.ge.s32.totalorder %s14_s17, 4   ;;  %s12734_s16 = smov %s12736_s18 }
 0x5e8   :  { %13 = sbr.rel (!%p11_p8) target bundleno = 2 (0x2), region = 83 }

</bundles_post_ra>
